<compile_context>
chip_gen: v7x
topology: tpu7x:2x2x1
jax: 0.10.0
libtpu: 0.0.40
codegen_flags: <defaults>
</compile_context>

<pallas_src>
import functools

import jax
import jax.numpy as jnp
from jax import lax
from jax.experimental import pallas as pl
from jax.experimental.pallas import tpu as pltpu


# ------------------------------ fused kernel -------------------------------

def _fused_forward_kernel(
    # inputs
    x1_ref, x2_ref, bw_ref,                  # backbone (per-view x, weight K-tile)
    p0_ref, g0_ref, b0_ref, p1_ref,          # projector
    wp_ref, bp_ref,                          # predictor (weight stored as torch W.T)
    lw_ref, lb_ref, lbl_ref,                 # linear classifier + labels
    # outputs
    inv_ref, cov_ref, ce_ref, pred_ref,
    # scratch
    acc_ref,
    *, half, eps):
  """Whole forward in one kernel.

  Grid axis 0 tiles the backbone contraction (In) dimension; the backbone
  features `r` accumulate in an f32 VMEM scratch.  On the final K step the
  projector / BN / predictor / losses all run out of VMEM.
  """
  k = pl.program_id(0)
  nk = pl.num_programs(0)

  @pl.when(k == 0)
  def _():
    acc_ref[...] = jnp.zeros_like(acc_ref)

  # --- backbone stand-in: r = [y1; y2] @ W_backbone  (bf16 in, f32 accum) ---
  w = bw_ref[...]
  acc_ref[0:half, :] += jnp.dot(x1_ref[...], w,
                                preferred_element_type=jnp.float32)
  acc_ref[half:2 * half, :] += jnp.dot(x2_ref[...], w,
                                       preferred_element_type=jnp.float32)

  @pl.when(k == nk - 1)
  def _():
    r = acc_ref[...]                                   # (2B, 2048) f32
    dim = p1_ref.shape[-1]

    def per_view_bn(v, gamma=None, beta=None):
      # Stats per view: matches two separate PyTorch calls of batch size B
      # (training-mode biased variance; running stats not modeled).
      v3 = v.reshape(2, half, v.shape[-1])
      mean = jnp.mean(v3, axis=1, keepdims=True)
      var = jnp.mean(jnp.square(v3 - mean), axis=1, keepdims=True)
      y = (v3 - mean) * lax.rsqrt(var + eps)
      if gamma is not None:
        y = y * gamma + beta
      return y.reshape(v.shape)

    # projector: Linear(2048->h, no bias) -> BN+ReLU -> Linear(h->d, no bias)
    h = jnp.dot(r.astype(jnp.bfloat16), p0_ref[...],
                preferred_element_type=jnp.float32)
    h = jnp.maximum(per_view_bn(h, g0_ref[...], b0_ref[...]), 0.0)
    z = jnp.dot(h, p1_ref[...], preferred_element_type=jnp.float32)
    z = per_view_bn(z)                                 # BatchNorm1d(affine=False)

    # predictor Linear(d->d) + bias
    pz = jnp.dot(z, wp_ref[...], preferred_element_type=jnp.float32) + bp_ref[...]

    z3 = z.reshape(2, half, dim)
    pz3 = pz.reshape(2, half, dim)

    # invariance loss
    inv_ref[0, 0] = (jnp.mean(jnp.square(pz3[0] - z3[1]))
                     + jnp.mean(jnp.square(pz3[1] - z3[0])))

    # covariance loss: per-view grams (batched over view axis) vs W^T W
    corr = lax.dot_general(pz3, pz3, (((1,), (1,)), ((0,), (0,))),
                           preferred_element_type=jnp.float32) * (1.0 / half)
    wt = wp_ref[...]                                   # torch W.T, shape (in, out)
    wtw = lax.dot_general(wt, wt, (((1,), (1,)), ((), ())),
                          preferred_element_type=jnp.float32)   # == W^T @ W
    # (mse(corr2, wtw) + mse(corr1, wtw)) * dim
    cov_ref[0, 0] = jnp.mean(jnp.square(corr - wtw[None])) * (2.0 * dim)

    # linear classifier on (detached) view-1 features + cross-entropy
    r1 = r[0:half, :]
    logits = (jnp.dot(r1.astype(jnp.bfloat16), lw_ref[...],
                      preferred_element_type=jnp.float32) + lb_ref[...])
    pred_ref[...] = logits
    m = jnp.max(logits, axis=-1, keepdims=True)
    lse = jnp.log(jnp.sum(jnp.exp(logits - m), axis=-1, keepdims=True)) + m
    cls = lax.broadcasted_iota(jnp.int32, logits.shape, 1)
    tgt = jnp.sum(jnp.where(lbl_ref[...] == cls, logits, 0.0),
                  axis=-1, keepdims=True)
    ce_ref[0, 0] = jnp.mean(lse - tgt)


# ------------------------------- wrapper -----------------------------------

def _pick_k_tile(in_feat, out_feat, budget_bytes=6 << 20):
  """Largest K tile (full In, or a multiple of 128) whose bf16 weight block
  fits the per-buffer budget (keeps the kernel VMEM-bounded by tile choice,
  budgeted well under v7x's 64 MiB)."""
  if in_feat * out_feat * 2 <= budget_bytes or in_feat % 128 != 0:
    return in_feat
  tk = max(128, (budget_bytes // (out_feat * 2)) // 128 * 128)
  while in_feat % tk:
    tk -= 128
  return tk


def model_forward(params, y1, y2, labels):
  B = y1.shape[0]
  in_feat = y1.shape[1] * y1.shape[2] * y1.shape[3]

  # Flatten + single bf16 cast in the wrapper (not per grid step in-kernel).
  x1 = y1.reshape(B, in_feat).astype(jnp.bfloat16)
  x2 = y2.reshape(B, in_feat).astype(jnp.bfloat16)

  bw = params["backbone_w"]                    # (In, 2048) bf16
  feat = bw.shape[1]
  hidden = params["proj_w0"].shape[1]
  dim = params["proj_w1"].shape[1]
  num_classes = params["lincls_w"].shape[1]

  tk = _pick_k_tile(in_feat, feat)
  nk = in_feat // tk

  kernel = functools.partial(_fused_forward_kernel, half=B, eps=1e-5)
  smem_scalar = pl.BlockSpec(memory_space=pltpu.MemorySpace.SMEM)

  grid_spec = pltpu.PrefetchScalarGridSpec(
      num_scalar_prefetch=0,
      grid=(nk,),
      in_specs=[
          pl.BlockSpec((B, tk), lambda k: (0, k)),               # x1 (view 1)
          pl.BlockSpec((B, tk), lambda k: (0, k)),               # x2 (view 2)
          pl.BlockSpec((tk, feat), lambda k: (k, 0)),            # backbone W
          pl.BlockSpec((feat, hidden), lambda k: (0, 0)),        # proj_w0
          pl.BlockSpec((1, hidden), lambda k: (0, 0)),           # BN gamma
          pl.BlockSpec((1, hidden), lambda k: (0, 0)),           # BN beta
          pl.BlockSpec((hidden, dim), lambda k: (0, 0)),         # proj_w1
          pl.BlockSpec((dim, dim), lambda k: (0, 0)),            # pred W.T
          pl.BlockSpec((1, dim), lambda k: (0, 0)),              # pred bias
          pl.BlockSpec((feat, num_classes), lambda k: (0, 0)),   # lincls W
          pl.BlockSpec((1, num_classes), lambda k: (0, 0)),      # lincls bias
          pl.BlockSpec((B, 1), lambda k: (0, 0)),                # labels
      ],
      out_specs=(
          smem_scalar,                                           # inv_loss
          smem_scalar,                                           # cov_loss
          smem_scalar,                                           # lincls_loss
          pl.BlockSpec((B, num_classes), lambda k: (0, 0)),      # lincls_pred
      ),
      scratch_shapes=[pltpu.VMEM((2 * B, feat), jnp.float32)],   # r accumulator
  )

  inv, cov, ce, pred = pl.pallas_call(
      kernel,
      grid_spec=grid_spec,
      out_shape=(
          jax.ShapeDtypeStruct((1, 1), jnp.float32),
          jax.ShapeDtypeStruct((1, 1), jnp.float32),
          jax.ShapeDtypeStruct((1, 1), jnp.float32),
          jax.ShapeDtypeStruct((B, num_classes), jnp.float32),
      ),
      compiler_params=pltpu.CompilerParams(
          dimension_semantics=("arbitrary",),
          vmem_limit_bytes=32 * 1024 * 1024),
  )(x1, x2, bw,
    params["proj_w0"],
    params["proj_g0"].reshape(1, hidden),
    params["proj_b0"].reshape(1, hidden),
    params["proj_w1"],
    params["pred_w_t"],
    params["pred_b"].reshape(1, dim),
    params["lincls_w"],
    params["lincls_b"].reshape(1, num_classes),
    labels.reshape(B, 1).astype(jnp.int32))

  return inv[0, 0], cov[0, 0], ce[0, 0], pred


# ------------------------------ parameters ---------------------------------

def init_params(key, in_feat, hidden, dim, num_classes):
  ks = jax.random.split(key, 6)
  s = 0.02
  return dict(
      # bf16 weights halve HBM streaming / VMEM residency (f32 MXU accum).
      backbone_w=(jax.random.normal(ks[0], (in_feat, 2048), jnp.float32) * s
                  ).astype(jnp.bfloat16),
      proj_w0=(jax.random.normal(ks[1], (2048, hidden), jnp.float32) * s
               ).astype(jnp.bfloat16),
      proj_g0=jnp.ones((hidden,), jnp.float32),    # BN gamma (init 1)
      proj_b0=jnp.zeros((hidden,), jnp.float32),   # BN beta  (init 0)
      proj_w1=jax.random.normal(ks[2], (hidden, dim), jnp.float32) * s,
      # predictor weight stored pre-transposed (in, out) == torch W.T
      pred_w_t=jax.random.normal(ks[3], (dim, dim), jnp.float32) * s,
      pred_b=jax.random.normal(ks[4], (dim,), jnp.float32) * s,
      lincls_w=(jax.random.normal(ks[5], (2048, num_classes), jnp.float32) * s
                ).astype(jnp.bfloat16),
      lincls_b=jnp.zeros((num_classes,), jnp.float32),
  )


if __name__ == "__main__":
  key = jax.random.PRNGKey(0)
  k1, k2, k3, kp = jax.random.split(key, 4)

  B, C, H, W = 8, 3, 16, 16
  num_classes = 16
  hidden = 128
  dim = 128

  y1 = jax.random.normal(k1, (B, C, H, W), jnp.float32)
  y2 = jax.random.normal(k2, (B, C, H, W), jnp.float32)
  labels = jax.random.randint(k3, (B,), 0, num_classes, dtype=jnp.int32)

  params = init_params(kp, C * H * W, hidden=hidden, dim=dim,
                       num_classes=num_classes)

  fwd = jax.jit(model_forward)
  inv_loss, cov_loss, lincls_loss, lincls_pred = fwd(params, y1, y2, labels)
  jax.block_until_ready((inv_loss, cov_loss, lincls_loss, lincls_pred))

  assert lincls_pred.shape == (B, num_classes)
  print("KERNEL_OK")
</pallas_src>

<mosaic_0001>
module attributes {stable_mosaic.version = 11 : i64} {
  func.func @_fused_forward_kernel(%arg0: i32, %arg1: memref<8x768xbf16, #tpu.memory_space<vmem>>, %arg2: memref<8x768xbf16, #tpu.memory_space<vmem>>, %arg3: memref<768x2048xbf16, #tpu.memory_space<vmem>>, %arg4: memref<2048x128xbf16, #tpu.memory_space<vmem>>, %arg5: memref<1x128xf32, #tpu.memory_space<vmem>>, %arg6: memref<1x128xf32, #tpu.memory_space<vmem>>, %arg7: memref<128x128xf32, #tpu.memory_space<vmem>>, %arg8: memref<128x128xf32, #tpu.memory_space<vmem>>, %arg9: memref<1x128xf32, #tpu.memory_space<vmem>>, %arg10: memref<2048x16xbf16, #tpu.memory_space<vmem>>, %arg11: memref<1x16xf32, #tpu.memory_space<vmem>>, %arg12: memref<8x1xi32, #tpu.memory_space<vmem>>, %arg13: memref<1x1xf32, #tpu.memory_space<smem>>, %arg14: memref<1x1xf32, #tpu.memory_space<smem>>, %arg15: memref<1x1xf32, #tpu.memory_space<smem>>, %arg16: memref<8x16xf32, #tpu.memory_space<vmem>>, %arg17: memref<16x2048xf32, #tpu.memory_space<vmem>>) attributes {dimension_semantics = [#tpu.dimension_semantics<arbitrary>], iteration_bounds = array<i64: 1>, scalar_prefetch = 0 : i64, scratch_operands = 1 : i64, tpu.core_type = #tpu.core_type<tc>, window_params = [{transform_indices = @transform_0, window_bounds = array<i64: 8, 768>}, {transform_indices = @transform_1, window_bounds = array<i64: 8, 768>}, {transform_indices = @transform_2, window_bounds = array<i64: 768, 2048>}, {pipeline_mode = #tpu.pipeline_mode<synchronous>, transform_indices = @transform_3, window_bounds = array<i64: 2048, 128>}, {pipeline_mode = #tpu.pipeline_mode<synchronous>, transform_indices = @transform_4, window_bounds = array<i64: 1, 128>}, {pipeline_mode = #tpu.pipeline_mode<synchronous>, transform_indices = @transform_5, window_bounds = array<i64: 1, 128>}, {pipeline_mode = #tpu.pipeline_mode<synchronous>, transform_indices = @transform_6, window_bounds = array<i64: 128, 128>}, {pipeline_mode = #tpu.pipeline_mode<synchronous>, transform_indices = @transform_7, window_bounds = array<i64: 128, 128>}, {pipeline_mode = #tpu.pipeline_mode<synchronous>, transform_indices = @transform_8, window_bounds = array<i64: 1, 128>}, {pipeline_mode = #tpu.pipeline_mode<synchronous>, transform_indices = @transform_9, window_bounds = array<i64: 2048, 16>}, {pipeline_mode = #tpu.pipeline_mode<synchronous>, transform_indices = @transform_10, window_bounds = array<i64: 1, 16>}, {pipeline_mode = #tpu.pipeline_mode<synchronous>, transform_indices = @transform_11, window_bounds = array<i64: 8, 1>}, {transform_indices = @transform_12, window_bounds = array<i64: 1, 1>}, {transform_indices = @transform_13, window_bounds = array<i64: 1, 1>}, {transform_indices = @transform_14, window_bounds = array<i64: 1, 1>}, {pipeline_mode = #tpu.pipeline_mode<synchronous>, transform_indices = @transform_15, window_bounds = array<i64: 8, 16>}]} {
    %c0_i32 = arith.constant 0 : i32
    %0 = arith.cmpi eq, %arg0, %c0_i32 : i32
    %1 = arith.extui %0 : i1 to i32
    %c0_i32_0 = arith.constant 0 : i32
    %2 = arith.cmpi ne, %1, %c0_i32_0 : i32
    scf.if %2 {
      %cst_16 = arith.constant 0.000000e+00 : f32
      %17 = vector.broadcast %cst_16 : f32 to vector<16x2048xf32>
      %c0_17 = arith.constant 0 : index
      %c0_18 = arith.constant 0 : index
      %18 = vector.load %arg17[%c0_17, %c0_18] : memref<16x2048xf32, #tpu.memory_space<vmem>>, vector<16x2048xf32>
      tpu.vector_store %arg17[%c0_17, %c0_18], %17 {strides = array<i32>} : memref<16x2048xf32, #tpu.memory_space<vmem>>, vector<16x2048xf32>,
    } else {
    }
    %c0 = arith.constant 0 : index
    %c0_1 = arith.constant 0 : index
    %3 = vector.load %arg3[%c0, %c0_1] : memref<768x2048xbf16, #tpu.memory_space<vmem>>, vector<768x2048xbf16>
    %c0_2 = arith.constant 0 : index
    %c0_3 = arith.constant 0 : index
    %4 = vector.load %arg17[%c0_2, %c0_3] : memref<16x2048xf32, #tpu.memory_space<vmem>>, vector<8x2048xf32>
    %c0_4 = arith.constant 0 : index
    %c0_5 = arith.constant 0 : index
    %5 = vector.load %arg1[%c0_4, %c0_5] : memref<8x768xbf16, #tpu.memory_space<vmem>>, vector<8x768xbf16>
    %cst = arith.constant dense<0.000000e+00> : vector<8x2048xf32>
    %6 = tpu.matmul %5, %3, %cst {dimension_numbers = #tpu.dot_dimension_numbers<[1], [0], [0], [1], [0, 0, 1, 1], [], []>} : vector<8x768xbf16>, vector<768x2048xbf16>, vector<8x2048xf32> -> vector<8x2048xf32>
    %7 = arith.addf %4, %6 : vector<8x2048xf32>
    %c0_6 = arith.constant 0 : index
    %c0_7 = arith.constant 0 : index
    %8 = vector.load %arg17[%c0_6, %c0_7] : memref<16x2048xf32, #tpu.memory_space<vmem>>, vector<8x2048xf32>
    tpu.vector_store %arg17[%c0_6, %c0_7], %7 {strides = array<i32>} : memref<16x2048xf32, #tpu.memory_space<vmem>>, vector<8x2048xf32>,
    %c8 = arith.constant 8 : index
    %c0_8 = arith.constant 0 : index
    %9 = vector.load %arg17[%c8, %c0_8] : memref<16x2048xf32, #tpu.memory_space<vmem>>, vector<8x2048xf32>
    %c0_9 = arith.constant 0 : index
    %c0_10 = arith.constant 0 : index
    %10 = vector.load %arg2[%c0_9, %c0_10] : memref<8x768xbf16, #tpu.memory_space<vmem>>, vector<8x768xbf16>
    %cst_11 = arith.constant dense<0.000000e+00> : vector<8x2048xf32>
    %11 = tpu.matmul %10, %3, %cst_11 {dimension_numbers = #tpu.dot_dimension_numbers<[1], [0], [0], [1], [0, 0, 1, 1], [], []>} : vector<8x768xbf16>, vector<768x2048xbf16>, vector<8x2048xf32> -> vector<8x2048xf32>
    %12 = arith.addf %9, %11 : vector<8x2048xf32>
    %c8_12 = arith.constant 8 : index
    %c0_13 = arith.constant 0 : index
    %13 = vector.load %arg17[%c8_12, %c0_13] : memref<16x2048xf32, #tpu.memory_space<vmem>>, vector<8x2048xf32>
    tpu.vector_store %arg17[%c8_12, %c0_13], %12 {strides = array<i32>} : memref<16x2048xf32, #tpu.memory_space<vmem>>, vector<8x2048xf32>,
    %c0_i32_14 = arith.constant 0 : i32
    %14 = arith.cmpi eq, %arg0, %c0_i32_14 : i32
    %15 = arith.extui %14 : i1 to i32
    %c0_i32_15 = arith.constant 0 : i32
    %16 = arith.cmpi ne, %15, %c0_i32_15 : i32
    scf.if %16 {
      %c0_16 = arith.constant 0 : index
      %c0_17 = arith.constant 0 : index
      %17 = vector.load %arg17[%c0_16, %c0_17] : memref<16x2048xf32, #tpu.memory_space<vmem>>, vector<16x2048xf32>
      %18 = arith.truncf %17 : vector<16x2048xf32> to vector<16x2048xbf16>
      %c0_18 = arith.constant 0 : index
      %c0_19 = arith.constant 0 : index
      %19 = vector.load %arg4[%c0_18, %c0_19] : memref<2048x128xbf16, #tpu.memory_space<vmem>>, vector<2048x128xbf16>
      %cst_20 = arith.constant dense<0.000000e+00> : vector<16x128xf32>
      %20 = tpu.matmul %18, %19, %cst_20 {dimension_numbers = #tpu.dot_dimension_numbers<[1], [0], [0], [1], [0, 0, 1, 1], [], []>} : vector<16x2048xbf16>, vector<2048x128xbf16>, vector<16x128xf32> -> vector<16x128xf32>
      %c0_21 = arith.constant 0 : index
      %c0_22 = arith.constant 0 : index
      %21 = vector.load %arg5[%c0_21, %c0_22] : memref<1x128xf32, #tpu.memory_space<vmem>>, vector<1x128xf32>
      %c0_23 = arith.constant 0 : index
      %c0_24 = arith.constant 0 : index
      %22 = vector.load %arg6[%c0_23, %c0_24] : memref<1x128xf32, #tpu.memory_space<vmem>>, vector<1x128xf32>
      %23 = vector.shape_cast %20 : vector<16x128xf32> to vector<2x8x128xf32>
      %cst_25 = arith.constant dense<0.000000e+00> : vector<2x128xf32>
      %24 = vector.multi_reduction <add>, %23, %cst_25 [1] : vector<2x8x128xf32> to vector<2x128xf32>
      %25 = vector.shape_cast %24 : vector<2x128xf32> to vector<2x1x128xf32>
      %cst_26 = arith.constant 8.000000e+00 : f32
      %26 = vector.broadcast %cst_26 : f32 to vector<2x1x128xf32>
      %27 = arith.divf %25, %26 : vector<2x1x128xf32>
      %28 = vector.broadcast %27 : vector<2x1x128xf32> to vector<2x8x128xf32>
      %29 = arith.subf %23, %28 : vector<2x8x128xf32>
      %30 = arith.mulf %29, %29 : vector<2x8x128xf32>
      %cst_27 = arith.constant dense<0.000000e+00> : vector<2x128xf32>
      %31 = vector.multi_reduction <add>, %30, %cst_27 [1] : vector<2x8x128xf32> to vector<2x128xf32>
      %32 = vector.shape_cast %31 : vector<2x128xf32> to vector<2x1x128xf32>
      %cst_28 = arith.constant 8.000000e+00 : f32
      %33 = vector.broadcast %cst_28 : f32 to vector<2x1x128xf32>
      %34 = arith.divf %32, %33 : vector<2x1x128xf32>
      %35 = vector.broadcast %27 : vector<2x1x128xf32> to vector<2x8x128xf32>
      %36 = arith.subf %23, %35 : vector<2x8x128xf32>
      %cst_29 = arith.constant 9.99999974E-6 : f32
      %37 = vector.broadcast %cst_29 : f32 to vector<2x1x128xf32>
      %38 = arith.addf %34, %37 : vector<2x1x128xf32>
      %39 = math.rsqrt %38 : vector<2x1x128xf32>
      %40 = vector.broadcast %39 : vector<2x1x128xf32> to vector<2x8x128xf32>
      %41 = arith.mulf %36, %40 : vector<2x8x128xf32>
      %42 = vector.shape_cast %21 : vector<1x128xf32> to vector<1x1x128xf32>
      %43 = vector.broadcast %42 : vector<1x1x128xf32> to vector<2x8x128xf32>
      %44 = arith.mulf %41, %43 : vector<2x8x128xf32>
      %45 = vector.shape_cast %22 : vector<1x128xf32> to vector<1x1x128xf32>
      %46 = vector.broadcast %45 : vector<1x1x128xf32> to vector<2x8x128xf32>
      %47 = arith.addf %44, %46 : vector<2x8x128xf32>
      %48 = vector.shape_cast %47 : vector<2x8x128xf32> to vector<16x128xf32>
      %cst_30 = arith.constant 0.000000e+00 : f32
      %49 = vector.broadcast %cst_30 : f32 to vector<16x128xf32>
      %50 = arith.maximumf %48, %49 : vector<16x128xf32>
      %c0_31 = arith.constant 0 : index
      %c0_32 = arith.constant 0 : index
      %51 = vector.load %arg7[%c0_31, %c0_32] : memref<128x128xf32, #tpu.memory_space<vmem>>, vector<128x128xf32>
      %cst_33 = arith.constant dense<0.000000e+00> : vector<16x128xf32>
      %52 = tpu.matmul %50, %51, %cst_33 {dimension_numbers = #tpu.dot_dimension_numbers<[1], [0], [0], [1], [0, 0, 1, 1], [], []>} : vector<16x128xf32>, vector<128x128xf32>, vector<16x128xf32> -> vector<16x128xf32>
      %53 = vector.shape_cast %52 : vector<16x128xf32> to vector<2x8x128xf32>
      %cst_34 = arith.constant dense<0.000000e+00> : vector<2x128xf32>
      %54 = vector.multi_reduction <add>, %53, %cst_34 [1] : vector<2x8x128xf32> to vector<2x128xf32>
      %55 = vector.shape_cast %54 : vector<2x128xf32> to vector<2x1x128xf32>
      %cst_35 = arith.constant 8.000000e+00 : f32
      %56 = vector.broadcast %cst_35 : f32 to vector<2x1x128xf32>
      %57 = arith.divf %55, %56 : vector<2x1x128xf32>
      %58 = vector.broadcast %57 : vector<2x1x128xf32> to vector<2x8x128xf32>
      %59 = arith.subf %53, %58 : vector<2x8x128xf32>
      %60 = arith.mulf %59, %59 : vector<2x8x128xf32>
      %cst_36 = arith.constant dense<0.000000e+00> : vector<2x128xf32>
      %61 = vector.multi_reduction <add>, %60, %cst_36 [1] : vector<2x8x128xf32> to vector<2x128xf32>
      %62 = vector.shape_cast %61 : vector<2x128xf32> to vector<2x1x128xf32>
      %cst_37 = arith.constant 8.000000e+00 : f32
      %63 = vector.broadcast %cst_37 : f32 to vector<2x1x128xf32>
      %64 = arith.divf %62, %63 : vector<2x1x128xf32>
      %65 = vector.broadcast %57 : vector<2x1x128xf32> to vector<2x8x128xf32>
      %66 = arith.subf %53, %65 : vector<2x8x128xf32>
      %cst_38 = arith.constant 9.99999974E-6 : f32
      %67 = vector.broadcast %cst_38 : f32 to vector<2x1x128xf32>
      %68 = arith.addf %64, %67 : vector<2x1x128xf32>
      %69 = math.rsqrt %68 : vector<2x1x128xf32>
      %70 = vector.broadcast %69 : vector<2x1x128xf32> to vector<2x8x128xf32>
      %71 = arith.mulf %66, %70 : vector<2x8x128xf32>
      %72 = vector.shape_cast %71 : vector<2x8x128xf32> to vector<16x128xf32>
      %c0_39 = arith.constant 0 : index
      %c0_40 = arith.constant 0 : index
      %73 = vector.load %arg8[%c0_39, %c0_40] : memref<128x128xf32, #tpu.memory_space<vmem>>, vector<128x128xf32>
      %cst_41 = arith.constant dense<0.000000e+00> : vector<16x128xf32>
      %74 = tpu.matmul %72, %73, %cst_41 {dimension_numbers = #tpu.dot_dimension_numbers<[1], [0], [0], [1], [0, 0, 1, 1], [], []>} : vector<16x128xf32>, vector<128x128xf32>, vector<16x128xf32> -> vector<16x128xf32>
      %c0_42 = arith.constant 0 : index
      %c0_43 = arith.constant 0 : index
      %75 = vector.load %arg9[%c0_42, %c0_43] : memref<1x128xf32, #tpu.memory_space<vmem>>, vector<1x128xf32>
      %76 = vector.broadcast %75 : vector<1x128xf32> to vector<16x128xf32>
      %77 = arith.addf %74, %76 : vector<16x128xf32>
      %78 = vector.shape_cast %72 : vector<16x128xf32> to vector<2x8x128xf32>
      %79 = vector.shape_cast %77 : vector<16x128xf32> to vector<2x8x128xf32>
      %80 = vector.extract_strided_slice %79 {offsets = [0, 0, 0], sizes = [1, 8, 128], strides = [1, 1, 1]} : vector<2x8x128xf32> to vector<1x8x128xf32>
      %81 = vector.shape_cast %80 : vector<1x8x128xf32> to vector<8x128xf32>
      %82 = vector.extract_strided_slice %78 {offsets = [1, 0, 0], sizes = [1, 8, 128], strides = [1, 1, 1]} : vector<2x8x128xf32> to vector<1x8x128xf32>
      %83 = vector.shape_cast %82 : vector<1x8x128xf32> to vector<8x128xf32>
      %84 = arith.subf %81, %83 : vector<8x128xf32>
      %85 = arith.mulf %84, %84 : vector<8x128xf32>
      %86 = vector.shape_cast %85 : vector<8x128xf32> to vector<1x8x128xf32>
      %cst_44 = arith.constant dense<0.000000e+00> : vector<1xf32>
      %87 = vector.multi_reduction <add>, %86, %cst_44 [1, 2] : vector<1x8x128xf32> to vector<1xf32>
      %88 = vector.shape_cast %87 : vector<1xf32> to vector<1x1x1xf32>
      %89 = vector.extract %88[0, 0, 0] : f32 from vector<1x1x1xf32>
      %cst_45 = arith.constant 1.024000e+03 : f32
      %90 = arith.divf %89, %cst_45 : f32
      %91 = vector.extract_strided_slice %79 {offsets = [1, 0, 0], sizes = [1, 8, 128], strides = [1, 1, 1]} : vector<2x8x128xf32> to vector<1x8x128xf32>
      %92 = vector.shape_cast %91 : vector<1x8x128xf32> to vector<8x128xf32>
      %93 = vector.extract_strided_slice %78 {offsets = [0, 0, 0], sizes = [1, 8, 128], strides = [1, 1, 1]} : vector<2x8x128xf32> to vector<1x8x128xf32>
      %94 = vector.shape_cast %93 : vector<1x8x128xf32> to vector<8x128xf32>
      %95 = arith.subf %92, %94 : vector<8x128xf32>
      %96 = arith.mulf %95, %95 : vector<8x128xf32>
      %97 = vector.shape_cast %96 : vector<8x128xf32> to vector<1x8x128xf32>
      %cst_46 = arith.constant dense<0.000000e+00> : vector<1xf32>
      %98 = vector.multi_reduction <add>, %97, %cst_46 [1, 2] : vector<1x8x128xf32> to vector<1xf32>
      %99 = vector.shape_cast %98 : vector<1xf32> to vector<1x1x1xf32>
      %100 = vector.extract %99[0, 0, 0] : f32 from vector<1x1x1xf32>
      %cst_47 = arith.constant 1.024000e+03 : f32
      %101 = arith.divf %100, %cst_47 : f32
      %102 = arith.addf %90, %101 : f32
      %c0_48 = arith.constant 0 : index
      %c0_49 = arith.constant 0 : index
      %103 = memref.load %arg13[%c0_48, %c0_49] : memref<1x1xf32, #tpu.memory_space<smem>>
      memref.store %102, %arg13[%c0_48, %c0_49] : memref<1x1xf32, #tpu.memory_space<smem>>
      %cst_50 = arith.constant dense<0.000000e+00> : vector<2x128x128xf32>
      %104 = tpu.matmul %79, %79, %cst_50 {dimension_numbers = #tpu.dot_dimension_numbers<[1], [1], [2], [2], [0, 0, 0, 2, 1, 2], [0], [0]>} : vector<2x8x128xf32>, vector<2x8x128xf32>, vector<2x128x128xf32> -> vector<2x128x128xf32>
      %cst_51 = arith.constant 1.250000e-01 : f32
      %105 = vector.broadcast %cst_51 : f32 to vector<2x128x128xf32>
      %106 = arith.mulf %104, %105 : vector<2x128x128xf32>
      %c0_52 = arith.constant 0 : index
      %c0_53 = arith.constant 0 : index
      %107 = vector.load %arg8[%c0_52, %c0_53] : memref<128x128xf32, #tpu.memory_space<vmem>>, vector<128x128xf32>
      %cst_54 = arith.constant dense<0.000000e+00> : vector<128x128xf32>
      %108 = tpu.matmul %107, %107, %cst_54 {dimension_numbers = #tpu.dot_dimension_numbers<[1], [1], [0], [0], [0, 0, 1, 0], [], []>} : vector<128x128xf32>, vector<128x128xf32>, vector<128x128xf32> -> vector<128x128xf32>
      %109 = vector.shape_cast %108 : vector<128x128xf32> to vector<1x128x128xf32>
      %110 = vector.broadcast %109 : vector<1x128x128xf32> to vector<2x128x128xf32>
      %111 = arith.subf %106, %110 : vector<2x128x128xf32>
      %112 = arith.mulf %111, %111 : vector<2x128x128xf32>
      %113 = vector.shape_cast %112 : vector<2x128x128xf32> to vector<1x2x128x128xf32>
      %cst_55 = arith.constant dense<0.000000e+00> : vector<1xf32>
      %114 = vector.multi_reduction <add>, %113, %cst_55 [1, 2, 3] : vector<1x2x128x128xf32> to vector<1xf32>
      %115 = vector.shape_cast %114 : vector<1xf32> to vector<1x1x1x1xf32>
      %116 = vector.extract %115[0, 0, 0, 0] : f32 from vector<1x1x1x1xf32>
      %cst_56 = arith.constant 3.276800e+04 : f32
      %117 = arith.divf %116, %cst_56 : f32
      %cst_57 = arith.constant 2.560000e+02 : f32
      %118 = arith.mulf %117, %cst_57 : f32
      %c0_58 = arith.constant 0 : index
      %c0_59 = arith.constant 0 : index
      %119 = memref.load %arg14[%c0_58, %c0_59] : memref<1x1xf32, #tpu.memory_space<smem>>
      memref.store %118, %arg14[%c0_58, %c0_59] : memref<1x1xf32, #tpu.memory_space<smem>>
      %120 = vector.extract_strided_slice %17 {offsets = [0, 0], sizes = [8, 2048], strides = [1, 1]} : vector<16x2048xf32> to vector<8x2048xf32>
      %121 = arith.truncf %120 : vector<8x2048xf32> to vector<8x2048xbf16>
      %c0_60 = arith.constant 0 : index
      %c0_61 = arith.constant 0 : index
      %122 = vector.load %arg10[%c0_60, %c0_61] : memref<2048x16xbf16, #tpu.memory_space<vmem>>, vector<2048x16xbf16>
      %cst_62 = arith.constant dense<0.000000e+00> : vector<8x16xf32>
      %123 = tpu.matmul %121, %122, %cst_62 {dimension_numbers = #tpu.dot_dimension_numbers<[1], [0], [0], [1], [0, 0, 1, 1], [], []>} : vector<8x2048xbf16>, vector<2048x16xbf16>, vector<8x16xf32> -> vector<8x16xf32>
      %c0_63 = arith.constant 0 : index
      %c0_64 = arith.constant 0 : index
      %124 = vector.load %arg11[%c0_63, %c0_64] : memref<1x16xf32, #tpu.memory_space<vmem>>, vector<1x16xf32>
      %125 = vector.broadcast %124 : vector<1x16xf32> to vector<8x16xf32>
      %126 = arith.addf %123, %125 : vector<8x16xf32>
      %c0_65 = arith.constant 0 : index
      %c0_66 = arith.constant 0 : index
      %127 = vector.load %arg16[%c0_65, %c0_66] : memref<8x16xf32, #tpu.memory_space<vmem>>, vector<8x16xf32>
      tpu.vector_store %arg16[%c0_65, %c0_66], %126 {strides = array<i32>} : memref<8x16xf32, #tpu.memory_space<vmem>>, vector<8x16xf32>,
      %cst_67 = arith.constant dense<0xFF800000> : vector<8xf32>
      %128 = vector.multi_reduction <maximumf>, %126, %cst_67 [1] : vector<8x16xf32> to vector<8xf32>
      %129 = vector.shape_cast %128 : vector<8xf32> to vector<8x1xf32>
      %130 = vector.broadcast %129 : vector<8x1xf32> to vector<8x16xf32>
      %131 = arith.subf %126, %130 : vector<8x16xf32>
      %132 = math.exp %131 : vector<8x16xf32>
      %cst_68 = arith.constant dense<0.000000e+00> : vector<8xf32>
      %133 = vector.multi_reduction <add>, %132, %cst_68 [1] : vector<8x16xf32> to vector<8xf32>
      %134 = vector.shape_cast %133 : vector<8xf32> to vector<8x1xf32>
      %135 = math.log %134 : vector<8x1xf32>
      %136 = arith.addf %135, %129 : vector<8x1xf32>
      %137 = tpu.iota {dimensions = array<i32: 1>} : vector<8x16xi32>
      %c0_69 = arith.constant 0 : index
      %c0_70 = arith.constant 0 : index
      %138 = vector.load %arg12[%c0_69, %c0_70] : memref<8x1xi32, #tpu.memory_space<vmem>>, vector<8x1xi32>
      %139 = vector.broadcast %138 : vector<8x1xi32> to vector<8x16xi32>
      %140 = arith.cmpi eq, %139, %137 : vector<8x16xi32>
      %cst_71 = arith.constant 0.000000e+00 : f32
      %141 = vector.broadcast %cst_71 : f32 to vector<8x16xf32>
      %142 = arith.select %140, %126, %141 : vector<8x16xi1>, vector<8x16xf32>
      %cst_72 = arith.constant dense<0.000000e+00> : vector<8xf32>
      %143 = vector.multi_reduction <add>, %142, %cst_72 [1] : vector<8x16xf32> to vector<8xf32>
      %144 = vector.shape_cast %143 : vector<8xf32> to vector<8x1xf32>
      %145 = arith.subf %136, %144 : vector<8x1xf32>
      %146 = vector.shape_cast %145 : vector<8x1xf32> to vector<1x8x1xf32>
      %cst_73 = arith.constant dense<0.000000e+00> : vector<1xf32>
      %147 = vector.multi_reduction <add>, %146, %cst_73 [1, 2] : vector<1x8x1xf32> to vector<1xf32>
      %148 = vector.shape_cast %147 : vector<1xf32> to vector<1x1x1xf32>
      %149 = vector.extract %148[0, 0, 0] : f32 from vector<1x1x1xf32>
      %cst_74 = arith.constant 8.000000e+00 : f32
      %150 = arith.divf %149, %cst_74 : f32
      %c0_75 = arith.constant 0 : index
      %c0_76 = arith.constant 0 : index
      %151 = memref.load %arg15[%c0_75, %c0_76] : memref<1x1xf32, #tpu.memory_space<smem>>
      memref.store %150, %arg15[%c0_75, %c0_76] : memref<1x1xf32, #tpu.memory_space<smem>>
    } else {
    }
    return
  }
  func.func @transform_0(%arg0: i32) -> (i32, i32) {
    %c0_i32 = arith.constant 0 : i32
    %c0_i32_0 = arith.constant 0 : i32
    return %c0_i32, %arg0 : i32, i32
  }
  func.func @transform_1(%arg0: i32) -> (i32, i32) {
    %c0_i32 = arith.constant 0 : i32
    %c0_i32_0 = arith.constant 0 : i32
    return %c0_i32, %arg0 : i32, i32
  }
  func.func @transform_2(%arg0: i32) -> (i32, i32) {
    %c0_i32 = arith.constant 0 : i32
    %c0_i32_0 = arith.constant 0 : i32
    return %arg0, %c0_i32 : i32, i32
  }
  func.func @transform_3(%arg0: i32) -> (i32, i32) {
    %c0_i32 = arith.constant 0 : i32
    %c0_i32_0 = arith.constant 0 : i32
    %c0_i32_1 = arith.constant 0 : i32
    return %c0_i32, %c0_i32_0 : i32, i32
  }
  func.func @transform_4(%arg0: i32) -> (i32, i32) {
    %c0_i32 = arith.constant 0 : i32
    %c0_i32_0 = arith.constant 0 : i32
    %c0_i32_1 = arith.constant 0 : i32
    return %c0_i32, %c0_i32_0 : i32, i32
  }
  func.func @transform_5(%arg0: i32) -> (i32, i32) {
    %c0_i32 = arith.constant 0 : i32
    %c0_i32_0 = arith.constant 0 : i32
    %c0_i32_1 = arith.constant 0 : i32
    return %c0_i32, %c0_i32_0 : i32, i32
  }
  func.func @transform_6(%arg0: i32) -> (i32, i32) {
    %c0_i32 = arith.constant 0 : i32
    %c0_i32_0 = arith.constant 0 : i32
    %c0_i32_1 = arith.constant 0 : i32
    return %c0_i32, %c0_i32_0 : i32, i32
  }
  func.func @transform_7(%arg0: i32) -> (i32, i32) {
    %c0_i32 = arith.constant 0 : i32
    %c0_i32_0 = arith.constant 0 : i32
    %c0_i32_1 = arith.constant 0 : i32
    return %c0_i32, %c0_i32_0 : i32, i32
  }
  func.func @transform_8(%arg0: i32) -> (i32, i32) {
    %c0_i32 = arith.constant 0 : i32
    %c0_i32_0 = arith.constant 0 : i32
    %c0_i32_1 = arith.constant 0 : i32
    return %c0_i32, %c0_i32_0 : i32, i32
  }
  func.func @transform_9(%arg0: i32) -> (i32, i32) {
    %c0_i32 = arith.constant 0 : i32
    %c0_i32_0 = arith.constant 0 : i32
    %c0_i32_1 = arith.constant 0 : i32
    return %c0_i32, %c0_i32_0 : i32, i32
  }
  func.func @transform_10(%arg0: i32) -> (i32, i32) {
    %c0_i32 = arith.constant 0 : i32
    %c0_i32_0 = arith.constant 0 : i32
    %c0_i32_1 = arith.constant 0 : i32
    return %c0_i32, %c0_i32_0 : i32, i32
  }
  func.func @transform_11(%arg0: i32) -> (i32, i32) {
    %c0_i32 = arith.constant 0 : i32
    %c0_i32_0 = arith.constant 0 : i32
    %c0_i32_1 = arith.constant 0 : i32
    return %c0_i32, %c0_i32_0 : i32, i32
  }
  func.func @transform_12(%arg0: i32) -> (i32, i32) {
    %c0_i32 = arith.constant 0 : i32
    %c0_i32_0 = arith.constant 0 : i32
    %c0_i32_1 = arith.constant 0 : i32
    return %c0_i32, %c0_i32_0 : i32, i32
  }
  func.func @transform_13(%arg0: i32) -> (i32, i32) {
    %c0_i32 = arith.constant 0 : i32
    %c0_i32_0 = arith.constant 0 : i32
    %c0_i32_1 = arith.constant 0 : i32
    return %c0_i32, %c0_i32_0 : i32, i32
  }
  func.func @transform_14(%arg0: i32) -> (i32, i32) {
    %c0_i32 = arith.constant 0 : i32
    %c0_i32_0 = arith.constant 0 : i32
    %c0_i32_1 = arith.constant 0 : i32
    return %c0_i32, %c0_i32_0 : i32, i32
  }
  func.func @transform_15(%arg0: i32) -> (i32, i32) {
    %c0_i32 = arith.constant 0 : i32
    %c0_i32_0 = arith.constant 0 : i32
    %c0_i32_1 = arith.constant 0 : i32
    return %c0_i32, %c0_i32_0 : i32, i32
  }
}

</mosaic_0001>

<bundles_post_ra>
// kernel: model_forward.1
= control target key start
LH: loop header
LB: loop body
LE: loop exit
PB: predicated region body
PF: predicated region fallthrough
CT: control target
= control target key end

     0   :  { %21 = vsyncpa [#allocation4], 0  ;;  %s17571_s0 = inlined_call_operand.vmem [shape: bf16[8,768], index: 0, kind: input, shape index: {}]   ;;  %s17572_s1 = inlined_call_operand.vmem [shape: bf16[8,768], index: 1, kind: input, shape index: {}]   ;;  %s17573_s2 = inlined_call_operand.hbm [shape: bf16[768,2048], index: 2, kind: input, shape index: {}]   ;;  %s17574_s3 = inlined_call_operand.hbm [shape: bf16[2048,128], index: 3, kind: input, shape index: {}]   ;;  %s17575_s4 = inlined_call_operand.hbm [shape: f32[1,128], index: 4, kind: input, shape index: {}]   ;;  %s17576_s5 = inlined_call_operand.hbm [shape: f32[1,128], index: 5, kind: input, shape index: {}]   ;;  %s17577_s6 = inlined_call_operand.hbm [shape: f32[128,128], index: 6, kind: input, shape index: {}]   ;;  %s17578_s7 = inlined_call_operand.hbm [shape: f32[128,128], index: 7, kind: input, shape index: {}]   ;;  %s17579_s8 = inlined_call_operand.hbm [shape: f32[1,128], index: 8, kind: input, shape index: {}]   ;;  %s17580_s9 = inlined_call_operand.vmem [shape: bf16[2048,16], index: 9, kind: input, shape index: {}]   ;;  %s17581_s10 = inlined_call_operand.hbm [shape: f32[1,16], index: 10, kind: input, shape index: {}]   ;;  %s17582_s11 = inlined_call_operand.vmem [shape: s32[8,1], index: 11, kind: input, shape index: {}]   ;;  %s17583_s12 = inlined_call_operand.hbm [shape: f32[1,1], index: 12, kind: output, shape index: {0}]   ;;  %s17584_s13 = inlined_call_operand.hbm [shape: f32[1,1], index: 13, kind: output, shape index: {1}]   ;;  %s17585_s14 = inlined_call_operand.hbm [shape: f32[1,1], index: 14, kind: output, shape index: {2}]   ;;  %s17586_s15 = inlined_call_operand.hbm [shape: f32[8,16], index: 15, kind: output, shape index: {3}]  }
   0x1   :  { %22 = vsyncpa [#allocation8], 0 }
   0x2   :  { %23 = vsyncpa [#allocation11], 0 }
   0x3   :  { %24 = vsyncpa [#allocation14], 0 }
   0x4   :  { %25 = vsyncpa [#allocation17], 0 }
   0x5   :  { %26 = vsyncpa [#allocation6], 0 }
   0x6   :  { %27 = vsyncpa [#allocation20], 0 }
   0x7   :  { %28 = vsyncpa [#allocation5], 0  ;;  %s13325_s18 = smov [#allocation7]   ;;  %s13081_s22 = scalar_lea.hbm %s17574_s3, 16384 }
   0x8   :  { %s50_s19 = sshll.u32 %s13325_s18, 4  ;;  %p13082_p0 = scmp.ne.s32.totalorder %s17574_s3, %s13081_s22  ;;  %s51_s19 = int_to_ptr.vmem [resolvable:$true] %s50_s19 }
   0x9   :  { %p13085_p1 = scmp.lt.u32.totalorder %s13081_s22, %s17574_s3 }
   0xb   :  { %p13087_p2 = pnand %p13085_p1, %p13082_p0 }
   0xd   :  { %13090 = shalt.err (!%p13087_p2)
}
   0xe   :  { %s13091_s27 = scalar_lea.vmem %s51_s19, 16384  ;;  %p13096_p4 = scmp.lt.s32.totalorder %s51_s19, %s51_s19 }
   0xf   :  { %p13092_p3 = scmp.ne.s32.totalorder %s51_s19, %s13091_s27  ;;  %p13097_p5 = scmp.lt.s32.totalorder %s13091_s27, %s13091_s27 }
  0x11   :  { %p13098_p6 = por %p13097_p5, %p13096_p4 }
  0x13   :  { %p13099_p7 = pnand %p13098_p6, %p13092_p3 }
  0x15   :  { %13102 = shalt.err (!%p13099_p7)
}
  0x16   :  { %s13326_s28 = smov 64   ;;  %s13327_s29 = smov 4  }
  0x17   :  { %56 = dma.hbm_to_vmem [thread:$0]  %s17574_s3, 16384, %s51_s19, [#allocation8], %s13326_s28, %s13326_s28, %s13327_s29  }
  0x18   :  { %s13328_s17 = smov [#allocation10]   ;;  %s13103_s22 = scalar_lea.hbm %s17576_s5, 16 }
  0x19   :  { %s73_s18 = sshll.u32 %s13328_s17, 4  ;;  %p13104_p8 = scmp.ne.s32.totalorder %s17576_s5, %s13103_s22  ;;  %s74_s18 = int_to_ptr.vmem [resolvable:$true] %s73_s18 }
  0x1a   :  { %p13107_p9 = scmp.lt.u32.totalorder %s13103_s22, %s17576_s5 }
  0x1c   :  { %p13109_p10 = pnand %p13107_p9, %p13104_p8 }
  0x1e   :  { %13112 = shalt.err (!%p13109_p10)
}
  0x1f   :  { %s13113_s27 = scalar_lea.vmem %s74_s18, 16  ;;  %s13117_s3 = scalar_lea.vmem %s74_s18, 32 }
  0x20   :  { %p13114_p11 = scmp.ne.s32.totalorder %s74_s18, %s13113_s27  ;;  %p13118_p12 = scmp.lt.s32.totalorder %s74_s18, %s74_s18 }
  0x21   :  { %p13119_p13 = scmp.lt.s32.totalorder %s13117_s3, %s13113_s27 }
  0x23   :  { %p13120_p0 = por %p13119_p13, %p13118_p12 }
  0x25   :  { %p13121_p1 = pnand %p13120_p0, %p13114_p11 }
  0x27   :  { %13124 = shalt.err (!%p13121_p1)
}
  0x28   :  { %76 = dma.hbm_to_vmem [thread:$0]  %s17576_s5, 16, %s74_s18, [#allocation11]  }
  0x29   :  { %s13329_s30 = smov [#allocation13]   ;;  %s13330_s17 = smov [#allocation3]  }
  0x2a   :  { %s94_s16 = sshll.u32 %s13329_s30, 4  ;;  %s38_s20 = sshll.u32 %s13330_s17, 4  ;;  %s95_s16 = int_to_ptr.vmem [resolvable:$true] %s94_s16  ;;  %s13449_s20 = int_to_ptr.vmem [resolvable:$true] %s38_s20 }
  0x2b   :  { %s13125_s23 = scalar_lea.hbm %s17578_s7, 2048 }
  0x2c   :  { %p13126_p2 = scmp.ne.s32.totalorder %s17578_s7, %s13125_s23  ;;  %p13129_p3 = scmp.lt.u32.totalorder %s13125_s23, %s17578_s7 }
  0x2e   :  { %p13131_p4 = pnand %p13129_p3, %p13126_p2 }
  0x30   :  { %13134 = shalt.err (!%p13131_p4)
}
  0x31   :  { %s13135_s5 = scalar_lea.vmem %s95_s16, 2048  ;;  %p13140_p6 = scmp.lt.s32.totalorder %s95_s16, %s95_s16 }
  0x32   :  { %p13136_p5 = scmp.ne.s32.totalorder %s95_s16, %s13135_s5  ;;  %p13141_p7 = scmp.lt.s32.totalorder %s13135_s5, %s13135_s5 }
  0x34   :  { %p13142_p8 = por %p13141_p7, %p13140_p6 }
  0x36   :  { %p13143_p9 = pnand %p13142_p8, %p13136_p5 }
  0x38   :  { %13146 = shalt.err (!%p13143_p9)
}
  0x39   :  { %s13331_s18 = smov 128   ;;  %s13332_s3 = smov 8  }
  0x3a   :  { %100 = dma.hbm_to_vmem [thread:$0]  %s17578_s7, 2048, %s95_s16, [#allocation14], %s13331_s18, %s13331_s18, %s13332_s3  }
  0x3b   :  { %s13147_s21 = scalar_lea.hbm %s17573_s2, 98304 }
  0x3c   :  { %p13148_p10 = scmp.ne.s32.totalorder %s17573_s2, %s13147_s21  ;;  %p13151_p11 = scmp.lt.u32.totalorder %s13147_s21, %s17573_s2 }
  0x3e   :  { %p13153_p12 = pnand %p13151_p11, %p13148_p10 }
  0x40   :  { %13156 = shalt.err (!%p13153_p12)
}
  0x41   :  { %s13157_s26 = scalar_lea.vmem %s13449_s20, 98304  ;;  %p13162_p0 = scmp.lt.s32.totalorder %s13449_s20, %s13449_s20 }
  0x42   :  { %p13158_p13 = scmp.ne.s32.totalorder %s13449_s20, %s13157_s26  ;;  %p13163_p1 = scmp.lt.s32.totalorder %s13157_s26, %s13157_s26 }
  0x44   :  { %p13164_p2 = por %p13163_p1, %p13162_p0 }
  0x46   :  { %p13165_p3 = pnand %p13164_p2, %p13158_p13 }
  0x48   :  { %13168 = shalt.err (!%p13165_p3)
}
  0x49   :  { %s13333_s7 = smov 1024   ;;  %s13334_s5 = smov [#allocation9]  }
  0x4a   :  { %44 = dma.hbm_to_vmem [thread:$0]  %s17573_s2, 98304, %s13449_s20, [#allocation4], %s13333_s7, %s13333_s7, %s13326_s28  }
  0x4b   :  { %s63_s19 = sshll.u32 %s13334_s5, 4  ;;  %s13335_s29 = smov [#allocation12]   ;;  %s64_s19 = int_to_ptr.vmem [resolvable:$true] %s63_s19 }
  0x4c   :  { %s82_s30 = sshll.u32 %s13335_s29, 4  ;;  %s13169_s22 = scalar_lea.hbm %s17575_s4, 16  ;;  %s83_s30 = int_to_ptr.vmem [resolvable:$true] %s82_s30 }
  0x4d   :  { %p13170_p4 = scmp.ne.s32.totalorder %s17575_s4, %s13169_s22  ;;  %p13173_p5 = scmp.lt.u32.totalorder %s13169_s22, %s17575_s4 }
  0x4f   :  { %p13175_p6 = pnand %p13173_p5, %p13170_p4 }
  0x51   :  { %13178 = shalt.err (!%p13175_p6)
}
  0x52   :  { %s13179_s2 = scalar_lea.vmem %s64_s19, 16  ;;  %s13183_s28 = scalar_lea.vmem %s64_s19, 32 }
  0x53   :  { %p13180_p7 = scmp.ne.s32.totalorder %s64_s19, %s13179_s2  ;;  %p13184_p8 = scmp.lt.s32.totalorder %s64_s19, %s64_s19 }
  0x54   :  { %p13185_p9 = scmp.lt.s32.totalorder %s13183_s28, %s13179_s2 }
  0x56   :  { %p13186_p10 = por %p13185_p9, %p13184_p8 }
  0x58   :  { %p13187_p11 = pnand %p13186_p10, %p13180_p7 }
  0x5a   :  { %13190 = shalt.err (!%p13187_p11)
}
  0x5b   :  { %66 = dma.hbm_to_vmem [thread:$0]  %s17575_s4, 16, %s64_s19, [#allocation8]  }
  0x5c   :  { %s13191_s5 = scalar_lea.hbm %s17577_s6, 2048 }
  0x5d   :  { %p13192_p12 = scmp.ne.s32.totalorder %s17577_s6, %s13191_s5  ;;  %p13195_p13 = scmp.lt.u32.totalorder %s13191_s5, %s17577_s6 }
  0x5f   :  { %p13197_p0 = pnand %p13195_p13, %p13192_p12 }
  0x61   :  { %13200 = shalt.err (!%p13197_p0)
}
  0x62   :  { %s13201_s23 = scalar_lea.vmem %s83_s30, 2048  ;;  %p13206_p2 = scmp.lt.s32.totalorder %s83_s30, %s83_s30 }
  0x63   :  { %p13202_p1 = scmp.ne.s32.totalorder %s83_s30, %s13201_s23  ;;  %p13207_p3 = scmp.lt.s32.totalorder %s13201_s23, %s13201_s23 }
  0x65   :  { %p13208_p4 = por %p13207_p3, %p13206_p2 }
  0x67   :  { %p13209_p5 = pnand %p13208_p4, %p13202_p1 }
  0x69   :  { %13212 = shalt.err (!%p13209_p5)
}
  0x6a   :  { %88 = dma.hbm_to_vmem [thread:$0]  %s17577_s6, 2048, %s83_s30, [#allocation11], %s13331_s18, %s13331_s18, %s13332_s3  }
  0x6b   :  { %s13336_s24 = smov [#allocation15]   ;;  %s13337_s26 = smov [#allocation16]  }
  0x6c   :  { %s107_s25 = sshll.u32 %s13336_s24, 4  ;;  %s119_s2 = sshll.u32 %s13337_s26, 4  ;;  %s108_s25 = int_to_ptr.vmem [resolvable:$true] %s107_s25  ;;  %s120_s2 = int_to_ptr.vmem [resolvable:$true] %s119_s2 }
  0x6d   :  { %s13213_s7 = scalar_lea.hbm %s17579_s8, 16 }
  0x6e   :  { %p13214_p6 = scmp.ne.s32.totalorder %s17579_s8, %s13213_s7  ;;  %p13217_p7 = scmp.lt.u32.totalorder %s13213_s7, %s17579_s8 }
  0x70   :  { %p13219_p8 = pnand %p13217_p7, %p13214_p6 }
  0x72   :  { %13222 = shalt.err (!%p13219_p8)
}
  0x73   :  { %s13223_s6 = scalar_lea.vmem %s108_s25, 16  ;;  %s13227_s18 = scalar_lea.vmem %s108_s25, 32 }
  0x74   :  { %p13224_p9 = scmp.ne.s32.totalorder %s108_s25, %s13223_s6  ;;  %p13228_p10 = scmp.lt.s32.totalorder %s108_s25, %s108_s25 }
  0x75   :  { %p13229_p11 = scmp.lt.s32.totalorder %s13227_s18, %s13223_s6 }
  0x77   :  { %p13230_p12 = por %p13229_p11, %p13228_p10 }
  0x79   :  { %p13231_p13 = pnand %p13230_p12, %p13224_p9 }
  0x7b   :  { %13234 = shalt.err (!%p13231_p13)
}
  0x7c   :  { %110 = dma.hbm_to_vmem [thread:$0]  %s17579_s8, 16, %s108_s25, [#allocation14]  }
  0x7d   :  { %s13235_s22 = scalar_lea.hbm %s17581_s10, 16 }
  0x7e   :  { %p13236_p0 = scmp.ne.s32.totalorder %s17581_s10, %s13235_s22  ;;  %p13239_p1 = scmp.lt.u32.totalorder %s13235_s22, %s17581_s10 }
  0x80   :  { %p13241_p2 = pnand %p13239_p1, %p13236_p0 }
  0x82   :  { %13244 = shalt.err (!%p13241_p2)
}
  0x83   :  { %s13245_s26 = scalar_lea.vmem %s120_s2, 16  ;;  %s13249_s28 = scalar_lea.vmem %s120_s2, 32 }
  0x84   :  { %p13246_p3 = scmp.ne.s32.totalorder %s120_s2, %s13245_s26  ;;  %p13250_p4 = scmp.lt.s32.totalorder %s120_s2, %s120_s2 }
  0x85   :  { %p13251_p5 = scmp.lt.s32.totalorder %s13249_s28, %s13245_s26 }
  0x87   :  { %p13252_p6 = por %p13251_p5, %p13250_p4 }
  0x89   :  { %p13253_p7 = pnand %p13252_p6, %p13246_p3 }
  0x8b   :  { %13256 = shalt.err (!%p13253_p7)
}
  0x8c   :  { %122 = dma.hbm_to_vmem [thread:$0]  %s17581_s10, 16, %s120_s2, [#allocation17]  }
  0x8d   :  { %13309 = dma.done.wait [#allocation4], 98304  }
  0x8e   :  { %13310 = vsyncadd [#allocation4], 4294868992 }
  0x8f   :  { %13311 = dma.done.wait [#allocation8], 16400  }
  0x90   :  { %13312 = vsyncadd [#allocation8], 4294950896 }
  0x91   :  { %13313 = dma.done.wait [#allocation11], 2064  }
  0x92   :  { %13314 = vsyncadd [#allocation11], 4294965232 }
  0x93   :  { %13315 = dma.done.wait [#allocation14], 2064  }
  0x94   :  { %13316 = vsyncadd [#allocation14], 4294965232 }
  0x95   :  { %13317 = dma.done.wait [#allocation17], 16  }
  0x96   :  { %13318 = vsyncadd [#allocation17], 4294967280  ;;  %v186_v0 = vld [vmem:[#allocation3] sm:$0xff]  ;;  %v187_v2 = vld [vmem:[#allocation3 + $0x8] sm:$0xff]  ;;  %vm8658_vm0 = vcmask 64512   ;;  %vm10747_vm1 = vcmask 130048  }
  0x97   :  { %v194_v1 = vld [vmem:[#allocation3 + $0x40] sm:$0xff]  ;;  %v195_v4 = vld [vmem:[#allocation3 + $0x48] sm:$0xff]  ;;  %vm10773_vm3 = vcmask 7168   ;;  %s13257_s7 = scalar_lea.hbm %s17584_s13, 16 }
  0x98   :  { %v13535_v3 = vcombine.high %v186_v0, %v194_v1  ;;  %v13537_v5 = vcombine.low %v186_v0, %v194_v1  ;;  %v202_v6 = vld [vmem:[#allocation3 + $0x80] sm:$0xff]  ;;  %v13539_v8 = vcombine.high %v187_v2, %v195_v4  ;;  %v13541_v9 = vcombine.low %v187_v2, %v195_v4  ;;  %v203_v11 = vld [vmem:[#allocation3 + $0x88] sm:$0xff]  ;;  %p13258_p8 = scmp.ne.s32.totalorder %s17584_s13, %s13257_s7  ;;  %p13261_p9 = scmp.lt.u32.totalorder %s13257_s7, %s17584_s13 }
  0x99   :  { %v210_v7 = vld [vmem:[#allocation3 + $0xc0] sm:$0xff]  ;;  %v211_v12 = vld [vmem:[#allocation3 + $0xc8] sm:$0xff] }
  0x9a   :  { %v13543_v10 = vcombine.high %v202_v6, %v210_v7  ;;  %v218_v13 = vld [vmem:[#allocation3 + $0x100] sm:$0xff]  ;;  %4834 = vmatprep.subr.bf16.mxu0 %v13535_v3  ;;  %v13546_v14 = vcombine.high %v203_v11, %v211_v12  ;;  %v219_v16 = vld [vmem:[#allocation3 + $0x108] sm:$0xff]  ;;  %4957 = vmatprep.subr.bf16.mxu1 %v13539_v8  ;;  %v13550_v18 = vcombine.low %v202_v6, %v210_v7  ;;  %p13263_p10 = pnand %p13261_p9, %p13258_p8 }
  0x9b   :  { %v226_v15 = vld [vmem:[#allocation3 + $0x140] sm:$0xff]  ;;  %v227_v17 = vld [vmem:[#allocation3 + $0x148] sm:$0xff]  ;;  %4835 = vmatpush1.bf16.msra.mxu0 %v13537_v5  ;;  %4958 = vmatpush1.bf16.msra.mxu1 %v13541_v9  ;;  %v13554_v19 = vcombine.low %v203_v11, %v211_v12 }
  0x9c   :  { %4836 = vmatprep.subr.bf16.mxu0 %v13543_v10  ;;  %v13556_v20 = vcombine.high %v218_v13, %v226_v15  ;;  %4959 = vmatprep.subr.bf16.mxu1 %v13546_v14  ;;  %v13559_v21 = vcombine.high %v219_v16, %v227_v17  ;;  %v234_v22 = vld [vmem:[#allocation3 + $0x180] sm:$0xff]  ;;  %v235_v24 = vld [vmem:[#allocation3 + $0x188] sm:$0xff]  ;;  %v13562_v26 = vcombine.low %v218_v13, %v226_v15 }
  0x9d   :  { %v242_v23 = vld [vmem:[#allocation3 + $0x1c0] sm:$0xff]  ;;  %v243_v25 = vld [vmem:[#allocation3 + $0x1c8] sm:$0xff]  ;;  %v13566_v27 = vcombine.low %v219_v16, %v227_v17 }
  0x9e   :  { %v13568_v28 = vcombine.high %v234_v22, %v242_v23  ;;  %v13571_v29 = vcombine.high %v235_v24, %v243_v25  ;;  %v250_v30 = vld [vmem:[#allocation3 + $0x200] sm:$0xff]  ;;  %v251_v32 = vld [vmem:[#allocation3 + $0x208] sm:$0xff]  ;;  %v13574_v34 = vcombine.low %v234_v22, %v242_v23  ;;  %v13578_v35 = vcombine.low %v235_v24, %v243_v25 }
  0x9f   :  { %4837 = vmatpush1.bf16.msra.mxu0 %v13550_v18  ;;  %4960 = vmatpush1.bf16.msra.mxu1 %v13554_v19  ;;  %v258_v31 = vld [vmem:[#allocation3 + $0x240] sm:$0xff]  ;;  %v259_v33 = vld [vmem:[#allocation3 + $0x248] sm:$0xff] }
  0xa0   :  { %4838 = vmatprep.subr.bf16.mxu0 %v13556_v20  ;;  %4961 = vmatprep.subr.bf16.mxu1 %v13559_v21  ;;  %v13580_v36 = vcombine.high %v250_v30, %v258_v31  ;;  %v13583_v37 = vcombine.high %v251_v32, %v259_v33  ;;  %v266_v38 = vld [vmem:[#allocation3 + $0x280] sm:$0xff]  ;;  %v267_v40 = vld [vmem:[#allocation3 + $0x288] sm:$0xff]  ;;  %v13586_v42 = vcombine.low %v250_v30, %v258_v31 }
  0xa1   :  { %v274_v39 = vld [vmem:[#allocation3 + $0x2c0] sm:$0xff]  ;;  %v275_v41 = vld [vmem:[#allocation3 + $0x2c8] sm:$0xff]  ;;  %v13590_v43 = vcombine.low %v251_v32, %v259_v33 }
  0xa2   :  { %v13592_v44 = vcombine.high %v266_v38, %v274_v39  ;;  %v13595_v45 = vcombine.high %v267_v40, %v275_v41  ;;  %v282_v46 = vld [vmem:[#allocation3 + $0x300] sm:$0xff]  ;;  %v283_v48 = vld [vmem:[#allocation3 + $0x308] sm:$0xff]  ;;  %v13598_v50 = vcombine.low %v266_v38, %v274_v39  ;;  %v13602_v51 = vcombine.low %v267_v40, %v275_v41 }
  0xa3   :  { %4839 = vmatpush1.bf16.msra.mxu0 %v13562_v26  ;;  %4962 = vmatpush1.bf16.msra.mxu1 %v13566_v27  ;;  %v290_v47 = vld [vmem:[#allocation3 + $0x340] sm:$0xff]  ;;  %v291_v49 = vld [vmem:[#allocation3 + $0x348] sm:$0xff] }
  0xa4   :  { %4840 = vmatprep.subr.bf16.mxu0 %v13568_v28  ;;  %4963 = vmatprep.subr.bf16.mxu1 %v13571_v29  ;;  %v13604_v52 = vcombine.high %v282_v46, %v290_v47  ;;  %v13609_v53 = vld [vmem:[%s17571_s0] sm:$0xff]  ;;  %v13612_v54 = vcombine.high %v283_v48, %v291_v49  ;;  %v299_v58 = vld [vmem:[#allocation3 + $0x388] sm:$0xff]  ;;  %v13619_v60 = vcombine.low %v282_v46, %v290_v47 }
  0xa5   :  { %v298_v55 = vld [vmem:[#allocation3 + $0x380] sm:$0xff]  ;;  %v13616_v57 = vcombine.high %v13609_v53, %v13609_v53  ;;  %v307_v59 = vld [vmem:[#allocation3 + $0x3c8] sm:$0xff]  ;;  %v13624_v61 = vcombine.low %v283_v48, %v291_v49 }
  0xa6   :  { %v306_v56 = vld [vmem:[#allocation3 + $0x3c0] sm:$0xff]  ;;  %v13629_v63 = vcombine.high %v299_v58, %v307_v59  ;;  %v315_v2 = vld [vmem:[#allocation3 + $0x408] sm:$0xff]  ;;  %v13637_v7 = vcombine.low %v299_v58, %v307_v59 }
  0xa7   :  { %4841 = vmatpush1.bf16.msra.mxu0 %v13574_v34  ;;  %4964 = vmatpush1.bf16.msra.mxu1 %v13578_v35  ;;  %v13626_v62 = vcombine.high %v298_v55, %v306_v56  ;;  %v314_v0 = vld [vmem:[#allocation3 + $0x400] sm:$0xff]  ;;  %v323_v4 = vld [vmem:[#allocation3 + $0x448] sm:$0xff]  ;;  %v13633_v6 = vcombine.low %v298_v55, %v306_v56 }
  0xa8   :  { %4842 = vmatprep.subr.bf16.mxu0 %v13580_v36  ;;  %4965 = vmatprep.subr.bf16.mxu1 %v13583_v37  ;;  %v322_v1 = vld [vmem:[#allocation3 + $0x440] sm:$0xff]  ;;  %v13642_v12 = vcombine.high %v315_v2, %v323_v4  ;;  %v331_v16 = vld [vmem:[#allocation3 + $0x488] sm:$0xff]  ;;  %v13649_v23 = vcombine.low %v315_v2, %v323_v4 }
  0xa9   :  { %4866 = vmatprep.mubr.bf16.mxu0 %v13616_v57  ;;  %4989 = vmatprep.mubr.bf16.mxu1 %v13616_v57  ;;  %v13639_v11 = vcombine.high %v314_v0, %v322_v1  ;;  %v330_v13 = vld [vmem:[#allocation3 + $0x480] sm:$0xff]  ;;  %v339_v17 = vld [vmem:[#allocation3 + $0x4c8] sm:$0xff]  ;;  %v13645_v22 = vcombine.low %v314_v0, %v322_v1 }
  0xaa   :  { %v338_v15 = vld [vmem:[#allocation3 + $0x4c0] sm:$0xff]  ;;  %v13654_v25 = vcombine.high %v331_v16, %v339_v17  ;;  %v347_v32 = vld [vmem:[#allocation3 + $0x508] sm:$0xff]  ;;  %v13661_v39 = vcombine.low %v331_v16, %v339_v17 }
  0xab   :  { %4843 = vmatpush1.bf16.msra.mxu0 %v13586_v42  ;;  %4966 = vmatpush1.bf16.msra.mxu1 %v13590_v43  ;;  %v13651_v24 = vcombine.high %v330_v13, %v338_v15  ;;  %v346_v30 = vld [vmem:[#allocation3 + $0x500] sm:$0xff]  ;;  %v355_v33 = vld [vmem:[#allocation3 + $0x548] sm:$0xff]  ;;  %v13657_v38 = vcombine.low %v330_v13, %v338_v15 }
  0xac   :  { %4844 = vmatprep.subr.bf16.mxu0 %v13592_v44  ;;  %4967 = vmatprep.subr.bf16.mxu1 %v13595_v45  ;;  %18309 = vst [vmem:[#allocation31_spill] sm:$0xff] %v13654_v25  ;;  %v354_v31 = vld [vmem:[#allocation3 + $0x540] sm:$0xff]  ;;  %18311 = vst [vmem:[#allocation33_spill] sm:$0xff] %v13661_v39  ;;  %v13666_v41 = vcombine.high %v347_v32, %v355_v33  ;;  %v363_v48 = vld [vmem:[#allocation3 + $0x588] sm:$0xff]  ;;  %v13673_v56 = vcombine.low %v347_v32, %v355_v33 }
  0xad   :  { %18310 = vst [vmem:[#allocation32_spill] sm:$0xff] %v13657_v38  ;;  %v13663_v40 = vcombine.high %v346_v30, %v354_v31  ;;  %v362_v46 = vld [vmem:[#allocation3 + $0x580] sm:$0xff]  ;;  %v371_v49 = vld [vmem:[#allocation3 + $0x5c8] sm:$0xff]  ;;  %v13669_v55 = vcombine.low %v346_v30, %v354_v31 }
  0xae   :  { %18313 = vst [vmem:[#allocation35_spill] sm:$0xff] %v13666_v41  ;;  %v370_v47 = vld [vmem:[#allocation3 + $0x5c0] sm:$0xff]  ;;  %18315 = vst [vmem:[#allocation37_spill] sm:$0xff] %v13673_v56  ;;  %v13678_v59 = vcombine.high %v363_v48, %v371_v49  ;;  %v379_v2 = vld [vmem:[#allocation3 + $0x608] sm:$0xff]  ;;  %v13685_v15 = vcombine.low %v363_v48, %v371_v49 }
  0xaf   :  { %4845 = vmatpush1.bf16.msra.mxu0 %v13598_v50  ;;  %4968 = vmatpush1.bf16.msra.mxu1 %v13602_v51  ;;  %18312 = vst [vmem:[#allocation34_spill] sm:$0xff] %v13663_v40  ;;  %18314 = vst [vmem:[#allocation36_spill] sm:$0xff] %v13669_v55  ;;  %v13675_v58 = vcombine.high %v362_v46, %v370_v47  ;;  %v378_v0 = vld [vmem:[#allocation3 + $0x600] sm:$0xff]  ;;  %v387_v4 = vld [vmem:[#allocation3 + $0x648] sm:$0xff]  ;;  %v13681_v13 = vcombine.low %v362_v46, %v370_v47 }
  0xb0   :  { %4846 = vmatprep.subr.bf16.mxu0 %v13604_v52  ;;  %4969 = vmatprep.subr.bf16.mxu1 %v13612_v54  ;;  %18317 = vst [vmem:[#allocation39_spill] sm:$0xff] %v13678_v59  ;;  %v386_v1 = vld [vmem:[#allocation3 + $0x640] sm:$0xff]  ;;  %18319 = vst [vmem:[#allocation41_spill] sm:$0xff] %v13685_v15  ;;  %v13690_v17 = vcombine.high %v379_v2, %v387_v4  ;;  %v395_v32 = vld [vmem:[#allocation3 + $0x688] sm:$0xff]  ;;  %v13697_v47 = vcombine.low %v379_v2, %v387_v4 }
  0xb1   :  { %18316 = vst [vmem:[#allocation38_spill] sm:$0xff] %v13675_v58  ;;  %18318 = vst [vmem:[#allocation40_spill] sm:$0xff] %v13681_v13  ;;  %v13687_v16 = vcombine.high %v378_v0, %v386_v1  ;;  %v394_v30 = vld [vmem:[#allocation3 + $0x680] sm:$0xff]  ;;  %v403_v33 = vld [vmem:[#allocation3 + $0x6c8] sm:$0xff]  ;;  %v13693_v46 = vcombine.low %v378_v0, %v386_v1 }
  0xb2   :  { %18321 = vst [vmem:[#allocation43_spill] sm:$0xff] %v13690_v17  ;;  %v402_v31 = vld [vmem:[#allocation3 + $0x6c0] sm:$0xff]  ;;  %18323 = vst [vmem:[#allocation45_spill] sm:$0xff] %v13697_v47  ;;  %v13702_v49 = vcombine.high %v395_v32, %v403_v33  ;;  %v13709_v1 = vcombine.low %v395_v32, %v403_v33 }
  0xb3   :  { %4847 = vmatpush1.bf16.msra.mxu0 %v13619_v60  ;;  %4970 = vmatpush1.bf16.msra.mxu1 %v13624_v61  ;;  %18320 = vst [vmem:[#allocation42_spill] sm:$0xff] %v13687_v16  ;;  %18322 = vst [vmem:[#allocation44_spill] sm:$0xff] %v13693_v46  ;;  %v13699_v48 = vcombine.high %v394_v30, %v402_v31  ;;  %v13705_v0 = vcombine.low %v394_v30, %v402_v31 }
  0xb4   :  { %4848 = vmatprep.subr.bf16.mxu0 %v13626_v62  ;;  %4971 = vmatprep.subr.bf16.mxu1 %v13629_v63  ;;  %18325 = vst [vmem:[#allocation47_spill] sm:$0xff] %v13702_v49  ;;  %18327 = vst [vmem:[#allocation49_spill] sm:$0xff] %v13709_v1 }
  0xb5   :  { %18324 = vst [vmem:[#allocation46_spill] sm:$0xff] %v13699_v48  ;;  %18326 = vst [vmem:[#allocation48_spill] sm:$0xff] %v13705_v0 }
  0xb7   :  { %4849 = vmatpush1.bf16.msra.mxu0 %v13633_v6  ;;  %4972 = vmatpush1.bf16.msra.mxu1 %v13637_v7 }
  0xb8   :  { %4850 = vmatprep.subr.bf16.mxu0 %v13639_v11  ;;  %4973 = vmatprep.subr.bf16.mxu1 %v13642_v12 }
  0xbb   :  { %4851 = vmatpush1.bf16.msra.mxu0 %v13645_v22  ;;  %4974 = vmatpush1.bf16.msra.mxu1 %v13649_v23 }
  0xbc   :  { %4852 = vmatprep.subr.bf16.mxu0 %v13651_v24  ;;  %4975 = vmatprep.subr.bf16.mxu1 %v13654_v25 }
  0xbf   :  { %4853 = vmatpush1.bf16.msra.mxu0 %v13657_v38  ;;  %4976 = vmatpush1.bf16.msra.mxu1 %v13661_v39  ;;  %v771_v38 = vld [vmem:[#allocation3 + $0x1248] sm:$0xff] }
  0xc0   :  { %4854 = vmatprep.subr.bf16.mxu0 %v13663_v40  ;;  %4977 = vmatprep.subr.bf16.mxu1 %v13666_v41  ;;  %v483_v41 = vld [vmem:[#allocation3 + $0x948] sm:$0xff] }
  0xc1   :  { %v515_v40 = vld [vmem:[#allocation3 + $0xa48] sm:$0xff] }
  0xc3   :  { %4855 = vmatpush1.bf16.msra.mxu0 %v13669_v55  ;;  %4978 = vmatpush1.bf16.msra.mxu1 %v13673_v56  ;;  %v411_v56 = vld [vmem:[#allocation3 + $0x708] sm:$0xff] }
  0xc4   :  { %4856 = vmatprep.subr.bf16.mxu0 %v13675_v58  ;;  %4979 = vmatprep.subr.bf16.mxu1 %v13678_v59  ;;  %v410_v59 = vld [vmem:[#allocation3 + $0x700] sm:$0xff]  ;;  %v419_v55 = vld [vmem:[#allocation3 + $0x748] sm:$0xff] }
  0xc5   :  { %v418_v58 = vld [vmem:[#allocation3 + $0x740] sm:$0xff]  ;;  %v13714_v4 = vcombine.high %v411_v56, %v419_v55  ;;  %v13721_v31 = vcombine.low %v411_v56, %v419_v55 }
  0xc6   :  { %v13711_v2 = vcombine.high %v410_v59, %v418_v58  ;;  %v13717_v30 = vcombine.low %v410_v59, %v418_v58 }
  0xc7   :  { %4857 = vmatpush1.bf16.msra.mxu0 %v13681_v13  ;;  %4980 = vmatpush1.bf16.msra.mxu1 %v13685_v15  ;;  %18329 = vst [vmem:[#allocation51_spill] sm:$0xff] %v13714_v4  ;;  %v427_v15 = vld [vmem:[#allocation3 + $0x788] sm:$0xff]  ;;  %18331 = vst [vmem:[#allocation53_spill] sm:$0xff] %v13721_v31 }
  0xc8   :  { %4858 = vmatprep.subr.bf16.mxu0 %v13687_v16  ;;  %4981 = vmatprep.subr.bf16.mxu1 %v13690_v17  ;;  %18328 = vst [vmem:[#allocation50_spill] sm:$0xff] %v13711_v2  ;;  %v426_v17 = vld [vmem:[#allocation3 + $0x780] sm:$0xff]  ;;  %v435_v13 = vld [vmem:[#allocation3 + $0x7c8] sm:$0xff]  ;;  %18330 = vst [vmem:[#allocation52_spill] sm:$0xff] %v13717_v30 }
  0xc9   :  { %v434_v16 = vld [vmem:[#allocation3 + $0x7c0] sm:$0xff]  ;;  %v13726_v33 = vcombine.high %v427_v15, %v435_v13  ;;  %v13733_v55 = vcombine.low %v427_v15, %v435_v13 }
  0xca   :  { %v13723_v32 = vcombine.high %v426_v17, %v434_v16  ;;  %v13729_v58 = vcombine.low %v426_v17, %v434_v16  ;;  %v459_v16 = vld [vmem:[#allocation3 + $0x888] sm:$0xff] }
  0xcb   :  { %4859 = vmatpush1.bf16.msra.mxu0 %v13693_v46  ;;  %4982 = vmatpush1.bf16.msra.mxu1 %v13697_v47  ;;  %18333 = vst [vmem:[#allocation55_spill] sm:$0xff] %v13726_v33  ;;  %v443_v47 = vld [vmem:[#allocation3 + $0x808] sm:$0xff]  ;;  %18335 = vst [vmem:[#allocation57_spill] sm:$0xff] %v13733_v55 }
  0xcc   :  { %4860 = vmatprep.subr.bf16.mxu0 %v13699_v48  ;;  %4983 = vmatprep.subr.bf16.mxu1 %v13702_v49  ;;  %18332 = vst [vmem:[#allocation54_spill] sm:$0xff] %v13723_v32  ;;  %v442_v49 = vld [vmem:[#allocation3 + $0x800] sm:$0xff]  ;;  %v451_v46 = vld [vmem:[#allocation3 + $0x848] sm:$0xff]  ;;  %18334 = vst [vmem:[#allocation56_spill] sm:$0xff] %v13729_v58 }
  0xcd   :  { %v450_v48 = vld [vmem:[#allocation3 + $0x840] sm:$0xff]  ;;  %v13738_v59 = vcombine.high %v443_v47, %v451_v46  ;;  %v467_v17 = vld [vmem:[#allocation3 + $0x8c8] sm:$0xff]  ;;  %v13754_v15 = vcombine.low %v443_v47, %v451_v46 }
  0xce   :  { %v13735_v56 = vcombine.high %v442_v49, %v450_v48  ;;  %v13750_v13 = vcombine.low %v442_v49, %v450_v48  ;;  %v13772_v47 = vcombine.low %v459_v16, %v467_v17 }
  0xcf   :  { %4861 = vmatpush1.bf16.msra.mxu0 %v13705_v0  ;;  %4984 = vmatpush1.bf16.msra.mxu1 %v13709_v1  ;;  %18337 = vst [vmem:[#allocation59_spill] sm:$0xff] %v13738_v59  ;;  %v13742_v1 = vcombine.low %v13609_v53, %v13609_v53  ;;  %18339 = vst [vmem:[#allocation61_spill] sm:$0xff] %v13754_v15  ;;  %v474_v53 = vld [vmem:[#allocation3 + $0x900] sm:$0xff]  ;;  %v13759_v0 = vcombine.high %v459_v16, %v467_v17 }
  0xd0   :  { %4862 = vmatprep.subr.bf16.mxu0 %v13711_v2  ;;  %4985 = vmatprep.subr.bf16.mxu1 %v13714_v4  ;;  %18336 = vst [vmem:[#allocation58_spill] sm:$0xff] %v13735_v56  ;;  %v458_v4 = vld [vmem:[#allocation3 + $0x880] sm:$0xff]  ;;  %18338 = vst [vmem:[#allocation60_spill] sm:$0xff] %v13750_v13 }
  0xd1   :  { %v466_v2 = vld [vmem:[#allocation3 + $0x8c0] sm:$0xff]  ;;  %18341 = vst [vmem:[#allocation63_spill] sm:$0xff] %v13759_v0  ;;  %18343 = vst [vmem:[#allocation65_spill] sm:$0xff] %v13772_v47 }
  0xd2   :  { %v13768_v46 = vcombine.low %v458_v4, %v466_v2  ;;  %v506_v17 = vld [vmem:[#allocation3 + $0xa00] sm:$0xff] }
  0xd3   :  { %4863 = vmatpush1.bf16.msra.mxu0 %v13717_v30  ;;  %4986 = vmatpush1.bf16.msra.mxu1 %v13721_v31  ;;  %v482_v31 = vld [vmem:[#allocation3 + $0x940] sm:$0xff]  ;;  %v475_v30 = vld [vmem:[#allocation3 + $0x908] sm:$0xff] }
  0xd4   :  { %4864 = vmatprep.subr.bf16.mxu0 %v13723_v32  ;;  %4987 = vmatprep.subr.bf16.mxu1 %v13726_v33  ;;  %v13747_v32 = vld [vmem:[%s17571_s0 + $0x8] sm:$0xff]  ;;  %v13756_v33 = vcombine.high %v458_v4, %v466_v2  ;;  %18342 = vst [vmem:[#allocation64_spill] sm:$0xff] %v13768_v46  ;;  %v13774_v49 = vcombine.high %v474_v53, %v482_v31 }
  0xd5   :  { %v13763_v48 = vcombine.high %v13747_v32, %v13747_v32  ;;  %v13782_v2 = vcombine.low %v474_v53, %v482_v31  ;;  %v13786_v4 = vcombine.low %v475_v30, %v483_v41  ;;  %v522_v53 = vld [vmem:[#allocation3 + $0xa80] sm:$0xff] }
  0xd6   :  { %18340 = vst [vmem:[#allocation62_spill] sm:$0xff] %v13756_v33  ;;  %18344 = vst [vmem:[#allocation66_spill] sm:$0xff] %v13774_v49 }
  0xd7   :  { %4865 = vmatpush1.bf16.msra.mxu0 %v13729_v58  ;;  %4988 = vmatpush1.bf16.msra.mxu1 %v13733_v55  ;;  %v491_v55 = vld [vmem:[#allocation3 + $0x988] sm:$0xff]  ;;  %v13777_v58 = vcombine.high %v475_v30, %v483_v41  ;;  %18346 = vst [vmem:[#allocation68_spill] sm:$0xff] %v13782_v2  ;;  %18347 = vst [vmem:[#allocation69_spill] sm:$0xff] %v13786_v4 }
  0xd8   :  { %4875 = vmatprep.subr.bf16.mxu0 %v13735_v56  ;;  %4998 = vmatprep.subr.bf16.mxu1 %v13738_v59  ;;  %v490_v59 = vld [vmem:[#allocation3 + $0x980] sm:$0xff] }
  0xd9   :  { %v498_v56 = vld [vmem:[#allocation3 + $0x9c0] sm:$0xff]  ;;  %18345 = vst [vmem:[#allocation67_spill] sm:$0xff] %v13777_v58 }
  0xda   :  { %4867 = vmatmul.mubr.bf16.vlgmr.msra.gmra.mrb[0].mxu0 %v13742_v1  ;;  %4990 = vmatmul.mubr.bf16.vlgmr.msra.gmra.mrb[0].mxu1 %v13742_v1  ;;  %v13788_v16 = vcombine.high %v490_v59, %v498_v56  ;;  %v13794_v31 = vcombine.low %v490_v59, %v498_v56 }
  0xdb   :  { %4876 = vmatpush1.bf16.msra.mxu0 %v13750_v13  ;;  %4999 = vmatpush1.bf16.msra.mxu1 %v13754_v15  ;;  %v499_v13 = vld [vmem:[#allocation3 + $0x9c8] sm:$0xff] }
  0xdc   :  { %4877 = vmatprep.subr.bf16.mxu0 %v13756_v33  ;;  %5000 = vmatprep.subr.bf16.mxu1 %v13759_v0  ;;  %18348 = vst [vmem:[#allocation70_spill] sm:$0xff] %v13788_v16  ;;  %v514_v0 = vld [vmem:[#allocation3 + $0xa40] sm:$0xff]  ;;  %v507_v33 = vld [vmem:[#allocation3 + $0xa08] sm:$0xff]  ;;  %v13791_v15 = vcombine.high %v491_v55, %v499_v13  ;;  %18350 = vst [vmem:[#allocation72_spill] sm:$0xff] %v13794_v31  ;;  %v13798_v41 = vcombine.low %v491_v55, %v499_v13 }
  0xdd   :  { %4907 = vmatprep.mubr.bf16.mxu0 %v13763_v48  ;;  %5030 = vmatprep.mubr.bf16.mxu1 %v13763_v48  ;;  %v13800_v30 = vcombine.high %v506_v17, %v514_v0  ;;  %v13806_v56 = vcombine.low %v506_v17, %v514_v0  ;;  %v13810_v55 = vcombine.low %v507_v33, %v515_v40  ;;  %v538_v13 = vld [vmem:[#allocation3 + $0xb00] sm:$0xff] }
  0xde   :  { %18349 = vst [vmem:[#allocation71_spill] sm:$0xff] %v13791_v15  ;;  %18351 = vst [vmem:[#allocation73_spill] sm:$0xff] %v13798_v41  ;;  %v554_v17 = vld [vmem:[#allocation3 + $0xb80] sm:$0xff] }
  0xdf   :  { %4878 = vmatpush1.bf16.msra.mxu0 %v13768_v46  ;;  %5001 = vmatpush1.bf16.msra.mxu1 %v13772_v47  ;;  %18352 = vst [vmem:[#allocation74_spill] sm:$0xff] %v13800_v30  ;;  %v523_v47 = vld [vmem:[#allocation3 + $0xa88] sm:$0xff]  ;;  %18354 = vst [vmem:[#allocation76_spill] sm:$0xff] %v13806_v56 }
  0xe0   :  { %4879 = vmatprep.subr.bf16.mxu0 %v13774_v49  ;;  %5002 = vmatprep.subr.bf16.mxu1 %v13777_v58  ;;  %v530_v49 = vld [vmem:[#allocation3 + $0xac0] sm:$0xff]  ;;  %v13803_v58 = vcombine.high %v507_v33, %v515_v40  ;;  %v531_v46 = vld [vmem:[#allocation3 + $0xac8] sm:$0xff]  ;;  %18355 = vst [vmem:[#allocation77_spill] sm:$0xff] %v13810_v55 }
  0xe1   :  { %v13812_v59 = vcombine.high %v522_v53, %v530_v49  ;;  %v13818_v0 = vcombine.low %v522_v53, %v530_v49  ;;  %v13822_v40 = vcombine.low %v523_v47, %v531_v46  ;;  %v570_v53 = vld [vmem:[#allocation3 + $0xc00] sm:$0xff] }
  0xe2   :  { %18353 = vst [vmem:[#allocation75_spill] sm:$0xff] %v13803_v58 }
  0xe3   :  { %4880 = vmatpush1.bf16.msra.mxu0 %v13782_v2  ;;  %5003 = vmatpush1.bf16.msra.mxu1 %v13786_v4  ;;  %18356 = vst [vmem:[#allocation78_spill] sm:$0xff] %v13812_v59  ;;  %v539_v4 = vld [vmem:[#allocation3 + $0xb08] sm:$0xff]  ;;  %18358 = vst [vmem:[#allocation80_spill] sm:$0xff] %v13818_v0 }
  0xe4   :  { %4881 = vmatprep.subr.bf16.mxu0 %v13788_v16  ;;  %5004 = vmatprep.subr.bf16.mxu1 %v13791_v15  ;;  %v546_v16 = vld [vmem:[#allocation3 + $0xb40] sm:$0xff]  ;;  %v13815_v15 = vcombine.high %v523_v47, %v531_v46  ;;  %v547_v2 = vld [vmem:[#allocation3 + $0xb48] sm:$0xff]  ;;  %18359 = vst [vmem:[#allocation81_spill] sm:$0xff] %v13822_v40 }
  0xe5   :  { %v13824_v33 = vcombine.high %v538_v13, %v546_v16  ;;  %v13830_v49 = vcombine.low %v538_v13, %v546_v16  ;;  %v13834_v46 = vcombine.low %v539_v4, %v547_v2  ;;  %v586_v13 = vld [vmem:[#allocation3 + $0xc80] sm:$0xff] }
  0xe6   :  { %18357 = vst [vmem:[#allocation79_spill] sm:$0xff] %v13815_v15 }
  0xe7   :  { %4882 = vmatpush1.bf16.msra.mxu0 %v13794_v31  ;;  %5005 = vmatpush1.bf16.msra.mxu1 %v13798_v41  ;;  %18360 = vst [vmem:[#allocation82_spill] sm:$0xff] %v13824_v33  ;;  %v555_v41 = vld [vmem:[#allocation3 + $0xb88] sm:$0xff]  ;;  %18362 = vst [vmem:[#allocation84_spill] sm:$0xff] %v13830_v49 }
  0xe8   :  { %4883 = vmatprep.subr.bf16.mxu0 %v13800_v30  ;;  %5006 = vmatprep.subr.bf16.mxu1 %v13803_v58  ;;  %v562_v30 = vld [vmem:[#allocation3 + $0xbc0] sm:$0xff]  ;;  %v13827_v58 = vcombine.high %v539_v4, %v547_v2  ;;  %v563_v31 = vld [vmem:[#allocation3 + $0xbc8] sm:$0xff]  ;;  %18363 = vst [vmem:[#allocation85_spill] sm:$0xff] %v13834_v46 }
  0xe9   :  { %v13836_v47 = vcombine.high %v554_v17, %v562_v30  ;;  %v13842_v16 = vcombine.low %v554_v17, %v562_v30  ;;  %v13846_v2 = vcombine.low %v555_v41, %v563_v31  ;;  %v602_v17 = vld [vmem:[#allocation3 + $0xd00] sm:$0xff] }
  0xea   :  { %18361 = vst [vmem:[#allocation83_spill] sm:$0xff] %v13827_v58 }
  0xeb   :  { %4884 = vmatpush1.bf16.msra.mxu0 %v13806_v56  ;;  %5007 = vmatpush1.bf16.msra.mxu1 %v13810_v55  ;;  %18364 = vst [vmem:[#allocation86_spill] sm:$0xff] %v13836_v47  ;;  %v571_v55 = vld [vmem:[#allocation3 + $0xc08] sm:$0xff]  ;;  %18366 = vst [vmem:[#allocation88_spill] sm:$0xff] %v13842_v16 }
  0xec   :  { %4885 = vmatprep.subr.bf16.mxu0 %v13812_v59  ;;  %5008 = vmatprep.subr.bf16.mxu1 %v13815_v15  ;;  %v578_v59 = vld [vmem:[#allocation3 + $0xc40] sm:$0xff]  ;;  %v13839_v15 = vcombine.high %v555_v41, %v563_v31  ;;  %v579_v56 = vld [vmem:[#allocation3 + $0xc48] sm:$0xff]  ;;  %18367 = vst [vmem:[#allocation89_spill] sm:$0xff] %v13846_v2 }
  0xed   :  { %v13848_v4 = vcombine.high %v570_v53, %v578_v59  ;;  %v13854_v30 = vcombine.low %v570_v53, %v578_v59  ;;  %v13858_v31 = vcombine.low %v571_v55, %v579_v56  ;;  %v618_v53 = vld [vmem:[#allocation3 + $0xd80] sm:$0xff] }
  0xee   :  { %18365 = vst [vmem:[#allocation87_spill] sm:$0xff] %v13839_v15 }
  0xef   :  { %4886 = vmatpush1.bf16.msra.mxu0 %v13818_v0  ;;  %5009 = vmatpush1.bf16.msra.mxu1 %v13822_v40  ;;  %18368 = vst [vmem:[#allocation90_spill] sm:$0xff] %v13848_v4  ;;  %v587_v40 = vld [vmem:[#allocation3 + $0xc88] sm:$0xff]  ;;  %18370 = vst [vmem:[#allocation92_spill] sm:$0xff] %v13854_v30 }
  0xf0   :  { %4887 = vmatprep.subr.bf16.mxu0 %v13824_v33  ;;  %5010 = vmatprep.subr.bf16.mxu1 %v13827_v58  ;;  %v594_v33 = vld [vmem:[#allocation3 + $0xcc0] sm:$0xff]  ;;  %v13851_v58 = vcombine.high %v571_v55, %v579_v56  ;;  %v595_v0 = vld [vmem:[#allocation3 + $0xcc8] sm:$0xff]  ;;  %18371 = vst [vmem:[#allocation93_spill] sm:$0xff] %v13858_v31 }
  0xf1   :  { %v13860_v41 = vcombine.high %v586_v13, %v594_v33  ;;  %v13866_v59 = vcombine.low %v586_v13, %v594_v33  ;;  %v13870_v56 = vcombine.low %v587_v40, %v595_v0  ;;  %v634_v13 = vld [vmem:[#allocation3 + $0xe00] sm:$0xff] }
  0xf2   :  { %18369 = vst [vmem:[#allocation91_spill] sm:$0xff] %v13851_v58 }
  0xf3   :  { %4888 = vmatpush1.bf16.msra.mxu0 %v13830_v49  ;;  %5011 = vmatpush1.bf16.msra.mxu1 %v13834_v46  ;;  %18372 = vst [vmem:[#allocation94_spill] sm:$0xff] %v13860_v41  ;;  %v603_v46 = vld [vmem:[#allocation3 + $0xd08] sm:$0xff]  ;;  %18374 = vst [vmem:[#allocation96_spill] sm:$0xff] %v13866_v59 }
  0xf4   :  { %4889 = vmatprep.subr.bf16.mxu0 %v13836_v47  ;;  %5012 = vmatprep.subr.bf16.mxu1 %v13839_v15  ;;  %v610_v47 = vld [vmem:[#allocation3 + $0xd40] sm:$0xff]  ;;  %v13863_v15 = vcombine.high %v587_v40, %v595_v0  ;;  %v611_v49 = vld [vmem:[#allocation3 + $0xd48] sm:$0xff]  ;;  %18375 = vst [vmem:[#allocation97_spill] sm:$0xff] %v13870_v56 }
  0xf5   :  { %v13872_v55 = vcombine.high %v602_v17, %v610_v47  ;;  %v13878_v33 = vcombine.low %v602_v17, %v610_v47  ;;  %v13882_v0 = vcombine.low %v603_v46, %v611_v49  ;;  %v650_v17 = vld [vmem:[#allocation3 + $0xe80] sm:$0xff] }
  0xf6   :  { %18373 = vst [vmem:[#allocation95_spill] sm:$0xff] %v13863_v15 }
  0xf7   :  { %4890 = vmatpush1.bf16.msra.mxu0 %v13842_v16  ;;  %5013 = vmatpush1.bf16.msra.mxu1 %v13846_v2  ;;  %18376 = vst [vmem:[#allocation98_spill] sm:$0xff] %v13872_v55  ;;  %v619_v2 = vld [vmem:[#allocation3 + $0xd88] sm:$0xff]  ;;  %18378 = vst [vmem:[#allocation100_spill] sm:$0xff] %v13878_v33 }
  0xf8   :  { %4891 = vmatprep.subr.bf16.mxu0 %v13848_v4  ;;  %5014 = vmatprep.subr.bf16.mxu1 %v13851_v58  ;;  %v626_v4 = vld [vmem:[#allocation3 + $0xdc0] sm:$0xff]  ;;  %v13875_v58 = vcombine.high %v603_v46, %v611_v49  ;;  %v627_v16 = vld [vmem:[#allocation3 + $0xdc8] sm:$0xff]  ;;  %18379 = vst [vmem:[#allocation101_spill] sm:$0xff] %v13882_v0 }
  0xf9   :  { %v13884_v40 = vcombine.high %v618_v53, %v626_v4  ;;  %v13890_v47 = vcombine.low %v618_v53, %v626_v4  ;;  %v13894_v49 = vcombine.low %v619_v2, %v627_v16  ;;  %v666_v53 = vld [vmem:[#allocation3 + $0xf00] sm:$0xff] }
  0xfa   :  { %18377 = vst [vmem:[#allocation99_spill] sm:$0xff] %v13875_v58 }
  0xfb   :  { %4892 = vmatpush1.bf16.msra.mxu0 %v13854_v30  ;;  %5015 = vmatpush1.bf16.msra.mxu1 %v13858_v31  ;;  %18380 = vst [vmem:[#allocation102_spill] sm:$0xff] %v13884_v40  ;;  %v635_v31 = vld [vmem:[#allocation3 + $0xe08] sm:$0xff]  ;;  %18382 = vst [vmem:[#allocation104_spill] sm:$0xff] %v13890_v47 }
  0xfc   :  { %4893 = vmatprep.subr.bf16.mxu0 %v13860_v41  ;;  %5016 = vmatprep.subr.bf16.mxu1 %v13863_v15  ;;  %v642_v41 = vld [vmem:[#allocation3 + $0xe40] sm:$0xff]  ;;  %v13887_v15 = vcombine.high %v619_v2, %v627_v16  ;;  %v643_v30 = vld [vmem:[#allocation3 + $0xe48] sm:$0xff]  ;;  %18383 = vst [vmem:[#allocation105_spill] sm:$0xff] %v13894_v49 }
  0xfd   :  { %v13896_v46 = vcombine.high %v634_v13, %v642_v41  ;;  %v13902_v4 = vcombine.low %v634_v13, %v642_v41  ;;  %v13906_v16 = vcombine.low %v635_v31, %v643_v30  ;;  %v682_v13 = vld [vmem:[#allocation3 + $0xf80] sm:$0xff] }
  0xfe   :  { %18381 = vst [vmem:[#allocation103_spill] sm:$0xff] %v13887_v15 }
  0xff   :  { %4894 = vmatpush1.bf16.msra.mxu0 %v13866_v59  ;;  %5017 = vmatpush1.bf16.msra.mxu1 %v13870_v56  ;;  %18384 = vst [vmem:[#allocation106_spill] sm:$0xff] %v13896_v46  ;;  %v651_v56 = vld [vmem:[#allocation3 + $0xe88] sm:$0xff]  ;;  %18386 = vst [vmem:[#allocation108_spill] sm:$0xff] %v13902_v4 }
 0x100   :  { %4895 = vmatprep.subr.bf16.mxu0 %v13872_v55  ;;  %5018 = vmatprep.subr.bf16.mxu1 %v13875_v58  ;;  %v658_v55 = vld [vmem:[#allocation3 + $0xec0] sm:$0xff]  ;;  %v13899_v58 = vcombine.high %v635_v31, %v643_v30  ;;  %v659_v59 = vld [vmem:[#allocation3 + $0xec8] sm:$0xff]  ;;  %18387 = vst [vmem:[#allocation109_spill] sm:$0xff] %v13906_v16 }
 0x101   :  { %v13908_v2 = vcombine.high %v650_v17, %v658_v55  ;;  %v13914_v41 = vcombine.low %v650_v17, %v658_v55  ;;  %v13918_v30 = vcombine.low %v651_v56, %v659_v59  ;;  %v698_v17 = vld [vmem:[#allocation3 + $0x1000] sm:$0xff] }
 0x102   :  { %18385 = vst [vmem:[#allocation107_spill] sm:$0xff] %v13899_v58 }
 0x103   :  { %4896 = vmatpush1.bf16.msra.mxu0 %v13878_v33  ;;  %5019 = vmatpush1.bf16.msra.mxu1 %v13882_v0  ;;  %18388 = vst [vmem:[#allocation110_spill] sm:$0xff] %v13908_v2  ;;  %v667_v0 = vld [vmem:[#allocation3 + $0xf08] sm:$0xff]  ;;  %18390 = vst [vmem:[#allocation112_spill] sm:$0xff] %v13914_v41 }
 0x104   :  { %4897 = vmatprep.subr.bf16.mxu0 %v13884_v40  ;;  %5020 = vmatprep.subr.bf16.mxu1 %v13887_v15  ;;  %v674_v40 = vld [vmem:[#allocation3 + $0xf40] sm:$0xff]  ;;  %v13911_v15 = vcombine.high %v651_v56, %v659_v59  ;;  %v675_v33 = vld [vmem:[#allocation3 + $0xf48] sm:$0xff]  ;;  %18391 = vst [vmem:[#allocation113_spill] sm:$0xff] %v13918_v30 }
 0x105   :  { %v13920_v31 = vcombine.high %v666_v53, %v674_v40  ;;  %v13926_v55 = vcombine.low %v666_v53, %v674_v40  ;;  %v13930_v59 = vcombine.low %v667_v0, %v675_v33  ;;  %v714_v53 = vld [vmem:[#allocation3 + $0x1080] sm:$0xff] }
 0x106   :  { %18389 = vst [vmem:[#allocation111_spill] sm:$0xff] %v13911_v15 }
 0x107   :  { %4898 = vmatpush1.bf16.msra.mxu0 %v13890_v47  ;;  %5021 = vmatpush1.bf16.msra.mxu1 %v13894_v49  ;;  %18392 = vst [vmem:[#allocation114_spill] sm:$0xff] %v13920_v31  ;;  %v683_v49 = vld [vmem:[#allocation3 + $0xf88] sm:$0xff]  ;;  %18394 = vst [vmem:[#allocation116_spill] sm:$0xff] %v13926_v55 }
 0x108   :  { %4899 = vmatprep.subr.bf16.mxu0 %v13896_v46  ;;  %5022 = vmatprep.subr.bf16.mxu1 %v13899_v58  ;;  %v690_v46 = vld [vmem:[#allocation3 + $0xfc0] sm:$0xff]  ;;  %v13923_v58 = vcombine.high %v667_v0, %v675_v33  ;;  %v691_v47 = vld [vmem:[#allocation3 + $0xfc8] sm:$0xff]  ;;  %18395 = vst [vmem:[#allocation117_spill] sm:$0xff] %v13930_v59 }
 0x109   :  { %v13932_v56 = vcombine.high %v682_v13, %v690_v46  ;;  %v13938_v40 = vcombine.low %v682_v13, %v690_v46  ;;  %v13942_v33 = vcombine.low %v683_v49, %v691_v47  ;;  %v13952_v46 = vld [vmem:[%s17571_s0 + $0x10] sm:$0xff]  ;;  %v13956_v13 = vcombine.low %v13747_v32, %v13747_v32  ;;  %v739_v32 = vld [vmem:[#allocation3 + $0x1148] sm:$0xff] }
 0x10a   :  { %18393 = vst [vmem:[#allocation115_spill] sm:$0xff] %v13923_v58 }
 0x10b   :  { %4900 = vmatpush1.bf16.msra.mxu0 %v13902_v4  ;;  %5023 = vmatpush1.bf16.msra.mxu1 %v13906_v16  ;;  %18396 = vst [vmem:[#allocation118_spill] sm:$0xff] %v13932_v56  ;;  %v699_v16 = vld [vmem:[#allocation3 + $0x1008] sm:$0xff]  ;;  %18398 = vst [vmem:[#allocation120_spill] sm:$0xff] %v13938_v40 }
 0x10c   :  { %4901 = vmatprep.subr.bf16.mxu0 %v13908_v2  ;;  %5024 = vmatprep.subr.bf16.mxu1 %v13911_v15  ;;  %v706_v2 = vld [vmem:[#allocation3 + $0x1040] sm:$0xff]  ;;  %v13935_v15 = vcombine.high %v683_v49, %v691_v47  ;;  %v707_v4 = vld [vmem:[#allocation3 + $0x1048] sm:$0xff]  ;;  %18399 = vst [vmem:[#allocation121_spill] sm:$0xff] %v13942_v33 }
 0x10d   :  { %v13944_v0 = vcombine.high %v698_v17, %v706_v2  ;;  %v13959_v47 = vcombine.low %v698_v17, %v706_v2  ;;  %v13963_v49 = vcombine.low %v699_v16, %v707_v4  ;;  %v13972_v2 = vcombine.high %v13952_v46, %v13952_v46 }
 0x10e   :  { %18397 = vst [vmem:[#allocation119_spill] sm:$0xff] %v13935_v15 }
 0x10f   :  { %4902 = vmatpush1.bf16.msra.mxu0 %v13914_v41  ;;  %5025 = vmatpush1.bf16.msra.mxu1 %v13918_v30  ;;  %18400 = vst [vmem:[#allocation122_spill] sm:$0xff] %v13944_v0  ;;  %v715_v30 = vld [vmem:[#allocation3 + $0x1088] sm:$0xff]  ;;  %18402 = vst [vmem:[#allocation124_spill] sm:$0xff] %v13959_v47 }
 0x110   :  { %4903 = vmatprep.subr.bf16.mxu0 %v13920_v31  ;;  %5026 = vmatprep.subr.bf16.mxu1 %v13923_v58  ;;  %v722_v31 = vld [vmem:[#allocation3 + $0x10c0] sm:$0xff]  ;;  %v723_v41 = vld [vmem:[#allocation3 + $0x10c8] sm:$0xff]  ;;  %v13947_v58 = vcombine.high %v699_v16, %v707_v4  ;;  %18403 = vst [vmem:[#allocation125_spill] sm:$0xff] %v13963_v49 }
 0x111   :  { %v13968_v39 = vcombine.high %v715_v30, %v723_v41  ;;  %v13977_v4 = vcombine.low %v714_v53, %v722_v31  ;;  %v13981_v16 = vcombine.low %v715_v30, %v723_v41 }
 0x112   :  { %18401 = vst [vmem:[#allocation123_spill] sm:$0xff] %v13947_v58 }
 0x113   :  { %4904 = vmatpush1.bf16.msra.mxu0 %v13926_v55  ;;  %5027 = vmatpush1.bf16.msra.mxu1 %v13930_v59  ;;  %v738_v59 = vld [vmem:[#allocation3 + $0x1140] sm:$0xff]  ;;  %v731_v55 = vld [vmem:[#allocation3 + $0x1108] sm:$0xff]  ;;  %18405 = vst [vmem:[#allocation127_spill] sm:$0xff] %v13968_v39  ;;  %18406 = vst [vmem:[#allocation128_spill] sm:$0xff] %v13977_v4 }
 0x114   :  { %4905 = vmatprep.subr.bf16.mxu0 %v13932_v56  ;;  %5028 = vmatprep.subr.bf16.mxu1 %v13935_v15  ;;  %v13965_v15 = vcombine.high %v714_v53, %v722_v31  ;;  %v730_v56 = vld [vmem:[#allocation3 + $0x1100] sm:$0xff]  ;;  %18407 = vst [vmem:[#allocation129_spill] sm:$0xff] %v13981_v16  ;;  %v13995_v41 = vcombine.low %v731_v55, %v739_v32 }
 0x115   :  { %v13983_v17 = vcombine.high %v730_v56, %v738_v59  ;;  %v13991_v31 = vcombine.low %v730_v56, %v738_v59  ;;  %v762_v53 = vld [vmem:[#allocation3 + $0x1200] sm:$0xff] }
 0x116   :  { %18404 = vst [vmem:[#allocation126_spill] sm:$0xff] %v13965_v15  ;;  %18411 = vst [vmem:[#allocation133_spill] sm:$0xff] %v13995_v41 }
 0x117   :  { %4906 = vmatpush1.bf16.msra.mxu0 %v13938_v40  ;;  %5029 = vmatpush1.bf16.msra.mxu1 %v13942_v33  ;;  %18408 = vst [vmem:[#allocation130_spill] sm:$0xff] %v13983_v17  ;;  %v747_v33 = vld [vmem:[#allocation3 + $0x1188] sm:$0xff]  ;;  %v13986_v40 = vcombine.high %v731_v55, %v739_v32  ;;  %18410 = vst [vmem:[#allocation132_spill] sm:$0xff] %v13991_v31  ;;  %v778_v32 = vld [vmem:[#allocation3 + $0x1280] sm:$0xff] }
 0x118   :  { %4916 = vmatprep.subr.bf16.mxu0 %v13944_v0  ;;  %5039 = vmatprep.subr.bf16.mxu1 %v13947_v58  ;;  %v746_v58 = vld [vmem:[#allocation3 + $0x1180] sm:$0xff] }
 0x119   :  { %v754_v0 = vld [vmem:[#allocation3 + $0x11c0] sm:$0xff]  ;;  %18409 = vst [vmem:[#allocation131_spill] sm:$0xff] %v13986_v40 }
 0x11a   :  { %4908 = vmatmul.mubr.bf16.vlgmr.msra.gmra.mrb[0].mxu0 %v13956_v13  ;;  %5031 = vmatmul.mubr.bf16.vlgmr.msra.gmra.mrb[0].mxu1 %v13956_v13  ;;  %v13997_v30 = vcombine.high %v746_v58, %v754_v0  ;;  %v14003_v59 = vcombine.low %v746_v58, %v754_v0 }
 0x11b   :  { %4917 = vmatpush1.bf16.msra.mxu0 %v13959_v47  ;;  %5040 = vmatpush1.bf16.msra.mxu1 %v13963_v49  ;;  %v755_v47 = vld [vmem:[#allocation3 + $0x11c8] sm:$0xff] }
 0x11c   :  { %4918 = vmatprep.subr.bf16.mxu0 %v13965_v15  ;;  %5041 = vmatprep.subr.bf16.mxu1 %v13968_v39  ;;  %18412 = vst [vmem:[#allocation134_spill] sm:$0xff] %v13997_v30  ;;  %v770_v39 = vld [vmem:[#allocation3 + $0x1240] sm:$0xff]  ;;  %v763_v15 = vld [vmem:[#allocation3 + $0x1208] sm:$0xff]  ;;  %v14000_v49 = vcombine.high %v747_v33, %v755_v47  ;;  %18414 = vst [vmem:[#allocation136_spill] sm:$0xff] %v14003_v59  ;;  %v14007_v55 = vcombine.low %v747_v33, %v755_v47 }
 0x11d   :  { %4948 = vmatprep.mubr.bf16.mxu0 %v13972_v2  ;;  %5071 = vmatprep.mubr.bf16.mxu1 %v13972_v2  ;;  %v14009_v56 = vcombine.high %v762_v53, %v770_v39  ;;  %v14015_v58 = vcombine.low %v762_v53, %v770_v39  ;;  %v14019_v33 = vcombine.low %v763_v15, %v771_v38  ;;  %v794_v47 = vld [vmem:[#allocation3 + $0x1300] sm:$0xff] }
 0x11e   :  { %18413 = vst [vmem:[#allocation135_spill] sm:$0xff] %v14000_v49  ;;  %18415 = vst [vmem:[#allocation137_spill] sm:$0xff] %v14007_v55  ;;  %v810_v53 = vld [vmem:[#allocation3 + $0x1380] sm:$0xff] }
 0x11f   :  { %4919 = vmatpush1.bf16.msra.mxu0 %v13977_v4  ;;  %5042 = vmatpush1.bf16.msra.mxu1 %v13981_v16  ;;  %18416 = vst [vmem:[#allocation138_spill] sm:$0xff] %v14009_v56  ;;  %v779_v16 = vld [vmem:[#allocation3 + $0x1288] sm:$0xff]  ;;  %18418 = vst [vmem:[#allocation140_spill] sm:$0xff] %v14015_v58 }
 0x120   :  { %4920 = vmatprep.subr.bf16.mxu0 %v13983_v17  ;;  %5043 = vmatprep.subr.bf16.mxu1 %v13986_v40  ;;  %v786_v17 = vld [vmem:[#allocation3 + $0x12c0] sm:$0xff]  ;;  %v14012_v40 = vcombine.high %v763_v15, %v771_v38  ;;  %v787_v4 = vld [vmem:[#allocation3 + $0x12c8] sm:$0xff]  ;;  %18419 = vst [vmem:[#allocation141_spill] sm:$0xff] %v14019_v33 }
 0x121   :  { %v14021_v0 = vcombine.high %v778_v32, %v786_v17  ;;  %v14027_v39 = vcombine.low %v778_v32, %v786_v17  ;;  %v14031_v38 = vcombine.low %v779_v16, %v787_v4  ;;  %v826_v32 = vld [vmem:[#allocation3 + $0x1400] sm:$0xff] }
 0x122   :  { %18417 = vst [vmem:[#allocation139_spill] sm:$0xff] %v14012_v40 }
 0x123   :  { %4921 = vmatpush1.bf16.msra.mxu0 %v13991_v31  ;;  %5044 = vmatpush1.bf16.msra.mxu1 %v13995_v41  ;;  %18420 = vst [vmem:[#allocation142_spill] sm:$0xff] %v14021_v0  ;;  %v795_v41 = vld [vmem:[#allocation3 + $0x1308] sm:$0xff]  ;;  %18422 = vst [vmem:[#allocation144_spill] sm:$0xff] %v14027_v39 }
 0x124   :  { %4922 = vmatprep.subr.bf16.mxu0 %v13997_v30  ;;  %5045 = vmatprep.subr.bf16.mxu1 %v14000_v49  ;;  %v802_v30 = vld [vmem:[#allocation3 + $0x1340] sm:$0xff]  ;;  %v14024_v49 = vcombine.high %v779_v16, %v787_v4  ;;  %v803_v31 = vld [vmem:[#allocation3 + $0x1348] sm:$0xff]  ;;  %18423 = vst [vmem:[#allocation145_spill] sm:$0xff] %v14031_v38 }
 0x125   :  { %v14033_v15 = vcombine.high %v794_v47, %v802_v30  ;;  %v14039_v17 = vcombine.low %v794_v47, %v802_v30  ;;  %v14043_v4 = vcombine.low %v795_v41, %v803_v31  ;;  %v842_v47 = vld [vmem:[#allocation3 + $0x1480] sm:$0xff] }
 0x126   :  { %18421 = vst [vmem:[#allocation143_spill] sm:$0xff] %v14024_v49 }
 0x127   :  { %4923 = vmatpush1.bf16.msra.mxu0 %v14003_v59  ;;  %5046 = vmatpush1.bf16.msra.mxu1 %v14007_v55  ;;  %18424 = vst [vmem:[#allocation146_spill] sm:$0xff] %v14033_v15  ;;  %v811_v55 = vld [vmem:[#allocation3 + $0x1388] sm:$0xff]  ;;  %18426 = vst [vmem:[#allocation148_spill] sm:$0xff] %v14039_v17 }
 0x128   :  { %4924 = vmatprep.subr.bf16.mxu0 %v14009_v56  ;;  %5047 = vmatprep.subr.bf16.mxu1 %v14012_v40  ;;  %v818_v56 = vld [vmem:[#allocation3 + $0x13c0] sm:$0xff]  ;;  %v14036_v40 = vcombine.high %v795_v41, %v803_v31  ;;  %v819_v59 = vld [vmem:[#allocation3 + $0x13c8] sm:$0xff]  ;;  %18427 = vst [vmem:[#allocation149_spill] sm:$0xff] %v14043_v4 }
 0x129   :  { %v14045_v16 = vcombine.high %v810_v53, %v818_v56  ;;  %v14051_v30 = vcombine.low %v810_v53, %v818_v56  ;;  %v14055_v31 = vcombine.low %v811_v55, %v819_v59  ;;  %v858_v53 = vld [vmem:[#allocation3 + $0x1500] sm:$0xff] }
 0x12a   :  { %18425 = vst [vmem:[#allocation147_spill] sm:$0xff] %v14036_v40 }
 0x12b   :  { %4925 = vmatpush1.bf16.msra.mxu0 %v14015_v58  ;;  %5048 = vmatpush1.bf16.msra.mxu1 %v14019_v33  ;;  %18428 = vst [vmem:[#allocation150_spill] sm:$0xff] %v14045_v16  ;;  %v827_v33 = vld [vmem:[#allocation3 + $0x1408] sm:$0xff]  ;;  %18430 = vst [vmem:[#allocation152_spill] sm:$0xff] %v14051_v30 }
 0x12c   :  { %4926 = vmatprep.subr.bf16.mxu0 %v14021_v0  ;;  %5049 = vmatprep.subr.bf16.mxu1 %v14024_v49  ;;  %v834_v0 = vld [vmem:[#allocation3 + $0x1440] sm:$0xff]  ;;  %v14048_v49 = vcombine.high %v811_v55, %v819_v59  ;;  %v835_v58 = vld [vmem:[#allocation3 + $0x1448] sm:$0xff]  ;;  %18431 = vst [vmem:[#allocation153_spill] sm:$0xff] %v14055_v31 }
 0x12d   :  { %v14057_v41 = vcombine.high %v826_v32, %v834_v0  ;;  %v14063_v56 = vcombine.low %v826_v32, %v834_v0  ;;  %v14067_v59 = vcombine.low %v827_v33, %v835_v58  ;;  %v874_v32 = vld [vmem:[#allocation3 + $0x1580] sm:$0xff] }
 0x12e   :  { %18429 = vst [vmem:[#allocation151_spill] sm:$0xff] %v14048_v49 }
 0x12f   :  { %4927 = vmatpush1.bf16.msra.mxu0 %v14027_v39  ;;  %5050 = vmatpush1.bf16.msra.mxu1 %v14031_v38  ;;  %18432 = vst [vmem:[#allocation154_spill] sm:$0xff] %v14057_v41  ;;  %v843_v38 = vld [vmem:[#allocation3 + $0x1488] sm:$0xff]  ;;  %18434 = vst [vmem:[#allocation156_spill] sm:$0xff] %v14063_v56 }
 0x130   :  { %4928 = vmatprep.subr.bf16.mxu0 %v14033_v15  ;;  %5051 = vmatprep.subr.bf16.mxu1 %v14036_v40  ;;  %v850_v15 = vld [vmem:[#allocation3 + $0x14c0] sm:$0xff]  ;;  %v14060_v40 = vcombine.high %v827_v33, %v835_v58  ;;  %v851_v39 = vld [vmem:[#allocation3 + $0x14c8] sm:$0xff]  ;;  %18435 = vst [vmem:[#allocation157_spill] sm:$0xff] %v14067_v59 }
 0x131   :  { %v14069_v55 = vcombine.high %v842_v47, %v850_v15  ;;  %v14075_v0 = vcombine.low %v842_v47, %v850_v15  ;;  %v14079_v58 = vcombine.low %v843_v38, %v851_v39  ;;  %v890_v47 = vld [vmem:[#allocation3 + $0x1600] sm:$0xff] }
 0x132   :  { %18433 = vst [vmem:[#allocation155_spill] sm:$0xff] %v14060_v40 }
 0x133   :  { %4929 = vmatpush1.bf16.msra.mxu0 %v14039_v17  ;;  %5052 = vmatpush1.bf16.msra.mxu1 %v14043_v4  ;;  %18436 = vst [vmem:[#allocation158_spill] sm:$0xff] %v14069_v55  ;;  %v859_v4 = vld [vmem:[#allocation3 + $0x1508] sm:$0xff]  ;;  %18438 = vst [vmem:[#allocation160_spill] sm:$0xff] %v14075_v0 }
 0x134   :  { %4930 = vmatprep.subr.bf16.mxu0 %v14045_v16  ;;  %5053 = vmatprep.subr.bf16.mxu1 %v14048_v49  ;;  %v866_v16 = vld [vmem:[#allocation3 + $0x1540] sm:$0xff]  ;;  %v14072_v49 = vcombine.high %v843_v38, %v851_v39  ;;  %v867_v17 = vld [vmem:[#allocation3 + $0x1548] sm:$0xff]  ;;  %18439 = vst [vmem:[#allocation161_spill] sm:$0xff] %v14079_v58 }
 0x135   :  { %v14081_v33 = vcombine.high %v858_v53, %v866_v16  ;;  %v14087_v15 = vcombine.low %v858_v53, %v866_v16  ;;  %v14091_v39 = vcombine.low %v859_v4, %v867_v17  ;;  %v906_v53 = vld [vmem:[#allocation3 + $0x1680] sm:$0xff] }
 0x136   :  { %18437 = vst [vmem:[#allocation159_spill] sm:$0xff] %v14072_v49 }
 0x137   :  { %4931 = vmatpush1.bf16.msra.mxu0 %v14051_v30  ;;  %5054 = vmatpush1.bf16.msra.mxu1 %v14055_v31  ;;  %18440 = vst [vmem:[#allocation162_spill] sm:$0xff] %v14081_v33  ;;  %v875_v31 = vld [vmem:[#allocation3 + $0x1588] sm:$0xff]  ;;  %18442 = vst [vmem:[#allocation164_spill] sm:$0xff] %v14087_v15 }
 0x138   :  { %4932 = vmatprep.subr.bf16.mxu0 %v14057_v41  ;;  %5055 = vmatprep.subr.bf16.mxu1 %v14060_v40  ;;  %v882_v41 = vld [vmem:[#allocation3 + $0x15c0] sm:$0xff]  ;;  %v14084_v40 = vcombine.high %v859_v4, %v867_v17  ;;  %v883_v30 = vld [vmem:[#allocation3 + $0x15c8] sm:$0xff]  ;;  %18443 = vst [vmem:[#allocation165_spill] sm:$0xff] %v14091_v39 }
 0x139   :  { %v14093_v38 = vcombine.high %v874_v32, %v882_v41  ;;  %v14099_v16 = vcombine.low %v874_v32, %v882_v41  ;;  %v14103_v17 = vcombine.low %v875_v31, %v883_v30  ;;  %v922_v32 = vld [vmem:[#allocation3 + $0x1700] sm:$0xff] }
 0x13a   :  { %18441 = vst [vmem:[#allocation163_spill] sm:$0xff] %v14084_v40 }
 0x13b   :  { %4933 = vmatpush1.bf16.msra.mxu0 %v14063_v56  ;;  %5056 = vmatpush1.bf16.msra.mxu1 %v14067_v59  ;;  %18444 = vst [vmem:[#allocation166_spill] sm:$0xff] %v14093_v38  ;;  %v891_v59 = vld [vmem:[#allocation3 + $0x1608] sm:$0xff]  ;;  %18446 = vst [vmem:[#allocation168_spill] sm:$0xff] %v14099_v16 }
 0x13c   :  { %4934 = vmatprep.subr.bf16.mxu0 %v14069_v55  ;;  %5057 = vmatprep.subr.bf16.mxu1 %v14072_v49  ;;  %v898_v55 = vld [vmem:[#allocation3 + $0x1640] sm:$0xff]  ;;  %v14096_v49 = vcombine.high %v875_v31, %v883_v30  ;;  %v899_v56 = vld [vmem:[#allocation3 + $0x1648] sm:$0xff]  ;;  %18447 = vst [vmem:[#allocation169_spill] sm:$0xff] %v14103_v17 }
 0x13d   :  { %v14105_v4 = vcombine.high %v890_v47, %v898_v55  ;;  %v14111_v41 = vcombine.low %v890_v47, %v898_v55  ;;  %v14115_v30 = vcombine.low %v891_v59, %v899_v56  ;;  %v938_v47 = vld [vmem:[#allocation3 + $0x1780] sm:$0xff] }
 0x13e   :  { %18445 = vst [vmem:[#allocation167_spill] sm:$0xff] %v14096_v49 }
 0x13f   :  { %4935 = vmatpush1.bf16.msra.mxu0 %v14075_v0  ;;  %5058 = vmatpush1.bf16.msra.mxu1 %v14079_v58  ;;  %18448 = vst [vmem:[#allocation170_spill] sm:$0xff] %v14105_v4  ;;  %v907_v58 = vld [vmem:[#allocation3 + $0x1688] sm:$0xff]  ;;  %18450 = vst [vmem:[#allocation172_spill] sm:$0xff] %v14111_v41 }
 0x140   :  { %4936 = vmatprep.subr.bf16.mxu0 %v14081_v33  ;;  %5059 = vmatprep.subr.bf16.mxu1 %v14084_v40  ;;  %v914_v33 = vld [vmem:[#allocation3 + $0x16c0] sm:$0xff]  ;;  %v14108_v40 = vcombine.high %v891_v59, %v899_v56  ;;  %v915_v0 = vld [vmem:[#allocation3 + $0x16c8] sm:$0xff]  ;;  %18451 = vst [vmem:[#allocation173_spill] sm:$0xff] %v14115_v30 }
 0x141   :  { %v14117_v31 = vcombine.high %v906_v53, %v914_v33  ;;  %v14123_v55 = vcombine.low %v906_v53, %v914_v33  ;;  %v14127_v56 = vcombine.low %v907_v58, %v915_v0  ;;  %v188_v53 = vld [vmem:[#allocation3 + $0x10] sm:$0xff] }
 0x142   :  { %18449 = vst [vmem:[#allocation171_spill] sm:$0xff] %v14108_v40 }
 0x143   :  { %4937 = vmatpush1.bf16.msra.mxu0 %v14087_v15  ;;  %5060 = vmatpush1.bf16.msra.mxu1 %v14091_v39  ;;  %18452 = vst [vmem:[#allocation174_spill] sm:$0xff] %v14117_v31  ;;  %v923_v39 = vld [vmem:[#allocation3 + $0x1708] sm:$0xff]  ;;  %18454 = vst [vmem:[#allocation176_spill] sm:$0xff] %v14123_v55 }
 0x144   :  { %4938 = vmatprep.subr.bf16.mxu0 %v14093_v38  ;;  %5061 = vmatprep.subr.bf16.mxu1 %v14096_v49  ;;  %v930_v38 = vld [vmem:[#allocation3 + $0x1740] sm:$0xff]  ;;  %v14120_v49 = vcombine.high %v907_v58, %v915_v0  ;;  %v931_v15 = vld [vmem:[#allocation3 + $0x1748] sm:$0xff]  ;;  %18455 = vst [vmem:[#allocation177_spill] sm:$0xff] %v14127_v56 }
 0x145   :  { %v14129_v59 = vcombine.high %v922_v32, %v930_v38  ;;  %v14135_v33 = vcombine.low %v922_v32, %v930_v38  ;;  %v14139_v0 = vcombine.low %v923_v39, %v931_v15  ;;  %v204_v32 = vld [vmem:[#allocation3 + $0x90] sm:$0xff] }
 0x146   :  { %18453 = vst [vmem:[#allocation175_spill] sm:$0xff] %v14120_v49 }
 0x147   :  { %4939 = vmatpush1.bf16.msra.mxu0 %v14099_v16  ;;  %5062 = vmatpush1.bf16.msra.mxu1 %v14103_v17  ;;  %18456 = vst [vmem:[#allocation178_spill] sm:$0xff] %v14129_v59  ;;  %v939_v17 = vld [vmem:[#allocation3 + $0x1788] sm:$0xff]  ;;  %18458 = vst [vmem:[#allocation180_spill] sm:$0xff] %v14135_v33 }
 0x148   :  { %4940 = vmatprep.subr.bf16.mxu0 %v14105_v4  ;;  %5063 = vmatprep.subr.bf16.mxu1 %v14108_v40  ;;  %v946_v4 = vld [vmem:[#allocation3 + $0x17c0] sm:$0xff]  ;;  %v14132_v40 = vcombine.high %v923_v39, %v931_v15  ;;  %v947_v16 = vld [vmem:[#allocation3 + $0x17c8] sm:$0xff]  ;;  %18459 = vst [vmem:[#allocation181_spill] sm:$0xff] %v14139_v0 }
 0x149   :  { %v14141_v58 = vcombine.high %v938_v47, %v946_v4  ;;  %v14147_v38 = vcombine.low %v938_v47, %v946_v4  ;;  %v14151_v15 = vcombine.low %v939_v17, %v947_v16  ;;  %v14160_v4 = vcombine.low %v13952_v46, %v13952_v46  ;;  %v229_v46 = vld [vmem:[#allocation3 + $0x158] sm:$0xff] }
 0x14a   :  { %18457 = vst [vmem:[#allocation179_spill] sm:$0xff] %v14132_v40 }
 0x14b   :  { %4941 = vmatpush1.bf16.msra.mxu0 %v14111_v41  ;;  %5064 = vmatpush1.bf16.msra.mxu1 %v14115_v30  ;;  %18460 = vst [vmem:[#allocation182_spill] sm:$0xff] %v14141_v58  ;;  %v189_v30 = vld [vmem:[#allocation3 + $0x18] sm:$0xff]  ;;  %18462 = vst [vmem:[#allocation184_spill] sm:$0xff] %v14147_v38 }
 0x14c   :  { %4942 = vmatprep.subr.bf16.mxu0 %v14117_v31  ;;  %5065 = vmatprep.subr.bf16.mxu1 %v14120_v49  ;;  %v196_v31 = vld [vmem:[#allocation3 + $0x50] sm:$0xff]  ;;  %v14144_v49 = vcombine.high %v939_v17, %v947_v16  ;;  %v197_v41 = vld [vmem:[#allocation3 + $0x58] sm:$0xff]  ;;  %18463 = vst [vmem:[#allocation185_spill] sm:$0xff] %v14151_v15 }
 0x14d   :  { %v14153_v39 = vcombine.high %v188_v53, %v196_v31  ;;  %v14163_v47 = vcombine.low %v188_v53, %v196_v31  ;;  %v14167_v16 = vcombine.low %v189_v30, %v197_v41  ;;  %v236_v53 = vld [vmem:[#allocation3 + $0x190] sm:$0xff] }
 0x14e   :  { %18461 = vst [vmem:[#allocation183_spill] sm:$0xff] %v14144_v49 }
 0x14f   :  { %4943 = vmatpush1.bf16.msra.mxu0 %v14123_v55  ;;  %5066 = vmatpush1.bf16.msra.mxu1 %v14127_v56  ;;  %18464 = vst [vmem:[#allocation186_spill] sm:$0xff] %v14153_v39  ;;  %v205_v56 = vld [vmem:[#allocation3 + $0x98] sm:$0xff]  ;;  %18466 = vst [vmem:[#allocation188_spill] sm:$0xff] %v14163_v47 }
 0x150   :  { %4944 = vmatprep.subr.bf16.mxu0 %v14129_v59  ;;  %5067 = vmatprep.subr.bf16.mxu1 %v14132_v40  ;;  %v212_v59 = vld [vmem:[#allocation3 + $0xd0] sm:$0xff]  ;;  %v14156_v40 = vcombine.high %v189_v30, %v197_v41  ;;  %v213_v55 = vld [vmem:[#allocation3 + $0xd8] sm:$0xff]  ;;  %18467 = vst [vmem:[#allocation189_spill] sm:$0xff] %v14167_v16 }
 0x151   :  { %v14169_v17 = vcombine.high %v204_v32, %v212_v59  ;;  %v14177_v31 = vcombine.low %v204_v32, %v212_v59  ;;  %v14181_v41 = vcombine.low %v205_v56, %v213_v55  ;;  %v252_v32 = vld [vmem:[#allocation3 + $0x210] sm:$0xff] }
 0x152   :  { %18465 = vst [vmem:[#allocation187_spill] sm:$0xff] %v14156_v40 }
 0x153   :  { %4945 = vmatpush1.bf16.msra.mxu0 %v14135_v33  ;;  %5068 = vmatpush1.bf16.msra.mxu1 %v14139_v0  ;;  %18468 = vst [vmem:[#allocation190_spill] sm:$0xff] %v14169_v17  ;;  %v221_v0 = vld [vmem:[#allocation3 + $0x118] sm:$0xff]  ;;  %v14172_v33 = vcombine.high %v205_v56, %v213_v55  ;;  %18470 = vst [vmem:[#allocation192_spill] sm:$0xff] %v14177_v31 }
 0x154   :  { %4946 = vmatprep.subr.bf16.mxu0 %v14141_v58  ;;  %5069 = vmatprep.subr.bf16.mxu1 %v14144_v49  ;;  %v220_v49 = vld [vmem:[#allocation3 + $0x110] sm:$0xff]  ;;  %18471 = vst [vmem:[#allocation193_spill] sm:$0xff] %v14181_v41  ;;  %v14195_v55 = vcombine.low %v221_v0, %v229_v46 }
 0x155   :  { %v228_v58 = vld [vmem:[#allocation3 + $0x150] sm:$0xff]  ;;  %18469 = vst [vmem:[#allocation191_spill] sm:$0xff] %v14172_v33 }
 0x156   :  { %v14183_v30 = vcombine.high %v220_v49, %v228_v58  ;;  %v14191_v59 = vcombine.low %v220_v49, %v228_v58  ;;  %18475 = vst [vmem:[#allocation197_spill] sm:$0xff] %v14195_v55 }
 0x157   :  { %4947 = vmatpush1.bf16.msra.mxu0 %v14147_v38  ;;  %5070 = vmatpush1.bf16.msra.mxu1 %v14151_v15  ;;  %v14186_v15 = vcombine.high %v221_v0, %v229_v46  ;;  %v245_v38 = vld [vmem:[#allocation3 + $0x1d8] sm:$0xff]  ;;  %v268_v46 = vld [vmem:[#allocation3 + $0x290] sm:$0xff] }
 0x158   :  { %5080 = vmatprep.subr.bf16.mxu0 %v14153_v39  ;;  %5203 = vmatprep.subr.bf16.mxu1 %v14156_v40  ;;  %18472 = vst [vmem:[#allocation194_spill] sm:$0xff] %v14183_v30  ;;  %v244_v40 = vld [vmem:[#allocation3 + $0x1d0] sm:$0xff]  ;;  %v237_v39 = vld [vmem:[#allocation3 + $0x198] sm:$0xff]  ;;  %18474 = vst [vmem:[#allocation196_spill] sm:$0xff] %v14191_v59 }
 0x159   :  { %18473 = vst [vmem:[#allocation195_spill] sm:$0xff] %v14186_v15  ;;  %v14197_v56 = vcombine.high %v236_v53, %v244_v40  ;;  %v14203_v49 = vcombine.low %v236_v53, %v244_v40  ;;  %v14207_v0 = vcombine.low %v237_v39, %v245_v38  ;;  %v284_v53 = vld [vmem:[#allocation3 + $0x310] sm:$0xff] }
 0x15a   :  { %4949 = vmatmul.mubr.bf16.vlgmr.msra.gmra.mrb[0].mxu0 %v14160_v4  ;;  %5072 = vmatmul.mubr.bf16.vlgmr.msra.gmra.mrb[0].mxu1 %v14160_v4 }
 0x15b   :  { %5081 = vmatpush1.bf16.msra.mxu0 %v14163_v47  ;;  %5204 = vmatpush1.bf16.msra.mxu1 %v14167_v16  ;;  %18476 = vst [vmem:[#allocation198_spill] sm:$0xff] %v14197_v56  ;;  %v14200_v16 = vcombine.high %v237_v39, %v245_v38  ;;  %v261_v47 = vld [vmem:[#allocation3 + $0x258] sm:$0xff]  ;;  %18478 = vst [vmem:[#allocation200_spill] sm:$0xff] %v14203_v49 }
 0x15c   :  { %5082 = vmatprep.subr.bf16.mxu0 %v14169_v17  ;;  %5205 = vmatprep.subr.bf16.mxu1 %v14172_v33  ;;  %v260_v33 = vld [vmem:[#allocation3 + $0x250] sm:$0xff]  ;;  %v253_v17 = vld [vmem:[#allocation3 + $0x218] sm:$0xff]  ;;  %18479 = vst [vmem:[#allocation201_spill] sm:$0xff] %v14207_v0 }
 0x15d   :  { %5112 = vmatprep.mubr.bf16.mxu0 %v13616_v57  ;;  %5235 = vmatprep.mubr.bf16.mxu1 %v13616_v57  ;;  %18477 = vst [vmem:[#allocation199_spill] sm:$0xff] %v14200_v16  ;;  %v14209_v58 = vcombine.high %v252_v32, %v260_v33  ;;  %v14215_v40 = vcombine.low %v252_v32, %v260_v33  ;;  %v300_v32 = vld [vmem:[#allocation3 + $0x390] sm:$0xff] }
 0x15e   :  { %v14219_v38 = vcombine.low %v253_v17, %v261_v47 }
 0x15f   :  { %5083 = vmatpush1.bf16.msra.mxu0 %v14177_v31  ;;  %5206 = vmatpush1.bf16.msra.mxu1 %v14181_v41  ;;  %18480 = vst [vmem:[#allocation202_spill] sm:$0xff] %v14209_v58  ;;  %v269_v41 = vld [vmem:[#allocation3 + $0x298] sm:$0xff]  ;;  %18482 = vst [vmem:[#allocation204_spill] sm:$0xff] %v14215_v40 }
 0x160   :  { %5084 = vmatprep.subr.bf16.mxu0 %v14183_v30  ;;  %5207 = vmatprep.subr.bf16.mxu1 %v14186_v15  ;;  %v276_v30 = vld [vmem:[#allocation3 + $0x2d0] sm:$0xff]  ;;  %v14212_v15 = vcombine.high %v253_v17, %v261_v47  ;;  %v277_v31 = vld [vmem:[#allocation3 + $0x2d8] sm:$0xff]  ;;  %18483 = vst [vmem:[#allocation205_spill] sm:$0xff] %v14219_v38 }
 0x161   :  { %v14221_v39 = vcombine.high %v268_v46, %v276_v30  ;;  %v14227_v33 = vcombine.low %v268_v46, %v276_v30  ;;  %v14231_v47 = vcombine.low %v269_v41, %v277_v31  ;;  %v316_v46 = vld [vmem:[#allocation3 + $0x410] sm:$0xff] }
 0x162   :  { %18481 = vst [vmem:[#allocation203_spill] sm:$0xff] %v14212_v15 }
 0x163   :  { %5085 = vmatpush1.bf16.msra.mxu0 %v14191_v59  ;;  %5208 = vmatpush1.bf16.msra.mxu1 %v14195_v55  ;;  %18484 = vst [vmem:[#allocation206_spill] sm:$0xff] %v14221_v39  ;;  %v285_v55 = vld [vmem:[#allocation3 + $0x318] sm:$0xff]  ;;  %18486 = vst [vmem:[#allocation208_spill] sm:$0xff] %v14227_v33 }
 0x164   :  { %5086 = vmatprep.subr.bf16.mxu0 %v14197_v56  ;;  %5209 = vmatprep.subr.bf16.mxu1 %v14200_v16  ;;  %v292_v56 = vld [vmem:[#allocation3 + $0x350] sm:$0xff]  ;;  %v14224_v16 = vcombine.high %v269_v41, %v277_v31  ;;  %v293_v59 = vld [vmem:[#allocation3 + $0x358] sm:$0xff]  ;;  %18487 = vst [vmem:[#allocation209_spill] sm:$0xff] %v14231_v47 }
 0x165   :  { %v14233_v17 = vcombine.high %v284_v53, %v292_v56  ;;  %v14239_v30 = vcombine.low %v284_v53, %v292_v56  ;;  %v14243_v31 = vcombine.low %v285_v55, %v293_v59  ;;  %v332_v53 = vld [vmem:[#allocation3 + $0x490] sm:$0xff] }
 0x166   :  { %18485 = vst [vmem:[#allocation207_spill] sm:$0xff] %v14224_v16 }
 0x167   :  { %5087 = vmatpush1.bf16.msra.mxu0 %v14203_v49  ;;  %5210 = vmatpush1.bf16.msra.mxu1 %v14207_v0  ;;  %18488 = vst [vmem:[#allocation210_spill] sm:$0xff] %v14233_v17  ;;  %v301_v0 = vld [vmem:[#allocation3 + $0x398] sm:$0xff]  ;;  %18490 = vst [vmem:[#allocation212_spill] sm:$0xff] %v14239_v30 }
 0x168   :  { %5088 = vmatprep.subr.bf16.mxu0 %v14209_v58  ;;  %5211 = vmatprep.subr.bf16.mxu1 %v14212_v15  ;;  %v308_v58 = vld [vmem:[#allocation3 + $0x3d0] sm:$0xff]  ;;  %v14236_v15 = vcombine.high %v285_v55, %v293_v59  ;;  %v309_v49 = vld [vmem:[#allocation3 + $0x3d8] sm:$0xff]  ;;  %18491 = vst [vmem:[#allocation213_spill] sm:$0xff] %v14243_v31 }
 0x169   :  { %v14245_v41 = vcombine.high %v300_v32, %v308_v58  ;;  %v14251_v56 = vcombine.low %v300_v32, %v308_v58  ;;  %v14255_v59 = vcombine.low %v301_v0, %v309_v49  ;;  %v348_v32 = vld [vmem:[#allocation3 + $0x510] sm:$0xff] }
 0x16a   :  { %18489 = vst [vmem:[#allocation211_spill] sm:$0xff] %v14236_v15 }
 0x16b   :  { %5089 = vmatpush1.bf16.msra.mxu0 %v14215_v40  ;;  %5212 = vmatpush1.bf16.msra.mxu1 %v14219_v38  ;;  %18492 = vst [vmem:[#allocation214_spill] sm:$0xff] %v14245_v41  ;;  %v317_v38 = vld [vmem:[#allocation3 + $0x418] sm:$0xff]  ;;  %18494 = vst [vmem:[#allocation216_spill] sm:$0xff] %v14251_v56 }
 0x16c   :  { %5090 = vmatprep.subr.bf16.mxu0 %v14221_v39  ;;  %5213 = vmatprep.subr.bf16.mxu1 %v14224_v16  ;;  %v324_v39 = vld [vmem:[#allocation3 + $0x450] sm:$0xff]  ;;  %v14248_v16 = vcombine.high %v301_v0, %v309_v49  ;;  %v325_v40 = vld [vmem:[#allocation3 + $0x458] sm:$0xff]  ;;  %18495 = vst [vmem:[#allocation217_spill] sm:$0xff] %v14255_v59 }
 0x16d   :  { %v14257_v55 = vcombine.high %v316_v46, %v324_v39  ;;  %v14263_v58 = vcombine.low %v316_v46, %v324_v39  ;;  %v14267_v49 = vcombine.low %v317_v38, %v325_v40  ;;  %v364_v46 = vld [vmem:[#allocation3 + $0x590] sm:$0xff] }
 0x16e   :  { %18493 = vst [vmem:[#allocation215_spill] sm:$0xff] %v14248_v16 }
 0x16f   :  { %5091 = vmatpush1.bf16.msra.mxu0 %v14227_v33  ;;  %5214 = vmatpush1.bf16.msra.mxu1 %v14231_v47  ;;  %18496 = vst [vmem:[#allocation218_spill] sm:$0xff] %v14257_v55  ;;  %v333_v47 = vld [vmem:[#allocation3 + $0x498] sm:$0xff]  ;;  %18498 = vst [vmem:[#allocation220_spill] sm:$0xff] %v14263_v58 }
 0x170   :  { %5092 = vmatprep.subr.bf16.mxu0 %v14233_v17  ;;  %5215 = vmatprep.subr.bf16.mxu1 %v14236_v15  ;;  %v340_v17 = vld [vmem:[#allocation3 + $0x4d0] sm:$0xff]  ;;  %v14260_v15 = vcombine.high %v317_v38, %v325_v40  ;;  %v341_v33 = vld [vmem:[#allocation3 + $0x4d8] sm:$0xff]  ;;  %18499 = vst [vmem:[#allocation221_spill] sm:$0xff] %v14267_v49 }
 0x171   :  { %v14269_v0 = vcombine.high %v332_v53, %v340_v17  ;;  %v14275_v39 = vcombine.low %v332_v53, %v340_v17  ;;  %v14279_v40 = vcombine.low %v333_v47, %v341_v33  ;;  %v380_v53 = vld [vmem:[#allocation3 + $0x610] sm:$0xff] }
 0x172   :  { %18497 = vst [vmem:[#allocation219_spill] sm:$0xff] %v14260_v15 }
 0x173   :  { %5093 = vmatpush1.bf16.msra.mxu0 %v14239_v30  ;;  %5216 = vmatpush1.bf16.msra.mxu1 %v14243_v31  ;;  %18500 = vst [vmem:[#allocation222_spill] sm:$0xff] %v14269_v0  ;;  %v349_v31 = vld [vmem:[#allocation3 + $0x518] sm:$0xff]  ;;  %18502 = vst [vmem:[#allocation224_spill] sm:$0xff] %v14275_v39 }
 0x174   :  { %5094 = vmatprep.subr.bf16.mxu0 %v14245_v41  ;;  %5217 = vmatprep.subr.bf16.mxu1 %v14248_v16  ;;  %v356_v41 = vld [vmem:[#allocation3 + $0x550] sm:$0xff]  ;;  %v14272_v16 = vcombine.high %v333_v47, %v341_v33  ;;  %v357_v30 = vld [vmem:[#allocation3 + $0x558] sm:$0xff]  ;;  %18503 = vst [vmem:[#allocation225_spill] sm:$0xff] %v14279_v40 }
 0x175   :  { %v14281_v38 = vcombine.high %v348_v32, %v356_v41  ;;  %v14287_v17 = vcombine.low %v348_v32, %v356_v41  ;;  %v14291_v33 = vcombine.low %v349_v31, %v357_v30  ;;  %v396_v32 = vld [vmem:[#allocation3 + $0x690] sm:$0xff] }
 0x176   :  { %18501 = vst [vmem:[#allocation223_spill] sm:$0xff] %v14272_v16 }
 0x177   :  { %5095 = vmatpush1.bf16.msra.mxu0 %v14251_v56  ;;  %5218 = vmatpush1.bf16.msra.mxu1 %v14255_v59  ;;  %18504 = vst [vmem:[#allocation226_spill] sm:$0xff] %v14281_v38  ;;  %v365_v59 = vld [vmem:[#allocation3 + $0x598] sm:$0xff]  ;;  %18506 = vst [vmem:[#allocation228_spill] sm:$0xff] %v14287_v17 }
 0x178   :  { %5096 = vmatprep.subr.bf16.mxu0 %v14257_v55  ;;  %5219 = vmatprep.subr.bf16.mxu1 %v14260_v15  ;;  %v372_v55 = vld [vmem:[#allocation3 + $0x5d0] sm:$0xff]  ;;  %v14284_v15 = vcombine.high %v349_v31, %v357_v30  ;;  %v373_v56 = vld [vmem:[#allocation3 + $0x5d8] sm:$0xff]  ;;  %18507 = vst [vmem:[#allocation229_spill] sm:$0xff] %v14291_v33 }
 0x179   :  { %v14293_v47 = vcombine.high %v364_v46, %v372_v55  ;;  %v14299_v41 = vcombine.low %v364_v46, %v372_v55  ;;  %v14303_v30 = vcombine.low %v365_v59, %v373_v56  ;;  %v412_v46 = vld [vmem:[#allocation3 + $0x710] sm:$0xff] }
 0x17a   :  { %18505 = vst [vmem:[#allocation227_spill] sm:$0xff] %v14284_v15 }
 0x17b   :  { %5097 = vmatpush1.bf16.msra.mxu0 %v14263_v58  ;;  %5220 = vmatpush1.bf16.msra.mxu1 %v14267_v49  ;;  %18508 = vst [vmem:[#allocation230_spill] sm:$0xff] %v14293_v47  ;;  %v381_v49 = vld [vmem:[#allocation3 + $0x618] sm:$0xff]  ;;  %18510 = vst [vmem:[#allocation232_spill] sm:$0xff] %v14299_v41 }
 0x17c   :  { %5098 = vmatprep.subr.bf16.mxu0 %v14269_v0  ;;  %5221 = vmatprep.subr.bf16.mxu1 %v14272_v16  ;;  %v388_v0 = vld [vmem:[#allocation3 + $0x650] sm:$0xff]  ;;  %v14296_v16 = vcombine.high %v365_v59, %v373_v56  ;;  %v389_v58 = vld [vmem:[#allocation3 + $0x658] sm:$0xff]  ;;  %18511 = vst [vmem:[#allocation233_spill] sm:$0xff] %v14303_v30 }
 0x17d   :  { %v14305_v31 = vcombine.high %v380_v53, %v388_v0  ;;  %v14311_v55 = vcombine.low %v380_v53, %v388_v0  ;;  %v14315_v56 = vcombine.low %v381_v49, %v389_v58  ;;  %v428_v53 = vld [vmem:[#allocation3 + $0x790] sm:$0xff] }
 0x17e   :  { %18509 = vst [vmem:[#allocation231_spill] sm:$0xff] %v14296_v16 }
 0x17f   :  { %5099 = vmatpush1.bf16.msra.mxu0 %v14275_v39  ;;  %5222 = vmatpush1.bf16.msra.mxu1 %v14279_v40  ;;  %18512 = vst [vmem:[#allocation234_spill] sm:$0xff] %v14305_v31  ;;  %v397_v40 = vld [vmem:[#allocation3 + $0x698] sm:$0xff]  ;;  %18514 = vst [vmem:[#allocation236_spill] sm:$0xff] %v14311_v55 }
 0x180   :  { %5100 = vmatprep.subr.bf16.mxu0 %v14281_v38  ;;  %5223 = vmatprep.subr.bf16.mxu1 %v14284_v15  ;;  %v404_v38 = vld [vmem:[#allocation3 + $0x6d0] sm:$0xff]  ;;  %v14308_v15 = vcombine.high %v381_v49, %v389_v58  ;;  %v405_v39 = vld [vmem:[#allocation3 + $0x6d8] sm:$0xff]  ;;  %18515 = vst [vmem:[#allocation237_spill] sm:$0xff] %v14315_v56 }
 0x181   :  { %v14317_v59 = vcombine.high %v396_v32, %v404_v38  ;;  %v14323_v0 = vcombine.low %v396_v32, %v404_v38  ;;  %v14327_v58 = vcombine.low %v397_v40, %v405_v39  ;;  %v444_v32 = vld [vmem:[#allocation3 + $0x810] sm:$0xff] }
 0x182   :  { %18513 = vst [vmem:[#allocation235_spill] sm:$0xff] %v14308_v15 }
 0x183   :  { %5101 = vmatpush1.bf16.msra.mxu0 %v14287_v17  ;;  %5224 = vmatpush1.bf16.msra.mxu1 %v14291_v33  ;;  %18516 = vst [vmem:[#allocation238_spill] sm:$0xff] %v14317_v59  ;;  %v413_v33 = vld [vmem:[#allocation3 + $0x718] sm:$0xff]  ;;  %18518 = vst [vmem:[#allocation240_spill] sm:$0xff] %v14323_v0 }
 0x184   :  { %5102 = vmatprep.subr.bf16.mxu0 %v14293_v47  ;;  %5225 = vmatprep.subr.bf16.mxu1 %v14296_v16  ;;  %v420_v47 = vld [vmem:[#allocation3 + $0x750] sm:$0xff]  ;;  %v14320_v16 = vcombine.high %v397_v40, %v405_v39  ;;  %v421_v17 = vld [vmem:[#allocation3 + $0x758] sm:$0xff]  ;;  %18519 = vst [vmem:[#allocation241_spill] sm:$0xff] %v14327_v58 }
 0x185   :  { %v14329_v49 = vcombine.high %v412_v46, %v420_v47  ;;  %v14335_v38 = vcombine.low %v412_v46, %v420_v47  ;;  %v14339_v39 = vcombine.low %v413_v33, %v421_v17  ;;  %v460_v46 = vld [vmem:[#allocation3 + $0x890] sm:$0xff] }
 0x186   :  { %18517 = vst [vmem:[#allocation239_spill] sm:$0xff] %v14320_v16 }
 0x187   :  { %5103 = vmatpush1.bf16.msra.mxu0 %v14299_v41  ;;  %5226 = vmatpush1.bf16.msra.mxu1 %v14303_v30  ;;  %18520 = vst [vmem:[#allocation242_spill] sm:$0xff] %v14329_v49  ;;  %v429_v30 = vld [vmem:[#allocation3 + $0x798] sm:$0xff]  ;;  %18522 = vst [vmem:[#allocation244_spill] sm:$0xff] %v14335_v38 }
 0x188   :  { %5104 = vmatprep.subr.bf16.mxu0 %v14305_v31  ;;  %5227 = vmatprep.subr.bf16.mxu1 %v14308_v15  ;;  %v436_v31 = vld [vmem:[#allocation3 + $0x7d0] sm:$0xff]  ;;  %v14332_v15 = vcombine.high %v413_v33, %v421_v17  ;;  %v437_v41 = vld [vmem:[#allocation3 + $0x7d8] sm:$0xff]  ;;  %18523 = vst [vmem:[#allocation245_spill] sm:$0xff] %v14339_v39 }
 0x189   :  { %v14341_v40 = vcombine.high %v428_v53, %v436_v31  ;;  %v14347_v47 = vcombine.low %v428_v53, %v436_v31  ;;  %v14351_v17 = vcombine.low %v429_v30, %v437_v41  ;;  %v476_v53 = vld [vmem:[#allocation3 + $0x910] sm:$0xff] }
 0x18a   :  { %18521 = vst [vmem:[#allocation243_spill] sm:$0xff] %v14332_v15 }
 0x18b   :  { %5105 = vmatpush1.bf16.msra.mxu0 %v14311_v55  ;;  %5228 = vmatpush1.bf16.msra.mxu1 %v14315_v56  ;;  %18524 = vst [vmem:[#allocation246_spill] sm:$0xff] %v14341_v40  ;;  %v445_v56 = vld [vmem:[#allocation3 + $0x818] sm:$0xff]  ;;  %18526 = vst [vmem:[#allocation248_spill] sm:$0xff] %v14347_v47 }
 0x18c   :  { %5106 = vmatprep.subr.bf16.mxu0 %v14317_v59  ;;  %5229 = vmatprep.subr.bf16.mxu1 %v14320_v16  ;;  %v452_v59 = vld [vmem:[#allocation3 + $0x850] sm:$0xff]  ;;  %v14344_v16 = vcombine.high %v429_v30, %v437_v41  ;;  %v453_v55 = vld [vmem:[#allocation3 + $0x858] sm:$0xff]  ;;  %18527 = vst [vmem:[#allocation249_spill] sm:$0xff] %v14351_v17 }
 0x18d   :  { %v14353_v33 = vcombine.high %v444_v32, %v452_v59  ;;  %v14359_v31 = vcombine.low %v444_v32, %v452_v59  ;;  %v14363_v41 = vcombine.low %v445_v56, %v453_v55  ;;  %v492_v32 = vld [vmem:[#allocation3 + $0x990] sm:$0xff] }
 0x18e   :  { %18525 = vst [vmem:[#allocation247_spill] sm:$0xff] %v14344_v16 }
 0x18f   :  { %5107 = vmatpush1.bf16.msra.mxu0 %v14323_v0  ;;  %5230 = vmatpush1.bf16.msra.mxu1 %v14327_v58  ;;  %18528 = vst [vmem:[#allocation250_spill] sm:$0xff] %v14353_v33  ;;  %v461_v58 = vld [vmem:[#allocation3 + $0x898] sm:$0xff]  ;;  %18530 = vst [vmem:[#allocation252_spill] sm:$0xff] %v14359_v31 }
 0x190   :  { %5108 = vmatprep.subr.bf16.mxu0 %v14329_v49  ;;  %5231 = vmatprep.subr.bf16.mxu1 %v14332_v15  ;;  %v468_v49 = vld [vmem:[#allocation3 + $0x8d0] sm:$0xff]  ;;  %v14356_v15 = vcombine.high %v445_v56, %v453_v55  ;;  %v469_v0 = vld [vmem:[#allocation3 + $0x8d8] sm:$0xff]  ;;  %18531 = vst [vmem:[#allocation253_spill] sm:$0xff] %v14363_v41 }
 0x191   :  { %v14365_v30 = vcombine.high %v460_v46, %v468_v49  ;;  %v14373_v59 = vcombine.low %v460_v46, %v468_v49  ;;  %v14377_v55 = vcombine.low %v461_v58, %v469_v0  ;;  %v508_v46 = vld [vmem:[#allocation3 + $0xa10] sm:$0xff] }
 0x192   :  { %18529 = vst [vmem:[#allocation251_spill] sm:$0xff] %v14356_v15 }
 0x193   :  { %5109 = vmatpush1.bf16.msra.mxu0 %v14335_v38  ;;  %5232 = vmatpush1.bf16.msra.mxu1 %v14339_v39  ;;  %18532 = vst [vmem:[#allocation254_spill] sm:$0xff] %v14365_v30  ;;  %v477_v39 = vld [vmem:[#allocation3 + $0x918] sm:$0xff]  ;;  %18534 = vst [vmem:[#allocation256_spill] sm:$0xff] %v14373_v59 }
 0x194   :  { %5110 = vmatprep.subr.bf16.mxu0 %v14341_v40  ;;  %5233 = vmatprep.subr.bf16.mxu1 %v14344_v16  ;;  %v484_v40 = vld [vmem:[#allocation3 + $0x950] sm:$0xff]  ;;  %v14368_v16 = vcombine.high %v461_v58, %v469_v0  ;;  %v485_v38 = vld [vmem:[#allocation3 + $0x958] sm:$0xff]  ;;  %18535 = vst [vmem:[#allocation257_spill] sm:$0xff] %v14377_v55 }
 0x195   :  { %v14379_v56 = vcombine.high %v476_v53, %v484_v40  ;;  %v14387_v49 = vcombine.low %v476_v53, %v484_v40  ;;  %v14391_v0 = vcombine.low %v477_v39, %v485_v38  ;;  %v524_v53 = vld [vmem:[#allocation3 + $0xa90] sm:$0xff] }
 0x196   :  { %18533 = vst [vmem:[#allocation255_spill] sm:$0xff] %v14368_v16 }
 0x197   :  { %5111 = vmatpush1.bf16.msra.mxu0 %v14347_v47  ;;  %5234 = vmatpush1.bf16.msra.mxu1 %v14351_v17  ;;  %18536 = vst [vmem:[#allocation258_spill] sm:$0xff] %v14379_v56  ;;  %v14382_v17 = vcombine.high %v477_v39, %v485_v38  ;;  %18538 = vst [vmem:[#allocation260_spill] sm:$0xff] %v14387_v49  ;;  %v517_v47 = vld [vmem:[#allocation3 + $0xa58] sm:$0xff] }
 0x198   :  { %5121 = vmatprep.subr.bf16.mxu0 %v14353_v33  ;;  %5244 = vmatprep.subr.bf16.mxu1 %v14356_v15  ;;  %v500_v15 = vld [vmem:[#allocation3 + $0x9d0] sm:$0xff]  ;;  %v493_v33 = vld [vmem:[#allocation3 + $0x998] sm:$0xff]  ;;  %18539 = vst [vmem:[#allocation261_spill] sm:$0xff] %v14391_v0 }
 0x199   :  { %18537 = vst [vmem:[#allocation259_spill] sm:$0xff] %v14382_v17  ;;  %v14393_v58 = vcombine.high %v492_v32, %v500_v15  ;;  %v14399_v40 = vcombine.low %v492_v32, %v500_v15  ;;  %v540_v32 = vld [vmem:[#allocation3 + $0xb10] sm:$0xff] }
 0x19a   :  { %5113 = vmatmul.mubr.bf16.vlgmr.msra.gmra.mrb[4].mxu0 %v13742_v1  ;;  %5236 = vmatmul.mubr.bf16.vlgmr.msra.gmra.mrb[4].mxu1 %v13742_v1 }
 0x19b   :  { %5122 = vmatpush1.bf16.msra.mxu0 %v14359_v31  ;;  %5245 = vmatpush1.bf16.msra.mxu1 %v14363_v41  ;;  %v501_v31 = vld [vmem:[#allocation3 + $0x9d8] sm:$0xff]  ;;  %18540 = vst [vmem:[#allocation262_spill] sm:$0xff] %v14393_v58  ;;  %18542 = vst [vmem:[#allocation264_spill] sm:$0xff] %v14399_v40 }
 0x19c   :  { %5123 = vmatprep.subr.bf16.mxu0 %v14365_v30  ;;  %5246 = vmatprep.subr.bf16.mxu1 %v14368_v16  ;;  %v516_v16 = vld [vmem:[#allocation3 + $0xa50] sm:$0xff]  ;;  %v509_v30 = vld [vmem:[#allocation3 + $0xa18] sm:$0xff]  ;;  %v14396_v41 = vcombine.high %v493_v33, %v501_v31  ;;  %v14403_v38 = vcombine.low %v493_v33, %v501_v31 }
 0x19d   :  { %5153 = vmatprep.mubr.bf16.mxu0 %v13763_v48  ;;  %5276 = vmatprep.mubr.bf16.mxu1 %v13763_v48  ;;  %v14405_v39 = vcombine.high %v508_v46, %v516_v16  ;;  %v14411_v15 = vcombine.low %v508_v46, %v516_v16  ;;  %v14415_v33 = vcombine.low %v509_v30, %v517_v47  ;;  %v556_v46 = vld [vmem:[#allocation3 + $0xb90] sm:$0xff] }
 0x19e   :  { %18541 = vst [vmem:[#allocation263_spill] sm:$0xff] %v14396_v41  ;;  %18543 = vst [vmem:[#allocation265_spill] sm:$0xff] %v14403_v38 }
 0x19f   :  { %5124 = vmatpush1.bf16.msra.mxu0 %v14373_v59  ;;  %5247 = vmatpush1.bf16.msra.mxu1 %v14377_v55  ;;  %18544 = vst [vmem:[#allocation266_spill] sm:$0xff] %v14405_v39  ;;  %v525_v55 = vld [vmem:[#allocation3 + $0xa98] sm:$0xff]  ;;  %18546 = vst [vmem:[#allocation268_spill] sm:$0xff] %v14411_v15 }
 0x1a0   :  { %5125 = vmatprep.subr.bf16.mxu0 %v14379_v56  ;;  %5248 = vmatprep.subr.bf16.mxu1 %v14382_v17  ;;  %v532_v56 = vld [vmem:[#allocation3 + $0xad0] sm:$0xff]  ;;  %v14408_v17 = vcombine.high %v509_v30, %v517_v47  ;;  %v533_v59 = vld [vmem:[#allocation3 + $0xad8] sm:$0xff]  ;;  %18547 = vst [vmem:[#allocation269_spill] sm:$0xff] %v14415_v33 }
 0x1a1   :  { %v14417_v31 = vcombine.high %v524_v53, %v532_v56  ;;  %v14423_v16 = vcombine.low %v524_v53, %v532_v56  ;;  %v14427_v47 = vcombine.low %v525_v55, %v533_v59  ;;  %v572_v53 = vld [vmem:[#allocation3 + $0xc10] sm:$0xff] }
 0x1a2   :  { %18545 = vst [vmem:[#allocation267_spill] sm:$0xff] %v14408_v17 }
 0x1a3   :  { %5126 = vmatpush1.bf16.msra.mxu0 %v14387_v49  ;;  %5249 = vmatpush1.bf16.msra.mxu1 %v14391_v0  ;;  %18548 = vst [vmem:[#allocation270_spill] sm:$0xff] %v14417_v31  ;;  %v541_v0 = vld [vmem:[#allocation3 + $0xb18] sm:$0xff]  ;;  %18550 = vst [vmem:[#allocation272_spill] sm:$0xff] %v14423_v16 }
 0x1a4   :  { %5127 = vmatprep.subr.bf16.mxu0 %v14393_v58  ;;  %5250 = vmatprep.subr.bf16.mxu1 %v14396_v41  ;;  %v548_v58 = vld [vmem:[#allocation3 + $0xb50] sm:$0xff]  ;;  %v14420_v41 = vcombine.high %v525_v55, %v533_v59  ;;  %v549_v49 = vld [vmem:[#allocation3 + $0xb58] sm:$0xff]  ;;  %18551 = vst [vmem:[#allocation273_spill] sm:$0xff] %v14427_v47 }
 0x1a5   :  { %v14429_v30 = vcombine.high %v540_v32, %v548_v58  ;;  %v14435_v56 = vcombine.low %v540_v32, %v548_v58  ;;  %v14439_v59 = vcombine.low %v541_v0, %v549_v49  ;;  %v588_v32 = vld [vmem:[#allocation3 + $0xc90] sm:$0xff] }
 0x1a6   :  { %18549 = vst [vmem:[#allocation271_spill] sm:$0xff] %v14420_v41 }
 0x1a7   :  { %5128 = vmatpush1.bf16.msra.mxu0 %v14399_v40  ;;  %5251 = vmatpush1.bf16.msra.mxu1 %v14403_v38  ;;  %18552 = vst [vmem:[#allocation274_spill] sm:$0xff] %v14429_v30  ;;  %v557_v38 = vld [vmem:[#allocation3 + $0xb98] sm:$0xff]  ;;  %18554 = vst [vmem:[#allocation276_spill] sm:$0xff] %v14435_v56 }
 0x1a8   :  { %5129 = vmatprep.subr.bf16.mxu0 %v14405_v39  ;;  %5252 = vmatprep.subr.bf16.mxu1 %v14408_v17  ;;  %v564_v39 = vld [vmem:[#allocation3 + $0xbd0] sm:$0xff]  ;;  %v14432_v17 = vcombine.high %v541_v0, %v549_v49  ;;  %v565_v40 = vld [vmem:[#allocation3 + $0xbd8] sm:$0xff]  ;;  %18555 = vst [vmem:[#allocation277_spill] sm:$0xff] %v14439_v59 }
 0x1a9   :  { %v14441_v55 = vcombine.high %v556_v46, %v564_v39  ;;  %v14447_v58 = vcombine.low %v556_v46, %v564_v39  ;;  %v14451_v49 = vcombine.low %v557_v38, %v565_v40  ;;  %v604_v46 = vld [vmem:[#allocation3 + $0xd10] sm:$0xff] }
 0x1aa   :  { %18553 = vst [vmem:[#allocation275_spill] sm:$0xff] %v14432_v17 }
 0x1ab   :  { %5130 = vmatpush1.bf16.msra.mxu0 %v14411_v15  ;;  %5253 = vmatpush1.bf16.msra.mxu1 %v14415_v33  ;;  %18556 = vst [vmem:[#allocation278_spill] sm:$0xff] %v14441_v55  ;;  %v573_v33 = vld [vmem:[#allocation3 + $0xc18] sm:$0xff]  ;;  %18558 = vst [vmem:[#allocation280_spill] sm:$0xff] %v14447_v58 }
 0x1ac   :  { %5131 = vmatprep.subr.bf16.mxu0 %v14417_v31  ;;  %5254 = vmatprep.subr.bf16.mxu1 %v14420_v41  ;;  %v580_v31 = vld [vmem:[#allocation3 + $0xc50] sm:$0xff]  ;;  %v14444_v41 = vcombine.high %v557_v38, %v565_v40  ;;  %v581_v15 = vld [vmem:[#allocation3 + $0xc58] sm:$0xff]  ;;  %18559 = vst [vmem:[#allocation281_spill] sm:$0xff] %v14451_v49 }
 0x1ad   :  { %v14453_v0 = vcombine.high %v572_v53, %v580_v31  ;;  %v14459_v39 = vcombine.low %v572_v53, %v580_v31  ;;  %v14463_v40 = vcombine.low %v573_v33, %v581_v15  ;;  %v620_v53 = vld [vmem:[#allocation3 + $0xd90] sm:$0xff] }
 0x1ae   :  { %18557 = vst [vmem:[#allocation279_spill] sm:$0xff] %v14444_v41 }
 0x1af   :  { %5132 = vmatpush1.bf16.msra.mxu0 %v14423_v16  ;;  %5255 = vmatpush1.bf16.msra.mxu1 %v14427_v47  ;;  %18560 = vst [vmem:[#allocation282_spill] sm:$0xff] %v14453_v0  ;;  %v589_v47 = vld [vmem:[#allocation3 + $0xc98] sm:$0xff]  ;;  %18562 = vst [vmem:[#allocation284_spill] sm:$0xff] %v14459_v39 }
 0x1b0   :  { %5133 = vmatprep.subr.bf16.mxu0 %v14429_v30  ;;  %5256 = vmatprep.subr.bf16.mxu1 %v14432_v17  ;;  %v596_v30 = vld [vmem:[#allocation3 + $0xcd0] sm:$0xff]  ;;  %v14456_v17 = vcombine.high %v573_v33, %v581_v15  ;;  %v597_v16 = vld [vmem:[#allocation3 + $0xcd8] sm:$0xff]  ;;  %18563 = vst [vmem:[#allocation285_spill] sm:$0xff] %v14463_v40 }
 0x1b1   :  { %v14465_v38 = vcombine.high %v588_v32, %v596_v30  ;;  %v14471_v31 = vcombine.low %v588_v32, %v596_v30  ;;  %v14475_v15 = vcombine.low %v589_v47, %v597_v16  ;;  %v636_v32 = vld [vmem:[#allocation3 + $0xe10] sm:$0xff] }
 0x1b2   :  { %18561 = vst [vmem:[#allocation283_spill] sm:$0xff] %v14456_v17 }
 0x1b3   :  { %5134 = vmatpush1.bf16.msra.mxu0 %v14435_v56  ;;  %5257 = vmatpush1.bf16.msra.mxu1 %v14439_v59  ;;  %18564 = vst [vmem:[#allocation286_spill] sm:$0xff] %v14465_v38  ;;  %v605_v59 = vld [vmem:[#allocation3 + $0xd18] sm:$0xff]  ;;  %18566 = vst [vmem:[#allocation288_spill] sm:$0xff] %v14471_v31 }
 0x1b4   :  { %5135 = vmatprep.subr.bf16.mxu0 %v14441_v55  ;;  %5258 = vmatprep.subr.bf16.mxu1 %v14444_v41  ;;  %v612_v55 = vld [vmem:[#allocation3 + $0xd50] sm:$0xff]  ;;  %v14468_v41 = vcombine.high %v589_v47, %v597_v16  ;;  %v613_v56 = vld [vmem:[#allocation3 + $0xd58] sm:$0xff]  ;;  %18567 = vst [vmem:[#allocation289_spill] sm:$0xff] %v14475_v15 }
 0x1b5   :  { %v14477_v33 = vcombine.high %v604_v46, %v612_v55  ;;  %v14483_v30 = vcombine.low %v604_v46, %v612_v55  ;;  %v14487_v16 = vcombine.low %v605_v59, %v613_v56  ;;  %v652_v46 = vld [vmem:[#allocation3 + $0xe90] sm:$0xff] }
 0x1b6   :  { %18565 = vst [vmem:[#allocation287_spill] sm:$0xff] %v14468_v41 }
 0x1b7   :  { %5136 = vmatpush1.bf16.msra.mxu0 %v14447_v58  ;;  %5259 = vmatpush1.bf16.msra.mxu1 %v14451_v49  ;;  %18568 = vst [vmem:[#allocation290_spill] sm:$0xff] %v14477_v33  ;;  %v621_v49 = vld [vmem:[#allocation3 + $0xd98] sm:$0xff]  ;;  %18570 = vst [vmem:[#allocation292_spill] sm:$0xff] %v14483_v30 }
 0x1b8   :  { %5137 = vmatprep.subr.bf16.mxu0 %v14453_v0  ;;  %5260 = vmatprep.subr.bf16.mxu1 %v14456_v17  ;;  %v628_v0 = vld [vmem:[#allocation3 + $0xdd0] sm:$0xff]  ;;  %v14480_v17 = vcombine.high %v605_v59, %v613_v56  ;;  %v629_v58 = vld [vmem:[#allocation3 + $0xdd8] sm:$0xff]  ;;  %18571 = vst [vmem:[#allocation293_spill] sm:$0xff] %v14487_v16 }
 0x1b9   :  { %v14489_v47 = vcombine.high %v620_v53, %v628_v0  ;;  %v14495_v55 = vcombine.low %v620_v53, %v628_v0  ;;  %v14499_v56 = vcombine.low %v621_v49, %v629_v58  ;;  %v668_v53 = vld [vmem:[#allocation3 + $0xf10] sm:$0xff] }
 0x1ba   :  { %18569 = vst [vmem:[#allocation291_spill] sm:$0xff] %v14480_v17 }
 0x1bb   :  { %5138 = vmatpush1.bf16.msra.mxu0 %v14459_v39  ;;  %5261 = vmatpush1.bf16.msra.mxu1 %v14463_v40  ;;  %18572 = vst [vmem:[#allocation294_spill] sm:$0xff] %v14489_v47  ;;  %v637_v40 = vld [vmem:[#allocation3 + $0xe18] sm:$0xff]  ;;  %18574 = vst [vmem:[#allocation296_spill] sm:$0xff] %v14495_v55 }
 0x1bc   :  { %5139 = vmatprep.subr.bf16.mxu0 %v14465_v38  ;;  %5262 = vmatprep.subr.bf16.mxu1 %v14468_v41  ;;  %v644_v38 = vld [vmem:[#allocation3 + $0xe50] sm:$0xff]  ;;  %v14492_v41 = vcombine.high %v621_v49, %v629_v58  ;;  %v645_v39 = vld [vmem:[#allocation3 + $0xe58] sm:$0xff]  ;;  %18575 = vst [vmem:[#allocation297_spill] sm:$0xff] %v14499_v56 }
 0x1bd   :  { %v14501_v59 = vcombine.high %v636_v32, %v644_v38  ;;  %v14507_v0 = vcombine.low %v636_v32, %v644_v38  ;;  %v14511_v58 = vcombine.low %v637_v40, %v645_v39  ;;  %v684_v32 = vld [vmem:[#allocation3 + $0xf90] sm:$0xff] }
 0x1be   :  { %18573 = vst [vmem:[#allocation295_spill] sm:$0xff] %v14492_v41 }
 0x1bf   :  { %5140 = vmatpush1.bf16.msra.mxu0 %v14471_v31  ;;  %5263 = vmatpush1.bf16.msra.mxu1 %v14475_v15  ;;  %18576 = vst [vmem:[#allocation298_spill] sm:$0xff] %v14501_v59  ;;  %v653_v15 = vld [vmem:[#allocation3 + $0xe98] sm:$0xff]  ;;  %18578 = vst [vmem:[#allocation300_spill] sm:$0xff] %v14507_v0 }
 0x1c0   :  { %5141 = vmatprep.subr.bf16.mxu0 %v14477_v33  ;;  %5264 = vmatprep.subr.bf16.mxu1 %v14480_v17  ;;  %v660_v33 = vld [vmem:[#allocation3 + $0xed0] sm:$0xff]  ;;  %v14504_v17 = vcombine.high %v637_v40, %v645_v39  ;;  %v661_v31 = vld [vmem:[#allocation3 + $0xed8] sm:$0xff]  ;;  %18579 = vst [vmem:[#allocation301_spill] sm:$0xff] %v14511_v58 }
 0x1c1   :  { %v14513_v49 = vcombine.high %v652_v46, %v660_v33  ;;  %v14519_v38 = vcombine.low %v652_v46, %v660_v33  ;;  %v14523_v39 = vcombine.low %v653_v15, %v661_v31  ;;  %v700_v46 = vld [vmem:[#allocation3 + $0x1010] sm:$0xff] }
 0x1c2   :  { %18577 = vst [vmem:[#allocation299_spill] sm:$0xff] %v14504_v17 }
 0x1c3   :  { %5142 = vmatpush1.bf16.msra.mxu0 %v14483_v30  ;;  %5265 = vmatpush1.bf16.msra.mxu1 %v14487_v16  ;;  %18580 = vst [vmem:[#allocation302_spill] sm:$0xff] %v14513_v49  ;;  %v669_v16 = vld [vmem:[#allocation3 + $0xf18] sm:$0xff]  ;;  %18582 = vst [vmem:[#allocation304_spill] sm:$0xff] %v14519_v38 }
 0x1c4   :  { %5143 = vmatprep.subr.bf16.mxu0 %v14489_v47  ;;  %5266 = vmatprep.subr.bf16.mxu1 %v14492_v41  ;;  %v676_v47 = vld [vmem:[#allocation3 + $0xf50] sm:$0xff]  ;;  %v14516_v41 = vcombine.high %v653_v15, %v661_v31  ;;  %v677_v30 = vld [vmem:[#allocation3 + $0xf58] sm:$0xff]  ;;  %18583 = vst [vmem:[#allocation305_spill] sm:$0xff] %v14523_v39 }
 0x1c5   :  { %v14525_v40 = vcombine.high %v668_v53, %v676_v47  ;;  %v14531_v33 = vcombine.low %v668_v53, %v676_v47  ;;  %v14535_v31 = vcombine.low %v669_v16, %v677_v30  ;;  %v716_v53 = vld [vmem:[#allocation3 + $0x1090] sm:$0xff] }
 0x1c6   :  { %18581 = vst [vmem:[#allocation303_spill] sm:$0xff] %v14516_v41 }
 0x1c7   :  { %5144 = vmatpush1.bf16.msra.mxu0 %v14495_v55  ;;  %5267 = vmatpush1.bf16.msra.mxu1 %v14499_v56  ;;  %18584 = vst [vmem:[#allocation306_spill] sm:$0xff] %v14525_v40  ;;  %v685_v56 = vld [vmem:[#allocation3 + $0xf98] sm:$0xff]  ;;  %18586 = vst [vmem:[#allocation308_spill] sm:$0xff] %v14531_v33 }
 0x1c8   :  { %5145 = vmatprep.subr.bf16.mxu0 %v14501_v59  ;;  %5268 = vmatprep.subr.bf16.mxu1 %v14504_v17  ;;  %v692_v59 = vld [vmem:[#allocation3 + $0xfd0] sm:$0xff]  ;;  %v14528_v17 = vcombine.high %v669_v16, %v677_v30  ;;  %v693_v55 = vld [vmem:[#allocation3 + $0xfd8] sm:$0xff]  ;;  %18587 = vst [vmem:[#allocation309_spill] sm:$0xff] %v14535_v31 }
 0x1c9   :  { %v14537_v15 = vcombine.high %v684_v32, %v692_v59  ;;  %v14543_v47 = vcombine.low %v684_v32, %v692_v59  ;;  %v14547_v30 = vcombine.low %v685_v56, %v693_v55 }
 0x1ca   :  { %18585 = vst [vmem:[#allocation307_spill] sm:$0xff] %v14528_v17 }
 0x1cb   :  { %5146 = vmatpush1.bf16.msra.mxu0 %v14507_v0  ;;  %5269 = vmatpush1.bf16.msra.mxu1 %v14511_v58  ;;  %18588 = vst [vmem:[#allocation310_spill] sm:$0xff] %v14537_v15  ;;  %v701_v58 = vld [vmem:[#allocation3 + $0x1018] sm:$0xff]  ;;  %18590 = vst [vmem:[#allocation312_spill] sm:$0xff] %v14543_v47 }
 0x1cc   :  { %5147 = vmatprep.subr.bf16.mxu0 %v14513_v49  ;;  %5270 = vmatprep.subr.bf16.mxu1 %v14516_v41  ;;  %v708_v49 = vld [vmem:[#allocation3 + $0x1050] sm:$0xff]  ;;  %v14540_v41 = vcombine.high %v685_v56, %v693_v55  ;;  %v709_v0 = vld [vmem:[#allocation3 + $0x1058] sm:$0xff]  ;;  %18591 = vst [vmem:[#allocation313_spill] sm:$0xff] %v14547_v30 }
 0x1cd   :  { %v14549_v16 = vcombine.high %v700_v46, %v708_v49  ;;  %v14555_v59 = vcombine.low %v700_v46, %v708_v49  ;;  %v14559_v55 = vcombine.low %v701_v58, %v709_v0 }
 0x1ce   :  { %18589 = vst [vmem:[#allocation311_spill] sm:$0xff] %v14540_v41 }
 0x1cf   :  { %5148 = vmatpush1.bf16.msra.mxu0 %v14519_v38  ;;  %5271 = vmatpush1.bf16.msra.mxu1 %v14523_v39  ;;  %18592 = vst [vmem:[#allocation314_spill] sm:$0xff] %v14549_v16  ;;  %v717_v39 = vld [vmem:[#allocation3 + $0x1098] sm:$0xff]  ;;  %18594 = vst [vmem:[#allocation316_spill] sm:$0xff] %v14555_v59 }
 0x1d0   :  { %5149 = vmatprep.subr.bf16.mxu0 %v14525_v40  ;;  %5272 = vmatprep.subr.bf16.mxu1 %v14528_v17  ;;  %v724_v40 = vld [vmem:[#allocation3 + $0x10d0] sm:$0xff]  ;;  %v14552_v17 = vcombine.high %v701_v58, %v709_v0  ;;  %v725_v38 = vld [vmem:[#allocation3 + $0x10d8] sm:$0xff]  ;;  %18595 = vst [vmem:[#allocation317_spill] sm:$0xff] %v14559_v55 }
 0x1d1   :  { %v14561_v56 = vcombine.high %v716_v53, %v724_v40  ;;  %v14564_v32 = vcombine.high %v717_v39, %v725_v38  ;;  %v14569_v49 = vcombine.low %v716_v53, %v724_v40  ;;  %v14573_v0 = vcombine.low %v717_v39, %v725_v38 }
 0x1d2   :  { %18593 = vst [vmem:[#allocation315_spill] sm:$0xff] %v14552_v17 }
 0x1d3   :  { %5150 = vmatpush1.bf16.msra.mxu0 %v14531_v33  ;;  %5273 = vmatpush1.bf16.msra.mxu1 %v14535_v31  ;;  %18596 = vst [vmem:[#allocation318_spill] sm:$0xff] %v14561_v56  ;;  %18597 = vst [vmem:[#allocation319_spill] sm:$0xff] %v14564_v32  ;;  %v733_v31 = vld [vmem:[#allocation3 + $0x1118] sm:$0xff] }
 0x1d4   :  { %5151 = vmatprep.subr.bf16.mxu0 %v14537_v15  ;;  %5274 = vmatprep.subr.bf16.mxu1 %v14540_v41  ;;  %v732_v41 = vld [vmem:[#allocation3 + $0x1110] sm:$0xff]  ;;  %18598 = vst [vmem:[#allocation320_spill] sm:$0xff] %v14569_v49  ;;  %18599 = vst [vmem:[#allocation321_spill] sm:$0xff] %v14573_v0  ;;  %v773_v33 = vld [vmem:[#allocation3 + $0x1258] sm:$0xff] }
 0x1d5   :  { %v740_v15 = vld [vmem:[#allocation3 + $0x1150] sm:$0xff] }
 0x1d6   :  { %v14575_v58 = vcombine.high %v732_v41, %v740_v15  ;;  %v14583_v40 = vcombine.low %v732_v41, %v740_v15 }
 0x1d7   :  { %5152 = vmatpush1.bf16.msra.mxu0 %v14543_v47  ;;  %5275 = vmatpush1.bf16.msra.mxu1 %v14547_v30  ;;  %v741_v47 = vld [vmem:[#allocation3 + $0x1158] sm:$0xff] }
 0x1d8   :  { %5162 = vmatprep.subr.bf16.mxu0 %v14549_v16  ;;  %5285 = vmatprep.subr.bf16.mxu1 %v14552_v17  ;;  %18600 = vst [vmem:[#allocation322_spill] sm:$0xff] %v14575_v58  ;;  %v14578_v46 = vcombine.high %v733_v31, %v741_v47  ;;  %v748_v17 = vld [vmem:[#allocation3 + $0x1190] sm:$0xff]  ;;  %v757_v30 = vld [vmem:[#allocation3 + $0x11d8] sm:$0xff]  ;;  %18602 = vst [vmem:[#allocation324_spill] sm:$0xff] %v14583_v40  ;;  %v14587_v38 = vcombine.low %v733_v31, %v741_v47 }
 0x1d9   :  { %v756_v16 = vld [vmem:[#allocation3 + $0x11d0] sm:$0xff] }
 0x1da   :  { %5154 = vmatmul.mubr.bf16.vlgmr.msra.gmra.mrb[4].mxu0 %v13956_v13  ;;  %5277 = vmatmul.mubr.bf16.vlgmr.msra.gmra.mrb[4].mxu1 %v13956_v13  ;;  %18601 = vst [vmem:[#allocation323_spill] sm:$0xff] %v14578_v46  ;;  %18603 = vst [vmem:[#allocation325_spill] sm:$0xff] %v14587_v38  ;;  %v14589_v39 = vcombine.high %v748_v17, %v756_v16  ;;  %v14595_v41 = vcombine.low %v748_v17, %v756_v16 }
 0x1db   :  { %5163 = vmatpush1.bf16.msra.mxu0 %v14555_v59  ;;  %5286 = vmatpush1.bf16.msra.mxu1 %v14559_v55  ;;  %v749_v59 = vld [vmem:[#allocation3 + $0x1198] sm:$0xff] }
 0x1dc   :  { %5164 = vmatprep.subr.bf16.mxu0 %v14561_v56  ;;  %5287 = vmatprep.subr.bf16.mxu1 %v14564_v32  ;;  %18604 = vst [vmem:[#allocation326_spill] sm:$0xff] %v14589_v39  ;;  %v14592_v53 = vcombine.high %v749_v59, %v757_v30  ;;  %v764_v32 = vld [vmem:[#allocation3 + $0x1210] sm:$0xff]  ;;  %v765_v55 = vld [vmem:[#allocation3 + $0x1218] sm:$0xff]  ;;  %18606 = vst [vmem:[#allocation328_spill] sm:$0xff] %v14595_v41  ;;  %v14599_v31 = vcombine.low %v749_v59, %v757_v30 }
 0x1dd   :  { %5194 = vmatprep.mubr.bf16.mxu0 %v13972_v2  ;;  %5317 = vmatprep.mubr.bf16.mxu1 %v13972_v2  ;;  %v772_v56 = vld [vmem:[#allocation3 + $0x1250] sm:$0xff]  ;;  %v14604_v47 = vcombine.high %v765_v55, %v773_v33  ;;  %v14611_v30 = vcombine.low %v765_v55, %v773_v33 }
 0x1de   :  { %18605 = vst [vmem:[#allocation327_spill] sm:$0xff] %v14592_v53  ;;  %18607 = vst [vmem:[#allocation329_spill] sm:$0xff] %v14599_v31  ;;  %v14601_v15 = vcombine.high %v764_v32, %v772_v56  ;;  %v14607_v17 = vcombine.low %v764_v32, %v772_v56 }
 0x1df   :  { %5165 = vmatpush1.bf16.msra.mxu0 %v14569_v49  ;;  %5288 = vmatpush1.bf16.msra.mxu1 %v14573_v0  ;;  %18609 = vst [vmem:[#allocation331_spill] sm:$0xff] %v14604_v47  ;;  %v781_v0 = vld [vmem:[#allocation3 + $0x1298] sm:$0xff]  ;;  %18611 = vst [vmem:[#allocation333_spill] sm:$0xff] %v14611_v30 }
 0x1e0   :  { %5166 = vmatprep.subr.bf16.mxu0 %v14575_v58  ;;  %5289 = vmatprep.subr.bf16.mxu1 %v14578_v46  ;;  %18608 = vst [vmem:[#allocation330_spill] sm:$0xff] %v14601_v15  ;;  %v780_v46 = vld [vmem:[#allocation3 + $0x1290] sm:$0xff]  ;;  %v789_v49 = vld [vmem:[#allocation3 + $0x12d8] sm:$0xff]  ;;  %18610 = vst [vmem:[#allocation332_spill] sm:$0xff] %v14607_v17 }
 0x1e1   :  { %v788_v58 = vld [vmem:[#allocation3 + $0x12d0] sm:$0xff]  ;;  %v14616_v59 = vcombine.high %v781_v0, %v789_v49  ;;  %v14623_v33 = vcombine.low %v781_v0, %v789_v49 }
 0x1e2   :  { %v14613_v16 = vcombine.high %v780_v46, %v788_v58  ;;  %v14619_v56 = vcombine.low %v780_v46, %v788_v58 }
 0x1e3   :  { %5167 = vmatpush1.bf16.msra.mxu0 %v14583_v40  ;;  %5290 = vmatpush1.bf16.msra.mxu1 %v14587_v38  ;;  %18613 = vst [vmem:[#allocation335_spill] sm:$0xff] %v14616_v59  ;;  %v797_v38 = vld [vmem:[#allocation3 + $0x1318] sm:$0xff]  ;;  %18615 = vst [vmem:[#allocation337_spill] sm:$0xff] %v14623_v33 }
 0x1e4   :  { %5168 = vmatprep.subr.bf16.mxu0 %v14589_v39  ;;  %5291 = vmatprep.subr.bf16.mxu1 %v14592_v53  ;;  %18612 = vst [vmem:[#allocation334_spill] sm:$0xff] %v14613_v16  ;;  %v796_v53 = vld [vmem:[#allocation3 + $0x1310] sm:$0xff]  ;;  %v805_v40 = vld [vmem:[#allocation3 + $0x1358] sm:$0xff]  ;;  %18614 = vst [vmem:[#allocation336_spill] sm:$0xff] %v14619_v56 }
 0x1e5   :  { %v804_v39 = vld [vmem:[#allocation3 + $0x1350] sm:$0xff]  ;;  %v14628_v32 = vcombine.high %v797_v38, %v805_v40  ;;  %v14635_v49 = vcombine.low %v797_v38, %v805_v40 }
 0x1e6   :  { %v14625_v55 = vcombine.high %v796_v53, %v804_v39  ;;  %v14631_v58 = vcombine.low %v796_v53, %v804_v39 }
 0x1e7   :  { %5169 = vmatpush1.bf16.msra.mxu0 %v14595_v41  ;;  %5292 = vmatpush1.bf16.msra.mxu1 %v14599_v31  ;;  %18617 = vst [vmem:[#allocation339_spill] sm:$0xff] %v14628_v32  ;;  %v813_v31 = vld [vmem:[#allocation3 + $0x1398] sm:$0xff]  ;;  %18619 = vst [vmem:[#allocation341_spill] sm:$0xff] %v14635_v49 }
 0x1e8   :  { %5170 = vmatprep.subr.bf16.mxu0 %v14601_v15  ;;  %5293 = vmatprep.subr.bf16.mxu1 %v14604_v47  ;;  %18616 = vst [vmem:[#allocation338_spill] sm:$0xff] %v14625_v55  ;;  %v812_v47 = vld [vmem:[#allocation3 + $0x1390] sm:$0xff]  ;;  %v821_v41 = vld [vmem:[#allocation3 + $0x13d8] sm:$0xff]  ;;  %18618 = vst [vmem:[#allocation340_spill] sm:$0xff] %v14631_v58 }
 0x1e9   :  { %v820_v15 = vld [vmem:[#allocation3 + $0x13d0] sm:$0xff]  ;;  %v14640_v46 = vcombine.high %v813_v31, %v821_v41  ;;  %v14647_v40 = vcombine.low %v813_v31, %v821_v41 }
 0x1ea   :  { %v14637_v0 = vcombine.high %v812_v47, %v820_v15  ;;  %v14643_v39 = vcombine.low %v812_v47, %v820_v15 }
 0x1eb   :  { %5171 = vmatpush1.bf16.msra.mxu0 %v14607_v17  ;;  %5294 = vmatpush1.bf16.msra.mxu1 %v14611_v30  ;;  %18621 = vst [vmem:[#allocation343_spill] sm:$0xff] %v14640_v46  ;;  %v829_v30 = vld [vmem:[#allocation3 + $0x1418] sm:$0xff]  ;;  %18623 = vst [vmem:[#allocation345_spill] sm:$0xff] %v14647_v40 }
 0x1ec   :  { %5172 = vmatprep.subr.bf16.mxu0 %v14613_v16  ;;  %5295 = vmatprep.subr.bf16.mxu1 %v14616_v59  ;;  %18620 = vst [vmem:[#allocation342_spill] sm:$0xff] %v14637_v0  ;;  %v828_v59 = vld [vmem:[#allocation3 + $0x1410] sm:$0xff]  ;;  %v837_v17 = vld [vmem:[#allocation3 + $0x1458] sm:$0xff]  ;;  %18622 = vst [vmem:[#allocation344_spill] sm:$0xff] %v14643_v39 }
 0x1ed   :  { %v836_v16 = vld [vmem:[#allocation3 + $0x1450] sm:$0xff]  ;;  %v14652_v53 = vcombine.high %v829_v30, %v837_v17  ;;  %v14659_v41 = vcombine.low %v829_v30, %v837_v17 }
 0x1ee   :  { %v14649_v38 = vcombine.high %v828_v59, %v836_v16  ;;  %v14655_v15 = vcombine.low %v828_v59, %v836_v16 }
 0x1ef   :  { %5173 = vmatpush1.bf16.msra.mxu0 %v14619_v56  ;;  %5296 = vmatpush1.bf16.msra.mxu1 %v14623_v33  ;;  %18625 = vst [vmem:[#allocation347_spill] sm:$0xff] %v14652_v53  ;;  %v845_v33 = vld [vmem:[#allocation3 + $0x1498] sm:$0xff]  ;;  %18627 = vst [vmem:[#allocation349_spill] sm:$0xff] %v14659_v41 }
 0x1f0   :  { %5174 = vmatprep.subr.bf16.mxu0 %v14625_v55  ;;  %5297 = vmatprep.subr.bf16.mxu1 %v14628_v32  ;;  %18624 = vst [vmem:[#allocation346_spill] sm:$0xff] %v14649_v38  ;;  %v844_v32 = vld [vmem:[#allocation3 + $0x1490] sm:$0xff]  ;;  %v853_v56 = vld [vmem:[#allocation3 + $0x14d8] sm:$0xff]  ;;  %18626 = vst [vmem:[#allocation348_spill] sm:$0xff] %v14655_v15 }
 0x1f1   :  { %v852_v55 = vld [vmem:[#allocation3 + $0x14d0] sm:$0xff]  ;;  %v14664_v47 = vcombine.high %v845_v33, %v853_v56  ;;  %v14671_v17 = vcombine.low %v845_v33, %v853_v56 }
 0x1f2   :  { %v14661_v31 = vcombine.high %v844_v32, %v852_v55  ;;  %v14667_v16 = vcombine.low %v844_v32, %v852_v55 }
 0x1f3   :  { %5175 = vmatpush1.bf16.msra.mxu0 %v14631_v58  ;;  %5298 = vmatpush1.bf16.msra.mxu1 %v14635_v49  ;;  %18629 = vst [vmem:[#allocation351_spill] sm:$0xff] %v14664_v47  ;;  %v861_v49 = vld [vmem:[#allocation3 + $0x1518] sm:$0xff]  ;;  %18631 = vst [vmem:[#allocation353_spill] sm:$0xff] %v14671_v17 }
 0x1f4   :  { %5176 = vmatprep.subr.bf16.mxu0 %v14637_v0  ;;  %5299 = vmatprep.subr.bf16.mxu1 %v14640_v46  ;;  %18628 = vst [vmem:[#allocation350_spill] sm:$0xff] %v14661_v31  ;;  %v860_v46 = vld [vmem:[#allocation3 + $0x1510] sm:$0xff]  ;;  %v869_v58 = vld [vmem:[#allocation3 + $0x1558] sm:$0xff]  ;;  %18630 = vst [vmem:[#allocation352_spill] sm:$0xff] %v14667_v16 }
 0x1f5   :  { %v868_v0 = vld [vmem:[#allocation3 + $0x1550] sm:$0xff]  ;;  %v14676_v59 = vcombine.high %v861_v49, %v869_v58  ;;  %v14683_v56 = vcombine.low %v861_v49, %v869_v58 }
 0x1f6   :  { %v14673_v30 = vcombine.high %v860_v46, %v868_v0  ;;  %v14679_v55 = vcombine.low %v860_v46, %v868_v0 }
 0x1f7   :  { %5177 = vmatpush1.bf16.msra.mxu0 %v14643_v39  ;;  %5300 = vmatpush1.bf16.msra.mxu1 %v14647_v40  ;;  %18633 = vst [vmem:[#allocation355_spill] sm:$0xff] %v14676_v59  ;;  %v877_v40 = vld [vmem:[#allocation3 + $0x1598] sm:$0xff]  ;;  %18635 = vst [vmem:[#allocation357_spill] sm:$0xff] %v14683_v56 }
 0x1f8   :  { %5178 = vmatprep.subr.bf16.mxu0 %v14649_v38  ;;  %5301 = vmatprep.subr.bf16.mxu1 %v14652_v53  ;;  %18632 = vst [vmem:[#allocation354_spill] sm:$0xff] %v14673_v30  ;;  %v876_v53 = vld [vmem:[#allocation3 + $0x1590] sm:$0xff]  ;;  %v885_v39 = vld [vmem:[#allocation3 + $0x15d8] sm:$0xff]  ;;  %18634 = vst [vmem:[#allocation356_spill] sm:$0xff] %v14679_v55 }
 0x1f9   :  { %v884_v38 = vld [vmem:[#allocation3 + $0x15d0] sm:$0xff]  ;;  %v14688_v32 = vcombine.high %v877_v40, %v885_v39  ;;  %v14695_v58 = vcombine.low %v877_v40, %v885_v39 }
 0x1fa   :  { %v14685_v33 = vcombine.high %v876_v53, %v884_v38  ;;  %v14691_v0 = vcombine.low %v876_v53, %v884_v38 }
 0x1fb   :  { %5179 = vmatpush1.bf16.msra.mxu0 %v14655_v15  ;;  %5302 = vmatpush1.bf16.msra.mxu1 %v14659_v41  ;;  %18637 = vst [vmem:[#allocation359_spill] sm:$0xff] %v14688_v32  ;;  %v893_v41 = vld [vmem:[#allocation3 + $0x1618] sm:$0xff]  ;;  %18639 = vst [vmem:[#allocation361_spill] sm:$0xff] %v14695_v58 }
 0x1fc   :  { %5180 = vmatprep.subr.bf16.mxu0 %v14661_v31  ;;  %5303 = vmatprep.subr.bf16.mxu1 %v14664_v47  ;;  %18636 = vst [vmem:[#allocation358_spill] sm:$0xff] %v14685_v33  ;;  %v892_v47 = vld [vmem:[#allocation3 + $0x1610] sm:$0xff]  ;;  %v901_v15 = vld [vmem:[#allocation3 + $0x1658] sm:$0xff]  ;;  %18638 = vst [vmem:[#allocation360_spill] sm:$0xff] %v14691_v0 }
 0x1fd   :  { %v900_v31 = vld [vmem:[#allocation3 + $0x1650] sm:$0xff]  ;;  %v14700_v46 = vcombine.high %v893_v41, %v901_v15  ;;  %v14707_v39 = vcombine.low %v893_v41, %v901_v15 }
 0x1fe   :  { %v14697_v49 = vcombine.high %v892_v47, %v900_v31  ;;  %v14703_v38 = vcombine.low %v892_v47, %v900_v31 }
 0x1ff   :  { %5181 = vmatpush1.bf16.msra.mxu0 %v14667_v16  ;;  %5304 = vmatpush1.bf16.msra.mxu1 %v14671_v17  ;;  %18641 = vst [vmem:[#allocation363_spill] sm:$0xff] %v14700_v46  ;;  %v909_v17 = vld [vmem:[#allocation3 + $0x1698] sm:$0xff]  ;;  %18643 = vst [vmem:[#allocation365_spill] sm:$0xff] %v14707_v39 }
 0x200   :  { %5182 = vmatprep.subr.bf16.mxu0 %v14673_v30  ;;  %5305 = vmatprep.subr.bf16.mxu1 %v14676_v59  ;;  %18640 = vst [vmem:[#allocation362_spill] sm:$0xff] %v14697_v49  ;;  %v908_v59 = vld [vmem:[#allocation3 + $0x1690] sm:$0xff]  ;;  %v917_v16 = vld [vmem:[#allocation3 + $0x16d8] sm:$0xff]  ;;  %18642 = vst [vmem:[#allocation364_spill] sm:$0xff] %v14703_v38 }
 0x201   :  { %v916_v30 = vld [vmem:[#allocation3 + $0x16d0] sm:$0xff]  ;;  %v14712_v53 = vcombine.high %v909_v17, %v917_v16  ;;  %v14719_v15 = vcombine.low %v909_v17, %v917_v16 }
 0x202   :  { %v14709_v40 = vcombine.high %v908_v59, %v916_v30  ;;  %v14715_v31 = vcombine.low %v908_v59, %v916_v30 }
 0x203   :  { %5183 = vmatpush1.bf16.msra.mxu0 %v14679_v55  ;;  %5306 = vmatpush1.bf16.msra.mxu1 %v14683_v56  ;;  %18645 = vst [vmem:[#allocation367_spill] sm:$0xff] %v14712_v53  ;;  %v925_v56 = vld [vmem:[#allocation3 + $0x1718] sm:$0xff]  ;;  %18647 = vst [vmem:[#allocation369_spill] sm:$0xff] %v14719_v15 }
 0x204   :  { %5184 = vmatprep.subr.bf16.mxu0 %v14685_v33  ;;  %5307 = vmatprep.subr.bf16.mxu1 %v14688_v32  ;;  %18644 = vst [vmem:[#allocation366_spill] sm:$0xff] %v14709_v40  ;;  %v924_v32 = vld [vmem:[#allocation3 + $0x1710] sm:$0xff]  ;;  %v933_v55 = vld [vmem:[#allocation3 + $0x1758] sm:$0xff]  ;;  %18646 = vst [vmem:[#allocation368_spill] sm:$0xff] %v14715_v31 }
 0x205   :  { %v932_v33 = vld [vmem:[#allocation3 + $0x1750] sm:$0xff]  ;;  %v14724_v47 = vcombine.high %v925_v56, %v933_v55  ;;  %v14731_v16 = vcombine.low %v925_v56, %v933_v55 }
 0x206   :  { %v14721_v41 = vcombine.high %v924_v32, %v932_v33  ;;  %v14727_v30 = vcombine.low %v924_v32, %v932_v33 }
 0x207   :  { %5185 = vmatpush1.bf16.msra.mxu0 %v14691_v0  ;;  %5308 = vmatpush1.bf16.msra.mxu1 %v14695_v58  ;;  %18649 = vst [vmem:[#allocation371_spill] sm:$0xff] %v14724_v47  ;;  %v941_v58 = vld [vmem:[#allocation3 + $0x1798] sm:$0xff]  ;;  %18651 = vst [vmem:[#allocation373_spill] sm:$0xff] %v14731_v16 }
 0x208   :  { %5186 = vmatprep.subr.bf16.mxu0 %v14697_v49  ;;  %5309 = vmatprep.subr.bf16.mxu1 %v14700_v46  ;;  %18648 = vst [vmem:[#allocation370_spill] sm:$0xff] %v14721_v41  ;;  %v940_v46 = vld [vmem:[#allocation3 + $0x1790] sm:$0xff]  ;;  %v949_v0 = vld [vmem:[#allocation3 + $0x17d8] sm:$0xff]  ;;  %18650 = vst [vmem:[#allocation372_spill] sm:$0xff] %v14727_v30 }
 0x209   :  { %v948_v49 = vld [vmem:[#allocation3 + $0x17d0] sm:$0xff]  ;;  %v14736_v59 = vcombine.high %v941_v58, %v949_v0  ;;  %v14743_v55 = vcombine.low %v941_v58, %v949_v0 }
 0x20a   :  { %v14733_v17 = vcombine.high %v940_v46, %v948_v49  ;;  %v14739_v33 = vcombine.low %v940_v46, %v948_v49 }
 0x20b   :  { %5187 = vmatpush1.bf16.msra.mxu0 %v14703_v38  ;;  %5310 = vmatpush1.bf16.msra.mxu1 %v14707_v39  ;;  %18653 = vst [vmem:[#allocation375_spill] sm:$0xff] %v14736_v59  ;;  %v191_v39 = vld [vmem:[#allocation3 + $0x28] sm:$0xff]  ;;  %18655 = vst [vmem:[#allocation377_spill] sm:$0xff] %v14743_v55 }
 0x20c   :  { %5188 = vmatprep.subr.bf16.mxu0 %v14709_v40  ;;  %5311 = vmatprep.subr.bf16.mxu1 %v14712_v53  ;;  %18652 = vst [vmem:[#allocation374_spill] sm:$0xff] %v14733_v17  ;;  %v190_v53 = vld [vmem:[#allocation3 + $0x20] sm:$0xff]  ;;  %v199_v38 = vld [vmem:[#allocation3 + $0x68] sm:$0xff]  ;;  %18654 = vst [vmem:[#allocation376_spill] sm:$0xff] %v14739_v33 }
 0x20d   :  { %v198_v40 = vld [vmem:[#allocation3 + $0x60] sm:$0xff]  ;;  %v14748_v32 = vcombine.high %v191_v39, %v199_v38  ;;  %v14755_v0 = vcombine.low %v191_v39, %v199_v38 }
 0x20e   :  { %v14745_v56 = vcombine.high %v190_v53, %v198_v40  ;;  %v14751_v49 = vcombine.low %v190_v53, %v198_v40 }
 0x20f   :  { %5189 = vmatpush1.bf16.msra.mxu0 %v14715_v31  ;;  %5312 = vmatpush1.bf16.msra.mxu1 %v14719_v15  ;;  %18657 = vst [vmem:[#allocation379_spill] sm:$0xff] %v14748_v32  ;;  %v207_v15 = vld [vmem:[#allocation3 + $0xa8] sm:$0xff]  ;;  %18659 = vst [vmem:[#allocation381_spill] sm:$0xff] %v14755_v0 }
 0x210   :  { %5190 = vmatprep.subr.bf16.mxu0 %v14721_v41  ;;  %5313 = vmatprep.subr.bf16.mxu1 %v14724_v47  ;;  %18656 = vst [vmem:[#allocation378_spill] sm:$0xff] %v14745_v56  ;;  %v206_v47 = vld [vmem:[#allocation3 + $0xa0] sm:$0xff]  ;;  %v215_v31 = vld [vmem:[#allocation3 + $0xe8] sm:$0xff]  ;;  %18658 = vst [vmem:[#allocation380_spill] sm:$0xff] %v14751_v49 }
 0x211   :  { %v214_v41 = vld [vmem:[#allocation3 + $0xe0] sm:$0xff]  ;;  %v14760_v46 = vcombine.high %v207_v15, %v215_v31  ;;  %v14769_v38 = vcombine.low %v207_v15, %v215_v31 }
 0x212   :  { %v14757_v58 = vcombine.high %v206_v47, %v214_v41  ;;  %v14765_v40 = vcombine.low %v206_v47, %v214_v41 }
 0x213   :  { %5191 = vmatpush1.bf16.msra.mxu0 %v14727_v30  ;;  %5314 = vmatpush1.bf16.msra.mxu1 %v14731_v16  ;;  %18661 = vst [vmem:[#allocation383_spill] sm:$0xff] %v14760_v46  ;;  %v223_v16 = vld [vmem:[#allocation3 + $0x128] sm:$0xff]  ;;  %18663 = vst [vmem:[#allocation385_spill] sm:$0xff] %v14769_v38 }
 0x214   :  { %5192 = vmatprep.subr.bf16.mxu0 %v14733_v17  ;;  %5315 = vmatprep.subr.bf16.mxu1 %v14736_v59  ;;  %18660 = vst [vmem:[#allocation382_spill] sm:$0xff] %v14757_v58  ;;  %v222_v59 = vld [vmem:[#allocation3 + $0x120] sm:$0xff]  ;;  %18662 = vst [vmem:[#allocation384_spill] sm:$0xff] %v14765_v40  ;;  %v263_v30 = vld [vmem:[#allocation3 + $0x268] sm:$0xff] }
 0x215   :  { %v230_v17 = vld [vmem:[#allocation3 + $0x160] sm:$0xff] }
 0x216   :  { %v14771_v39 = vcombine.high %v222_v59, %v230_v17  ;;  %v14779_v41 = vcombine.low %v222_v59, %v230_v17 }
 0x217   :  { %5193 = vmatpush1.bf16.msra.mxu0 %v14739_v33  ;;  %5316 = vmatpush1.bf16.msra.mxu1 %v14743_v55  ;;  %v231_v33 = vld [vmem:[#allocation3 + $0x168] sm:$0xff] }
 0x218   :  { %5326 = vmatprep.subr.bf16.mxu0 %v14745_v56  ;;  %5449 = vmatprep.subr.bf16.mxu1 %v14748_v32  ;;  %18664 = vst [vmem:[#allocation386_spill] sm:$0xff] %v14771_v39  ;;  %v14774_v53 = vcombine.high %v223_v16, %v231_v33  ;;  %v238_v32 = vld [vmem:[#allocation3 + $0x1a0] sm:$0xff]  ;;  %v239_v55 = vld [vmem:[#allocation3 + $0x1a8] sm:$0xff]  ;;  %18666 = vst [vmem:[#allocation388_spill] sm:$0xff] %v14779_v41  ;;  %v14783_v31 = vcombine.low %v223_v16, %v231_v33 }
 0x219   :  { %v246_v56 = vld [vmem:[#allocation3 + $0x1e0] sm:$0xff] }
 0x21a   :  { %5195 = vmatmul.mubr.bf16.vlgmr.msra.gmra.mrb[4].mxu0 %v14160_v4  ;;  %5318 = vmatmul.mubr.bf16.vlgmr.msra.gmra.mrb[4].mxu1 %v14160_v4  ;;  %18665 = vst [vmem:[#allocation387_spill] sm:$0xff] %v14774_v53  ;;  %18667 = vst [vmem:[#allocation389_spill] sm:$0xff] %v14783_v31  ;;  %v14785_v15 = vcombine.high %v238_v32, %v246_v56  ;;  %v14791_v17 = vcombine.low %v238_v32, %v246_v56 }
 0x21b   :  { %5327 = vmatpush1.bf16.msra.mxu0 %v14751_v49  ;;  %5450 = vmatpush1.bf16.msra.mxu1 %v14755_v0  ;;  %v247_v49 = vld [vmem:[#allocation3 + $0x1e8] sm:$0xff] }
 0x21c   :  { %5328 = vmatprep.subr.bf16.mxu0 %v14757_v58  ;;  %5451 = vmatprep.subr.bf16.mxu1 %v14760_v46  ;;  %18668 = vst [vmem:[#allocation390_spill] sm:$0xff] %v14785_v15  ;;  %v14788_v47 = vcombine.high %v239_v55, %v247_v49  ;;  %v254_v46 = vld [vmem:[#allocation3 + $0x220] sm:$0xff]  ;;  %v255_v0 = vld [vmem:[#allocation3 + $0x228] sm:$0xff]  ;;  %18670 = vst [vmem:[#allocation392_spill] sm:$0xff] %v14791_v17  ;;  %v14795_v16 = vcombine.low %v239_v55, %v247_v49 }
 0x21d   :  { %5358 = vmatprep.mubr.bf16.mxu0 %v13616_v57  ;;  %5481 = vmatprep.mubr.bf16.mxu1 %v13616_v57  ;;  %v262_v58 = vld [vmem:[#allocation3 + $0x260] sm:$0xff]  ;;  %v14800_v33 = vcombine.high %v255_v0, %v263_v30  ;;  %v14807_v55 = vcombine.low %v255_v0, %v263_v30 }
 0x21e   :  { %18669 = vst [vmem:[#allocation391_spill] sm:$0xff] %v14788_v47  ;;  %18671 = vst [vmem:[#allocation393_spill] sm:$0xff] %v14795_v16  ;;  %v14797_v59 = vcombine.high %v254_v46, %v262_v58  ;;  %v14803_v56 = vcombine.low %v254_v46, %v262_v58 }
 0x21f   :  { %5329 = vmatpush1.bf16.msra.mxu0 %v14765_v40  ;;  %5452 = vmatpush1.bf16.msra.mxu1 %v14769_v38  ;;  %18673 = vst [vmem:[#allocation395_spill] sm:$0xff] %v14800_v33  ;;  %v271_v38 = vld [vmem:[#allocation3 + $0x2a8] sm:$0xff]  ;;  %18675 = vst [vmem:[#allocation397_spill] sm:$0xff] %v14807_v55 }
 0x220   :  { %5330 = vmatprep.subr.bf16.mxu0 %v14771_v39  ;;  %5453 = vmatprep.subr.bf16.mxu1 %v14774_v53  ;;  %18672 = vst [vmem:[#allocation394_spill] sm:$0xff] %v14797_v59  ;;  %v270_v53 = vld [vmem:[#allocation3 + $0x2a0] sm:$0xff]  ;;  %v279_v40 = vld [vmem:[#allocation3 + $0x2e8] sm:$0xff]  ;;  %18674 = vst [vmem:[#allocation396_spill] sm:$0xff] %v14803_v56 }
 0x221   :  { %v278_v39 = vld [vmem:[#allocation3 + $0x2e0] sm:$0xff]  ;;  %v14812_v49 = vcombine.high %v271_v38, %v279_v40  ;;  %v14819_v30 = vcombine.low %v271_v38, %v279_v40 }
 0x222   :  { %v14809_v32 = vcombine.high %v270_v53, %v278_v39  ;;  %v14815_v58 = vcombine.low %v270_v53, %v278_v39  ;;  %v303_v53 = vld [vmem:[#allocation3 + $0x3a8] sm:$0xff] }
 0x223   :  { %5331 = vmatpush1.bf16.msra.mxu0 %v14779_v41  ;;  %5454 = vmatpush1.bf16.msra.mxu1 %v14783_v31  ;;  %18677 = vst [vmem:[#allocation399_spill] sm:$0xff] %v14812_v49  ;;  %v287_v31 = vld [vmem:[#allocation3 + $0x328] sm:$0xff] }
 0x224   :  { %5332 = vmatprep.subr.bf16.mxu0 %v14785_v15  ;;  %5455 = vmatprep.subr.bf16.mxu1 %v14788_v47  ;;  %18676 = vst [vmem:[#allocation398_spill] sm:$0xff] %v14809_v32  ;;  %v286_v47 = vld [vmem:[#allocation3 + $0x320] sm:$0xff]  ;;  %v295_v41 = vld [vmem:[#allocation3 + $0x368] sm:$0xff]  ;;  %18678 = vst [vmem:[#allocation400_spill] sm:$0xff] %v14815_v58 }
 0x225   :  { %v294_v15 = vld [vmem:[#allocation3 + $0x360] sm:$0xff] }
 0x226   :  { %v14821_v0 = vcombine.high %v286_v47, %v294_v15  ;;  %v14835_v38 = vcombine.low %v286_v47, %v294_v15  ;;  %v327_v15 = vld [vmem:[#allocation3 + $0x468] sm:$0xff] }
 0x227   :  { %5333 = vmatpush1.bf16.msra.mxu0 %v14791_v17  ;;  %5456 = vmatpush1.bf16.msra.mxu1 %v14795_v16  ;;  %v310_v16 = vld [vmem:[#allocation3 + $0x3e0] sm:$0xff] }
 0x228   :  { %5334 = vmatprep.subr.bf16.mxu0 %v14797_v59  ;;  %5457 = vmatprep.subr.bf16.mxu1 %v14800_v33  ;;  %18679 = vst [vmem:[#allocation401_spill] sm:$0xff] %v14821_v0  ;;  %v14826_v33 = vcombine.high %v287_v31, %v295_v41  ;;  %v302_v59 = vld [vmem:[#allocation3 + $0x3a0] sm:$0xff]  ;;  %18685 = vst [vmem:[#allocation407_spill] sm:$0xff] %v14835_v38 }
 0x229   :  { %v14847_v47 = vcombine.low %v302_v59, %v310_v16 }
 0x22a   :  { %18681 = vst [vmem:[#allocation403_spill] sm:$0xff] %v14826_v33 }
 0x22b   :  { %5335 = vmatpush1.bf16.msra.mxu0 %v14803_v56  ;;  %5458 = vmatpush1.bf16.msra.mxu1 %v14807_v55  ;;  %v311_v55 = vld [vmem:[#allocation3 + $0x3e8] sm:$0xff]  ;;  %18689 = vst [vmem:[#allocation411_spill] sm:$0xff] %v14847_v47 }
 0x22c   :  { %5336 = vmatprep.subr.bf16.mxu0 %v14809_v32  ;;  %5459 = vmatprep.subr.bf16.mxu1 %v14812_v49  ;;  %v14839_v32 = vcombine.low %v287_v31, %v295_v41  ;;  %v14844_v25 = vcombine.high %v303_v53, %v311_v55  ;;  %v14851_v41 = vcombine.low %v303_v53, %v311_v55 }
 0x22d   :  { %v14823_v46 = vpop.f32.mrb[0].mxu0  ;;  %v14828_v17 = vpop.f32.mrb[0].mxu1 }
 0x22e   :  { %18680 = vst [vmem:[#allocation402_spill] sm:$0xff] %v14823_v46  ;;  %18682 = vst [vmem:[#allocation404_spill] sm:$0xff] %v14828_v17  ;;  %v14830_v39 = vpop.f32.mrb[1].mxu0  ;;  %v14832_v56 = vpop.f32.mrb[1].mxu1  ;;  %v14841_v17 = vcombine.high %v302_v59, %v310_v16 }
 0x22f   :  { %18683 = vst [vmem:[#allocation405_spill] sm:$0xff] %v14830_v39  ;;  %18684 = vst [vmem:[#allocation406_spill] sm:$0xff] %v14832_v56  ;;  %v4954_v40 = vpop.f32.mrb[2].mxu0  ;;  %5337 = vmatpush1.bf16.msra.mxu0 %v14815_v58  ;;  %v5077_v46 = vpop.f32.mrb[2].mxu1  ;;  %5460 = vmatpush1.bf16.msra.mxu1 %v14819_v30  ;;  %v326_v56 = vld [vmem:[#allocation3 + $0x460] sm:$0xff]  ;;  %v319_v58 = vld [vmem:[#allocation3 + $0x428] sm:$0xff] }
 0x230   :  { %v4955_v49 = vpop.f32.mrb[3].mxu0  ;;  %5338 = vmatprep.subr.bf16.mxu0 %v14821_v0  ;;  %18686 = vst [vmem:[#allocation408_spill] sm:$0xff] %v14839_v32  ;;  %18687 = vst [vmem:[#allocation409_spill] sm:$0xff] %v14841_v17  ;;  %v5078_v39 = vpop.f32.mrb[3].mxu1  ;;  %5461 = vmatprep.subr.bf16.mxu1 %v14826_v33  ;;  %v318_v40 = vld [vmem:[#allocation3 + $0x420] sm:$0xff]  ;;  %v335_v33 = vld [vmem:[#allocation3 + $0x4a8] sm:$0xff]  ;;  %v14863_v59 = vcombine.low %v319_v58, %v327_v15 }
 0x231   :  { %18688 = vst [vmem:[#allocation410_spill] sm:$0xff] %v14844_v25  ;;  %18690 = vst [vmem:[#allocation412_spill] sm:$0xff] %v14851_v41  ;;  %v14853_v31 = vcombine.high %v318_v40, %v326_v56  ;;  %v14856_v49 = vcombine.high %v319_v58, %v327_v15  ;;  %v334_v46 = vld [vmem:[#allocation3 + $0x4a0] sm:$0xff]  ;;  %v343_v0 = vld [vmem:[#allocation3 + $0x4e8] sm:$0xff]  ;;  %v14859_v16 = vcombine.low %v318_v40, %v326_v56 }
 0x232   :  { %v342_v39 = vld [vmem:[#allocation3 + $0x4e0] sm:$0xff]  ;;  %18694 = vst [vmem:[#allocation416_spill] sm:$0xff] %v14863_v59  ;;  %v14868_v53 = vcombine.high %v335_v33, %v343_v0  ;;  %v14875_v58 = vcombine.low %v335_v33, %v343_v0 }
 0x233   :  { %5339 = vmatpush1.bf16.msra.mxu0 %v14835_v38  ;;  %5462 = vmatpush1.bf16.msra.mxu1 %v14839_v32  ;;  %18691 = vst [vmem:[#allocation413_spill] sm:$0xff] %v14853_v31  ;;  %18692 = vst [vmem:[#allocation414_spill] sm:$0xff] %v14856_v49  ;;  %v14865_v55 = vcombine.high %v334_v46, %v342_v39  ;;  %v351_v32 = vld [vmem:[#allocation3 + $0x528] sm:$0xff]  ;;  %v14871_v56 = vcombine.low %v334_v46, %v342_v39 }
 0x234   :  { %5340 = vmatprep.subr.bf16.mxu0 %v14841_v17  ;;  %5463 = vmatprep.subr.bf16.mxu1 %v14844_v25  ;;  %18693 = vst [vmem:[#allocation415_spill] sm:$0xff] %v14859_v16  ;;  %18696 = vst [vmem:[#allocation418_spill] sm:$0xff] %v14868_v53  ;;  %v350_v25 = vld [vmem:[#allocation3 + $0x520] sm:$0xff]  ;;  %v359_v38 = vld [vmem:[#allocation3 + $0x568] sm:$0xff] }
 0x235   :  { %18695 = vst [vmem:[#allocation417_spill] sm:$0xff] %v14865_v55  ;;  %v358_v17 = vld [vmem:[#allocation3 + $0x560] sm:$0xff]  ;;  %18697 = vst [vmem:[#allocation419_spill] sm:$0xff] %v14871_v56  ;;  %v14880_v15 = vcombine.high %v351_v32, %v359_v38  ;;  %v14887_v33 = vcombine.low %v351_v32, %v359_v38 }
 0x236   :  { %18698 = vst [vmem:[#allocation420_spill] sm:$0xff] %v14875_v58  ;;  %v14877_v40 = vcombine.high %v350_v25, %v358_v17  ;;  %v14883_v46 = vcombine.low %v350_v25, %v358_v17 }
 0x237   :  { %5341 = vmatpush1.bf16.msra.mxu0 %v14847_v47  ;;  %5464 = vmatpush1.bf16.msra.mxu1 %v14851_v41  ;;  %18700 = vst [vmem:[#allocation422_spill] sm:$0xff] %v14880_v15  ;;  %v367_v41 = vld [vmem:[#allocation3 + $0x5a8] sm:$0xff]  ;;  %18702 = vst [vmem:[#allocation424_spill] sm:$0xff] %v14887_v33 }
 0x238   :  { %5342 = vmatprep.subr.bf16.mxu0 %v14853_v31  ;;  %5465 = vmatprep.subr.bf16.mxu1 %v14856_v49  ;;  %18699 = vst [vmem:[#allocation421_spill] sm:$0xff] %v14877_v40  ;;  %v366_v49 = vld [vmem:[#allocation3 + $0x5a0] sm:$0xff]  ;;  %v375_v47 = vld [vmem:[#allocation3 + $0x5e8] sm:$0xff]  ;;  %18701 = vst [vmem:[#allocation423_spill] sm:$0xff] %v14883_v46 }
 0x239   :  { %v374_v31 = vld [vmem:[#allocation3 + $0x5e0] sm:$0xff]  ;;  %v14892_v39 = vcombine.high %v367_v41, %v375_v47  ;;  %v14899_v17 = vcombine.low %v367_v41, %v375_v47 }
 0x23a   :  { %v14889_v0 = vcombine.high %v366_v49, %v374_v31  ;;  %v14895_v25 = vcombine.low %v366_v49, %v374_v31 }
 0x23b   :  { %5343 = vmatpush1.bf16.msra.mxu0 %v14859_v16  ;;  %5466 = vmatpush1.bf16.msra.mxu1 %v14863_v59  ;;  %18704 = vst [vmem:[#allocation426_spill] sm:$0xff] %v14892_v39  ;;  %v383_v59 = vld [vmem:[#allocation3 + $0x628] sm:$0xff]  ;;  %18706 = vst [vmem:[#allocation428_spill] sm:$0xff] %v14899_v17 }
 0x23c   :  { %5344 = vmatprep.subr.bf16.mxu0 %v14865_v55  ;;  %5467 = vmatprep.subr.bf16.mxu1 %v14868_v53  ;;  %18703 = vst [vmem:[#allocation425_spill] sm:$0xff] %v14889_v0  ;;  %v382_v53 = vld [vmem:[#allocation3 + $0x620] sm:$0xff]  ;;  %v391_v16 = vld [vmem:[#allocation3 + $0x668] sm:$0xff]  ;;  %18705 = vst [vmem:[#allocation427_spill] sm:$0xff] %v14895_v25 }
 0x23d   :  { %v390_v55 = vld [vmem:[#allocation3 + $0x660] sm:$0xff]  ;;  %v14904_v38 = vcombine.high %v383_v59, %v391_v16  ;;  %v14911_v47 = vcombine.low %v383_v59, %v391_v16 }
 0x23e   :  { %v14901_v32 = vcombine.high %v382_v53, %v390_v55  ;;  %v14907_v31 = vcombine.low %v382_v53, %v390_v55 }
 0x23f   :  { %5345 = vmatpush1.bf16.msra.mxu0 %v14871_v56  ;;  %5468 = vmatpush1.bf16.msra.mxu1 %v14875_v58  ;;  %18708 = vst [vmem:[#allocation430_spill] sm:$0xff] %v14904_v38  ;;  %v399_v58 = vld [vmem:[#allocation3 + $0x6a8] sm:$0xff]  ;;  %18710 = vst [vmem:[#allocation432_spill] sm:$0xff] %v14911_v47 }
 0x240   :  { %5346 = vmatprep.subr.bf16.mxu0 %v14877_v40  ;;  %5469 = vmatprep.subr.bf16.mxu1 %v14880_v15  ;;  %18707 = vst [vmem:[#allocation429_spill] sm:$0xff] %v14901_v32  ;;  %v398_v15 = vld [vmem:[#allocation3 + $0x6a0] sm:$0xff]  ;;  %v407_v56 = vld [vmem:[#allocation3 + $0x6e8] sm:$0xff]  ;;  %18709 = vst [vmem:[#allocation431_spill] sm:$0xff] %v14907_v31 }
 0x241   :  { %v406_v40 = vld [vmem:[#allocation3 + $0x6e0] sm:$0xff]  ;;  %v14916_v49 = vcombine.high %v399_v58, %v407_v56  ;;  %v14923_v16 = vcombine.low %v399_v58, %v407_v56 }
 0x242   :  { %v14913_v41 = vcombine.high %v398_v15, %v406_v40  ;;  %v14919_v55 = vcombine.low %v398_v15, %v406_v40 }
 0x243   :  { %5347 = vmatpush1.bf16.msra.mxu0 %v14883_v46  ;;  %5470 = vmatpush1.bf16.msra.mxu1 %v14887_v33  ;;  %18712 = vst [vmem:[#allocation434_spill] sm:$0xff] %v14916_v49  ;;  %v415_v33 = vld [vmem:[#allocation3 + $0x728] sm:$0xff]  ;;  %18714 = vst [vmem:[#allocation436_spill] sm:$0xff] %v14923_v16 }
 0x244   :  { %5348 = vmatprep.subr.bf16.mxu0 %v14889_v0  ;;  %5471 = vmatprep.subr.bf16.mxu1 %v14892_v39  ;;  %18711 = vst [vmem:[#allocation433_spill] sm:$0xff] %v14913_v41  ;;  %v414_v39 = vld [vmem:[#allocation3 + $0x720] sm:$0xff]  ;;  %v423_v46 = vld [vmem:[#allocation3 + $0x768] sm:$0xff]  ;;  %18713 = vst [vmem:[#allocation435_spill] sm:$0xff] %v14919_v55 }
 0x245   :  { %v422_v0 = vld [vmem:[#allocation3 + $0x760] sm:$0xff]  ;;  %v14928_v53 = vcombine.high %v415_v33, %v423_v46  ;;  %v14935_v56 = vcombine.low %v415_v33, %v423_v46 }
 0x246   :  { %v14925_v59 = vcombine.high %v414_v39, %v422_v0  ;;  %v14931_v40 = vcombine.low %v414_v39, %v422_v0 }
 0x247   :  { %5349 = vmatpush1.bf16.msra.mxu0 %v14895_v25  ;;  %5472 = vmatpush1.bf16.msra.mxu1 %v14899_v17  ;;  %18716 = vst [vmem:[#allocation438_spill] sm:$0xff] %v14928_v53  ;;  %v431_v17 = vld [vmem:[#allocation3 + $0x7a8] sm:$0xff]  ;;  %18718 = vst [vmem:[#allocation440_spill] sm:$0xff] %v14935_v56 }
 0x248   :  { %5350 = vmatprep.subr.bf16.mxu0 %v14901_v32  ;;  %5473 = vmatprep.subr.bf16.mxu1 %v14904_v38  ;;  %18715 = vst [vmem:[#allocation437_spill] sm:$0xff] %v14925_v59  ;;  %v430_v38 = vld [vmem:[#allocation3 + $0x7a0] sm:$0xff]  ;;  %v439_v25 = vld [vmem:[#allocation3 + $0x7e8] sm:$0xff]  ;;  %18717 = vst [vmem:[#allocation439_spill] sm:$0xff] %v14931_v40 }
 0x249   :  { %v438_v32 = vld [vmem:[#allocation3 + $0x7e0] sm:$0xff]  ;;  %v14940_v15 = vcombine.high %v431_v17, %v439_v25  ;;  %v14947_v46 = vcombine.low %v431_v17, %v439_v25 }
 0x24a   :  { %v14937_v58 = vcombine.high %v430_v38, %v438_v32  ;;  %v14943_v0 = vcombine.low %v430_v38, %v438_v32 }
 0x24b   :  { %5351 = vmatpush1.bf16.msra.mxu0 %v14907_v31  ;;  %5474 = vmatpush1.bf16.msra.mxu1 %v14911_v47  ;;  %18720 = vst [vmem:[#allocation442_spill] sm:$0xff] %v14940_v15  ;;  %v447_v47 = vld [vmem:[#allocation3 + $0x828] sm:$0xff]  ;;  %18722 = vst [vmem:[#allocation444_spill] sm:$0xff] %v14947_v46 }
 0x24c   :  { %5352 = vmatprep.subr.bf16.mxu0 %v14913_v41  ;;  %5475 = vmatprep.subr.bf16.mxu1 %v14916_v49  ;;  %18719 = vst [vmem:[#allocation441_spill] sm:$0xff] %v14937_v58  ;;  %v446_v49 = vld [vmem:[#allocation3 + $0x820] sm:$0xff]  ;;  %v455_v31 = vld [vmem:[#allocation3 + $0x868] sm:$0xff]  ;;  %18721 = vst [vmem:[#allocation443_spill] sm:$0xff] %v14943_v0 }
 0x24d   :  { %v454_v41 = vld [vmem:[#allocation3 + $0x860] sm:$0xff]  ;;  %v14952_v39 = vcombine.high %v447_v47, %v455_v31  ;;  %v14959_v25 = vcombine.low %v447_v47, %v455_v31 }
 0x24e   :  { %v14949_v33 = vcombine.high %v446_v49, %v454_v41  ;;  %v14955_v32 = vcombine.low %v446_v49, %v454_v41 }
 0x24f   :  { %5353 = vmatpush1.bf16.msra.mxu0 %v14919_v55  ;;  %5476 = vmatpush1.bf16.msra.mxu1 %v14923_v16  ;;  %18724 = vst [vmem:[#allocation446_spill] sm:$0xff] %v14952_v39  ;;  %v463_v16 = vld [vmem:[#allocation3 + $0x8a8] sm:$0xff]  ;;  %18726 = vst [vmem:[#allocation448_spill] sm:$0xff] %v14959_v25 }
 0x250   :  { %5354 = vmatprep.subr.bf16.mxu0 %v14925_v59  ;;  %5477 = vmatprep.subr.bf16.mxu1 %v14928_v53  ;;  %18723 = vst [vmem:[#allocation445_spill] sm:$0xff] %v14949_v33  ;;  %v462_v53 = vld [vmem:[#allocation3 + $0x8a0] sm:$0xff]  ;;  %v471_v55 = vld [vmem:[#allocation3 + $0x8e8] sm:$0xff]  ;;  %18725 = vst [vmem:[#allocation447_spill] sm:$0xff] %v14955_v32 }
 0x251   :  { %v470_v59 = vld [vmem:[#allocation3 + $0x8e0] sm:$0xff]  ;;  %v14964_v38 = vcombine.high %v463_v16, %v471_v55  ;;  %v14973_v31 = vcombine.low %v463_v16, %v471_v55 }
 0x252   :  { %v14961_v17 = vcombine.high %v462_v53, %v470_v59  ;;  %v14969_v41 = vcombine.low %v462_v53, %v470_v59 }
 0x253   :  { %5355 = vmatpush1.bf16.msra.mxu0 %v14931_v40  ;;  %5478 = vmatpush1.bf16.msra.mxu1 %v14935_v56  ;;  %18728 = vst [vmem:[#allocation450_spill] sm:$0xff] %v14964_v38  ;;  %v479_v56 = vld [vmem:[#allocation3 + $0x928] sm:$0xff]  ;;  %18730 = vst [vmem:[#allocation452_spill] sm:$0xff] %v14973_v31 }
 0x254   :  { %5356 = vmatprep.subr.bf16.mxu0 %v14937_v58  ;;  %5479 = vmatprep.subr.bf16.mxu1 %v14940_v15  ;;  %18727 = vst [vmem:[#allocation449_spill] sm:$0xff] %v14961_v17  ;;  %v478_v15 = vld [vmem:[#allocation3 + $0x920] sm:$0xff]  ;;  %18729 = vst [vmem:[#allocation451_spill] sm:$0xff] %v14969_v41  ;;  %v519_v40 = vld [vmem:[#allocation3 + $0xa68] sm:$0xff] }
 0x255   :  { %v486_v58 = vld [vmem:[#allocation3 + $0x960] sm:$0xff] }
 0x256   :  { %v14975_v47 = vcombine.high %v478_v15, %v486_v58  ;;  %v14983_v59 = vcombine.low %v478_v15, %v486_v58 }
 0x257   :  { %5357 = vmatpush1.bf16.msra.mxu0 %v14943_v0  ;;  %5480 = vmatpush1.bf16.msra.mxu1 %v14947_v46  ;;  %v487_v0 = vld [vmem:[#allocation3 + $0x968] sm:$0xff] }
 0x258   :  { %5367 = vmatprep.subr.bf16.mxu0 %v14949_v33  ;;  %5490 = vmatprep.subr.bf16.mxu1 %v14952_v39  ;;  %18731 = vst [vmem:[#allocation453_spill] sm:$0xff] %v14975_v47  ;;  %v14978_v49 = vcombine.high %v479_v56, %v487_v0  ;;  %v494_v39 = vld [vmem:[#allocation3 + $0x9a0] sm:$0xff]  ;;  %v503_v46 = vld [vmem:[#allocation3 + $0x9e8] sm:$0xff]  ;;  %18733 = vst [vmem:[#allocation455_spill] sm:$0xff] %v14983_v59  ;;  %v14987_v55 = vcombine.low %v479_v56, %v487_v0 }
 0x259   :  { %v502_v33 = vld [vmem:[#allocation3 + $0x9e0] sm:$0xff] }
 0x25a   :  { %5359 = vmatmul.mubr.bf16.vlgmr.msra.gmra.mrb[8].mxu0 %v13742_v1  ;;  %5482 = vmatmul.mubr.bf16.vlgmr.msra.gmra.mrb[8].mxu1 %v13742_v1  ;;  %18732 = vst [vmem:[#allocation454_spill] sm:$0xff] %v14978_v49  ;;  %18734 = vst [vmem:[#allocation456_spill] sm:$0xff] %v14987_v55  ;;  %v14989_v16 = vcombine.high %v494_v39, %v502_v33  ;;  %v14995_v58 = vcombine.low %v494_v39, %v502_v33 }
 0x25b   :  { %5368 = vmatpush1.bf16.msra.mxu0 %v14955_v32  ;;  %5491 = vmatpush1.bf16.msra.mxu1 %v14959_v25  ;;  %v495_v32 = vld [vmem:[#allocation3 + $0x9a8] sm:$0xff] }
 0x25c   :  { %5369 = vmatprep.subr.bf16.mxu0 %v14961_v17  ;;  %5492 = vmatprep.subr.bf16.mxu1 %v14964_v38  ;;  %18735 = vst [vmem:[#allocation457_spill] sm:$0xff] %v14989_v16  ;;  %v14992_v53 = vcombine.high %v495_v32, %v503_v46  ;;  %v510_v38 = vld [vmem:[#allocation3 + $0xa20] sm:$0xff]  ;;  %v511_v25 = vld [vmem:[#allocation3 + $0xa28] sm:$0xff]  ;;  %18737 = vst [vmem:[#allocation459_spill] sm:$0xff] %v14995_v58  ;;  %v14999_v56 = vcombine.low %v495_v32, %v503_v46 }
 0x25d   :  { %5399 = vmatprep.mubr.bf16.mxu0 %v13763_v48  ;;  %5522 = vmatprep.mubr.bf16.mxu1 %v13763_v48  ;;  %v518_v17 = vld [vmem:[#allocation3 + $0xa60] sm:$0xff]  ;;  %v15004_v0 = vcombine.high %v511_v25, %v519_v40  ;;  %v15011_v46 = vcombine.low %v511_v25, %v519_v40 }
 0x25e   :  { %18736 = vst [vmem:[#allocation458_spill] sm:$0xff] %v14992_v53  ;;  %18738 = vst [vmem:[#allocation460_spill] sm:$0xff] %v14999_v56  ;;  %v15001_v15 = vcombine.high %v510_v38, %v518_v17  ;;  %v15007_v33 = vcombine.low %v510_v38, %v518_v17 }
 0x25f   :  { %5370 = vmatpush1.bf16.msra.mxu0 %v14969_v41  ;;  %5493 = vmatpush1.bf16.msra.mxu1 %v14973_v31  ;;  %18740 = vst [vmem:[#allocation462_spill] sm:$0xff] %v15004_v0  ;;  %v527_v31 = vld [vmem:[#allocation3 + $0xaa8] sm:$0xff]  ;;  %18742 = vst [vmem:[#allocation464_spill] sm:$0xff] %v15011_v46 }
 0x260   :  { %5371 = vmatprep.subr.bf16.mxu0 %v14975_v47  ;;  %5494 = vmatprep.subr.bf16.mxu1 %v14978_v49  ;;  %18739 = vst [vmem:[#allocation461_spill] sm:$0xff] %v15001_v15  ;;  %v526_v49 = vld [vmem:[#allocation3 + $0xaa0] sm:$0xff]  ;;  %v535_v41 = vld [vmem:[#allocation3 + $0xae8] sm:$0xff]  ;;  %18741 = vst [vmem:[#allocation463_spill] sm:$0xff] %v15007_v33 }
 0x261   :  { %v534_v47 = vld [vmem:[#allocation3 + $0xae0] sm:$0xff]  ;;  %v15016_v32 = vcombine.high %v527_v31, %v535_v41  ;;  %v15023_v40 = vcombine.low %v527_v31, %v535_v41 }
 0x262   :  { %v15013_v39 = vcombine.high %v526_v49, %v534_v47  ;;  %v15019_v17 = vcombine.low %v526_v49, %v534_v47 }
 0x263   :  { %5372 = vmatpush1.bf16.msra.mxu0 %v14983_v59  ;;  %5495 = vmatpush1.bf16.msra.mxu1 %v14987_v55  ;;  %18744 = vst [vmem:[#allocation466_spill] sm:$0xff] %v15016_v32  ;;  %v543_v55 = vld [vmem:[#allocation3 + $0xb28] sm:$0xff]  ;;  %18746 = vst [vmem:[#allocation468_spill] sm:$0xff] %v15023_v40 }
 0x264   :  { %5373 = vmatprep.subr.bf16.mxu0 %v14989_v16  ;;  %5496 = vmatprep.subr.bf16.mxu1 %v14992_v53  ;;  %18743 = vst [vmem:[#allocation465_spill] sm:$0xff] %v15013_v39  ;;  %v542_v53 = vld [vmem:[#allocation3 + $0xb20] sm:$0xff]  ;;  %v551_v59 = vld [vmem:[#allocation3 + $0xb68] sm:$0xff]  ;;  %18745 = vst [vmem:[#allocation467_spill] sm:$0xff] %v15019_v17 }
 0x265   :  { %v550_v16 = vld [vmem:[#allocation3 + $0xb60] sm:$0xff]  ;;  %v15028_v38 = vcombine.high %v543_v55, %v551_v59  ;;  %v15035_v41 = vcombine.low %v543_v55, %v551_v59 }
 0x266   :  { %v15025_v25 = vcombine.high %v542_v53, %v550_v16  ;;  %v15031_v47 = vcombine.low %v542_v53, %v550_v16 }
 0x267   :  { %5374 = vmatpush1.bf16.msra.mxu0 %v14995_v58  ;;  %5497 = vmatpush1.bf16.msra.mxu1 %v14999_v56  ;;  %18748 = vst [vmem:[#allocation470_spill] sm:$0xff] %v15028_v38  ;;  %v559_v56 = vld [vmem:[#allocation3 + $0xba8] sm:$0xff]  ;;  %18750 = vst [vmem:[#allocation472_spill] sm:$0xff] %v15035_v41 }
 0x268   :  { %5375 = vmatprep.subr.bf16.mxu0 %v15001_v15  ;;  %5498 = vmatprep.subr.bf16.mxu1 %v15004_v0  ;;  %18747 = vst [vmem:[#allocation469_spill] sm:$0xff] %v15025_v25  ;;  %v558_v0 = vld [vmem:[#allocation3 + $0xba0] sm:$0xff]  ;;  %v567_v58 = vld [vmem:[#allocation3 + $0xbe8] sm:$0xff]  ;;  %18749 = vst [vmem:[#allocation471_spill] sm:$0xff] %v15031_v47 }
 0x269   :  { %v566_v15 = vld [vmem:[#allocation3 + $0xbe0] sm:$0xff]  ;;  %v15040_v49 = vcombine.high %v559_v56, %v567_v58  ;;  %v15047_v59 = vcombine.low %v559_v56, %v567_v58 }
 0x26a   :  { %v15037_v31 = vcombine.high %v558_v0, %v566_v15  ;;  %v15043_v16 = vcombine.low %v558_v0, %v566_v15 }
 0x26b   :  { %5376 = vmatpush1.bf16.msra.mxu0 %v15007_v33  ;;  %5499 = vmatpush1.bf16.msra.mxu1 %v15011_v46  ;;  %18752 = vst [vmem:[#allocation474_spill] sm:$0xff] %v15040_v49  ;;  %v575_v46 = vld [vmem:[#allocation3 + $0xc28] sm:$0xff]  ;;  %18754 = vst [vmem:[#allocation476_spill] sm:$0xff] %v15047_v59 }
 0x26c   :  { %5377 = vmatprep.subr.bf16.mxu0 %v15013_v39  ;;  %5500 = vmatprep.subr.bf16.mxu1 %v15016_v32  ;;  %18751 = vst [vmem:[#allocation473_spill] sm:$0xff] %v15037_v31  ;;  %v574_v32 = vld [vmem:[#allocation3 + $0xc20] sm:$0xff]  ;;  %v583_v33 = vld [vmem:[#allocation3 + $0xc68] sm:$0xff]  ;;  %18753 = vst [vmem:[#allocation475_spill] sm:$0xff] %v15043_v16 }
 0x26d   :  { %v582_v39 = vld [vmem:[#allocation3 + $0xc60] sm:$0xff]  ;;  %v15052_v53 = vcombine.high %v575_v46, %v583_v33  ;;  %v15059_v58 = vcombine.low %v575_v46, %v583_v33 }
 0x26e   :  { %v15049_v55 = vcombine.high %v574_v32, %v582_v39  ;;  %v15055_v15 = vcombine.low %v574_v32, %v582_v39 }
 0x26f   :  { %5378 = vmatpush1.bf16.msra.mxu0 %v15019_v17  ;;  %5501 = vmatpush1.bf16.msra.mxu1 %v15023_v40  ;;  %18756 = vst [vmem:[#allocation478_spill] sm:$0xff] %v15052_v53  ;;  %v591_v40 = vld [vmem:[#allocation3 + $0xca8] sm:$0xff]  ;;  %18758 = vst [vmem:[#allocation480_spill] sm:$0xff] %v15059_v58 }
 0x270   :  { %5379 = vmatprep.subr.bf16.mxu0 %v15025_v25  ;;  %5502 = vmatprep.subr.bf16.mxu1 %v15028_v38  ;;  %18755 = vst [vmem:[#allocation477_spill] sm:$0xff] %v15049_v55  ;;  %v590_v38 = vld [vmem:[#allocation3 + $0xca0] sm:$0xff]  ;;  %v599_v17 = vld [vmem:[#allocation3 + $0xce8] sm:$0xff]  ;;  %18757 = vst [vmem:[#allocation479_spill] sm:$0xff] %v15055_v15 }
 0x271   :  { %v598_v25 = vld [vmem:[#allocation3 + $0xce0] sm:$0xff]  ;;  %v15064_v0 = vcombine.high %v591_v40, %v599_v17  ;;  %v15071_v33 = vcombine.low %v591_v40, %v599_v17 }
 0x272   :  { %v15061_v56 = vcombine.high %v590_v38, %v598_v25  ;;  %v15067_v39 = vcombine.low %v590_v38, %v598_v25 }
 0x273   :  { %5380 = vmatpush1.bf16.msra.mxu0 %v15031_v47  ;;  %5503 = vmatpush1.bf16.msra.mxu1 %v15035_v41  ;;  %18760 = vst [vmem:[#allocation482_spill] sm:$0xff] %v15064_v0  ;;  %v607_v41 = vld [vmem:[#allocation3 + $0xd28] sm:$0xff]  ;;  %18762 = vst [vmem:[#allocation484_spill] sm:$0xff] %v15071_v33 }
 0x274   :  { %5381 = vmatprep.subr.bf16.mxu0 %v15037_v31  ;;  %5504 = vmatprep.subr.bf16.mxu1 %v15040_v49  ;;  %18759 = vst [vmem:[#allocation481_spill] sm:$0xff] %v15061_v56  ;;  %v606_v49 = vld [vmem:[#allocation3 + $0xd20] sm:$0xff]  ;;  %v615_v47 = vld [vmem:[#allocation3 + $0xd68] sm:$0xff]  ;;  %18761 = vst [vmem:[#allocation483_spill] sm:$0xff] %v15067_v39 }
 0x275   :  { %v614_v31 = vld [vmem:[#allocation3 + $0xd60] sm:$0xff]  ;;  %v15076_v32 = vcombine.high %v607_v41, %v615_v47  ;;  %v15083_v17 = vcombine.low %v607_v41, %v615_v47 }
 0x276   :  { %v15073_v46 = vcombine.high %v606_v49, %v614_v31  ;;  %v15079_v25 = vcombine.low %v606_v49, %v614_v31 }
 0x277   :  { %5382 = vmatpush1.bf16.msra.mxu0 %v15043_v16  ;;  %5505 = vmatpush1.bf16.msra.mxu1 %v15047_v59  ;;  %18764 = vst [vmem:[#allocation486_spill] sm:$0xff] %v15076_v32  ;;  %v623_v59 = vld [vmem:[#allocation3 + $0xda8] sm:$0xff]  ;;  %18766 = vst [vmem:[#allocation488_spill] sm:$0xff] %v15083_v17 }
 0x278   :  { %5383 = vmatprep.subr.bf16.mxu0 %v15049_v55  ;;  %5506 = vmatprep.subr.bf16.mxu1 %v15052_v53  ;;  %18763 = vst [vmem:[#allocation485_spill] sm:$0xff] %v15073_v46  ;;  %v622_v53 = vld [vmem:[#allocation3 + $0xda0] sm:$0xff]  ;;  %v631_v16 = vld [vmem:[#allocation3 + $0xde8] sm:$0xff]  ;;  %18765 = vst [vmem:[#allocation487_spill] sm:$0xff] %v15079_v25 }
 0x279   :  { %v630_v55 = vld [vmem:[#allocation3 + $0xde0] sm:$0xff]  ;;  %v15088_v38 = vcombine.high %v623_v59, %v631_v16  ;;  %v15095_v47 = vcombine.low %v623_v59, %v631_v16 }
 0x27a   :  { %v15085_v40 = vcombine.high %v622_v53, %v630_v55  ;;  %v15091_v31 = vcombine.low %v622_v53, %v630_v55 }
 0x27b   :  { %5384 = vmatpush1.bf16.msra.mxu0 %v15055_v15  ;;  %5507 = vmatpush1.bf16.msra.mxu1 %v15059_v58  ;;  %18768 = vst [vmem:[#allocation490_spill] sm:$0xff] %v15088_v38  ;;  %v639_v58 = vld [vmem:[#allocation3 + $0xe28] sm:$0xff]  ;;  %18770 = vst [vmem:[#allocation492_spill] sm:$0xff] %v15095_v47 }
 0x27c   :  { %5385 = vmatprep.subr.bf16.mxu0 %v15061_v56  ;;  %5508 = vmatprep.subr.bf16.mxu1 %v15064_v0  ;;  %18767 = vst [vmem:[#allocation489_spill] sm:$0xff] %v15085_v40  ;;  %v638_v0 = vld [vmem:[#allocation3 + $0xe20] sm:$0xff]  ;;  %v647_v15 = vld [vmem:[#allocation3 + $0xe68] sm:$0xff]  ;;  %18769 = vst [vmem:[#allocation491_spill] sm:$0xff] %v15091_v31 }
 0x27d   :  { %v646_v56 = vld [vmem:[#allocation3 + $0xe60] sm:$0xff]  ;;  %v15100_v49 = vcombine.high %v639_v58, %v647_v15  ;;  %v15107_v16 = vcombine.low %v639_v58, %v647_v15 }
 0x27e   :  { %v15097_v41 = vcombine.high %v638_v0, %v646_v56  ;;  %v15103_v55 = vcombine.low %v638_v0, %v646_v56 }
 0x27f   :  { %5386 = vmatpush1.bf16.msra.mxu0 %v15067_v39  ;;  %5509 = vmatpush1.bf16.msra.mxu1 %v15071_v33  ;;  %18772 = vst [vmem:[#allocation494_spill] sm:$0xff] %v15100_v49  ;;  %v655_v33 = vld [vmem:[#allocation3 + $0xea8] sm:$0xff]  ;;  %18774 = vst [vmem:[#allocation496_spill] sm:$0xff] %v15107_v16 }
 0x280   :  { %5387 = vmatprep.subr.bf16.mxu0 %v15073_v46  ;;  %5510 = vmatprep.subr.bf16.mxu1 %v15076_v32  ;;  %18771 = vst [vmem:[#allocation493_spill] sm:$0xff] %v15097_v41  ;;  %v654_v32 = vld [vmem:[#allocation3 + $0xea0] sm:$0xff]  ;;  %v663_v39 = vld [vmem:[#allocation3 + $0xee8] sm:$0xff]  ;;  %18773 = vst [vmem:[#allocation495_spill] sm:$0xff] %v15103_v55 }
 0x281   :  { %v662_v46 = vld [vmem:[#allocation3 + $0xee0] sm:$0xff]  ;;  %v15112_v53 = vcombine.high %v655_v33, %v663_v39  ;;  %v15119_v15 = vcombine.low %v655_v33, %v663_v39 }
 0x282   :  { %v15109_v59 = vcombine.high %v654_v32, %v662_v46  ;;  %v15115_v56 = vcombine.low %v654_v32, %v662_v46 }
 0x283   :  { %5388 = vmatpush1.bf16.msra.mxu0 %v15079_v25  ;;  %5511 = vmatpush1.bf16.msra.mxu1 %v15083_v17  ;;  %18776 = vst [vmem:[#allocation498_spill] sm:$0xff] %v15112_v53  ;;  %v671_v17 = vld [vmem:[#allocation3 + $0xf28] sm:$0xff]  ;;  %18778 = vst [vmem:[#allocation500_spill] sm:$0xff] %v15119_v15 }
 0x284   :  { %5389 = vmatprep.subr.bf16.mxu0 %v15085_v40  ;;  %5512 = vmatprep.subr.bf16.mxu1 %v15088_v38  ;;  %18775 = vst [vmem:[#allocation497_spill] sm:$0xff] %v15109_v59  ;;  %v670_v38 = vld [vmem:[#allocation3 + $0xf20] sm:$0xff]  ;;  %v679_v25 = vld [vmem:[#allocation3 + $0xf68] sm:$0xff]  ;;  %18777 = vst [vmem:[#allocation499_spill] sm:$0xff] %v15115_v56 }
 0x285   :  { %v678_v40 = vld [vmem:[#allocation3 + $0xf60] sm:$0xff]  ;;  %v15124_v0 = vcombine.high %v671_v17, %v679_v25  ;;  %v15131_v39 = vcombine.low %v671_v17, %v679_v25 }
 0x286   :  { %v15121_v58 = vcombine.high %v670_v38, %v678_v40  ;;  %v15127_v46 = vcombine.low %v670_v38, %v678_v40 }
 0x287   :  { %5390 = vmatpush1.bf16.msra.mxu0 %v15091_v31  ;;  %5513 = vmatpush1.bf16.msra.mxu1 %v15095_v47  ;;  %18780 = vst [vmem:[#allocation502_spill] sm:$0xff] %v15124_v0  ;;  %v687_v47 = vld [vmem:[#allocation3 + $0xfa8] sm:$0xff]  ;;  %18782 = vst [vmem:[#allocation504_spill] sm:$0xff] %v15131_v39 }
 0x288   :  { %5391 = vmatprep.subr.bf16.mxu0 %v15097_v41  ;;  %5514 = vmatprep.subr.bf16.mxu1 %v15100_v49  ;;  %18779 = vst [vmem:[#allocation501_spill] sm:$0xff] %v15121_v58  ;;  %v686_v49 = vld [vmem:[#allocation3 + $0xfa0] sm:$0xff]  ;;  %v695_v31 = vld [vmem:[#allocation3 + $0xfe8] sm:$0xff]  ;;  %18781 = vst [vmem:[#allocation503_spill] sm:$0xff] %v15127_v46 }
 0x289   :  { %v694_v41 = vld [vmem:[#allocation3 + $0xfe0] sm:$0xff]  ;;  %v15136_v32 = vcombine.high %v687_v47, %v695_v31  ;;  %v15143_v25 = vcombine.low %v687_v47, %v695_v31 }
 0x28a   :  { %v15133_v33 = vcombine.high %v686_v49, %v694_v41  ;;  %v15139_v40 = vcombine.low %v686_v49, %v694_v41 }
 0x28b   :  { %5392 = vmatpush1.bf16.msra.mxu0 %v15103_v55  ;;  %5515 = vmatpush1.bf16.msra.mxu1 %v15107_v16  ;;  %18784 = vst [vmem:[#allocation506_spill] sm:$0xff] %v15136_v32  ;;  %v703_v16 = vld [vmem:[#allocation3 + $0x1028] sm:$0xff]  ;;  %18786 = vst [vmem:[#allocation508_spill] sm:$0xff] %v15143_v25 }
 0x28c   :  { %5393 = vmatprep.subr.bf16.mxu0 %v15109_v59  ;;  %5516 = vmatprep.subr.bf16.mxu1 %v15112_v53  ;;  %18783 = vst [vmem:[#allocation505_spill] sm:$0xff] %v15133_v33  ;;  %v702_v53 = vld [vmem:[#allocation3 + $0x1020] sm:$0xff]  ;;  %v711_v55 = vld [vmem:[#allocation3 + $0x1068] sm:$0xff]  ;;  %18785 = vst [vmem:[#allocation507_spill] sm:$0xff] %v15139_v40 }
 0x28d   :  { %v710_v59 = vld [vmem:[#allocation3 + $0x1060] sm:$0xff]  ;;  %v15148_v38 = vcombine.high %v703_v16, %v711_v55  ;;  %v15155_v31 = vcombine.low %v703_v16, %v711_v55 }
 0x28e   :  { %v15145_v17 = vcombine.high %v702_v53, %v710_v59  ;;  %v15151_v41 = vcombine.low %v702_v53, %v710_v59 }
 0x28f   :  { %5394 = vmatpush1.bf16.msra.mxu0 %v15115_v56  ;;  %5517 = vmatpush1.bf16.msra.mxu1 %v15119_v15  ;;  %18788 = vst [vmem:[#allocation510_spill] sm:$0xff] %v15148_v38  ;;  %v719_v15 = vld [vmem:[#allocation3 + $0x10a8] sm:$0xff]  ;;  %18790 = vst [vmem:[#allocation512_spill] sm:$0xff] %v15155_v31 }
 0x290   :  { %5395 = vmatprep.subr.bf16.mxu0 %v15121_v58  ;;  %5518 = vmatprep.subr.bf16.mxu1 %v15124_v0  ;;  %18787 = vst [vmem:[#allocation509_spill] sm:$0xff] %v15145_v17  ;;  %v718_v0 = vld [vmem:[#allocation3 + $0x10a0] sm:$0xff]  ;;  %v727_v56 = vld [vmem:[#allocation3 + $0x10e8] sm:$0xff]  ;;  %18789 = vst [vmem:[#allocation511_spill] sm:$0xff] %v15151_v41 }
 0x291   :  { %v726_v58 = vld [vmem:[#allocation3 + $0x10e0] sm:$0xff]  ;;  %v15160_v49 = vcombine.high %v719_v15, %v727_v56  ;;  %v15169_v55 = vcombine.low %v719_v15, %v727_v56 }
 0x292   :  { %v15157_v47 = vcombine.high %v718_v0, %v726_v58  ;;  %v15165_v59 = vcombine.low %v718_v0, %v726_v58 }
 0x293   :  { %5396 = vmatpush1.bf16.msra.mxu0 %v15127_v46  ;;  %5519 = vmatpush1.bf16.msra.mxu1 %v15131_v39  ;;  %18792 = vst [vmem:[#allocation514_spill] sm:$0xff] %v15160_v49  ;;  %v735_v39 = vld [vmem:[#allocation3 + $0x1128] sm:$0xff]  ;;  %18794 = vst [vmem:[#allocation516_spill] sm:$0xff] %v15169_v55 }
 0x294   :  { %5397 = vmatprep.subr.bf16.mxu0 %v15133_v33  ;;  %5520 = vmatprep.subr.bf16.mxu1 %v15136_v32  ;;  %18791 = vst [vmem:[#allocation513_spill] sm:$0xff] %v15157_v47  ;;  %v734_v32 = vld [vmem:[#allocation3 + $0x1120] sm:$0xff]  ;;  %18793 = vst [vmem:[#allocation515_spill] sm:$0xff] %v15165_v59  ;;  %v775_v46 = vld [vmem:[#allocation3 + $0x1268] sm:$0xff] }
 0x295   :  { %v742_v33 = vld [vmem:[#allocation3 + $0x1160] sm:$0xff] }
 0x296   :  { %v15171_v16 = vcombine.high %v734_v32, %v742_v33  ;;  %v15179_v58 = vcombine.low %v734_v32, %v742_v33 }
 0x297   :  { %5398 = vmatpush1.bf16.msra.mxu0 %v15139_v40  ;;  %5521 = vmatpush1.bf16.msra.mxu1 %v15143_v25  ;;  %v743_v40 = vld [vmem:[#allocation3 + $0x1168] sm:$0xff] }
 0x298   :  { %5408 = vmatprep.subr.bf16.mxu0 %v15145_v17  ;;  %5531 = vmatprep.subr.bf16.mxu1 %v15148_v38  ;;  %18795 = vst [vmem:[#allocation517_spill] sm:$0xff] %v15171_v16  ;;  %v15174_v53 = vcombine.high %v735_v39, %v743_v40  ;;  %v750_v38 = vld [vmem:[#allocation3 + $0x11a0] sm:$0xff]  ;;  %v759_v25 = vld [vmem:[#allocation3 + $0x11e8] sm:$0xff]  ;;  %18797 = vst [vmem:[#allocation519_spill] sm:$0xff] %v15179_v58  ;;  %v15183_v56 = vcombine.low %v735_v39, %v743_v40 }
 0x299   :  { %v758_v17 = vld [vmem:[#allocation3 + $0x11e0] sm:$0xff] }
 0x29a   :  { %5400 = vmatmul.mubr.bf16.vlgmr.msra.gmra.mrb[8].mxu0 %v13956_v13  ;;  %5523 = vmatmul.mubr.bf16.vlgmr.msra.gmra.mrb[8].mxu1 %v13956_v13  ;;  %18796 = vst [vmem:[#allocation518_spill] sm:$0xff] %v15174_v53  ;;  %18798 = vst [vmem:[#allocation520_spill] sm:$0xff] %v15183_v56  ;;  %v15185_v15 = vcombine.high %v750_v38, %v758_v17  ;;  %v15191_v33 = vcombine.low %v750_v38, %v758_v17 }
 0x29b   :  { %5409 = vmatpush1.bf16.msra.mxu0 %v15151_v41  ;;  %5532 = vmatpush1.bf16.msra.mxu1 %v15155_v31  ;;  %v751_v41 = vld [vmem:[#allocation3 + $0x11a8] sm:$0xff] }
 0x29c   :  { %5410 = vmatprep.subr.bf16.mxu0 %v15157_v47  ;;  %5533 = vmatprep.subr.bf16.mxu1 %v15160_v49  ;;  %18799 = vst [vmem:[#allocation521_spill] sm:$0xff] %v15185_v15  ;;  %v15188_v0 = vcombine.high %v751_v41, %v759_v25  ;;  %v766_v49 = vld [vmem:[#allocation3 + $0x1220] sm:$0xff]  ;;  %v767_v31 = vld [vmem:[#allocation3 + $0x1228] sm:$0xff]  ;;  %18801 = vst [vmem:[#allocation523_spill] sm:$0xff] %v15191_v33  ;;  %v15195_v39 = vcombine.low %v751_v41, %v759_v25 }
 0x29d   :  { %5440 = vmatprep.mubr.bf16.mxu0 %v13972_v2  ;;  %5563 = vmatprep.mubr.bf16.mxu1 %v13972_v2  ;;  %v774_v47 = vld [vmem:[#allocation3 + $0x1260] sm:$0xff]  ;;  %v15200_v40 = vcombine.high %v767_v31, %v775_v46  ;;  %v15207_v25 = vcombine.low %v767_v31, %v775_v46 }
 0x29e   :  { %18800 = vst [vmem:[#allocation522_spill] sm:$0xff] %v15188_v0  ;;  %18802 = vst [vmem:[#allocation524_spill] sm:$0xff] %v15195_v39  ;;  %v15197_v32 = vcombine.high %v766_v49, %v774_v47  ;;  %v15203_v17 = vcombine.low %v766_v49, %v774_v47 }
 0x29f   :  { %5411 = vmatpush1.bf16.msra.mxu0 %v15165_v59  ;;  %5534 = vmatpush1.bf16.msra.mxu1 %v15169_v55  ;;  %18804 = vst [vmem:[#allocation526_spill] sm:$0xff] %v15200_v40  ;;  %v783_v55 = vld [vmem:[#allocation3 + $0x12a8] sm:$0xff]  ;;  %18806 = vst [vmem:[#allocation528_spill] sm:$0xff] %v15207_v25 }
 0x2a0   :  { %5412 = vmatprep.subr.bf16.mxu0 %v15171_v16  ;;  %5535 = vmatprep.subr.bf16.mxu1 %v15174_v53  ;;  %18803 = vst [vmem:[#allocation525_spill] sm:$0xff] %v15197_v32  ;;  %v782_v53 = vld [vmem:[#allocation3 + $0x12a0] sm:$0xff]  ;;  %v791_v59 = vld [vmem:[#allocation3 + $0x12e8] sm:$0xff]  ;;  %18805 = vst [vmem:[#allocation527_spill] sm:$0xff] %v15203_v17 }
 0x2a1   :  { %v790_v16 = vld [vmem:[#allocation3 + $0x12e0] sm:$0xff]  ;;  %v15212_v41 = vcombine.high %v783_v55, %v791_v59  ;;  %v15219_v46 = vcombine.low %v783_v55, %v791_v59 }
 0x2a2   :  { %v15209_v38 = vcombine.high %v782_v53, %v790_v16  ;;  %v15215_v47 = vcombine.low %v782_v53, %v790_v16 }
 0x2a3   :  { %5413 = vmatpush1.bf16.msra.mxu0 %v15179_v58  ;;  %5536 = vmatpush1.bf16.msra.mxu1 %v15183_v56  ;;  %18808 = vst [vmem:[#allocation530_spill] sm:$0xff] %v15212_v41  ;;  %v799_v56 = vld [vmem:[#allocation3 + $0x1328] sm:$0xff]  ;;  %18810 = vst [vmem:[#allocation532_spill] sm:$0xff] %v15219_v46 }
 0x2a4   :  { %5414 = vmatprep.subr.bf16.mxu0 %v15185_v15  ;;  %5537 = vmatprep.subr.bf16.mxu1 %v15188_v0  ;;  %18807 = vst [vmem:[#allocation529_spill] sm:$0xff] %v15209_v38  ;;  %v798_v0 = vld [vmem:[#allocation3 + $0x1320] sm:$0xff]  ;;  %v807_v58 = vld [vmem:[#allocation3 + $0x1368] sm:$0xff]  ;;  %18809 = vst [vmem:[#allocation531_spill] sm:$0xff] %v15215_v47 }
 0x2a5   :  { %v806_v15 = vld [vmem:[#allocation3 + $0x1360] sm:$0xff]  ;;  %v15224_v49 = vcombine.high %v799_v56, %v807_v58  ;;  %v15231_v59 = vcombine.low %v799_v56, %v807_v58 }
 0x2a6   :  { %v15221_v31 = vcombine.high %v798_v0, %v806_v15  ;;  %v15227_v16 = vcombine.low %v798_v0, %v806_v15 }
 0x2a7   :  { %5415 = vmatpush1.bf16.msra.mxu0 %v15191_v33  ;;  %5538 = vmatpush1.bf16.msra.mxu1 %v15195_v39  ;;  %18812 = vst [vmem:[#allocation534_spill] sm:$0xff] %v15224_v49  ;;  %v815_v39 = vld [vmem:[#allocation3 + $0x13a8] sm:$0xff]  ;;  %18814 = vst [vmem:[#allocation536_spill] sm:$0xff] %v15231_v59 }
 0x2a8   :  { %5416 = vmatprep.subr.bf16.mxu0 %v15197_v32  ;;  %5539 = vmatprep.subr.bf16.mxu1 %v15200_v40  ;;  %18811 = vst [vmem:[#allocation533_spill] sm:$0xff] %v15221_v31  ;;  %v814_v40 = vld [vmem:[#allocation3 + $0x13a0] sm:$0xff]  ;;  %v823_v33 = vld [vmem:[#allocation3 + $0x13e8] sm:$0xff]  ;;  %18813 = vst [vmem:[#allocation535_spill] sm:$0xff] %v15227_v16 }
 0x2a9   :  { %v822_v32 = vld [vmem:[#allocation3 + $0x13e0] sm:$0xff]  ;;  %v15236_v53 = vcombine.high %v815_v39, %v823_v33  ;;  %v15243_v58 = vcombine.low %v815_v39, %v823_v33 }
 0x2aa   :  { %v15233_v55 = vcombine.high %v814_v40, %v822_v32  ;;  %v15239_v15 = vcombine.low %v814_v40, %v822_v32 }
 0x2ab   :  { %5417 = vmatpush1.bf16.msra.mxu0 %v15203_v17  ;;  %5540 = vmatpush1.bf16.msra.mxu1 %v15207_v25  ;;  %18816 = vst [vmem:[#allocation538_spill] sm:$0xff] %v15236_v53  ;;  %v831_v25 = vld [vmem:[#allocation3 + $0x1428] sm:$0xff]  ;;  %18818 = vst [vmem:[#allocation540_spill] sm:$0xff] %v15243_v58 }
 0x2ac   :  { %5418 = vmatprep.subr.bf16.mxu0 %v15209_v38  ;;  %5541 = vmatprep.subr.bf16.mxu1 %v15212_v41  ;;  %18815 = vst [vmem:[#allocation537_spill] sm:$0xff] %v15233_v55  ;;  %v830_v41 = vld [vmem:[#allocation3 + $0x1420] sm:$0xff]  ;;  %v839_v17 = vld [vmem:[#allocation3 + $0x1468] sm:$0xff]  ;;  %18817 = vst [vmem:[#allocation539_spill] sm:$0xff] %v15239_v15 }
 0x2ad   :  { %v838_v38 = vld [vmem:[#allocation3 + $0x1460] sm:$0xff]  ;;  %v15248_v0 = vcombine.high %v831_v25, %v839_v17  ;;  %v15255_v33 = vcombine.low %v831_v25, %v839_v17 }
 0x2ae   :  { %v15245_v56 = vcombine.high %v830_v41, %v838_v38  ;;  %v15251_v32 = vcombine.low %v830_v41, %v838_v38 }
 0x2af   :  { %5419 = vmatpush1.bf16.msra.mxu0 %v15215_v47  ;;  %5542 = vmatpush1.bf16.msra.mxu1 %v15219_v46  ;;  %18820 = vst [vmem:[#allocation542_spill] sm:$0xff] %v15248_v0  ;;  %v847_v46 = vld [vmem:[#allocation3 + $0x14a8] sm:$0xff]  ;;  %18822 = vst [vmem:[#allocation544_spill] sm:$0xff] %v15255_v33 }
 0x2b0   :  { %5420 = vmatprep.subr.bf16.mxu0 %v15221_v31  ;;  %5543 = vmatprep.subr.bf16.mxu1 %v15224_v49  ;;  %18819 = vst [vmem:[#allocation541_spill] sm:$0xff] %v15245_v56  ;;  %v846_v49 = vld [vmem:[#allocation3 + $0x14a0] sm:$0xff]  ;;  %v855_v47 = vld [vmem:[#allocation3 + $0x14e8] sm:$0xff]  ;;  %18821 = vst [vmem:[#allocation543_spill] sm:$0xff] %v15251_v32 }
 0x2b1   :  { %v854_v31 = vld [vmem:[#allocation3 + $0x14e0] sm:$0xff]  ;;  %v15260_v40 = vcombine.high %v847_v46, %v855_v47  ;;  %v15267_v17 = vcombine.low %v847_v46, %v855_v47 }
 0x2b2   :  { %v15257_v39 = vcombine.high %v846_v49, %v854_v31  ;;  %v15263_v38 = vcombine.low %v846_v49, %v854_v31 }
 0x2b3   :  { %5421 = vmatpush1.bf16.msra.mxu0 %v15227_v16  ;;  %5544 = vmatpush1.bf16.msra.mxu1 %v15231_v59  ;;  %18824 = vst [vmem:[#allocation546_spill] sm:$0xff] %v15260_v40  ;;  %v863_v59 = vld [vmem:[#allocation3 + $0x1528] sm:$0xff]  ;;  %18826 = vst [vmem:[#allocation548_spill] sm:$0xff] %v15267_v17 }
 0x2b4   :  { %5422 = vmatprep.subr.bf16.mxu0 %v15233_v55  ;;  %5545 = vmatprep.subr.bf16.mxu1 %v15236_v53  ;;  %18823 = vst [vmem:[#allocation545_spill] sm:$0xff] %v15257_v39  ;;  %v862_v53 = vld [vmem:[#allocation3 + $0x1520] sm:$0xff]  ;;  %v871_v16 = vld [vmem:[#allocation3 + $0x1568] sm:$0xff]  ;;  %18825 = vst [vmem:[#allocation547_spill] sm:$0xff] %v15263_v38 }
 0x2b5   :  { %v870_v55 = vld [vmem:[#allocation3 + $0x1560] sm:$0xff]  ;;  %v15272_v41 = vcombine.high %v863_v59, %v871_v16  ;;  %v15279_v47 = vcombine.low %v863_v59, %v871_v16 }
 0x2b6   :  { %v15269_v25 = vcombine.high %v862_v53, %v870_v55  ;;  %v15275_v31 = vcombine.low %v862_v53, %v870_v55 }
 0x2b7   :  { %5423 = vmatpush1.bf16.msra.mxu0 %v15239_v15  ;;  %5546 = vmatpush1.bf16.msra.mxu1 %v15243_v58  ;;  %18828 = vst [vmem:[#allocation550_spill] sm:$0xff] %v15272_v41  ;;  %v879_v58 = vld [vmem:[#allocation3 + $0x15a8] sm:$0xff]  ;;  %18830 = vst [vmem:[#allocation552_spill] sm:$0xff] %v15279_v47 }
 0x2b8   :  { %5424 = vmatprep.subr.bf16.mxu0 %v15245_v56  ;;  %5547 = vmatprep.subr.bf16.mxu1 %v15248_v0  ;;  %18827 = vst [vmem:[#allocation549_spill] sm:$0xff] %v15269_v25  ;;  %v878_v0 = vld [vmem:[#allocation3 + $0x15a0] sm:$0xff]  ;;  %v887_v15 = vld [vmem:[#allocation3 + $0x15e8] sm:$0xff]  ;;  %18829 = vst [vmem:[#allocation551_spill] sm:$0xff] %v15275_v31 }
 0x2b9   :  { %v886_v56 = vld [vmem:[#allocation3 + $0x15e0] sm:$0xff]  ;;  %v15284_v49 = vcombine.high %v879_v58, %v887_v15  ;;  %v15291_v16 = vcombine.low %v879_v58, %v887_v15 }
 0x2ba   :  { %v15281_v46 = vcombine.high %v878_v0, %v886_v56  ;;  %v15287_v55 = vcombine.low %v878_v0, %v886_v56 }
 0x2bb   :  { %5425 = vmatpush1.bf16.msra.mxu0 %v15251_v32  ;;  %5548 = vmatpush1.bf16.msra.mxu1 %v15255_v33  ;;  %18832 = vst [vmem:[#allocation554_spill] sm:$0xff] %v15284_v49  ;;  %v895_v33 = vld [vmem:[#allocation3 + $0x1628] sm:$0xff]  ;;  %18834 = vst [vmem:[#allocation556_spill] sm:$0xff] %v15291_v16 }
 0x2bc   :  { %5426 = vmatprep.subr.bf16.mxu0 %v15257_v39  ;;  %5549 = vmatprep.subr.bf16.mxu1 %v15260_v40  ;;  %18831 = vst [vmem:[#allocation553_spill] sm:$0xff] %v15281_v46  ;;  %v894_v40 = vld [vmem:[#allocation3 + $0x1620] sm:$0xff]  ;;  %v903_v32 = vld [vmem:[#allocation3 + $0x1668] sm:$0xff]  ;;  %18833 = vst [vmem:[#allocation555_spill] sm:$0xff] %v15287_v55 }
 0x2bd   :  { %v902_v39 = vld [vmem:[#allocation3 + $0x1660] sm:$0xff]  ;;  %v15296_v53 = vcombine.high %v895_v33, %v903_v32  ;;  %v15303_v15 = vcombine.low %v895_v33, %v903_v32 }
 0x2be   :  { %v15293_v59 = vcombine.high %v894_v40, %v902_v39  ;;  %v15299_v56 = vcombine.low %v894_v40, %v902_v39 }
 0x2bf   :  { %5427 = vmatpush1.bf16.msra.mxu0 %v15263_v38  ;;  %5550 = vmatpush1.bf16.msra.mxu1 %v15267_v17  ;;  %18836 = vst [vmem:[#allocation558_spill] sm:$0xff] %v15296_v53  ;;  %v911_v17 = vld [vmem:[#allocation3 + $0x16a8] sm:$0xff]  ;;  %18838 = vst [vmem:[#allocation560_spill] sm:$0xff] %v15303_v15 }
 0x2c0   :  { %5428 = vmatprep.subr.bf16.mxu0 %v15269_v25  ;;  %5551 = vmatprep.subr.bf16.mxu1 %v15272_v41  ;;  %18835 = vst [vmem:[#allocation557_spill] sm:$0xff] %v15293_v59  ;;  %v910_v41 = vld [vmem:[#allocation3 + $0x16a0] sm:$0xff]  ;;  %v919_v38 = vld [vmem:[#allocation3 + $0x16e8] sm:$0xff]  ;;  %18837 = vst [vmem:[#allocation559_spill] sm:$0xff] %v15299_v56 }
 0x2c1   :  { %v918_v25 = vld [vmem:[#allocation3 + $0x16e0] sm:$0xff]  ;;  %v15308_v0 = vcombine.high %v911_v17, %v919_v38  ;;  %v15315_v32 = vcombine.low %v911_v17, %v919_v38 }
 0x2c2   :  { %v15305_v58 = vcombine.high %v910_v41, %v918_v25  ;;  %v15311_v39 = vcombine.low %v910_v41, %v918_v25 }
 0x2c3   :  { %5429 = vmatpush1.bf16.msra.mxu0 %v15275_v31  ;;  %5552 = vmatpush1.bf16.msra.mxu1 %v15279_v47  ;;  %18840 = vst [vmem:[#allocation562_spill] sm:$0xff] %v15308_v0  ;;  %v927_v47 = vld [vmem:[#allocation3 + $0x1728] sm:$0xff]  ;;  %18842 = vst [vmem:[#allocation564_spill] sm:$0xff] %v15315_v32 }
 0x2c4   :  { %5430 = vmatprep.subr.bf16.mxu0 %v15281_v46  ;;  %5553 = vmatprep.subr.bf16.mxu1 %v15284_v49  ;;  %18839 = vst [vmem:[#allocation561_spill] sm:$0xff] %v15305_v58  ;;  %v926_v49 = vld [vmem:[#allocation3 + $0x1720] sm:$0xff]  ;;  %v935_v31 = vld [vmem:[#allocation3 + $0x1768] sm:$0xff]  ;;  %18841 = vst [vmem:[#allocation563_spill] sm:$0xff] %v15311_v39 }
 0x2c5   :  { %v934_v46 = vld [vmem:[#allocation3 + $0x1760] sm:$0xff]  ;;  %v15320_v40 = vcombine.high %v927_v47, %v935_v31  ;;  %v15327_v38 = vcombine.low %v927_v47, %v935_v31 }
 0x2c6   :  { %v15317_v33 = vcombine.high %v926_v49, %v934_v46  ;;  %v15323_v25 = vcombine.low %v926_v49, %v934_v46 }
 0x2c7   :  { %5431 = vmatpush1.bf16.msra.mxu0 %v15287_v55  ;;  %5554 = vmatpush1.bf16.msra.mxu1 %v15291_v16  ;;  %18844 = vst [vmem:[#allocation566_spill] sm:$0xff] %v15320_v40  ;;  %v943_v16 = vld [vmem:[#allocation3 + $0x17a8] sm:$0xff]  ;;  %18846 = vst [vmem:[#allocation568_spill] sm:$0xff] %v15327_v38 }
 0x2c8   :  { %5432 = vmatprep.subr.bf16.mxu0 %v15293_v59  ;;  %5555 = vmatprep.subr.bf16.mxu1 %v15296_v53  ;;  %18843 = vst [vmem:[#allocation565_spill] sm:$0xff] %v15317_v33  ;;  %v942_v53 = vld [vmem:[#allocation3 + $0x17a0] sm:$0xff]  ;;  %v951_v55 = vld [vmem:[#allocation3 + $0x17e8] sm:$0xff]  ;;  %18845 = vst [vmem:[#allocation567_spill] sm:$0xff] %v15323_v25 }
 0x2c9   :  { %v950_v59 = vld [vmem:[#allocation3 + $0x17e0] sm:$0xff]  ;;  %v15332_v41 = vcombine.high %v943_v16, %v951_v55  ;;  %v15339_v31 = vcombine.low %v943_v16, %v951_v55 }
 0x2ca   :  { %v15329_v17 = vcombine.high %v942_v53, %v950_v59  ;;  %v15335_v46 = vcombine.low %v942_v53, %v950_v59 }
 0x2cb   :  { %5433 = vmatpush1.bf16.msra.mxu0 %v15299_v56  ;;  %5556 = vmatpush1.bf16.msra.mxu1 %v15303_v15  ;;  %18848 = vst [vmem:[#allocation570_spill] sm:$0xff] %v15332_v41  ;;  %v193_v15 = vld [vmem:[#allocation3 + $0x38] sm:$0xff]  ;;  %18850 = vst [vmem:[#allocation572_spill] sm:$0xff] %v15339_v31 }
 0x2cc   :  { %5434 = vmatprep.subr.bf16.mxu0 %v15305_v58  ;;  %5557 = vmatprep.subr.bf16.mxu1 %v15308_v0  ;;  %18847 = vst [vmem:[#allocation569_spill] sm:$0xff] %v15329_v17  ;;  %v192_v0 = vld [vmem:[#allocation3 + $0x30] sm:$0xff]  ;;  %v201_v56 = vld [vmem:[#allocation3 + $0x78] sm:$0xff]  ;;  %18849 = vst [vmem:[#allocation571_spill] sm:$0xff] %v15335_v46 }
 0x2cd   :  { %v200_v58 = vld [vmem:[#allocation3 + $0x70] sm:$0xff]  ;;  %v15344_v49 = vcombine.high %v193_v15, %v201_v56  ;;  %v15351_v55 = vcombine.low %v193_v15, %v201_v56 }
 0x2ce   :  { %v15341_v47 = vcombine.high %v192_v0, %v200_v58  ;;  %v15347_v59 = vcombine.low %v192_v0, %v200_v58 }
 0x2cf   :  { %5435 = vmatpush1.bf16.msra.mxu0 %v15311_v39  ;;  %5558 = vmatpush1.bf16.msra.mxu1 %v15315_v32  ;;  %18852 = vst [vmem:[#allocation574_spill] sm:$0xff] %v15344_v49  ;;  %v209_v32 = vld [vmem:[#allocation3 + $0xb8] sm:$0xff]  ;;  %18854 = vst [vmem:[#allocation576_spill] sm:$0xff] %v15351_v55 }
 0x2d0   :  { %5436 = vmatprep.subr.bf16.mxu0 %v15317_v33  ;;  %5559 = vmatprep.subr.bf16.mxu1 %v15320_v40  ;;  %18851 = vst [vmem:[#allocation573_spill] sm:$0xff] %v15341_v47  ;;  %v208_v40 = vld [vmem:[#allocation3 + $0xb0] sm:$0xff]  ;;  %v217_v39 = vld [vmem:[#allocation3 + $0xf8] sm:$0xff]  ;;  %18853 = vst [vmem:[#allocation575_spill] sm:$0xff] %v15347_v59 }
 0x2d1   :  { %v216_v33 = vld [vmem:[#allocation3 + $0xf0] sm:$0xff]  ;;  %v15356_v53 = vcombine.high %v209_v32, %v217_v39  ;;  %v15365_v56 = vcombine.low %v209_v32, %v217_v39 }
 0x2d2   :  { %v15353_v16 = vcombine.high %v208_v40, %v216_v33  ;;  %v15361_v58 = vcombine.low %v208_v40, %v216_v33 }
 0x2d3   :  { %5437 = vmatpush1.bf16.msra.mxu0 %v15323_v25  ;;  %5560 = vmatpush1.bf16.msra.mxu1 %v15327_v38  ;;  %18856 = vst [vmem:[#allocation578_spill] sm:$0xff] %v15356_v53  ;;  %v225_v38 = vld [vmem:[#allocation3 + $0x138] sm:$0xff]  ;;  %18858 = vst [vmem:[#allocation580_spill] sm:$0xff] %v15365_v56 }
 0x2d4   :  { %5438 = vmatprep.subr.bf16.mxu0 %v15329_v17  ;;  %5561 = vmatprep.subr.bf16.mxu1 %v15332_v41  ;;  %18855 = vst [vmem:[#allocation577_spill] sm:$0xff] %v15353_v16  ;;  %v224_v41 = vld [vmem:[#allocation3 + $0x130] sm:$0xff]  ;;  %18857 = vst [vmem:[#allocation579_spill] sm:$0xff] %v15361_v58 }
 0x2d5   :  { %v232_v17 = vld [vmem:[#allocation3 + $0x170] sm:$0xff] }
 0x2d6   :  { %v15367_v15 = vcombine.high %v224_v41, %v232_v17  ;;  %v15375_v33 = vcombine.low %v224_v41, %v232_v17 }
 0x2d7   :  { %5439 = vmatpush1.bf16.msra.mxu0 %v15335_v46  ;;  %5562 = vmatpush1.bf16.msra.mxu1 %v15339_v31  ;;  %v233_v46 = vld [vmem:[#allocation3 + $0x178] sm:$0xff] }
 0x2d8   :  { %5572 = vmatprep.subr.bf16.mxu0 %v15341_v47  ;;  %5695 = vmatprep.subr.bf16.mxu1 %v15344_v49  ;;  %18859 = vst [vmem:[#allocation581_spill] sm:$0xff] %v15367_v15  ;;  %v15370_v0 = vcombine.high %v225_v38, %v233_v46  ;;  %v240_v49 = vld [vmem:[#allocation3 + $0x1b0] sm:$0xff]  ;;  %v241_v31 = vld [vmem:[#allocation3 + $0x1b8] sm:$0xff]  ;;  %18861 = vst [vmem:[#allocation583_spill] sm:$0xff] %v15375_v33  ;;  %v15379_v39 = vcombine.low %v225_v38, %v233_v46 }
 0x2d9   :  { %v248_v47 = vld [vmem:[#allocation3 + $0x1f0] sm:$0xff] }
 0x2da   :  { %5441 = vmatmul.mubr.bf16.vlgmr.msra.gmra.mrb[8].mxu0 %v14160_v4  ;;  %5564 = vmatmul.mubr.bf16.vlgmr.msra.gmra.mrb[8].mxu1 %v14160_v4  ;;  %18860 = vst [vmem:[#allocation582_spill] sm:$0xff] %v15370_v0  ;;  %18862 = vst [vmem:[#allocation584_spill] sm:$0xff] %v15379_v39  ;;  %v15381_v32 = vcombine.high %v240_v49, %v248_v47  ;;  %v15387_v17 = vcombine.low %v240_v49, %v248_v47 }
 0x2db   :  { %5573 = vmatpush1.bf16.msra.mxu0 %v15347_v59  ;;  %5696 = vmatpush1.bf16.msra.mxu1 %v15351_v55  ;;  %v249_v59 = vld [vmem:[#allocation3 + $0x1f8] sm:$0xff] }
 0x2dc   :  { %5574 = vmatprep.subr.bf16.mxu0 %v15353_v16  ;;  %5697 = vmatprep.subr.bf16.mxu1 %v15356_v53  ;;  %18863 = vst [vmem:[#allocation585_spill] sm:$0xff] %v15381_v32  ;;  %v15384_v40 = vcombine.high %v241_v31, %v249_v59  ;;  %v256_v53 = vld [vmem:[#allocation3 + $0x230] sm:$0xff]  ;;  %v257_v55 = vld [vmem:[#allocation3 + $0x238] sm:$0xff]  ;;  %18865 = vst [vmem:[#allocation587_spill] sm:$0xff] %v15387_v17  ;;  %v15391_v38 = vcombine.low %v241_v31, %v249_v59 }
 0x2dd   :  { %5604 = vmatprep.mubr.bf16.mxu0 %v13616_v57  ;;  %5727 = vmatprep.mubr.bf16.mxu1 %v13616_v57  ;;  %v264_v16 = vld [vmem:[#allocation3 + $0x270] sm:$0xff]  ;;  %v265_v57 = vld [vmem:[#allocation3 + $0x278] sm:$0xff] }
 0x2de   :  { %18864 = vst [vmem:[#allocation586_spill] sm:$0xff] %v15384_v40  ;;  %18866 = vst [vmem:[#allocation588_spill] sm:$0xff] %v15391_v38  ;;  %v15393_v41 = vcombine.high %v256_v53, %v264_v16  ;;  %v15396_v46 = vcombine.high %v257_v55, %v265_v57  ;;  %v15399_v47 = vcombine.low %v256_v53, %v264_v16 }
 0x2df   :  { %5575 = vmatpush1.bf16.msra.mxu0 %v15361_v58  ;;  %5698 = vmatpush1.bf16.msra.mxu1 %v15365_v56  ;;  %v273_v56 = vld [vmem:[#allocation3 + $0x2b8] sm:$0xff]  ;;  %v15403_v31 = vcombine.low %v257_v55, %v265_v57 }
 0x2e0   :  { %5576 = vmatprep.subr.bf16.mxu0 %v15367_v15  ;;  %5699 = vmatprep.subr.bf16.mxu1 %v15370_v0  ;;  %18867 = vst [vmem:[#allocation589_spill] sm:$0xff] %v15393_v41  ;;  %18868 = vst [vmem:[#allocation590_spill] sm:$0xff] %v15396_v46  ;;  %v272_v0 = vld [vmem:[#allocation3 + $0x2b0] sm:$0xff]  ;;  %v281_v58 = vld [vmem:[#allocation3 + $0x2f8] sm:$0xff] }
 0x2e1   :  { %v280_v15 = vld [vmem:[#allocation3 + $0x2f0] sm:$0xff]  ;;  %18869 = vst [vmem:[#allocation591_spill] sm:$0xff] %v15399_v47  ;;  %18870 = vst [vmem:[#allocation592_spill] sm:$0xff] %v15403_v31  ;;  %v15408_v59 = vcombine.high %v273_v56, %v281_v58  ;;  %v15415_v55 = vcombine.low %v273_v56, %v281_v58 }
 0x2e2   :  { %v15405_v49 = vcombine.high %v272_v0, %v280_v15  ;;  %v15411_v16 = vcombine.low %v272_v0, %v280_v15  ;;  %v305_v0 = vld [vmem:[#allocation3 + $0x3b8] sm:$0xff] }
 0x2e3   :  { %5577 = vmatpush1.bf16.msra.mxu0 %v15375_v33  ;;  %5700 = vmatpush1.bf16.msra.mxu1 %v15379_v39  ;;  %18872 = vst [vmem:[#allocation594_spill] sm:$0xff] %v15408_v59  ;;  %v289_v39 = vld [vmem:[#allocation3 + $0x338] sm:$0xff] }
 0x2e4   :  { %5578 = vmatprep.subr.bf16.mxu0 %v15381_v32  ;;  %5701 = vmatprep.subr.bf16.mxu1 %v15384_v40  ;;  %18871 = vst [vmem:[#allocation593_spill] sm:$0xff] %v15405_v49  ;;  %v288_v40 = vld [vmem:[#allocation3 + $0x330] sm:$0xff]  ;;  %v297_v33 = vld [vmem:[#allocation3 + $0x378] sm:$0xff]  ;;  %18873 = vst [vmem:[#allocation595_spill] sm:$0xff] %v15411_v16 }
 0x2e5   :  { %v296_v32 = vld [vmem:[#allocation3 + $0x370] sm:$0xff] }
 0x2e6   :  { %v15417_v53 = vcombine.high %v288_v40, %v296_v32  ;;  %v15431_v56 = vcombine.low %v288_v40, %v296_v32  ;;  %v329_v32 = vld [vmem:[#allocation3 + $0x478] sm:$0xff] }
 0x2e7   :  { %5579 = vmatpush1.bf16.msra.mxu0 %v15387_v17  ;;  %5702 = vmatpush1.bf16.msra.mxu1 %v15391_v38  ;;  %v312_v38 = vld [vmem:[#allocation3 + $0x3f0] sm:$0xff] }
 0x2e8   :  { %5580 = vmatprep.subr.bf16.mxu0 %v15393_v41  ;;  %5703 = vmatprep.subr.bf16.mxu1 %v15396_v46  ;;  %18874 = vst [vmem:[#allocation596_spill] sm:$0xff] %v15417_v53  ;;  %v15422_v46 = vcombine.high %v289_v39, %v297_v33  ;;  %v304_v41 = vld [vmem:[#allocation3 + $0x3b0] sm:$0xff]  ;;  %18880 = vst [vmem:[#allocation602_spill] sm:$0xff] %v15431_v56 }
 0x2e9   :  { %v15443_v40 = vcombine.low %v304_v41, %v312_v38 }
 0x2ea   :  { %18876 = vst [vmem:[#allocation598_spill] sm:$0xff] %v15422_v46 }
 0x2eb   :  { %5581 = vmatpush1.bf16.msra.mxu0 %v15399_v47  ;;  %5704 = vmatpush1.bf16.msra.mxu1 %v15403_v31  ;;  %v313_v31 = vld [vmem:[#allocation3 + $0x3f8] sm:$0xff]  ;;  %18884 = vst [vmem:[#allocation606_spill] sm:$0xff] %v15443_v40 }
 0x2ec   :  { %5582 = vmatprep.subr.bf16.mxu0 %v15405_v49  ;;  %5705 = vmatprep.subr.bf16.mxu1 %v15408_v59  ;;  %v15435_v49 = vcombine.low %v289_v39, %v297_v33  ;;  %v15440_v25 = vcombine.high %v305_v0, %v313_v31  ;;  %v15447_v33 = vcombine.low %v305_v0, %v313_v31 }
 0x2ed   :  { %v15419_v57 = vpop.f32.mrb[4].mxu0  ;;  %v15424_v17 = vpop.f32.mrb[4].mxu1 }
 0x2ee   :  { %18875 = vst [vmem:[#allocation597_spill] sm:$0xff] %v15419_v57  ;;  %18877 = vst [vmem:[#allocation599_spill] sm:$0xff] %v15424_v17  ;;  %v15426_v15 = vpop.f32.mrb[5].mxu0  ;;  %v15428_v47 = vpop.f32.mrb[5].mxu1  ;;  %v15437_v17 = vcombine.high %v304_v41, %v312_v38 }
 0x2ef   :  { %18878 = vst [vmem:[#allocation600_spill] sm:$0xff] %v15426_v15  ;;  %18879 = vst [vmem:[#allocation601_spill] sm:$0xff] %v15428_v47  ;;  %v5200_v58 = vpop.f32.mrb[6].mxu0  ;;  %5583 = vmatpush1.bf16.msra.mxu0 %v15411_v16  ;;  %v5323_v57 = vpop.f32.mrb[6].mxu1  ;;  %5706 = vmatpush1.bf16.msra.mxu1 %v15415_v55  ;;  %v328_v47 = vld [vmem:[#allocation3 + $0x470] sm:$0xff]  ;;  %v321_v16 = vld [vmem:[#allocation3 + $0x438] sm:$0xff] }
 0x2f0   :  { %v5201_v59 = vpop.f32.mrb[7].mxu0  ;;  %5584 = vmatprep.subr.bf16.mxu0 %v15417_v53  ;;  %18881 = vst [vmem:[#allocation603_spill] sm:$0xff] %v15435_v49  ;;  %18882 = vst [vmem:[#allocation604_spill] sm:$0xff] %v15437_v17  ;;  %v5324_v15 = vpop.f32.mrb[7].mxu1  ;;  %5707 = vmatprep.subr.bf16.mxu1 %v15422_v46  ;;  %v320_v58 = vld [vmem:[#allocation3 + $0x430] sm:$0xff]  ;;  %v337_v46 = vld [vmem:[#allocation3 + $0x4b8] sm:$0xff]  ;;  %v15459_v41 = vcombine.low %v321_v16, %v329_v32 }
 0x2f1   :  { %18883 = vst [vmem:[#allocation605_spill] sm:$0xff] %v15440_v25  ;;  %18885 = vst [vmem:[#allocation607_spill] sm:$0xff] %v15447_v33  ;;  %v15449_v39 = vcombine.high %v320_v58, %v328_v47  ;;  %v15452_v59 = vcombine.high %v321_v16, %v329_v32  ;;  %v336_v57 = vld [vmem:[#allocation3 + $0x4b0] sm:$0xff]  ;;  %v345_v53 = vld [vmem:[#allocation3 + $0x4f8] sm:$0xff]  ;;  %v15455_v38 = vcombine.low %v320_v58, %v328_v47 }
 0x2f2   :  { %v344_v15 = vld [vmem:[#allocation3 + $0x4f0] sm:$0xff]  ;;  %18889 = vst [vmem:[#allocation611_spill] sm:$0xff] %v15459_v41  ;;  %v15464_v0 = vcombine.high %v337_v46, %v345_v53  ;;  %v15471_v16 = vcombine.low %v337_v46, %v345_v53 }
 0x2f3   :  { %5585 = vmatpush1.bf16.msra.mxu0 %v15431_v56  ;;  %5708 = vmatpush1.bf16.msra.mxu1 %v15435_v49  ;;  %18886 = vst [vmem:[#allocation608_spill] sm:$0xff] %v15449_v39  ;;  %18887 = vst [vmem:[#allocation609_spill] sm:$0xff] %v15452_v59  ;;  %v15461_v31 = vcombine.high %v336_v57, %v344_v15  ;;  %v353_v49 = vld [vmem:[#allocation3 + $0x538] sm:$0xff]  ;;  %v15467_v47 = vcombine.low %v336_v57, %v344_v15 }
 0x2f4   :  { %5586 = vmatprep.subr.bf16.mxu0 %v15437_v17  ;;  %5709 = vmatprep.subr.bf16.mxu1 %v15440_v25  ;;  %18888 = vst [vmem:[#allocation610_spill] sm:$0xff] %v15455_v38  ;;  %18891 = vst [vmem:[#allocation613_spill] sm:$0xff] %v15464_v0  ;;  %v352_v25 = vld [vmem:[#allocation3 + $0x530] sm:$0xff]  ;;  %v361_v56 = vld [vmem:[#allocation3 + $0x578] sm:$0xff] }
 0x2f5   :  { %18890 = vst [vmem:[#allocation612_spill] sm:$0xff] %v15461_v31  ;;  %v360_v17 = vld [vmem:[#allocation3 + $0x570] sm:$0xff]  ;;  %18892 = vst [vmem:[#allocation614_spill] sm:$0xff] %v15467_v47  ;;  %v15476_v32 = vcombine.high %v353_v49, %v361_v56  ;;  %v15483_v46 = vcombine.low %v353_v49, %v361_v56 }
 0x2f6   :  { %18893 = vst [vmem:[#allocation615_spill] sm:$0xff] %v15471_v16  ;;  %v15473_v58 = vcombine.high %v352_v25, %v360_v17  ;;  %v15479_v57 = vcombine.low %v352_v25, %v360_v17 }
 0x2f7   :  { %5587 = vmatpush1.bf16.msra.mxu0 %v15443_v40  ;;  %5710 = vmatpush1.bf16.msra.mxu1 %v15447_v33  ;;  %18895 = vst [vmem:[#allocation617_spill] sm:$0xff] %v15476_v32  ;;  %v369_v33 = vld [vmem:[#allocation3 + $0x5b8] sm:$0xff]  ;;  %18897 = vst [vmem:[#allocation619_spill] sm:$0xff] %v15483_v46 }
 0x2f8   :  { %5588 = vmatprep.subr.bf16.mxu0 %v15449_v39  ;;  %5711 = vmatprep.subr.bf16.mxu1 %v15452_v59  ;;  %18894 = vst [vmem:[#allocation616_spill] sm:$0xff] %v15473_v58  ;;  %v368_v59 = vld [vmem:[#allocation3 + $0x5b0] sm:$0xff]  ;;  %v377_v40 = vld [vmem:[#allocation3 + $0x5f8] sm:$0xff]  ;;  %18896 = vst [vmem:[#allocation618_spill] sm:$0xff] %v15479_v57 }
 0x2f9   :  { %v376_v39 = vld [vmem:[#allocation3 + $0x5f0] sm:$0xff]  ;;  %v15488_v15 = vcombine.high %v369_v33, %v377_v40  ;;  %v15495_v17 = vcombine.low %v369_v33, %v377_v40 }
 0x2fa   :  { %v15485_v53 = vcombine.high %v368_v59, %v376_v39  ;;  %v15491_v25 = vcombine.low %v368_v59, %v376_v39 }
 0x2fb   :  { %5589 = vmatpush1.bf16.msra.mxu0 %v15455_v38  ;;  %5712 = vmatpush1.bf16.msra.mxu1 %v15459_v41  ;;  %18899 = vst [vmem:[#allocation621_spill] sm:$0xff] %v15488_v15  ;;  %v385_v41 = vld [vmem:[#allocation3 + $0x638] sm:$0xff]  ;;  %18901 = vst [vmem:[#allocation623_spill] sm:$0xff] %v15495_v17 }
 0x2fc   :  { %5590 = vmatprep.subr.bf16.mxu0 %v15461_v31  ;;  %5713 = vmatprep.subr.bf16.mxu1 %v15464_v0  ;;  %18898 = vst [vmem:[#allocation620_spill] sm:$0xff] %v15485_v53  ;;  %v384_v0 = vld [vmem:[#allocation3 + $0x630] sm:$0xff]  ;;  %v393_v38 = vld [vmem:[#allocation3 + $0x678] sm:$0xff]  ;;  %18900 = vst [vmem:[#allocation622_spill] sm:$0xff] %v15491_v25 }
 0x2fd   :  { %v392_v31 = vld [vmem:[#allocation3 + $0x670] sm:$0xff]  ;;  %v15500_v56 = vcombine.high %v385_v41, %v393_v38  ;;  %v15507_v40 = vcombine.low %v385_v41, %v393_v38 }
 0x2fe   :  { %v15497_v49 = vcombine.high %v384_v0, %v392_v31  ;;  %v15503_v39 = vcombine.low %v384_v0, %v392_v31 }
 0x2ff   :  { %5591 = vmatpush1.bf16.msra.mxu0 %v15467_v47  ;;  %5714 = vmatpush1.bf16.msra.mxu1 %v15471_v16  ;;  %18903 = vst [vmem:[#allocation625_spill] sm:$0xff] %v15500_v56  ;;  %v401_v16 = vld [vmem:[#allocation3 + $0x6b8] sm:$0xff]  ;;  %18905 = vst [vmem:[#allocation627_spill] sm:$0xff] %v15507_v40 }
 0x300   :  { %5592 = vmatprep.subr.bf16.mxu0 %v15473_v58  ;;  %5715 = vmatprep.subr.bf16.mxu1 %v15476_v32  ;;  %18902 = vst [vmem:[#allocation624_spill] sm:$0xff] %v15497_v49  ;;  %v400_v32 = vld [vmem:[#allocation3 + $0x6b0] sm:$0xff]  ;;  %v409_v47 = vld [vmem:[#allocation3 + $0x6f8] sm:$0xff]  ;;  %18904 = vst [vmem:[#allocation626_spill] sm:$0xff] %v15503_v39 }
 0x301   :  { %v408_v58 = vld [vmem:[#allocation3 + $0x6f0] sm:$0xff]  ;;  %v15512_v59 = vcombine.high %v401_v16, %v409_v47  ;;  %v15519_v38 = vcombine.low %v401_v16, %v409_v47 }
 0x302   :  { %v15509_v33 = vcombine.high %v400_v32, %v408_v58  ;;  %v15515_v31 = vcombine.low %v400_v32, %v408_v58 }
 0x303   :  { %5593 = vmatpush1.bf16.msra.mxu0 %v15479_v57  ;;  %5716 = vmatpush1.bf16.msra.mxu1 %v15483_v46  ;;  %18907 = vst [vmem:[#allocation629_spill] sm:$0xff] %v15512_v59  ;;  %v417_v46 = vld [vmem:[#allocation3 + $0x738] sm:$0xff]  ;;  %18909 = vst [vmem:[#allocation631_spill] sm:$0xff] %v15519_v38 }
 0x304   :  { %5594 = vmatprep.subr.bf16.mxu0 %v15485_v53  ;;  %5717 = vmatprep.subr.bf16.mxu1 %v15488_v15  ;;  %18906 = vst [vmem:[#allocation628_spill] sm:$0xff] %v15509_v33  ;;  %v416_v15 = vld [vmem:[#allocation3 + $0x730] sm:$0xff]  ;;  %v425_v57 = vld [vmem:[#allocation3 + $0x778] sm:$0xff]  ;;  %18908 = vst [vmem:[#allocation630_spill] sm:$0xff] %v15515_v31 }
 0x305   :  { %v424_v53 = vld [vmem:[#allocation3 + $0x770] sm:$0xff]  ;;  %v15524_v0 = vcombine.high %v417_v46, %v425_v57  ;;  %v15531_v47 = vcombine.low %v417_v46, %v425_v57 }
 0x306   :  { %v15521_v41 = vcombine.high %v416_v15, %v424_v53  ;;  %v15527_v58 = vcombine.low %v416_v15, %v424_v53 }
 0x307   :  { %5595 = vmatpush1.bf16.msra.mxu0 %v15491_v25  ;;  %5718 = vmatpush1.bf16.msra.mxu1 %v15495_v17  ;;  %18911 = vst [vmem:[#allocation633_spill] sm:$0xff] %v15524_v0  ;;  %v433_v17 = vld [vmem:[#allocation3 + $0x7b8] sm:$0xff]  ;;  %18912 = vst [vmem:[#allocation634_spill] sm:$0xff] %v15531_v47 }
 0x308   :  { %5596 = vmatprep.subr.bf16.mxu0 %v15497_v49  ;;  %5719 = vmatprep.subr.bf16.mxu1 %v15500_v56  ;;  %18910 = vst [vmem:[#allocation632_spill] sm:$0xff] %v15521_v41  ;;  %v432_v56 = vld [vmem:[#allocation3 + $0x7b0] sm:$0xff]  ;;  %v441_v25 = vld [vmem:[#allocation3 + $0x7f8] sm:$0xff] }
 0x309   :  { %v440_v49 = vld [vmem:[#allocation3 + $0x7f0] sm:$0xff]  ;;  %v15536_v32 = vcombine.high %v433_v17, %v441_v25  ;;  %v15543_v57 = vcombine.low %v433_v17, %v441_v25 }
 0x30a   :  { %v15533_v16 = vcombine.high %v432_v56, %v440_v49  ;;  %v15539_v53 = vcombine.low %v432_v56, %v440_v49 }
 0x30b   :  { %5597 = vmatpush1.bf16.msra.mxu0 %v15503_v39  ;;  %5720 = vmatpush1.bf16.msra.mxu1 %v15507_v40  ;;  %18914 = vst [vmem:[#allocation636_spill] sm:$0xff] %v15536_v32  ;;  %v449_v40 = vld [vmem:[#allocation3 + $0x838] sm:$0xff] }
 0x30c   :  { %5598 = vmatprep.subr.bf16.mxu0 %v15509_v33  ;;  %5721 = vmatprep.subr.bf16.mxu1 %v15512_v59  ;;  %18913 = vst [vmem:[#allocation635_spill] sm:$0xff] %v15533_v16  ;;  %v448_v59 = vld [vmem:[#allocation3 + $0x830] sm:$0xff]  ;;  %v457_v39 = vld [vmem:[#allocation3 + $0x878] sm:$0xff]  ;;  %18915 = vst [vmem:[#allocation637_spill] sm:$0xff] %v15539_v53 }
 0x30d   :  { %v456_v33 = vld [vmem:[#allocation3 + $0x870] sm:$0xff]  ;;  %v15548_v15 = vcombine.high %v449_v40, %v457_v39  ;;  %v15555_v25 = vcombine.low %v449_v40, %v457_v39 }
 0x30e   :  { %v15545_v46 = vcombine.high %v448_v59, %v456_v33  ;;  %v15551_v49 = vcombine.low %v448_v59, %v456_v33 }
 0x30f   :  { %5599 = vmatpush1.bf16.msra.mxu0 %v15515_v31  ;;  %5722 = vmatpush1.bf16.msra.mxu1 %v15519_v38  ;;  %18917 = vst [vmem:[#allocation639_spill] sm:$0xff] %v15548_v15  ;;  %v465_v38 = vld [vmem:[#allocation3 + $0x8b8] sm:$0xff]  ;;  %18919 = vst [vmem:[#allocation641_spill] sm:$0xff] %v15555_v25 }
 0x310   :  { %5600 = vmatprep.subr.bf16.mxu0 %v15521_v41  ;;  %5723 = vmatprep.subr.bf16.mxu1 %v15524_v0  ;;  %18916 = vst [vmem:[#allocation638_spill] sm:$0xff] %v15545_v46  ;;  %v464_v0 = vld [vmem:[#allocation3 + $0x8b0] sm:$0xff]  ;;  %v473_v31 = vld [vmem:[#allocation3 + $0x8f8] sm:$0xff]  ;;  %18918 = vst [vmem:[#allocation640_spill] sm:$0xff] %v15551_v49 }
 0x311   :  { %v472_v41 = vld [vmem:[#allocation3 + $0x8f0] sm:$0xff]  ;;  %v15560_v56 = vcombine.high %v465_v38, %v473_v31  ;;  %v15569_v39 = vcombine.low %v465_v38, %v473_v31 }
 0x312   :  { %v15557_v17 = vcombine.high %v464_v0, %v472_v41  ;;  %v15565_v33 = vcombine.low %v464_v0, %v472_v41 }
 0x313   :  { %5601 = vmatpush1.bf16.msra.mxu0 %v15527_v58  ;;  %5724 = vmatpush1.bf16.msra.mxu1 %v15531_v47  ;;  %18921 = vst [vmem:[#allocation643_spill] sm:$0xff] %v15560_v56  ;;  %v481_v47 = vld [vmem:[#allocation3 + $0x938] sm:$0xff]  ;;  %18923 = vst [vmem:[#allocation645_spill] sm:$0xff] %v15569_v39 }
 0x314   :  { %5602 = vmatprep.subr.bf16.mxu0 %v15533_v16  ;;  %5725 = vmatprep.subr.bf16.mxu1 %v15536_v32  ;;  %18920 = vst [vmem:[#allocation642_spill] sm:$0xff] %v15557_v17  ;;  %v480_v32 = vld [vmem:[#allocation3 + $0x930] sm:$0xff]  ;;  %18922 = vst [vmem:[#allocation644_spill] sm:$0xff] %v15565_v33 }
 0x315   :  { %v488_v16 = vld [vmem:[#allocation3 + $0x970] sm:$0xff] }
 0x316   :  { %v15571_v40 = vcombine.high %v480_v32, %v488_v16  ;;  %v15579_v41 = vcombine.low %v480_v32, %v488_v16 }
 0x317   :  { %5603 = vmatpush1.bf16.msra.mxu0 %v15539_v53  ;;  %5726 = vmatpush1.bf16.msra.mxu1 %v15543_v57  ;;  %v489_v53 = vld [vmem:[#allocation3 + $0x978] sm:$0xff] }
 0x318   :  { %5613 = vmatprep.subr.bf16.mxu0 %v15545_v46  ;;  %5736 = vmatprep.subr.bf16.mxu1 %v15548_v15  ;;  %18924 = vst [vmem:[#allocation646_spill] sm:$0xff] %v15571_v40  ;;  %v15574_v59 = vcombine.high %v481_v47, %v489_v53  ;;  %v496_v15 = vld [vmem:[#allocation3 + $0x9b0] sm:$0xff]  ;;  %18926 = vst [vmem:[#allocation648_spill] sm:$0xff] %v15579_v41  ;;  %v15583_v31 = vcombine.low %v481_v47, %v489_v53 }
 0x319   :  { %v504_v46 = vld [vmem:[#allocation3 + $0x9f0] sm:$0xff] }
 0x31a   :  { %5605 = vmatmul.mubr.bf16.vlgmr.msra.gmra.mrb[12].mxu0 %v13742_v1  ;;  %5728 = vmatmul.mubr.bf16.vlgmr.msra.gmra.mrb[12].mxu1 %v13742_v1  ;;  %18925 = vst [vmem:[#allocation647_spill] sm:$0xff] %v15574_v59  ;;  %v505_v1 = vld [vmem:[#allocation3 + $0x9f8] sm:$0xff]  ;;  %18927 = vst [vmem:[#allocation649_spill] sm:$0xff] %v15583_v31  ;;  %v15585_v38 = vcombine.high %v496_v15, %v504_v46  ;;  %v15591_v16 = vcombine.low %v496_v15, %v504_v46 }
 0x31b   :  { %5614 = vmatpush1.bf16.msra.mxu0 %v15551_v49  ;;  %5737 = vmatpush1.bf16.msra.mxu1 %v15555_v25  ;;  %v497_v49 = vld [vmem:[#allocation3 + $0x9b8] sm:$0xff] }
 0x31c   :  { %5615 = vmatprep.subr.bf16.mxu0 %v15557_v17  ;;  %5738 = vmatprep.subr.bf16.mxu1 %v15560_v56  ;;  %18928 = vst [vmem:[#allocation650_spill] sm:$0xff] %v15585_v38  ;;  %v15588_v0 = vcombine.high %v497_v49, %v505_v1  ;;  %v512_v56 = vld [vmem:[#allocation3 + $0xa30] sm:$0xff]  ;;  %v513_v25 = vld [vmem:[#allocation3 + $0xa38] sm:$0xff]  ;;  %18930 = vst [vmem:[#allocation652_spill] sm:$0xff] %v15591_v16  ;;  %v15595_v47 = vcombine.low %v497_v49, %v505_v1 }
 0x31d   :  { %5645 = vmatprep.mubr.bf16.mxu0 %v13763_v48  ;;  %5768 = vmatprep.mubr.bf16.mxu1 %v13763_v48  ;;  %v520_v17 = vld [vmem:[#allocation3 + $0xa70] sm:$0xff]  ;;  %v521_v48 = vld [vmem:[#allocation3 + $0xa78] sm:$0xff] }
 0x31e   :  { %18929 = vst [vmem:[#allocation651_spill] sm:$0xff] %v15588_v0  ;;  %18931 = vst [vmem:[#allocation653_spill] sm:$0xff] %v15595_v47  ;;  %v15597_v32 = vcombine.high %v512_v56, %v520_v17  ;;  %v15600_v53 = vcombine.high %v513_v25, %v521_v48  ;;  %v15603_v46 = vcombine.low %v512_v56, %v520_v17 }
 0x31f   :  { %5616 = vmatpush1.bf16.msra.mxu0 %v15565_v33  ;;  %5739 = vmatpush1.bf16.msra.mxu1 %v15569_v39  ;;  %v529_v39 = vld [vmem:[#allocation3 + $0xab8] sm:$0xff]  ;;  %v15607_v15 = vcombine.low %v513_v25, %v521_v48 }
 0x320   :  { %5617 = vmatprep.subr.bf16.mxu0 %v15571_v40  ;;  %5740 = vmatprep.subr.bf16.mxu1 %v15574_v59  ;;  %18932 = vst [vmem:[#allocation654_spill] sm:$0xff] %v15597_v32  ;;  %18933 = vst [vmem:[#allocation655_spill] sm:$0xff] %v15600_v53  ;;  %v528_v59 = vld [vmem:[#allocation3 + $0xab0] sm:$0xff]  ;;  %v537_v33 = vld [vmem:[#allocation3 + $0xaf8] sm:$0xff] }
 0x321   :  { %v536_v40 = vld [vmem:[#allocation3 + $0xaf0] sm:$0xff]  ;;  %18934 = vst [vmem:[#allocation656_spill] sm:$0xff] %v15603_v46  ;;  %18935 = vst [vmem:[#allocation657_spill] sm:$0xff] %v15607_v15  ;;  %v15612_v1 = vcombine.high %v529_v39, %v537_v33  ;;  %v15619_v25 = vcombine.low %v529_v39, %v537_v33 }
 0x322   :  { %v15609_v49 = vcombine.high %v528_v59, %v536_v40  ;;  %v15615_v17 = vcombine.low %v528_v59, %v536_v40 }
 0x323   :  { %5618 = vmatpush1.bf16.msra.mxu0 %v15579_v41  ;;  %5741 = vmatpush1.bf16.msra.mxu1 %v15583_v31  ;;  %18937 = vst [vmem:[#allocation659_spill] sm:$0xff] %v15612_v1  ;;  %v545_v31 = vld [vmem:[#allocation3 + $0xb38] sm:$0xff]  ;;  %18939 = vst [vmem:[#allocation661_spill] sm:$0xff] %v15619_v25 }
 0x324   :  { %5619 = vmatprep.subr.bf16.mxu0 %v15585_v38  ;;  %5742 = vmatprep.subr.bf16.mxu1 %v15588_v0  ;;  %18936 = vst [vmem:[#allocation658_spill] sm:$0xff] %v15609_v49  ;;  %v544_v0 = vld [vmem:[#allocation3 + $0xb30] sm:$0xff]  ;;  %v553_v41 = vld [vmem:[#allocation3 + $0xb78] sm:$0xff]  ;;  %18938 = vst [vmem:[#allocation660_spill] sm:$0xff] %v15615_v17 }
 0x325   :  { %v552_v38 = vld [vmem:[#allocation3 + $0xb70] sm:$0xff]  ;;  %v15624_v48 = vcombine.high %v545_v31, %v553_v41  ;;  %v15631_v33 = vcombine.low %v545_v31, %v553_v41 }
 0x326   :  { %v15621_v56 = vcombine.high %v544_v0, %v552_v38  ;;  %v15627_v40 = vcombine.low %v544_v0, %v552_v38 }
 0x327   :  { %5620 = vmatpush1.bf16.msra.mxu0 %v15591_v16  ;;  %5743 = vmatpush1.bf16.msra.mxu1 %v15595_v47  ;;  %18941 = vst [vmem:[#allocation663_spill] sm:$0xff] %v15624_v48  ;;  %v561_v47 = vld [vmem:[#allocation3 + $0xbb8] sm:$0xff]  ;;  %18943 = vst [vmem:[#allocation665_spill] sm:$0xff] %v15631_v33 }
 0x328   :  { %5621 = vmatprep.subr.bf16.mxu0 %v15597_v32  ;;  %5744 = vmatprep.subr.bf16.mxu1 %v15600_v53  ;;  %18940 = vst [vmem:[#allocation662_spill] sm:$0xff] %v15621_v56  ;;  %v560_v53 = vld [vmem:[#allocation3 + $0xbb0] sm:$0xff]  ;;  %v569_v16 = vld [vmem:[#allocation3 + $0xbf8] sm:$0xff]  ;;  %18942 = vst [vmem:[#allocation664_spill] sm:$0xff] %v15627_v40 }
 0x329   :  { %v568_v32 = vld [vmem:[#allocation3 + $0xbf0] sm:$0xff]  ;;  %v15636_v59 = vcombine.high %v561_v47, %v569_v16  ;;  %v15643_v41 = vcombine.low %v561_v47, %v569_v16 }
 0x32a   :  { %v15633_v39 = vcombine.high %v560_v53, %v568_v32  ;;  %v15639_v38 = vcombine.low %v560_v53, %v568_v32 }
 0x32b   :  { %5622 = vmatpush1.bf16.msra.mxu0 %v15603_v46  ;;  %5745 = vmatpush1.bf16.msra.mxu1 %v15607_v15  ;;  %18945 = vst [vmem:[#allocation667_spill] sm:$0xff] %v15636_v59  ;;  %v577_v15 = vld [vmem:[#allocation3 + $0xc38] sm:$0xff]  ;;  %18947 = vst [vmem:[#allocation669_spill] sm:$0xff] %v15643_v41 }
 0x32c   :  { %5623 = vmatprep.subr.bf16.mxu0 %v15609_v49  ;;  %5746 = vmatprep.subr.bf16.mxu1 %v15612_v1  ;;  %18944 = vst [vmem:[#allocation666_spill] sm:$0xff] %v15633_v39  ;;  %v576_v1 = vld [vmem:[#allocation3 + $0xc30] sm:$0xff]  ;;  %v585_v46 = vld [vmem:[#allocation3 + $0xc78] sm:$0xff]  ;;  %18946 = vst [vmem:[#allocation668_spill] sm:$0xff] %v15639_v38 }
 0x32d   :  { %v584_v49 = vld [vmem:[#allocation3 + $0xc70] sm:$0xff]  ;;  %v15648_v0 = vcombine.high %v577_v15, %v585_v46  ;;  %v15655_v16 = vcombine.low %v577_v15, %v585_v46 }
 0x32e   :  { %v15645_v31 = vcombine.high %v576_v1, %v584_v49  ;;  %v15651_v32 = vcombine.low %v576_v1, %v584_v49 }
 0x32f   :  { %5624 = vmatpush1.bf16.msra.mxu0 %v15615_v17  ;;  %5747 = vmatpush1.bf16.msra.mxu1 %v15619_v25  ;;  %18949 = vst [vmem:[#allocation671_spill] sm:$0xff] %v15648_v0  ;;  %v593_v25 = vld [vmem:[#allocation3 + $0xcb8] sm:$0xff]  ;;  %18951 = vst [vmem:[#allocation673_spill] sm:$0xff] %v15655_v16 }
 0x330   :  { %5625 = vmatprep.subr.bf16.mxu0 %v15621_v56  ;;  %5748 = vmatprep.subr.bf16.mxu1 %v15624_v48  ;;  %18948 = vst [vmem:[#allocation670_spill] sm:$0xff] %v15645_v31  ;;  %v592_v48 = vld [vmem:[#allocation3 + $0xcb0] sm:$0xff]  ;;  %v601_v17 = vld [vmem:[#allocation3 + $0xcf8] sm:$0xff]  ;;  %18950 = vst [vmem:[#allocation672_spill] sm:$0xff] %v15651_v32 }
 0x331   :  { %v600_v56 = vld [vmem:[#allocation3 + $0xcf0] sm:$0xff]  ;;  %v15660_v53 = vcombine.high %v593_v25, %v601_v17  ;;  %v15667_v46 = vcombine.low %v593_v25, %v601_v17 }
 0x332   :  { %v15657_v47 = vcombine.high %v592_v48, %v600_v56  ;;  %v15663_v49 = vcombine.low %v592_v48, %v600_v56 }
 0x333   :  { %5626 = vmatpush1.bf16.msra.mxu0 %v15627_v40  ;;  %5749 = vmatpush1.bf16.msra.mxu1 %v15631_v33  ;;  %18953 = vst [vmem:[#allocation675_spill] sm:$0xff] %v15660_v53  ;;  %v609_v33 = vld [vmem:[#allocation3 + $0xd38] sm:$0xff]  ;;  %18955 = vst [vmem:[#allocation677_spill] sm:$0xff] %v15667_v46 }
 0x334   :  { %5627 = vmatprep.subr.bf16.mxu0 %v15633_v39  ;;  %5750 = vmatprep.subr.bf16.mxu1 %v15636_v59  ;;  %18952 = vst [vmem:[#allocation674_spill] sm:$0xff] %v15657_v47  ;;  %v608_v59 = vld [vmem:[#allocation3 + $0xd30] sm:$0xff]  ;;  %v617_v40 = vld [vmem:[#allocation3 + $0xd78] sm:$0xff]  ;;  %18954 = vst [vmem:[#allocation676_spill] sm:$0xff] %v15663_v49 }
 0x335   :  { %v616_v39 = vld [vmem:[#allocation3 + $0xd70] sm:$0xff]  ;;  %v15672_v1 = vcombine.high %v609_v33, %v617_v40  ;;  %v15679_v17 = vcombine.low %v609_v33, %v617_v40 }
 0x336   :  { %v15669_v15 = vcombine.high %v608_v59, %v616_v39  ;;  %v15675_v56 = vcombine.low %v608_v59, %v616_v39 }
 0x337   :  { %5628 = vmatpush1.bf16.msra.mxu0 %v15639_v38  ;;  %5751 = vmatpush1.bf16.msra.mxu1 %v15643_v41  ;;  %18957 = vst [vmem:[#allocation679_spill] sm:$0xff] %v15672_v1  ;;  %v625_v41 = vld [vmem:[#allocation3 + $0xdb8] sm:$0xff]  ;;  %18959 = vst [vmem:[#allocation681_spill] sm:$0xff] %v15679_v17 }
 0x338   :  { %5629 = vmatprep.subr.bf16.mxu0 %v15645_v31  ;;  %5752 = vmatprep.subr.bf16.mxu1 %v15648_v0  ;;  %18956 = vst [vmem:[#allocation678_spill] sm:$0xff] %v15669_v15  ;;  %v624_v0 = vld [vmem:[#allocation3 + $0xdb0] sm:$0xff]  ;;  %v633_v38 = vld [vmem:[#allocation3 + $0xdf8] sm:$0xff]  ;;  %18958 = vst [vmem:[#allocation680_spill] sm:$0xff] %v15675_v56 }
 0x339   :  { %v632_v31 = vld [vmem:[#allocation3 + $0xdf0] sm:$0xff]  ;;  %v15684_v48 = vcombine.high %v625_v41, %v633_v38  ;;  %v15691_v40 = vcombine.low %v625_v41, %v633_v38 }
 0x33a   :  { %v15681_v25 = vcombine.high %v624_v0, %v632_v31  ;;  %v15687_v39 = vcombine.low %v624_v0, %v632_v31 }
 0x33b   :  { %5630 = vmatpush1.bf16.msra.mxu0 %v15651_v32  ;;  %5753 = vmatpush1.bf16.msra.mxu1 %v15655_v16  ;;  %18961 = vst [vmem:[#allocation683_spill] sm:$0xff] %v15684_v48  ;;  %v641_v16 = vld [vmem:[#allocation3 + $0xe38] sm:$0xff]  ;;  %18963 = vst [vmem:[#allocation685_spill] sm:$0xff] %v15691_v40 }
 0x33c   :  { %5631 = vmatprep.subr.bf16.mxu0 %v15657_v47  ;;  %5754 = vmatprep.subr.bf16.mxu1 %v15660_v53  ;;  %18960 = vst [vmem:[#allocation682_spill] sm:$0xff] %v15681_v25  ;;  %v640_v53 = vld [vmem:[#allocation3 + $0xe30] sm:$0xff]  ;;  %v649_v32 = vld [vmem:[#allocation3 + $0xe78] sm:$0xff]  ;;  %18962 = vst [vmem:[#allocation684_spill] sm:$0xff] %v15687_v39 }
 0x33d   :  { %v648_v47 = vld [vmem:[#allocation3 + $0xe70] sm:$0xff]  ;;  %v15696_v59 = vcombine.high %v641_v16, %v649_v32  ;;  %v15703_v38 = vcombine.low %v641_v16, %v649_v32 }
 0x33e   :  { %v15693_v33 = vcombine.high %v640_v53, %v648_v47  ;;  %v15699_v31 = vcombine.low %v640_v53, %v648_v47 }
 0x33f   :  { %5632 = vmatpush1.bf16.msra.mxu0 %v15663_v49  ;;  %5755 = vmatpush1.bf16.msra.mxu1 %v15667_v46  ;;  %18965 = vst [vmem:[#allocation687_spill] sm:$0xff] %v15696_v59  ;;  %v657_v46 = vld [vmem:[#allocation3 + $0xeb8] sm:$0xff]  ;;  %18967 = vst [vmem:[#allocation689_spill] sm:$0xff] %v15703_v38 }
 0x340   :  { %5633 = vmatprep.subr.bf16.mxu0 %v15669_v15  ;;  %5756 = vmatprep.subr.bf16.mxu1 %v15672_v1  ;;  %18964 = vst [vmem:[#allocation686_spill] sm:$0xff] %v15693_v33  ;;  %v656_v1 = vld [vmem:[#allocation3 + $0xeb0] sm:$0xff]  ;;  %v665_v49 = vld [vmem:[#allocation3 + $0xef8] sm:$0xff]  ;;  %18966 = vst [vmem:[#allocation688_spill] sm:$0xff] %v15699_v31 }
 0x341   :  { %v664_v15 = vld [vmem:[#allocation3 + $0xef0] sm:$0xff]  ;;  %v15708_v0 = vcombine.high %v657_v46, %v665_v49  ;;  %v15715_v32 = vcombine.low %v657_v46, %v665_v49 }
 0x342   :  { %v15705_v41 = vcombine.high %v656_v1, %v664_v15  ;;  %v15711_v47 = vcombine.low %v656_v1, %v664_v15 }
 0x343   :  { %5634 = vmatpush1.bf16.msra.mxu0 %v15675_v56  ;;  %5757 = vmatpush1.bf16.msra.mxu1 %v15679_v17  ;;  %18969 = vst [vmem:[#allocation691_spill] sm:$0xff] %v15708_v0  ;;  %v673_v17 = vld [vmem:[#allocation3 + $0xf38] sm:$0xff]  ;;  %18971 = vst [vmem:[#allocation693_spill] sm:$0xff] %v15715_v32 }
 0x344   :  { %5635 = vmatprep.subr.bf16.mxu0 %v15681_v25  ;;  %5758 = vmatprep.subr.bf16.mxu1 %v15684_v48  ;;  %18968 = vst [vmem:[#allocation690_spill] sm:$0xff] %v15705_v41  ;;  %v672_v48 = vld [vmem:[#allocation3 + $0xf30] sm:$0xff]  ;;  %v681_v56 = vld [vmem:[#allocation3 + $0xf78] sm:$0xff]  ;;  %18970 = vst [vmem:[#allocation692_spill] sm:$0xff] %v15711_v47 }
 0x345   :  { %v680_v25 = vld [vmem:[#allocation3 + $0xf70] sm:$0xff]  ;;  %v15720_v53 = vcombine.high %v673_v17, %v681_v56  ;;  %v15727_v49 = vcombine.low %v673_v17, %v681_v56 }
 0x346   :  { %v15717_v16 = vcombine.high %v672_v48, %v680_v25  ;;  %v15723_v15 = vcombine.low %v672_v48, %v680_v25 }
 0x347   :  { %5636 = vmatpush1.bf16.msra.mxu0 %v15687_v39  ;;  %5759 = vmatpush1.bf16.msra.mxu1 %v15691_v40  ;;  %18973 = vst [vmem:[#allocation695_spill] sm:$0xff] %v15720_v53  ;;  %v689_v40 = vld [vmem:[#allocation3 + $0xfb8] sm:$0xff]  ;;  %18974 = vst [vmem:[#allocation696_spill] sm:$0xff] %v15727_v49 }
 0x348   :  { %5637 = vmatprep.subr.bf16.mxu0 %v15693_v33  ;;  %5760 = vmatprep.subr.bf16.mxu1 %v15696_v59  ;;  %18972 = vst [vmem:[#allocation694_spill] sm:$0xff] %v15717_v16  ;;  %v688_v59 = vld [vmem:[#allocation3 + $0xfb0] sm:$0xff]  ;;  %v697_v39 = vld [vmem:[#allocation3 + $0xff8] sm:$0xff] }
 0x349   :  { %v696_v33 = vld [vmem:[#allocation3 + $0xff0] sm:$0xff]  ;;  %v15732_v1 = vcombine.high %v689_v40, %v697_v39  ;;  %v15739_v56 = vcombine.low %v689_v40, %v697_v39 }
 0x34a   :  { %v15729_v46 = vcombine.high %v688_v59, %v696_v33  ;;  %v15735_v25 = vcombine.low %v688_v59, %v696_v33 }
 0x34b   :  { %5638 = vmatpush1.bf16.msra.mxu0 %v15699_v31  ;;  %5761 = vmatpush1.bf16.msra.mxu1 %v15703_v38  ;;  %18976 = vst [vmem:[#allocation698_spill] sm:$0xff] %v15732_v1  ;;  %v705_v38 = vld [vmem:[#allocation3 + $0x1038] sm:$0xff] }
 0x34c   :  { %5639 = vmatprep.subr.bf16.mxu0 %v15705_v41  ;;  %5762 = vmatprep.subr.bf16.mxu1 %v15708_v0  ;;  %18975 = vst [vmem:[#allocation697_spill] sm:$0xff] %v15729_v46  ;;  %v704_v0 = vld [vmem:[#allocation3 + $0x1030] sm:$0xff]  ;;  %v713_v31 = vld [vmem:[#allocation3 + $0x1078] sm:$0xff]  ;;  %18977 = vst [vmem:[#allocation699_spill] sm:$0xff] %v15735_v25 }
 0x34d   :  { %v712_v41 = vld [vmem:[#allocation3 + $0x1070] sm:$0xff]  ;;  %v15744_v48 = vcombine.high %v705_v38, %v713_v31  ;;  %v15751_v39 = vcombine.low %v705_v38, %v713_v31 }
 0x34e   :  { %v15741_v17 = vcombine.high %v704_v0, %v712_v41  ;;  %v15747_v33 = vcombine.low %v704_v0, %v712_v41 }
 0x34f   :  { %5640 = vmatpush1.bf16.msra.mxu0 %v15711_v47  ;;  %5763 = vmatpush1.bf16.msra.mxu1 %v15715_v32  ;;  %18979 = vst [vmem:[#allocation701_spill] sm:$0xff] %v15744_v48  ;;  %v721_v32 = vld [vmem:[#allocation3 + $0x10b8] sm:$0xff]  ;;  %18981 = vst [vmem:[#allocation703_spill] sm:$0xff] %v15751_v39 }
 0x350   :  { %5641 = vmatprep.subr.bf16.mxu0 %v15717_v16  ;;  %5764 = vmatprep.subr.bf16.mxu1 %v15720_v53  ;;  %18978 = vst [vmem:[#allocation700_spill] sm:$0xff] %v15741_v17  ;;  %v720_v53 = vld [vmem:[#allocation3 + $0x10b0] sm:$0xff]  ;;  %v729_v47 = vld [vmem:[#allocation3 + $0x10f8] sm:$0xff]  ;;  %18980 = vst [vmem:[#allocation702_spill] sm:$0xff] %v15747_v33 }
 0x351   :  { %v728_v16 = vld [vmem:[#allocation3 + $0x10f0] sm:$0xff]  ;;  %v15756_v59 = vcombine.high %v721_v32, %v729_v47  ;;  %v15765_v31 = vcombine.low %v721_v32, %v729_v47 }
 0x352   :  { %v15753_v40 = vcombine.high %v720_v53, %v728_v16  ;;  %v15761_v41 = vcombine.low %v720_v53, %v728_v16 }
 0x353   :  { %5642 = vmatpush1.bf16.msra.mxu0 %v15723_v15  ;;  %5765 = vmatpush1.bf16.msra.mxu1 %v15727_v49  ;;  %18983 = vst [vmem:[#allocation705_spill] sm:$0xff] %v15756_v59  ;;  %v737_v49 = vld [vmem:[#allocation3 + $0x1138] sm:$0xff]  ;;  %18985 = vst [vmem:[#allocation707_spill] sm:$0xff] %v15765_v31 }
 0x354   :  { %5643 = vmatprep.subr.bf16.mxu0 %v15729_v46  ;;  %5766 = vmatprep.subr.bf16.mxu1 %v15732_v1  ;;  %18982 = vst [vmem:[#allocation704_spill] sm:$0xff] %v15753_v40  ;;  %v736_v1 = vld [vmem:[#allocation3 + $0x1130] sm:$0xff]  ;;  %18984 = vst [vmem:[#allocation706_spill] sm:$0xff] %v15761_v41 }
 0x355   :  { %v744_v46 = vld [vmem:[#allocation3 + $0x1170] sm:$0xff] }
 0x356   :  { %v15767_v38 = vcombine.high %v736_v1, %v744_v46  ;;  %v15775_v16 = vcombine.low %v736_v1, %v744_v46 }
 0x357   :  { %5644 = vmatpush1.bf16.msra.mxu0 %v15735_v25  ;;  %5767 = vmatpush1.bf16.msra.mxu1 %v15739_v56  ;;  %v745_v25 = vld [vmem:[#allocation3 + $0x1178] sm:$0xff] }
 0x358   :  { %5654 = vmatprep.subr.bf16.mxu0 %v15741_v17  ;;  %5777 = vmatprep.subr.bf16.mxu1 %v15744_v48  ;;  %18986 = vst [vmem:[#allocation708_spill] sm:$0xff] %v15767_v38  ;;  %v15770_v0 = vcombine.high %v737_v49, %v745_v25  ;;  %v752_v48 = vld [vmem:[#allocation3 + $0x11b0] sm:$0xff]  ;;  %18988 = vst [vmem:[#allocation710_spill] sm:$0xff] %v15775_v16  ;;  %v15779_v47 = vcombine.low %v737_v49, %v745_v25 }
 0x359   :  { %v760_v17 = vld [vmem:[#allocation3 + $0x11f0] sm:$0xff] }
 0x35a   :  { %5646 = vmatmul.mubr.bf16.vlgmr.msra.gmra.mrb[12].mxu0 %v13956_v13  ;;  %5769 = vmatmul.mubr.bf16.vlgmr.msra.gmra.mrb[12].mxu1 %v13956_v13  ;;  %18987 = vst [vmem:[#allocation709_spill] sm:$0xff] %v15770_v0  ;;  %v761_v13 = vld [vmem:[#allocation3 + $0x11f8] sm:$0xff]  ;;  %18989 = vst [vmem:[#allocation711_spill] sm:$0xff] %v15779_v47  ;;  %v15781_v32 = vcombine.high %v752_v48, %v760_v17  ;;  %v15787_v46 = vcombine.low %v752_v48, %v760_v17 }
 0x35b   :  { %5655 = vmatpush1.bf16.msra.mxu0 %v15747_v33  ;;  %5778 = vmatpush1.bf16.msra.mxu1 %v15751_v39  ;;  %v753_v33 = vld [vmem:[#allocation3 + $0x11b8] sm:$0xff] }
 0x35c   :  { %5656 = vmatprep.subr.bf16.mxu0 %v15753_v40  ;;  %5779 = vmatprep.subr.bf16.mxu1 %v15756_v59  ;;  %18990 = vst [vmem:[#allocation712_spill] sm:$0xff] %v15781_v32  ;;  %v15784_v53 = vcombine.high %v753_v33, %v761_v13  ;;  %v768_v59 = vld [vmem:[#allocation3 + $0x1230] sm:$0xff]  ;;  %v769_v39 = vld [vmem:[#allocation3 + $0x1238] sm:$0xff]  ;;  %18992 = vst [vmem:[#allocation714_spill] sm:$0xff] %v15787_v46  ;;  %v15791_v49 = vcombine.low %v753_v33, %v761_v13 }
 0x35d   :  { %5686 = vmatprep.mubr.bf16.mxu0 %v13972_v2  ;;  %5809 = vmatprep.mubr.bf16.mxu1 %v13972_v2  ;;  %v776_v40 = vld [vmem:[#allocation3 + $0x1270] sm:$0xff]  ;;  %v777_v2 = vld [vmem:[#allocation3 + $0x1278] sm:$0xff] }
 0x35e   :  { %18991 = vst [vmem:[#allocation713_spill] sm:$0xff] %v15784_v53  ;;  %18993 = vst [vmem:[#allocation715_spill] sm:$0xff] %v15791_v49  ;;  %v15793_v1 = vcombine.high %v768_v59, %v776_v40  ;;  %v15796_v25 = vcombine.high %v769_v39, %v777_v2  ;;  %v15799_v17 = vcombine.low %v768_v59, %v776_v40 }
 0x35f   :  { %5657 = vmatpush1.bf16.msra.mxu0 %v15761_v41  ;;  %5780 = vmatpush1.bf16.msra.mxu1 %v15765_v31  ;;  %v785_v31 = vld [vmem:[#allocation3 + $0x12b8] sm:$0xff]  ;;  %v15803_v48 = vcombine.low %v769_v39, %v777_v2 }
 0x360   :  { %5658 = vmatprep.subr.bf16.mxu0 %v15767_v38  ;;  %5781 = vmatprep.subr.bf16.mxu1 %v15770_v0  ;;  %18994 = vst [vmem:[#allocation716_spill] sm:$0xff] %v15793_v1  ;;  %18995 = vst [vmem:[#allocation717_spill] sm:$0xff] %v15796_v25  ;;  %v784_v0 = vld [vmem:[#allocation3 + $0x12b0] sm:$0xff]  ;;  %v793_v41 = vld [vmem:[#allocation3 + $0x12f8] sm:$0xff] }
 0x361   :  { %v792_v38 = vld [vmem:[#allocation3 + $0x12f0] sm:$0xff]  ;;  %18996 = vst [vmem:[#allocation718_spill] sm:$0xff] %v15799_v17  ;;  %18997 = vst [vmem:[#allocation719_spill] sm:$0xff] %v15803_v48  ;;  %v15808_v13 = vcombine.high %v785_v31, %v793_v41  ;;  %v15815_v39 = vcombine.low %v785_v31, %v793_v41 }
 0x362   :  { %v15805_v33 = vcombine.high %v784_v0, %v792_v38  ;;  %v15811_v40 = vcombine.low %v784_v0, %v792_v38 }
 0x363   :  { %5659 = vmatpush1.bf16.msra.mxu0 %v15775_v16  ;;  %5782 = vmatpush1.bf16.msra.mxu1 %v15779_v47  ;;  %18999 = vst [vmem:[#allocation721_spill] sm:$0xff] %v15808_v13  ;;  %v801_v47 = vld [vmem:[#allocation3 + $0x1338] sm:$0xff]  ;;  %19001 = vst [vmem:[#allocation723_spill] sm:$0xff] %v15815_v39 }
 0x364   :  { %5660 = vmatprep.subr.bf16.mxu0 %v15781_v32  ;;  %5783 = vmatprep.subr.bf16.mxu1 %v15784_v53  ;;  %18998 = vst [vmem:[#allocation720_spill] sm:$0xff] %v15805_v33  ;;  %v800_v53 = vld [vmem:[#allocation3 + $0x1330] sm:$0xff]  ;;  %v809_v16 = vld [vmem:[#allocation3 + $0x1378] sm:$0xff]  ;;  %19000 = vst [vmem:[#allocation722_spill] sm:$0xff] %v15811_v40 }
 0x365   :  { %v808_v32 = vld [vmem:[#allocation3 + $0x1370] sm:$0xff]  ;;  %v15820_v2 = vcombine.high %v801_v47, %v809_v16  ;;  %v15827_v41 = vcombine.low %v801_v47, %v809_v16 }
 0x366   :  { %v15817_v59 = vcombine.high %v800_v53, %v808_v32  ;;  %v15823_v38 = vcombine.low %v800_v53, %v808_v32 }
 0x367   :  { %5661 = vmatpush1.bf16.msra.mxu0 %v15787_v46  ;;  %5784 = vmatpush1.bf16.msra.mxu1 %v15791_v49  ;;  %19003 = vst [vmem:[#allocation725_spill] sm:$0xff] %v15820_v2  ;;  %v817_v49 = vld [vmem:[#allocation3 + $0x13b8] sm:$0xff]  ;;  %19005 = vst [vmem:[#allocation727_spill] sm:$0xff] %v15827_v41 }
 0x368   :  { %5662 = vmatprep.subr.bf16.mxu0 %v15793_v1  ;;  %5785 = vmatprep.subr.bf16.mxu1 %v15796_v25  ;;  %19002 = vst [vmem:[#allocation724_spill] sm:$0xff] %v15817_v59  ;;  %v816_v25 = vld [vmem:[#allocation3 + $0x13b0] sm:$0xff]  ;;  %v825_v46 = vld [vmem:[#allocation3 + $0x13f8] sm:$0xff]  ;;  %19004 = vst [vmem:[#allocation726_spill] sm:$0xff] %v15823_v38 }
 0x369   :  { %v824_v1 = vld [vmem:[#allocation3 + $0x13f0] sm:$0xff]  ;;  %v15832_v0 = vcombine.high %v817_v49, %v825_v46  ;;  %v15839_v16 = vcombine.low %v817_v49, %v825_v46 }
 0x36a   :  { %v15829_v31 = vcombine.high %v816_v25, %v824_v1  ;;  %v15835_v32 = vcombine.low %v816_v25, %v824_v1 }
 0x36b   :  { %5663 = vmatpush1.bf16.msra.mxu0 %v15799_v17  ;;  %5786 = vmatpush1.bf16.msra.mxu1 %v15803_v48  ;;  %19007 = vst [vmem:[#allocation729_spill] sm:$0xff] %v15832_v0  ;;  %v833_v48 = vld [vmem:[#allocation3 + $0x1438] sm:$0xff]  ;;  %19009 = vst [vmem:[#allocation731_spill] sm:$0xff] %v15839_v16 }
 0x36c   :  { %5664 = vmatprep.subr.bf16.mxu0 %v15805_v33  ;;  %5787 = vmatprep.subr.bf16.mxu1 %v15808_v13  ;;  %19006 = vst [vmem:[#allocation728_spill] sm:$0xff] %v15829_v31  ;;  %v832_v13 = vld [vmem:[#allocation3 + $0x1430] sm:$0xff]  ;;  %v841_v17 = vld [vmem:[#allocation3 + $0x1478] sm:$0xff]  ;;  %19008 = vst [vmem:[#allocation730_spill] sm:$0xff] %v15835_v32 }
 0x36d   :  { %v840_v33 = vld [vmem:[#allocation3 + $0x1470] sm:$0xff]  ;;  %v15844_v53 = vcombine.high %v833_v48, %v841_v17  ;;  %v15851_v46 = vcombine.low %v833_v48, %v841_v17 }
 0x36e   :  { %v15841_v47 = vcombine.high %v832_v13, %v840_v33  ;;  %v15847_v1 = vcombine.low %v832_v13, %v840_v33 }
 0x36f   :  { %5665 = vmatpush1.bf16.msra.mxu0 %v15811_v40  ;;  %5788 = vmatpush1.bf16.msra.mxu1 %v15815_v39  ;;  %19011 = vst [vmem:[#allocation733_spill] sm:$0xff] %v15844_v53  ;;  %v849_v39 = vld [vmem:[#allocation3 + $0x14b8] sm:$0xff]  ;;  %19013 = vst [vmem:[#allocation735_spill] sm:$0xff] %v15851_v46 }
 0x370   :  { %5666 = vmatprep.subr.bf16.mxu0 %v15817_v59  ;;  %5789 = vmatprep.subr.bf16.mxu1 %v15820_v2  ;;  %19010 = vst [vmem:[#allocation732_spill] sm:$0xff] %v15841_v47  ;;  %v848_v2 = vld [vmem:[#allocation3 + $0x14b0] sm:$0xff]  ;;  %v857_v40 = vld [vmem:[#allocation3 + $0x14f8] sm:$0xff]  ;;  %19012 = vst [vmem:[#allocation734_spill] sm:$0xff] %v15847_v1 }
 0x371   :  { %v856_v59 = vld [vmem:[#allocation3 + $0x14f0] sm:$0xff]  ;;  %v15856_v25 = vcombine.high %v849_v39, %v857_v40  ;;  %v15863_v17 = vcombine.low %v849_v39, %v857_v40 }
 0x372   :  { %v15853_v49 = vcombine.high %v848_v2, %v856_v59  ;;  %v15859_v33 = vcombine.low %v848_v2, %v856_v59 }
 0x373   :  { %5667 = vmatpush1.bf16.msra.mxu0 %v15823_v38  ;;  %5790 = vmatpush1.bf16.msra.mxu1 %v15827_v41  ;;  %19015 = vst [vmem:[#allocation737_spill] sm:$0xff] %v15856_v25  ;;  %v865_v41 = vld [vmem:[#allocation3 + $0x1538] sm:$0xff]  ;;  %19017 = vst [vmem:[#allocation739_spill] sm:$0xff] %v15863_v17 }
 0x374   :  { %5668 = vmatprep.subr.bf16.mxu0 %v15829_v31  ;;  %5791 = vmatprep.subr.bf16.mxu1 %v15832_v0  ;;  %19014 = vst [vmem:[#allocation736_spill] sm:$0xff] %v15853_v49  ;;  %v864_v0 = vld [vmem:[#allocation3 + $0x1530] sm:$0xff]  ;;  %v873_v38 = vld [vmem:[#allocation3 + $0x1578] sm:$0xff]  ;;  %19016 = vst [vmem:[#allocation738_spill] sm:$0xff] %v15859_v33 }
 0x375   :  { %v872_v31 = vld [vmem:[#allocation3 + $0x1570] sm:$0xff]  ;;  %v15868_v13 = vcombine.high %v865_v41, %v873_v38  ;;  %v15875_v40 = vcombine.low %v865_v41, %v873_v38 }
 0x376   :  { %v15865_v48 = vcombine.high %v864_v0, %v872_v31  ;;  %v15871_v59 = vcombine.low %v864_v0, %v872_v31 }
 0x377   :  { %5669 = vmatpush1.bf16.msra.mxu0 %v15835_v32  ;;  %5792 = vmatpush1.bf16.msra.mxu1 %v15839_v16  ;;  %19019 = vst [vmem:[#allocation741_spill] sm:$0xff] %v15868_v13  ;;  %v881_v16 = vld [vmem:[#allocation3 + $0x15b8] sm:$0xff]  ;;  %19021 = vst [vmem:[#allocation743_spill] sm:$0xff] %v15875_v40 }
 0x378   :  { %5670 = vmatprep.subr.bf16.mxu0 %v15841_v47  ;;  %5793 = vmatprep.subr.bf16.mxu1 %v15844_v53  ;;  %19018 = vst [vmem:[#allocation740_spill] sm:$0xff] %v15865_v48  ;;  %v880_v53 = vld [vmem:[#allocation3 + $0x15b0] sm:$0xff]  ;;  %v889_v32 = vld [vmem:[#allocation3 + $0x15f8] sm:$0xff]  ;;  %19020 = vst [vmem:[#allocation742_spill] sm:$0xff] %v15871_v59 }
 0x379   :  { %v888_v47 = vld [vmem:[#allocation3 + $0x15f0] sm:$0xff]  ;;  %v15880_v2 = vcombine.high %v881_v16, %v889_v32  ;;  %v15887_v38 = vcombine.low %v881_v16, %v889_v32 }
 0x37a   :  { %v15877_v39 = vcombine.high %v880_v53, %v888_v47  ;;  %v15883_v31 = vcombine.low %v880_v53, %v888_v47 }
 0x37b   :  { %5671 = vmatpush1.bf16.msra.mxu0 %v15847_v1  ;;  %5794 = vmatpush1.bf16.msra.mxu1 %v15851_v46  ;;  %19023 = vst [vmem:[#allocation745_spill] sm:$0xff] %v15880_v2  ;;  %v897_v46 = vld [vmem:[#allocation3 + $0x1638] sm:$0xff]  ;;  %19025 = vst [vmem:[#allocation747_spill] sm:$0xff] %v15887_v38 }
 0x37c   :  { %5672 = vmatprep.subr.bf16.mxu0 %v15853_v49  ;;  %5795 = vmatprep.subr.bf16.mxu1 %v15856_v25  ;;  %19022 = vst [vmem:[#allocation744_spill] sm:$0xff] %v15877_v39  ;;  %v896_v25 = vld [vmem:[#allocation3 + $0x1630] sm:$0xff]  ;;  %v905_v1 = vld [vmem:[#allocation3 + $0x1678] sm:$0xff]  ;;  %19024 = vst [vmem:[#allocation746_spill] sm:$0xff] %v15883_v31 }
 0x37d   :  { %v904_v49 = vld [vmem:[#allocation3 + $0x1670] sm:$0xff]  ;;  %v15892_v0 = vcombine.high %v897_v46, %v905_v1  ;;  %v15899_v32 = vcombine.low %v897_v46, %v905_v1 }
 0x37e   :  { %v15889_v41 = vcombine.high %v896_v25, %v904_v49  ;;  %v15895_v47 = vcombine.low %v896_v25, %v904_v49 }
 0x37f   :  { %5673 = vmatpush1.bf16.msra.mxu0 %v15859_v33  ;;  %5796 = vmatpush1.bf16.msra.mxu1 %v15863_v17  ;;  %19027 = vst [vmem:[#allocation749_spill] sm:$0xff] %v15892_v0  ;;  %v913_v17 = vld [vmem:[#allocation3 + $0x16b8] sm:$0xff] }
 0x380   :  { %5674 = vmatprep.subr.bf16.mxu0 %v15865_v48  ;;  %5797 = vmatprep.subr.bf16.mxu1 %v15868_v13  ;;  %19026 = vst [vmem:[#allocation748_spill] sm:$0xff] %v15889_v41  ;;  %v912_v13 = vld [vmem:[#allocation3 + $0x16b0] sm:$0xff]  ;;  %v921_v33 = vld [vmem:[#allocation3 + $0x16f8] sm:$0xff] }
 0x381   :  { %v920_v48 = vld [vmem:[#allocation3 + $0x16f0] sm:$0xff]  ;;  %v15904_v53 = vcombine.high %v913_v17, %v921_v33  ;;  %v15911_v1 = vcombine.low %v913_v17, %v921_v33 }
 0x382   :  { %v15901_v16 = vcombine.high %v912_v13, %v920_v48  ;;  %v15907_v49 = vcombine.low %v912_v13, %v920_v48 }
 0x383   :  { %5675 = vmatpush1.bf16.msra.mxu0 %v15871_v59  ;;  %5798 = vmatpush1.bf16.msra.mxu1 %v15875_v40  ;;  %19028 = vst [vmem:[#allocation750_spill] sm:$0xff] %v15904_v53  ;;  %v929_v40 = vld [vmem:[#allocation3 + $0x1738] sm:$0xff] }
 0x384   :  { %5676 = vmatprep.subr.bf16.mxu0 %v15877_v39  ;;  %5799 = vmatprep.subr.bf16.mxu1 %v15880_v2  ;;  %v928_v2 = vld [vmem:[#allocation3 + $0x1730] sm:$0xff]  ;;  %v937_v59 = vld [vmem:[#allocation3 + $0x1778] sm:$0xff] }
 0x385   :  { %v936_v39 = vld [vmem:[#allocation3 + $0x1770] sm:$0xff]  ;;  %v15916_v25 = vcombine.high %v929_v40, %v937_v59  ;;  %v15923_v33 = vcombine.low %v929_v40, %v937_v59  ;;  %v15941_v59 = vld [vmem:[%s17572_s1] sm:$0xff] }
 0x386   :  { %v15913_v46 = vcombine.high %v928_v2, %v936_v39  ;;  %v15919_v48 = vcombine.low %v928_v2, %v936_v39  ;;  %v15949_v40 = vcombine.high %v15941_v59, %v15941_v59  ;;  %v19057_v2 = vld [vmem:[#allocation59_spill] sm:$0xff] }
 0x387   :  { %5677 = vmatpush1.bf16.msra.mxu0 %v15883_v31  ;;  %5800 = vmatpush1.bf16.msra.mxu1 %v15887_v38  ;;  %v945_v38 = vld [vmem:[#allocation3 + $0x17b8] sm:$0xff] }
 0x388   :  { %5678 = vmatprep.subr.bf16.mxu0 %v15889_v41  ;;  %5801 = vmatprep.subr.bf16.mxu1 %v15892_v0  ;;  %v944_v0 = vld [vmem:[#allocation3 + $0x17b0] sm:$0xff]  ;;  %v953_v31 = vld [vmem:[#allocation3 + $0x17f8] sm:$0xff] }
 0x389   :  { %v952_v41 = vld [vmem:[#allocation3 + $0x17f0] sm:$0xff]  ;;  %v15928_v13 = vcombine.high %v945_v38, %v953_v31  ;;  %v15935_v39 = vcombine.low %v945_v38, %v953_v31  ;;  %v19058_v38 = vld [vmem:[#allocation60_spill] sm:$0xff] }
 0x38a   :  { %v15925_v17 = vcombine.high %v944_v0, %v952_v41 }
 0x38b   :  { %5679 = vmatpush1.bf16.msra.mxu0 %v15895_v47  ;;  %5802 = vmatpush1.bf16.msra.mxu1 %v15899_v32 }
 0x38c   :  { %5680 = vmatprep.subr.bf16.mxu0 %v15901_v16  ;;  %5803 = vmatprep.subr.bf16.mxu1 %v15904_v53  ;;  %v15931_v53 = vcombine.low %v944_v0, %v952_v41  ;;  %v19059_v41 = vld [vmem:[#allocation61_spill] sm:$0xff]  ;;  %v19060_v0 = vld [vmem:[#allocation62_spill] sm:$0xff] }
 0x38f   :  { %5681 = vmatpush1.bf16.msra.mxu0 %v15907_v49  ;;  %5804 = vmatpush1.bf16.msra.mxu1 %v15911_v1 }
 0x390   :  { %5682 = vmatprep.subr.bf16.mxu0 %v15913_v46  ;;  %5805 = vmatprep.subr.bf16.mxu1 %v15916_v25 }
 0x393   :  { %5683 = vmatpush1.bf16.msra.mxu0 %v15919_v48  ;;  %5806 = vmatpush1.bf16.msra.mxu1 %v15923_v33 }
 0x394   :  { %5684 = vmatprep.subr.bf16.mxu0 %v15925_v17  ;;  %5807 = vmatprep.subr.bf16.mxu1 %v15928_v13 }
 0x397   :  { %5685 = vmatpush1.bf16.msra.mxu0 %v15931_v53  ;;  %5808 = vmatpush1.bf16.msra.mxu1 %v15935_v39 }
 0x398   :  { %5890 = vmatprep.subr.bf16.mxu0 %v13535_v3  ;;  %6013 = vmatprep.subr.bf16.mxu1 %v13539_v8 }
 0x39a   :  { %5687 = vmatmul.mubr.bf16.vlgmr.msra.gmra.mrb[12].mxu0 %v14160_v4  ;;  %5810 = vmatmul.mubr.bf16.vlgmr.msra.gmra.mrb[12].mxu1 %v14160_v4  ;;  %v19056_v4 = vld [vmem:[#allocation58_spill] sm:$0xff] }
 0x39b   :  { %5891 = vmatpush1.bf16.msra.mxu0 %v13537_v5  ;;  %6014 = vmatpush1.bf16.msra.mxu1 %v13541_v9 }
 0x39c   :  { %5892 = vmatprep.subr.bf16.mxu0 %v13543_v10  ;;  %6015 = vmatprep.subr.bf16.mxu1 %v13546_v14 }
 0x39d   :  { %5922 = vmatprep.mubr.bf16.mxu0 %v15949_v40  ;;  %6045 = vmatprep.mubr.bf16.mxu1 %v15949_v40 }
 0x39f   :  { %5893 = vmatpush1.bf16.msra.mxu0 %v13550_v18  ;;  %6016 = vmatpush1.bf16.msra.mxu1 %v13554_v19 }
 0x3a0   :  { %5894 = vmatprep.subr.bf16.mxu0 %v13556_v20  ;;  %6017 = vmatprep.subr.bf16.mxu1 %v13559_v21  ;;  %v19029_v20 = vld [vmem:[#allocation31_spill] sm:$0xff]  ;;  %v19030_v21 = vld [vmem:[#allocation32_spill] sm:$0xff] }
 0x3a3   :  { %5895 = vmatpush1.bf16.msra.mxu0 %v13562_v26  ;;  %6018 = vmatpush1.bf16.msra.mxu1 %v13566_v27  ;;  %v19031_v26 = vld [vmem:[#allocation33_spill] sm:$0xff]  ;;  %v19032_v27 = vld [vmem:[#allocation34_spill] sm:$0xff] }
 0x3a4   :  { %5896 = vmatprep.subr.bf16.mxu0 %v13568_v28  ;;  %6019 = vmatprep.subr.bf16.mxu1 %v13571_v29  ;;  %v19033_v28 = vld [vmem:[#allocation35_spill] sm:$0xff]  ;;  %v19034_v29 = vld [vmem:[#allocation36_spill] sm:$0xff] }
 0x3a7   :  { %5897 = vmatpush1.bf16.msra.mxu0 %v13574_v34  ;;  %6020 = vmatpush1.bf16.msra.mxu1 %v13578_v35  ;;  %v19035_v34 = vld [vmem:[#allocation37_spill] sm:$0xff]  ;;  %v19036_v35 = vld [vmem:[#allocation38_spill] sm:$0xff] }
 0x3a8   :  { %5898 = vmatprep.subr.bf16.mxu0 %v13580_v36  ;;  %6021 = vmatprep.subr.bf16.mxu1 %v13583_v37  ;;  %v19037_v36 = vld [vmem:[#allocation39_spill] sm:$0xff]  ;;  %v19038_v37 = vld [vmem:[#allocation40_spill] sm:$0xff] }
 0x3ab   :  { %5899 = vmatpush1.bf16.msra.mxu0 %v13586_v42  ;;  %6022 = vmatpush1.bf16.msra.mxu1 %v13590_v43  ;;  %v19039_v42 = vld [vmem:[#allocation41_spill] sm:$0xff]  ;;  %v19040_v43 = vld [vmem:[#allocation42_spill] sm:$0xff] }
 0x3ac   :  { %5900 = vmatprep.subr.bf16.mxu0 %v13592_v44  ;;  %6023 = vmatprep.subr.bf16.mxu1 %v13595_v45  ;;  %v19041_v44 = vld [vmem:[#allocation43_spill] sm:$0xff]  ;;  %v19042_v45 = vld [vmem:[#allocation44_spill] sm:$0xff] }
 0x3ad   :  { %v15974_v3 = vpop.f32.mrb[8].mxu0  ;;  %v15977_v5 = vpop.f32.mrb[8].mxu1 }
 0x3ae   :  { %v15979_v8 = vpop.f32.mrb[9].mxu0  ;;  %v15981_v9 = vpop.f32.mrb[9].mxu1 }
 0x3af   :  { %v5446_v10 = vpop.f32.mrb[10].mxu0  ;;  %5901 = vmatpush1.bf16.msra.mxu0 %v13598_v50  ;;  %v5569_v14 = vpop.f32.mrb[10].mxu1  ;;  %6024 = vmatpush1.bf16.msra.mxu1 %v13602_v51  ;;  %v19043_v50 = vld [vmem:[#allocation45_spill] sm:$0xff]  ;;  %v19044_v51 = vld [vmem:[#allocation46_spill] sm:$0xff] }
 0x3b0   :  { %v5447_v18 = vpop.f32.mrb[11].mxu0  ;;  %5902 = vmatprep.subr.bf16.mxu0 %v13604_v52  ;;  %v5570_v19 = vpop.f32.mrb[11].mxu1  ;;  %6025 = vmatprep.subr.bf16.mxu1 %v13612_v54  ;;  %v19045_v52 = vld [vmem:[#allocation47_spill] sm:$0xff]  ;;  %v19046_v54 = vld [vmem:[#allocation48_spill] sm:$0xff]  ;;  %v19063_v14 = vld [vmem:[#allocation65_spill] sm:$0xff] }
 0x3b1   :  { %v19062_v10 = vld [vmem:[#allocation64_spill] sm:$0xff]  ;;  %v19064_v18 = vld [vmem:[#allocation66_spill] sm:$0xff]  ;;  %v19065_v19 = vld [vmem:[#allocation67_spill] sm:$0xff] }
 0x3b3   :  { %5903 = vmatpush1.bf16.msra.mxu0 %v13619_v60  ;;  %6026 = vmatpush1.bf16.msra.mxu1 %v13624_v61  ;;  %v19047_v60 = vld [vmem:[#allocation49_spill] sm:$0xff]  ;;  %v19048_v61 = vld [vmem:[#allocation50_spill] sm:$0xff] }
 0x3b4   :  { %5904 = vmatprep.subr.bf16.mxu0 %v13626_v62  ;;  %6027 = vmatprep.subr.bf16.mxu1 %v13629_v63  ;;  %v19049_v62 = vld [vmem:[#allocation51_spill] sm:$0xff]  ;;  %v19050_v63 = vld [vmem:[#allocation52_spill] sm:$0xff] }
 0x3b7   :  { %5905 = vmatpush1.bf16.msra.mxu0 %v13633_v6  ;;  %6028 = vmatpush1.bf16.msra.mxu1 %v13637_v7  ;;  %v19051_v6 = vld [vmem:[#allocation53_spill] sm:$0xff]  ;;  %v19052_v7 = vld [vmem:[#allocation54_spill] sm:$0xff] }
 0x3b8   :  { %5906 = vmatprep.subr.bf16.mxu0 %v13639_v11  ;;  %6029 = vmatprep.subr.bf16.mxu1 %v13642_v12  ;;  %v19053_v11 = vld [vmem:[#allocation55_spill] sm:$0xff]  ;;  %v16025_v12 = vcombine.low %v15941_v59, %v15941_v59 }
 0x3b9   :  { %v19061_v59 = vld [vmem:[#allocation63_spill] sm:$0xff] }
 0x3bb   :  { %5907 = vmatpush1.bf16.msra.mxu0 %v13645_v22  ;;  %6030 = vmatpush1.bf16.msra.mxu1 %v13649_v23  ;;  %v16030_v22 = vld [vmem:[%s17572_s1 + $0x8] sm:$0xff]  ;;  %v19054_v23 = vld [vmem:[#allocation56_spill] sm:$0xff] }
 0x3bc   :  { %5908 = vmatprep.subr.bf16.mxu0 %v13651_v24  ;;  %6031 = vmatprep.subr.bf16.mxu1 %v19029_v20  ;;  %v19055_v24 = vld [vmem:[#allocation57_spill] sm:$0xff]  ;;  %v16038_v31 = vcombine.high %v16030_v22, %v16030_v22  ;;  %v19066_v20 = vld [vmem:[#allocation68_spill] sm:$0xff] }
 0x3bf   :  { %5909 = vmatpush1.bf16.msra.mxu0 %v19030_v21  ;;  %6032 = vmatpush1.bf16.msra.mxu1 %v19031_v26  ;;  %v19067_v21 = vld [vmem:[#allocation69_spill] sm:$0xff]  ;;  %v19068_v26 = vld [vmem:[#allocation70_spill] sm:$0xff] }
 0x3c0   :  { %5910 = vmatprep.subr.bf16.mxu0 %v19032_v27  ;;  %6033 = vmatprep.subr.bf16.mxu1 %v19033_v28  ;;  %v19069_v27 = vld [vmem:[#allocation71_spill] sm:$0xff]  ;;  %v19070_v28 = vld [vmem:[#allocation72_spill] sm:$0xff] }
 0x3c3   :  { %5911 = vmatpush1.bf16.msra.mxu0 %v19034_v29  ;;  %6034 = vmatpush1.bf16.msra.mxu1 %v19035_v34  ;;  %v19071_v29 = vld [vmem:[#allocation73_spill] sm:$0xff]  ;;  %v19072_v34 = vld [vmem:[#allocation74_spill] sm:$0xff] }
 0x3c4   :  { %5912 = vmatprep.subr.bf16.mxu0 %v19036_v35  ;;  %6035 = vmatprep.subr.bf16.mxu1 %v19037_v36  ;;  %v19073_v35 = vld [vmem:[#allocation75_spill] sm:$0xff]  ;;  %v19074_v36 = vld [vmem:[#allocation76_spill] sm:$0xff] }
 0x3c7   :  { %5913 = vmatpush1.bf16.msra.mxu0 %v19038_v37  ;;  %6036 = vmatpush1.bf16.msra.mxu1 %v19039_v42  ;;  %v19075_v37 = vld [vmem:[#allocation77_spill] sm:$0xff]  ;;  %v19076_v42 = vld [vmem:[#allocation78_spill] sm:$0xff] }
 0x3c8   :  { %5914 = vmatprep.subr.bf16.mxu0 %v19040_v43  ;;  %6037 = vmatprep.subr.bf16.mxu1 %v19041_v44  ;;  %v19077_v43 = vld [vmem:[#allocation79_spill] sm:$0xff]  ;;  %v19078_v44 = vld [vmem:[#allocation80_spill] sm:$0xff] }
 0x3cb   :  { %5915 = vmatpush1.bf16.msra.mxu0 %v19042_v45  ;;  %6038 = vmatpush1.bf16.msra.mxu1 %v19043_v50  ;;  %v19079_v45 = vld [vmem:[#allocation81_spill] sm:$0xff]  ;;  %v19080_v50 = vld [vmem:[#allocation82_spill] sm:$0xff] }
 0x3cc   :  { %5916 = vmatprep.subr.bf16.mxu0 %v19044_v51  ;;  %6039 = vmatprep.subr.bf16.mxu1 %v19045_v52  ;;  %v19081_v51 = vld [vmem:[#allocation83_spill] sm:$0xff]  ;;  %v19082_v52 = vld [vmem:[#allocation84_spill] sm:$0xff] }
 0x3cf   :  { %5917 = vmatpush1.bf16.msra.mxu0 %v19046_v54  ;;  %6040 = vmatpush1.bf16.msra.mxu1 %v19047_v60  ;;  %v19083_v54 = vld [vmem:[#allocation85_spill] sm:$0xff]  ;;  %v19084_v60 = vld [vmem:[#allocation86_spill] sm:$0xff] }
 0x3d0   :  { %5918 = vmatprep.subr.bf16.mxu0 %v19048_v61  ;;  %6041 = vmatprep.subr.bf16.mxu1 %v19049_v62  ;;  %v19085_v61 = vld [vmem:[#allocation87_spill] sm:$0xff]  ;;  %v19086_v62 = vld [vmem:[#allocation88_spill] sm:$0xff] }
 0x3d3   :  { %5919 = vmatpush1.bf16.msra.mxu0 %v19050_v63  ;;  %6042 = vmatpush1.bf16.msra.mxu1 %v19051_v6  ;;  %v19087_v63 = vld [vmem:[#allocation89_spill] sm:$0xff]  ;;  %v19088_v6 = vld [vmem:[#allocation90_spill] sm:$0xff] }
 0x3d4   :  { %5920 = vmatprep.subr.bf16.mxu0 %v19052_v7  ;;  %6043 = vmatprep.subr.bf16.mxu1 %v19053_v11  ;;  %v19089_v7 = vld [vmem:[#allocation91_spill] sm:$0xff]  ;;  %v19090_v11 = vld [vmem:[#allocation92_spill] sm:$0xff] }
 0x3d7   :  { %5921 = vmatpush1.bf16.msra.mxu0 %v19054_v23  ;;  %6044 = vmatpush1.bf16.msra.mxu1 %v19055_v24  ;;  %v19091_v23 = vld [vmem:[#allocation93_spill] sm:$0xff]  ;;  %v19092_v24 = vld [vmem:[#allocation94_spill] sm:$0xff] }
 0x3d8   :  { %5931 = vmatprep.subr.bf16.mxu0 %v19056_v4  ;;  %6054 = vmatprep.subr.bf16.mxu1 %v19057_v2  ;;  %v19093_v4 = vld [vmem:[#allocation95_spill] sm:$0xff]  ;;  %v19094_v2 = vld [vmem:[#allocation96_spill] sm:$0xff] }
 0x3da   :  { %5923 = vmatmul.mubr.bf16.vlgmr.msra.gmra.mrb[16].mxu0 %v16025_v12  ;;  %6046 = vmatmul.mubr.bf16.vlgmr.msra.gmra.mrb[16].mxu1 %v16025_v12 }
 0x3db   :  { %5932 = vmatpush1.bf16.msra.mxu0 %v19058_v38  ;;  %6055 = vmatpush1.bf16.msra.mxu1 %v19059_v41  ;;  %v19095_v38 = vld [vmem:[#allocation97_spill] sm:$0xff]  ;;  %v19096_v41 = vld [vmem:[#allocation98_spill] sm:$0xff] }
 0x3dc   :  { %5933 = vmatprep.subr.bf16.mxu0 %v19060_v0  ;;  %6056 = vmatprep.subr.bf16.mxu1 %v19061_v59  ;;  %v19097_v0 = vld [vmem:[#allocation99_spill] sm:$0xff]  ;;  %v19098_v59 = vld [vmem:[#allocation100_spill] sm:$0xff] }
 0x3dd   :  { %5963 = vmatprep.mubr.bf16.mxu0 %v16038_v31  ;;  %6086 = vmatprep.mubr.bf16.mxu1 %v16038_v31 }
 0x3df   :  { %5934 = vmatpush1.bf16.msra.mxu0 %v19062_v10  ;;  %6057 = vmatpush1.bf16.msra.mxu1 %v19063_v14  ;;  %v19099_v10 = vld [vmem:[#allocation101_spill] sm:$0xff]  ;;  %v19100_v14 = vld [vmem:[#allocation102_spill] sm:$0xff] }
 0x3e0   :  { %5935 = vmatprep.subr.bf16.mxu0 %v19064_v18  ;;  %6058 = vmatprep.subr.bf16.mxu1 %v19065_v19  ;;  %v19101_v18 = vld [vmem:[#allocation103_spill] sm:$0xff]  ;;  %v19102_v19 = vld [vmem:[#allocation104_spill] sm:$0xff] }
 0x3e3   :  { %5936 = vmatpush1.bf16.msra.mxu0 %v19066_v20  ;;  %6059 = vmatpush1.bf16.msra.mxu1 %v19067_v21  ;;  %v19103_v20 = vld [vmem:[#allocation105_spill] sm:$0xff]  ;;  %v19104_v21 = vld [vmem:[#allocation106_spill] sm:$0xff] }
 0x3e4   :  { %5937 = vmatprep.subr.bf16.mxu0 %v19068_v26  ;;  %6060 = vmatprep.subr.bf16.mxu1 %v19069_v27  ;;  %v19105_v26 = vld [vmem:[#allocation107_spill] sm:$0xff]  ;;  %v19106_v27 = vld [vmem:[#allocation108_spill] sm:$0xff] }
 0x3e7   :  { %5938 = vmatpush1.bf16.msra.mxu0 %v19070_v28  ;;  %6061 = vmatpush1.bf16.msra.mxu1 %v19071_v29  ;;  %v19107_v28 = vld [vmem:[#allocation109_spill] sm:$0xff]  ;;  %v19108_v29 = vld [vmem:[#allocation110_spill] sm:$0xff] }
 0x3e8   :  { %5939 = vmatprep.subr.bf16.mxu0 %v19072_v34  ;;  %6062 = vmatprep.subr.bf16.mxu1 %v19073_v35  ;;  %v19109_v34 = vld [vmem:[#allocation111_spill] sm:$0xff]  ;;  %v19110_v35 = vld [vmem:[#allocation112_spill] sm:$0xff] }
 0x3eb   :  { %5940 = vmatpush1.bf16.msra.mxu0 %v19074_v36  ;;  %6063 = vmatpush1.bf16.msra.mxu1 %v19075_v37  ;;  %v19111_v36 = vld [vmem:[#allocation113_spill] sm:$0xff]  ;;  %v19112_v37 = vld [vmem:[#allocation114_spill] sm:$0xff] }
 0x3ec   :  { %5941 = vmatprep.subr.bf16.mxu0 %v19076_v42  ;;  %6064 = vmatprep.subr.bf16.mxu1 %v19077_v43  ;;  %v19113_v42 = vld [vmem:[#allocation115_spill] sm:$0xff]  ;;  %v19114_v43 = vld [vmem:[#allocation116_spill] sm:$0xff] }
 0x3ef   :  { %5942 = vmatpush1.bf16.msra.mxu0 %v19078_v44  ;;  %6065 = vmatpush1.bf16.msra.mxu1 %v19079_v45  ;;  %v19115_v44 = vld [vmem:[#allocation117_spill] sm:$0xff]  ;;  %v19116_v45 = vld [vmem:[#allocation118_spill] sm:$0xff] }
 0x3f0   :  { %5943 = vmatprep.subr.bf16.mxu0 %v19080_v50  ;;  %6066 = vmatprep.subr.bf16.mxu1 %v19081_v51  ;;  %v19117_v50 = vld [vmem:[#allocation119_spill] sm:$0xff]  ;;  %v16106_v51 = vcombine.low %v16030_v22, %v16030_v22  ;;  %v19122_v22 = vld [vmem:[#allocation124_spill] sm:$0xff] }
 0x3f3   :  { %5944 = vmatpush1.bf16.msra.mxu0 %v19082_v52  ;;  %6067 = vmatpush1.bf16.msra.mxu1 %v19083_v54  ;;  %v16111_v52 = vld [vmem:[%s17572_s1 + $0x10] sm:$0xff]  ;;  %v19118_v54 = vld [vmem:[#allocation120_spill] sm:$0xff] }
 0x3f4   :  { %5945 = vmatprep.subr.bf16.mxu0 %v19084_v60  ;;  %6068 = vmatprep.subr.bf16.mxu1 %v19085_v61  ;;  %v19119_v60 = vld [vmem:[#allocation121_spill] sm:$0xff]  ;;  %v19120_v61 = vld [vmem:[#allocation122_spill] sm:$0xff] }
 0x3f7   :  { %5946 = vmatpush1.bf16.msra.mxu0 %v19086_v62  ;;  %6069 = vmatpush1.bf16.msra.mxu1 %v19087_v63  ;;  %v19121_v62 = vld [vmem:[#allocation123_spill] sm:$0xff]  ;;  %v16119_v63 = vcombine.high %v16111_v52, %v16111_v52 }
 0x3f8   :  { %5947 = vmatprep.subr.bf16.mxu0 %v19088_v6  ;;  %6070 = vmatprep.subr.bf16.mxu1 %v19089_v7  ;;  %v19123_v6 = vld [vmem:[#allocation125_spill] sm:$0xff]  ;;  %v19124_v7 = vld [vmem:[#allocation126_spill] sm:$0xff] }
 0x3fb   :  { %5948 = vmatpush1.bf16.msra.mxu0 %v19090_v11  ;;  %6071 = vmatpush1.bf16.msra.mxu1 %v19091_v23  ;;  %v19125_v11 = vld [vmem:[#allocation127_spill] sm:$0xff]  ;;  %v19126_v23 = vld [vmem:[#allocation128_spill] sm:$0xff] }
 0x3fc   :  { %5949 = vmatprep.subr.bf16.mxu0 %v19092_v24  ;;  %6072 = vmatprep.subr.bf16.mxu1 %v19093_v4  ;;  %v19127_v24 = vld [vmem:[#allocation129_spill] sm:$0xff]  ;;  %v19128_v4 = vld [vmem:[#allocation130_spill] sm:$0xff] }
 0x3ff   :  { %5950 = vmatpush1.bf16.msra.mxu0 %v19094_v2  ;;  %6073 = vmatpush1.bf16.msra.mxu1 %v19095_v38  ;;  %v19129_v2 = vld [vmem:[#allocation131_spill] sm:$0xff]  ;;  %v19130_v38 = vld [vmem:[#allocation132_spill] sm:$0xff] }
 0x400   :  { %5951 = vmatprep.subr.bf16.mxu0 %v19096_v41  ;;  %6074 = vmatprep.subr.bf16.mxu1 %v19097_v0  ;;  %v19131_v41 = vld [vmem:[#allocation133_spill] sm:$0xff]  ;;  %v19132_v0 = vld [vmem:[#allocation134_spill] sm:$0xff] }
 0x403   :  { %5952 = vmatpush1.bf16.msra.mxu0 %v19098_v59  ;;  %6075 = vmatpush1.bf16.msra.mxu1 %v19099_v10  ;;  %v19133_v59 = vld [vmem:[#allocation135_spill] sm:$0xff]  ;;  %v19134_v10 = vld [vmem:[#allocation136_spill] sm:$0xff] }
 0x404   :  { %5953 = vmatprep.subr.bf16.mxu0 %v19100_v14  ;;  %6076 = vmatprep.subr.bf16.mxu1 %v19101_v18  ;;  %v19135_v14 = vld [vmem:[#allocation137_spill] sm:$0xff]  ;;  %v19136_v18 = vld [vmem:[#allocation138_spill] sm:$0xff] }
 0x407   :  { %5954 = vmatpush1.bf16.msra.mxu0 %v19102_v19  ;;  %6077 = vmatpush1.bf16.msra.mxu1 %v19103_v20  ;;  %v19137_v19 = vld [vmem:[#allocation139_spill] sm:$0xff]  ;;  %v19138_v20 = vld [vmem:[#allocation140_spill] sm:$0xff] }
 0x408   :  { %5955 = vmatprep.subr.bf16.mxu0 %v19104_v21  ;;  %6078 = vmatprep.subr.bf16.mxu1 %v19105_v26  ;;  %v19139_v21 = vld [vmem:[#allocation141_spill] sm:$0xff]  ;;  %v19140_v26 = vld [vmem:[#allocation142_spill] sm:$0xff] }
 0x40b   :  { %5956 = vmatpush1.bf16.msra.mxu0 %v19106_v27  ;;  %6079 = vmatpush1.bf16.msra.mxu1 %v19107_v28  ;;  %v19141_v27 = vld [vmem:[#allocation143_spill] sm:$0xff]  ;;  %v19142_v28 = vld [vmem:[#allocation144_spill] sm:$0xff] }
 0x40c   :  { %5957 = vmatprep.subr.bf16.mxu0 %v19108_v29  ;;  %6080 = vmatprep.subr.bf16.mxu1 %v19109_v34  ;;  %v19143_v29 = vld [vmem:[#allocation145_spill] sm:$0xff]  ;;  %v19144_v34 = vld [vmem:[#allocation146_spill] sm:$0xff] }
 0x40f   :  { %5958 = vmatpush1.bf16.msra.mxu0 %v19110_v35  ;;  %6081 = vmatpush1.bf16.msra.mxu1 %v19111_v36  ;;  %v19145_v35 = vld [vmem:[#allocation147_spill] sm:$0xff]  ;;  %v19146_v36 = vld [vmem:[#allocation148_spill] sm:$0xff] }
 0x410   :  { %5959 = vmatprep.subr.bf16.mxu0 %v19112_v37  ;;  %6082 = vmatprep.subr.bf16.mxu1 %v19113_v42  ;;  %v19147_v37 = vld [vmem:[#allocation149_spill] sm:$0xff]  ;;  %v19148_v42 = vld [vmem:[#allocation150_spill] sm:$0xff] }
 0x413   :  { %5960 = vmatpush1.bf16.msra.mxu0 %v19114_v43  ;;  %6083 = vmatpush1.bf16.msra.mxu1 %v19115_v44  ;;  %v19149_v43 = vld [vmem:[#allocation151_spill] sm:$0xff]  ;;  %v19150_v44 = vld [vmem:[#allocation152_spill] sm:$0xff] }
 0x414   :  { %5961 = vmatprep.subr.bf16.mxu0 %v19116_v45  ;;  %6084 = vmatprep.subr.bf16.mxu1 %v19117_v50  ;;  %v19151_v45 = vld [vmem:[#allocation153_spill] sm:$0xff]  ;;  %v19152_v50 = vld [vmem:[#allocation154_spill] sm:$0xff] }
 0x417   :  { %5962 = vmatpush1.bf16.msra.mxu0 %v19118_v54  ;;  %6085 = vmatpush1.bf16.msra.mxu1 %v19119_v60  ;;  %v19153_v54 = vld [vmem:[#allocation155_spill] sm:$0xff]  ;;  %v19154_v60 = vld [vmem:[#allocation156_spill] sm:$0xff] }
 0x418   :  { %5972 = vmatprep.subr.bf16.mxu0 %v19120_v61  ;;  %6095 = vmatprep.subr.bf16.mxu1 %v19121_v62  ;;  %v19155_v61 = vld [vmem:[#allocation157_spill] sm:$0xff]  ;;  %v19156_v62 = vld [vmem:[#allocation158_spill] sm:$0xff] }
 0x41a   :  { %5964 = vmatmul.mubr.bf16.vlgmr.msra.gmra.mrb[16].mxu0 %v16106_v51  ;;  %6087 = vmatmul.mubr.bf16.vlgmr.msra.gmra.mrb[16].mxu1 %v16106_v51 }
 0x41b   :  { %5973 = vmatpush1.bf16.msra.mxu0 %v19122_v22  ;;  %6096 = vmatpush1.bf16.msra.mxu1 %v19123_v6  ;;  %v19157_v22 = vld [vmem:[#allocation159_spill] sm:$0xff]  ;;  %v19158_v6 = vld [vmem:[#allocation160_spill] sm:$0xff] }
 0x41c   :  { %5974 = vmatprep.subr.bf16.mxu0 %v19124_v7  ;;  %6097 = vmatprep.subr.bf16.mxu1 %v19125_v11  ;;  %v19159_v7 = vld [vmem:[#allocation161_spill] sm:$0xff]  ;;  %v19160_v11 = vld [vmem:[#allocation162_spill] sm:$0xff] }
 0x41d   :  { %6004 = vmatprep.mubr.bf16.mxu0 %v16119_v63  ;;  %6127 = vmatprep.mubr.bf16.mxu1 %v16119_v63 }
 0x41f   :  { %5975 = vmatpush1.bf16.msra.mxu0 %v19126_v23  ;;  %6098 = vmatpush1.bf16.msra.mxu1 %v19127_v24  ;;  %v19161_v23 = vld [vmem:[#allocation163_spill] sm:$0xff]  ;;  %v19162_v24 = vld [vmem:[#allocation164_spill] sm:$0xff] }
 0x420   :  { %5976 = vmatprep.subr.bf16.mxu0 %v19128_v4  ;;  %6099 = vmatprep.subr.bf16.mxu1 %v19129_v2  ;;  %v19163_v4 = vld [vmem:[#allocation165_spill] sm:$0xff]  ;;  %v19164_v2 = vld [vmem:[#allocation166_spill] sm:$0xff] }
 0x423   :  { %5977 = vmatpush1.bf16.msra.mxu0 %v19130_v38  ;;  %6100 = vmatpush1.bf16.msra.mxu1 %v19131_v41  ;;  %v19165_v38 = vld [vmem:[#allocation167_spill] sm:$0xff]  ;;  %v19166_v41 = vld [vmem:[#allocation168_spill] sm:$0xff] }
 0x424   :  { %5978 = vmatprep.subr.bf16.mxu0 %v19132_v0  ;;  %6101 = vmatprep.subr.bf16.mxu1 %v19133_v59  ;;  %v19167_v0 = vld [vmem:[#allocation169_spill] sm:$0xff]  ;;  %v19168_v59 = vld [vmem:[#allocation170_spill] sm:$0xff] }
 0x427   :  { %5979 = vmatpush1.bf16.msra.mxu0 %v19134_v10  ;;  %6102 = vmatpush1.bf16.msra.mxu1 %v19135_v14  ;;  %v19169_v10 = vld [vmem:[#allocation171_spill] sm:$0xff]  ;;  %v19170_v14 = vld [vmem:[#allocation172_spill] sm:$0xff] }
 0x428   :  { %5980 = vmatprep.subr.bf16.mxu0 %v19136_v18  ;;  %6103 = vmatprep.subr.bf16.mxu1 %v19137_v19  ;;  %v19171_v18 = vld [vmem:[#allocation173_spill] sm:$0xff]  ;;  %v19172_v19 = vld [vmem:[#allocation174_spill] sm:$0xff] }
 0x42b   :  { %5981 = vmatpush1.bf16.msra.mxu0 %v19138_v20  ;;  %6104 = vmatpush1.bf16.msra.mxu1 %v19139_v21  ;;  %v19173_v20 = vld [vmem:[#allocation175_spill] sm:$0xff]  ;;  %v19174_v21 = vld [vmem:[#allocation176_spill] sm:$0xff] }
 0x42c   :  { %5982 = vmatprep.subr.bf16.mxu0 %v19140_v26  ;;  %6105 = vmatprep.subr.bf16.mxu1 %v19141_v27  ;;  %v19175_v26 = vld [vmem:[#allocation177_spill] sm:$0xff]  ;;  %v19176_v27 = vld [vmem:[#allocation178_spill] sm:$0xff] }
 0x42f   :  { %5983 = vmatpush1.bf16.msra.mxu0 %v19142_v28  ;;  %6106 = vmatpush1.bf16.msra.mxu1 %v19143_v29  ;;  %v19177_v28 = vld [vmem:[#allocation179_spill] sm:$0xff]  ;;  %v19178_v29 = vld [vmem:[#allocation180_spill] sm:$0xff] }
 0x430   :  { %5984 = vmatprep.subr.bf16.mxu0 %v19144_v34  ;;  %6107 = vmatprep.subr.bf16.mxu1 %v19145_v35  ;;  %v19179_v34 = vld [vmem:[#allocation181_spill] sm:$0xff]  ;;  %v19180_v35 = vld [vmem:[#allocation182_spill] sm:$0xff] }
 0x433   :  { %5985 = vmatpush1.bf16.msra.mxu0 %v19146_v36  ;;  %6108 = vmatpush1.bf16.msra.mxu1 %v19147_v37  ;;  %v19181_v36 = vld [vmem:[#allocation183_spill] sm:$0xff]  ;;  %v16187_v37 = vcombine.low %v16111_v52, %v16111_v52 }
 0x434   :  { %5986 = vmatprep.subr.bf16.mxu0 %v19148_v42  ;;  %6109 = vmatprep.subr.bf16.mxu1 %v19149_v43  ;;  %v19182_v42 = vld [vmem:[#allocation184_spill] sm:$0xff]  ;;  %v19183_v43 = vld [vmem:[#allocation185_spill] sm:$0xff]  ;;  %v19189_v52 = vld [vmem:[#allocation191_spill] sm:$0xff] }
 0x437   :  { %5987 = vmatpush1.bf16.msra.mxu0 %v19150_v44  ;;  %6110 = vmatpush1.bf16.msra.mxu1 %v19151_v45  ;;  %v19184_v44 = vld [vmem:[#allocation186_spill] sm:$0xff]  ;;  %v19185_v45 = vld [vmem:[#allocation187_spill] sm:$0xff] }
 0x438   :  { %5988 = vmatprep.subr.bf16.mxu0 %v19152_v50  ;;  %6111 = vmatprep.subr.bf16.mxu1 %v19153_v54  ;;  %v19186_v50 = vld [vmem:[#allocation188_spill] sm:$0xff]  ;;  %v19187_v54 = vld [vmem:[#allocation189_spill] sm:$0xff] }
 0x43b   :  { %5989 = vmatpush1.bf16.msra.mxu0 %v19154_v60  ;;  %6112 = vmatpush1.bf16.msra.mxu1 %v19155_v61  ;;  %v19188_v60 = vld [vmem:[#allocation190_spill] sm:$0xff]  ;;  %v19190_v61 = vld [vmem:[#allocation192_spill] sm:$0xff] }
 0x43c   :  { %5990 = vmatprep.subr.bf16.mxu0 %v19156_v62  ;;  %6113 = vmatprep.subr.bf16.mxu1 %v19157_v22  ;;  %v19191_v62 = vld [vmem:[#allocation193_spill] sm:$0xff]  ;;  %v19192_v22 = vld [vmem:[#allocation194_spill] sm:$0xff] }
 0x43f   :  { %5991 = vmatpush1.bf16.msra.mxu0 %v19158_v6  ;;  %6114 = vmatpush1.bf16.msra.mxu1 %v19159_v7  ;;  %v19193_v6 = vld [vmem:[#allocation195_spill] sm:$0xff]  ;;  %v19194_v7 = vld [vmem:[#allocation196_spill] sm:$0xff] }
 0x440   :  { %5992 = vmatprep.subr.bf16.mxu0 %v19160_v11  ;;  %6115 = vmatprep.subr.bf16.mxu1 %v19161_v23  ;;  %v19195_v11 = vld [vmem:[#allocation197_spill] sm:$0xff]  ;;  %v19196_v23 = vld [vmem:[#allocation198_spill] sm:$0xff] }
 0x443   :  { %5993 = vmatpush1.bf16.msra.mxu0 %v19162_v24  ;;  %6116 = vmatpush1.bf16.msra.mxu1 %v19163_v4  ;;  %v19197_v24 = vld [vmem:[#allocation199_spill] sm:$0xff]  ;;  %v19198_v4 = vld [vmem:[#allocation200_spill] sm:$0xff] }
 0x444   :  { %5994 = vmatprep.subr.bf16.mxu0 %v19164_v2  ;;  %6117 = vmatprep.subr.bf16.mxu1 %v19165_v38  ;;  %v19199_v2 = vld [vmem:[#allocation201_spill] sm:$0xff]  ;;  %v19200_v38 = vld [vmem:[#allocation202_spill] sm:$0xff] }
 0x447   :  { %5995 = vmatpush1.bf16.msra.mxu0 %v19166_v41  ;;  %6118 = vmatpush1.bf16.msra.mxu1 %v19167_v0  ;;  %v19201_v41 = vld [vmem:[#allocation203_spill] sm:$0xff]  ;;  %v19202_v0 = vld [vmem:[#allocation204_spill] sm:$0xff] }
 0x448   :  { %5996 = vmatprep.subr.bf16.mxu0 %v19168_v59  ;;  %6119 = vmatprep.subr.bf16.mxu1 %v19169_v10  ;;  %v19203_v59 = vld [vmem:[#allocation205_spill] sm:$0xff]  ;;  %v19204_v10 = vld [vmem:[#allocation206_spill] sm:$0xff] }
 0x44b   :  { %5997 = vmatpush1.bf16.msra.mxu0 %v19170_v14  ;;  %6120 = vmatpush1.bf16.msra.mxu1 %v19171_v18  ;;  %v19205_v18 = vld [vmem:[#allocation207_spill] sm:$0xff] }
 0x44c   :  { %5998 = vmatprep.subr.bf16.mxu0 %v19172_v19  ;;  %6121 = vmatprep.subr.bf16.mxu1 %v19173_v20 }
 0x44f   :  { %5999 = vmatpush1.bf16.msra.mxu0 %v19174_v21  ;;  %6122 = vmatpush1.bf16.msra.mxu1 %v19175_v26 }
 0x450   :  { %6000 = vmatprep.subr.bf16.mxu0 %v19176_v27  ;;  %6123 = vmatprep.subr.bf16.mxu1 %v19177_v28  ;;  %v19208_v27 = vld [vmem:[#allocation208_spill] sm:$0xff] }
 0x453   :  { %6001 = vmatpush1.bf16.msra.mxu0 %v19178_v29  ;;  %6124 = vmatpush1.bf16.msra.mxu1 %v19179_v34  ;;  %v19209_v29 = vld [vmem:[#allocation209_spill] sm:$0xff] }
 0x454   :  { %6002 = vmatprep.subr.bf16.mxu0 %v19180_v35  ;;  %6125 = vmatprep.subr.bf16.mxu1 %v19181_v36  ;;  %v19210_v35 = vld [vmem:[#allocation210_spill] sm:$0xff] }
 0x457   :  { %6003 = vmatpush1.bf16.msra.mxu0 %v19182_v42  ;;  %6126 = vmatpush1.bf16.msra.mxu1 %v19183_v43  ;;  %v19211_v42 = vld [vmem:[#allocation211_spill] sm:$0xff]  ;;  %v19212_v43 = vld [vmem:[#allocation212_spill] sm:$0xff] }
 0x458   :  { %6136 = vmatprep.subr.bf16.mxu0 %v19184_v44  ;;  %6259 = vmatprep.subr.bf16.mxu1 %v19185_v45  ;;  %v19213_v44 = vld [vmem:[#allocation213_spill] sm:$0xff]  ;;  %v19214_v45 = vld [vmem:[#allocation214_spill] sm:$0xff] }
 0x45a   :  { %6005 = vmatmul.mubr.bf16.vlgmr.msra.gmra.mrb[16].mxu0 %v16187_v37  ;;  %6128 = vmatmul.mubr.bf16.vlgmr.msra.gmra.mrb[16].mxu1 %v16187_v37 }
 0x45b   :  { %6137 = vmatpush1.bf16.msra.mxu0 %v19186_v50  ;;  %6260 = vmatpush1.bf16.msra.mxu1 %v19187_v54  ;;  %v19215_v50 = vld [vmem:[#allocation215_spill] sm:$0xff]  ;;  %v19216_v54 = vld [vmem:[#allocation216_spill] sm:$0xff] }
 0x45c   :  { %6138 = vmatprep.subr.bf16.mxu0 %v19188_v60  ;;  %6261 = vmatprep.subr.bf16.mxu1 %v19189_v52  ;;  %v19217_v60 = vld [vmem:[#allocation217_spill] sm:$0xff]  ;;  %v19218_v52 = vld [vmem:[#allocation218_spill] sm:$0xff] }
 0x45d   :  { %6168 = vmatprep.mubr.bf16.mxu0 %v15949_v40  ;;  %6291 = vmatprep.mubr.bf16.mxu1 %v15949_v40 }
 0x45f   :  { %6139 = vmatpush1.bf16.msra.mxu0 %v19190_v61  ;;  %6262 = vmatpush1.bf16.msra.mxu1 %v19191_v62  ;;  %v19219_v61 = vld [vmem:[#allocation219_spill] sm:$0xff]  ;;  %v19220_v62 = vld [vmem:[#allocation220_spill] sm:$0xff] }
 0x460   :  { %6140 = vmatprep.subr.bf16.mxu0 %v19192_v22  ;;  %6263 = vmatprep.subr.bf16.mxu1 %v19193_v6  ;;  %v19221_v22 = vld [vmem:[#allocation221_spill] sm:$0xff]  ;;  %v19222_v6 = vld [vmem:[#allocation222_spill] sm:$0xff] }
 0x463   :  { %6141 = vmatpush1.bf16.msra.mxu0 %v19194_v7  ;;  %6264 = vmatpush1.bf16.msra.mxu1 %v19195_v11  ;;  %v19223_v7 = vld [vmem:[#allocation223_spill] sm:$0xff]  ;;  %v19224_v11 = vld [vmem:[#allocation224_spill] sm:$0xff] }
 0x464   :  { %6142 = vmatprep.subr.bf16.mxu0 %v19196_v23  ;;  %6265 = vmatprep.subr.bf16.mxu1 %v19197_v24  ;;  %v19225_v23 = vld [vmem:[#allocation225_spill] sm:$0xff]  ;;  %v19226_v24 = vld [vmem:[#allocation226_spill] sm:$0xff] }
 0x467   :  { %6143 = vmatpush1.bf16.msra.mxu0 %v19198_v4  ;;  %6266 = vmatpush1.bf16.msra.mxu1 %v19199_v2  ;;  %v19227_v4 = vld [vmem:[#allocation227_spill] sm:$0xff]  ;;  %v19228_v2 = vld [vmem:[#allocation228_spill] sm:$0xff] }
 0x468   :  { %6144 = vmatprep.subr.bf16.mxu0 %v19200_v38  ;;  %6267 = vmatprep.subr.bf16.mxu1 %v19201_v41  ;;  %v19229_v38 = vld [vmem:[#allocation229_spill] sm:$0xff]  ;;  %v19230_v41 = vld [vmem:[#allocation230_spill] sm:$0xff] }
 0x46b   :  { %6145 = vmatpush1.bf16.msra.mxu0 %v19202_v0  ;;  %6268 = vmatpush1.bf16.msra.mxu1 %v19203_v59  ;;  %v19231_v0 = vld [vmem:[#allocation231_spill] sm:$0xff]  ;;  %v19232_v59 = vld [vmem:[#allocation232_spill] sm:$0xff] }
 0x46c   :  { %6146 = vmatprep.subr.bf16.mxu0 %v19204_v10  ;;  %6269 = vmatprep.subr.bf16.mxu1 %v19205_v18  ;;  %v19233_v10 = vld [vmem:[#allocation233_spill] sm:$0xff]  ;;  %v19234_v18 = vld [vmem:[#allocation234_spill] sm:$0xff] }
 0x46d   :  { %v16216_v14 = vpop.f32.mrb[12].mxu0  ;;  %v16219_v19 = vpop.f32.mrb[12].mxu1 }
 0x46e   :  { %19206 = vst [vmem:[#allocation31_spill] sm:$0xff] %v16219_v19  ;;  %v16221_v20 = vpop.f32.mrb[13].mxu0  ;;  %v16223_v21 = vpop.f32.mrb[13].mxu1 }
 0x46f   :  { %19207 = vst [vmem:[#allocation32_spill] sm:$0xff] %v16223_v21  ;;  %v5692_v26 = vpop.f32.mrb[14].mxu0  ;;  %6147 = vmatpush1.bf16.msra.mxu0 %v19208_v27  ;;  %v5815_v28 = vpop.f32.mrb[14].mxu1  ;;  %6270 = vmatpush1.bf16.msra.mxu1 %v19209_v29  ;;  %v19236_v27 = vld [vmem:[#allocation236_spill] sm:$0xff]  ;;  %v19238_v29 = vld [vmem:[#allocation238_spill] sm:$0xff] }
 0x470   :  { %v5693_v34 = vpop.f32.mrb[15].mxu0  ;;  %6148 = vmatprep.subr.bf16.mxu0 %v19210_v35  ;;  %v5816_v36 = vpop.f32.mrb[15].mxu1  ;;  %6271 = vmatprep.subr.bf16.mxu1 %v19211_v42  ;;  %v19235_v26 = vld [vmem:[#allocation235_spill] sm:$0xff]  ;;  %v19237_v28 = vld [vmem:[#allocation237_spill] sm:$0xff]  ;;  %v19240_v35 = vld [vmem:[#allocation240_spill] sm:$0xff] }
 0x471   :  { %v19239_v34 = vld [vmem:[#allocation239_spill] sm:$0xff]  ;;  %v19241_v36 = vld [vmem:[#allocation241_spill] sm:$0xff]  ;;  %v19242_v42 = vld [vmem:[#allocation242_spill] sm:$0xff] }
 0x473   :  { %6149 = vmatpush1.bf16.msra.mxu0 %v19212_v43  ;;  %6272 = vmatpush1.bf16.msra.mxu1 %v19213_v44  ;;  %v19243_v43 = vld [vmem:[#allocation243_spill] sm:$0xff]  ;;  %v19244_v44 = vld [vmem:[#allocation244_spill] sm:$0xff] }
 0x474   :  { %6150 = vmatprep.subr.bf16.mxu0 %v19214_v45  ;;  %6273 = vmatprep.subr.bf16.mxu1 %v19215_v50  ;;  %v19245_v45 = vld [vmem:[#allocation245_spill] sm:$0xff]  ;;  %v19246_v50 = vld [vmem:[#allocation246_spill] sm:$0xff] }
 0x477   :  { %6151 = vmatpush1.bf16.msra.mxu0 %v19216_v54  ;;  %6274 = vmatpush1.bf16.msra.mxu1 %v19217_v60  ;;  %v19247_v54 = vld [vmem:[#allocation247_spill] sm:$0xff]  ;;  %v19248_v60 = vld [vmem:[#allocation248_spill] sm:$0xff] }
 0x478   :  { %6152 = vmatprep.subr.bf16.mxu0 %v19218_v52  ;;  %6275 = vmatprep.subr.bf16.mxu1 %v19219_v61  ;;  %v19249_v52 = vld [vmem:[#allocation249_spill] sm:$0xff]  ;;  %v19250_v61 = vld [vmem:[#allocation250_spill] sm:$0xff] }
 0x47b   :  { %6153 = vmatpush1.bf16.msra.mxu0 %v19220_v62  ;;  %6276 = vmatpush1.bf16.msra.mxu1 %v19221_v22  ;;  %v19251_v62 = vld [vmem:[#allocation251_spill] sm:$0xff]  ;;  %v19252_v22 = vld [vmem:[#allocation252_spill] sm:$0xff] }
 0x47c   :  { %6154 = vmatprep.subr.bf16.mxu0 %v19222_v6  ;;  %6277 = vmatprep.subr.bf16.mxu1 %v19223_v7  ;;  %v19253_v6 = vld [vmem:[#allocation253_spill] sm:$0xff]  ;;  %v19254_v7 = vld [vmem:[#allocation254_spill] sm:$0xff] }
 0x47f   :  { %6155 = vmatpush1.bf16.msra.mxu0 %v19224_v11  ;;  %6278 = vmatpush1.bf16.msra.mxu1 %v19225_v23  ;;  %v19255_v11 = vld [vmem:[#allocation255_spill] sm:$0xff]  ;;  %v19256_v23 = vld [vmem:[#allocation256_spill] sm:$0xff] }
 0x480   :  { %6156 = vmatprep.subr.bf16.mxu0 %v19226_v24  ;;  %6279 = vmatprep.subr.bf16.mxu1 %v19227_v4  ;;  %v19257_v24 = vld [vmem:[#allocation257_spill] sm:$0xff]  ;;  %v19258_v4 = vld [vmem:[#allocation258_spill] sm:$0xff] }
 0x483   :  { %6157 = vmatpush1.bf16.msra.mxu0 %v19228_v2  ;;  %6280 = vmatpush1.bf16.msra.mxu1 %v19229_v38  ;;  %v19259_v2 = vld [vmem:[#allocation259_spill] sm:$0xff]  ;;  %v19260_v38 = vld [vmem:[#allocation260_spill] sm:$0xff] }
 0x484   :  { %6158 = vmatprep.subr.bf16.mxu0 %v19230_v41  ;;  %6281 = vmatprep.subr.bf16.mxu1 %v19231_v0  ;;  %v19261_v41 = vld [vmem:[#allocation261_spill] sm:$0xff]  ;;  %v19262_v0 = vld [vmem:[#allocation262_spill] sm:$0xff] }
 0x487   :  { %6159 = vmatpush1.bf16.msra.mxu0 %v19232_v59  ;;  %6282 = vmatpush1.bf16.msra.mxu1 %v19233_v10  ;;  %v19263_v59 = vld [vmem:[#allocation263_spill] sm:$0xff]  ;;  %v19264_v10 = vld [vmem:[#allocation264_spill] sm:$0xff] }
 0x488   :  { %6160 = vmatprep.subr.bf16.mxu0 %v19234_v18  ;;  %6283 = vmatprep.subr.bf16.mxu1 %v19235_v26  ;;  %v19265_v18 = vld [vmem:[#allocation265_spill] sm:$0xff]  ;;  %v19266_v26 = vld [vmem:[#allocation266_spill] sm:$0xff] }
 0x48b   :  { %6161 = vmatpush1.bf16.msra.mxu0 %v19236_v27  ;;  %6284 = vmatpush1.bf16.msra.mxu1 %v19237_v28  ;;  %v19267_v27 = vld [vmem:[#allocation267_spill] sm:$0xff]  ;;  %v19268_v28 = vld [vmem:[#allocation268_spill] sm:$0xff] }
 0x48c   :  { %6162 = vmatprep.subr.bf16.mxu0 %v19238_v29  ;;  %6285 = vmatprep.subr.bf16.mxu1 %v19239_v34  ;;  %v19269_v29 = vld [vmem:[#allocation269_spill] sm:$0xff]  ;;  %v19270_v34 = vld [vmem:[#allocation270_spill] sm:$0xff] }
 0x48f   :  { %6163 = vmatpush1.bf16.msra.mxu0 %v19240_v35  ;;  %6286 = vmatpush1.bf16.msra.mxu1 %v19241_v36  ;;  %v19271_v35 = vld [vmem:[#allocation271_spill] sm:$0xff]  ;;  %v19272_v36 = vld [vmem:[#allocation272_spill] sm:$0xff] }
 0x490   :  { %6164 = vmatprep.subr.bf16.mxu0 %v19242_v42  ;;  %6287 = vmatprep.subr.bf16.mxu1 %v19243_v43  ;;  %v19273_v42 = vld [vmem:[#allocation273_spill] sm:$0xff]  ;;  %v19274_v43 = vld [vmem:[#allocation274_spill] sm:$0xff] }
 0x493   :  { %6165 = vmatpush1.bf16.msra.mxu0 %v19244_v44  ;;  %6288 = vmatpush1.bf16.msra.mxu1 %v19245_v45  ;;  %v19275_v44 = vld [vmem:[#allocation275_spill] sm:$0xff]  ;;  %v19276_v45 = vld [vmem:[#allocation276_spill] sm:$0xff] }
 0x494   :  { %6166 = vmatprep.subr.bf16.mxu0 %v19246_v50  ;;  %6289 = vmatprep.subr.bf16.mxu1 %v19247_v54  ;;  %v19277_v50 = vld [vmem:[#allocation277_spill] sm:$0xff]  ;;  %v19278_v54 = vld [vmem:[#allocation278_spill] sm:$0xff] }
 0x497   :  { %6167 = vmatpush1.bf16.msra.mxu0 %v19248_v60  ;;  %6290 = vmatpush1.bf16.msra.mxu1 %v19249_v52  ;;  %v19279_v60 = vld [vmem:[#allocation279_spill] sm:$0xff]  ;;  %v19280_v52 = vld [vmem:[#allocation280_spill] sm:$0xff] }
 0x498   :  { %6177 = vmatprep.subr.bf16.mxu0 %v19250_v61  ;;  %6300 = vmatprep.subr.bf16.mxu1 %v19251_v62  ;;  %v19281_v61 = vld [vmem:[#allocation281_spill] sm:$0xff]  ;;  %v19282_v62 = vld [vmem:[#allocation282_spill] sm:$0xff] }
 0x49a   :  { %6169 = vmatmul.mubr.bf16.vlgmr.msra.gmra.mrb[20].mxu0 %v16025_v12  ;;  %6292 = vmatmul.mubr.bf16.vlgmr.msra.gmra.mrb[20].mxu1 %v16025_v12 }
 0x49b   :  { %6178 = vmatpush1.bf16.msra.mxu0 %v19252_v22  ;;  %6301 = vmatpush1.bf16.msra.mxu1 %v19253_v6  ;;  %v19283_v22 = vld [vmem:[#allocation283_spill] sm:$0xff]  ;;  %v19284_v6 = vld [vmem:[#allocation284_spill] sm:$0xff] }
 0x49c   :  { %6179 = vmatprep.subr.bf16.mxu0 %v19254_v7  ;;  %6302 = vmatprep.subr.bf16.mxu1 %v19255_v11  ;;  %v19285_v7 = vld [vmem:[#allocation285_spill] sm:$0xff]  ;;  %v19286_v11 = vld [vmem:[#allocation286_spill] sm:$0xff] }
 0x49d   :  { %6209 = vmatprep.mubr.bf16.mxu0 %v16038_v31  ;;  %6332 = vmatprep.mubr.bf16.mxu1 %v16038_v31 }
 0x49f   :  { %6180 = vmatpush1.bf16.msra.mxu0 %v19256_v23  ;;  %6303 = vmatpush1.bf16.msra.mxu1 %v19257_v24  ;;  %v19287_v23 = vld [vmem:[#allocation287_spill] sm:$0xff]  ;;  %v19288_v24 = vld [vmem:[#allocation288_spill] sm:$0xff] }
 0x4a0   :  { %6181 = vmatprep.subr.bf16.mxu0 %v19258_v4  ;;  %6304 = vmatprep.subr.bf16.mxu1 %v19259_v2  ;;  %v19289_v4 = vld [vmem:[#allocation289_spill] sm:$0xff]  ;;  %v19290_v2 = vld [vmem:[#allocation290_spill] sm:$0xff] }
 0x4a3   :  { %6182 = vmatpush1.bf16.msra.mxu0 %v19260_v38  ;;  %6305 = vmatpush1.bf16.msra.mxu1 %v19261_v41  ;;  %v19291_v38 = vld [vmem:[#allocation291_spill] sm:$0xff]  ;;  %v19292_v41 = vld [vmem:[#allocation292_spill] sm:$0xff] }
 0x4a4   :  { %6183 = vmatprep.subr.bf16.mxu0 %v19262_v0  ;;  %6306 = vmatprep.subr.bf16.mxu1 %v19263_v59  ;;  %v19293_v0 = vld [vmem:[#allocation293_spill] sm:$0xff]  ;;  %v19294_v59 = vld [vmem:[#allocation294_spill] sm:$0xff] }
 0x4a7   :  { %6184 = vmatpush1.bf16.msra.mxu0 %v19264_v10  ;;  %6307 = vmatpush1.bf16.msra.mxu1 %v19265_v18  ;;  %v19295_v10 = vld [vmem:[#allocation295_spill] sm:$0xff]  ;;  %v19296_v18 = vld [vmem:[#allocation296_spill] sm:$0xff] }
 0x4a8   :  { %6185 = vmatprep.subr.bf16.mxu0 %v19266_v26  ;;  %6308 = vmatprep.subr.bf16.mxu1 %v19267_v27  ;;  %v19297_v26 = vld [vmem:[#allocation297_spill] sm:$0xff]  ;;  %v19298_v27 = vld [vmem:[#allocation298_spill] sm:$0xff] }
 0x4ab   :  { %6186 = vmatpush1.bf16.msra.mxu0 %v19268_v28  ;;  %6309 = vmatpush1.bf16.msra.mxu1 %v19269_v29  ;;  %v19299_v28 = vld [vmem:[#allocation299_spill] sm:$0xff]  ;;  %v19300_v29 = vld [vmem:[#allocation300_spill] sm:$0xff] }
 0x4ac   :  { %6187 = vmatprep.subr.bf16.mxu0 %v19270_v34  ;;  %6310 = vmatprep.subr.bf16.mxu1 %v19271_v35  ;;  %v19301_v34 = vld [vmem:[#allocation301_spill] sm:$0xff]  ;;  %v19302_v35 = vld [vmem:[#allocation302_spill] sm:$0xff] }
 0x4af   :  { %6188 = vmatpush1.bf16.msra.mxu0 %v19272_v36  ;;  %6311 = vmatpush1.bf16.msra.mxu1 %v19273_v42  ;;  %v19303_v36 = vld [vmem:[#allocation303_spill] sm:$0xff]  ;;  %v19304_v42 = vld [vmem:[#allocation304_spill] sm:$0xff] }
 0x4b0   :  { %6189 = vmatprep.subr.bf16.mxu0 %v19274_v43  ;;  %6312 = vmatprep.subr.bf16.mxu1 %v19275_v44  ;;  %v19305_v43 = vld [vmem:[#allocation305_spill] sm:$0xff]  ;;  %v19306_v44 = vld [vmem:[#allocation306_spill] sm:$0xff] }
 0x4b3   :  { %6190 = vmatpush1.bf16.msra.mxu0 %v19276_v45  ;;  %6313 = vmatpush1.bf16.msra.mxu1 %v19277_v50  ;;  %v19307_v45 = vld [vmem:[#allocation307_spill] sm:$0xff]  ;;  %v19308_v50 = vld [vmem:[#allocation308_spill] sm:$0xff] }
 0x4b4   :  { %6191 = vmatprep.subr.bf16.mxu0 %v19278_v54  ;;  %6314 = vmatprep.subr.bf16.mxu1 %v19279_v60  ;;  %v19309_v54 = vld [vmem:[#allocation309_spill] sm:$0xff]  ;;  %v19310_v60 = vld [vmem:[#allocation310_spill] sm:$0xff] }
 0x4b7   :  { %6192 = vmatpush1.bf16.msra.mxu0 %v19280_v52  ;;  %6315 = vmatpush1.bf16.msra.mxu1 %v19281_v61  ;;  %v19311_v52 = vld [vmem:[#allocation311_spill] sm:$0xff]  ;;  %v19312_v61 = vld [vmem:[#allocation312_spill] sm:$0xff] }
 0x4b8   :  { %6193 = vmatprep.subr.bf16.mxu0 %v19282_v62  ;;  %6316 = vmatprep.subr.bf16.mxu1 %v19283_v22  ;;  %v19313_v62 = vld [vmem:[#allocation313_spill] sm:$0xff]  ;;  %v19314_v22 = vld [vmem:[#allocation314_spill] sm:$0xff] }
 0x4bb   :  { %6194 = vmatpush1.bf16.msra.mxu0 %v19284_v6  ;;  %6317 = vmatpush1.bf16.msra.mxu1 %v19285_v7  ;;  %v19315_v6 = vld [vmem:[#allocation315_spill] sm:$0xff]  ;;  %v19316_v7 = vld [vmem:[#allocation316_spill] sm:$0xff] }
 0x4bc   :  { %6195 = vmatprep.subr.bf16.mxu0 %v19286_v11  ;;  %6318 = vmatprep.subr.bf16.mxu1 %v19287_v23  ;;  %v19317_v11 = vld [vmem:[#allocation317_spill] sm:$0xff]  ;;  %v19318_v23 = vld [vmem:[#allocation318_spill] sm:$0xff] }
 0x4bf   :  { %6196 = vmatpush1.bf16.msra.mxu0 %v19288_v24  ;;  %6319 = vmatpush1.bf16.msra.mxu1 %v19289_v4  ;;  %v19319_v24 = vld [vmem:[#allocation319_spill] sm:$0xff]  ;;  %v19320_v4 = vld [vmem:[#allocation320_spill] sm:$0xff] }
 0x4c0   :  { %6197 = vmatprep.subr.bf16.mxu0 %v19290_v2  ;;  %6320 = vmatprep.subr.bf16.mxu1 %v19291_v38  ;;  %v19321_v2 = vld [vmem:[#allocation321_spill] sm:$0xff]  ;;  %v19322_v38 = vld [vmem:[#allocation322_spill] sm:$0xff] }
 0x4c3   :  { %6198 = vmatpush1.bf16.msra.mxu0 %v19292_v41  ;;  %6321 = vmatpush1.bf16.msra.mxu1 %v19293_v0  ;;  %v19323_v41 = vld [vmem:[#allocation323_spill] sm:$0xff]  ;;  %v19324_v0 = vld [vmem:[#allocation324_spill] sm:$0xff] }
 0x4c4   :  { %6199 = vmatprep.subr.bf16.mxu0 %v19294_v59  ;;  %6322 = vmatprep.subr.bf16.mxu1 %v19295_v10  ;;  %v19325_v59 = vld [vmem:[#allocation325_spill] sm:$0xff]  ;;  %v19326_v10 = vld [vmem:[#allocation326_spill] sm:$0xff] }
 0x4c7   :  { %6200 = vmatpush1.bf16.msra.mxu0 %v19296_v18  ;;  %6323 = vmatpush1.bf16.msra.mxu1 %v19297_v26  ;;  %v19327_v18 = vld [vmem:[#allocation327_spill] sm:$0xff]  ;;  %v19328_v26 = vld [vmem:[#allocation328_spill] sm:$0xff] }
 0x4c8   :  { %6201 = vmatprep.subr.bf16.mxu0 %v19298_v27  ;;  %6324 = vmatprep.subr.bf16.mxu1 %v19299_v28  ;;  %v19329_v27 = vld [vmem:[#allocation329_spill] sm:$0xff]  ;;  %v19330_v28 = vld [vmem:[#allocation330_spill] sm:$0xff] }
 0x4cb   :  { %6202 = vmatpush1.bf16.msra.mxu0 %v19300_v29  ;;  %6325 = vmatpush1.bf16.msra.mxu1 %v19301_v34  ;;  %v19331_v29 = vld [vmem:[#allocation331_spill] sm:$0xff]  ;;  %v19332_v34 = vld [vmem:[#allocation332_spill] sm:$0xff] }
 0x4cc   :  { %6203 = vmatprep.subr.bf16.mxu0 %v19302_v35  ;;  %6326 = vmatprep.subr.bf16.mxu1 %v19303_v36  ;;  %v19333_v35 = vld [vmem:[#allocation333_spill] sm:$0xff]  ;;  %v19334_v36 = vld [vmem:[#allocation334_spill] sm:$0xff] }
 0x4cf   :  { %6204 = vmatpush1.bf16.msra.mxu0 %v19304_v42  ;;  %6327 = vmatpush1.bf16.msra.mxu1 %v19305_v43  ;;  %v19335_v42 = vld [vmem:[#allocation335_spill] sm:$0xff]  ;;  %v19336_v43 = vld [vmem:[#allocation336_spill] sm:$0xff] }
 0x4d0   :  { %6205 = vmatprep.subr.bf16.mxu0 %v19306_v44  ;;  %6328 = vmatprep.subr.bf16.mxu1 %v19307_v45  ;;  %v19337_v44 = vld [vmem:[#allocation337_spill] sm:$0xff]  ;;  %v19338_v45 = vld [vmem:[#allocation338_spill] sm:$0xff] }
 0x4d3   :  { %6206 = vmatpush1.bf16.msra.mxu0 %v19308_v50  ;;  %6329 = vmatpush1.bf16.msra.mxu1 %v19309_v54  ;;  %v19339_v50 = vld [vmem:[#allocation339_spill] sm:$0xff]  ;;  %v19340_v54 = vld [vmem:[#allocation340_spill] sm:$0xff] }
 0x4d4   :  { %6207 = vmatprep.subr.bf16.mxu0 %v19310_v60  ;;  %6330 = vmatprep.subr.bf16.mxu1 %v19311_v52  ;;  %v19341_v60 = vld [vmem:[#allocation341_spill] sm:$0xff]  ;;  %v19342_v52 = vld [vmem:[#allocation342_spill] sm:$0xff] }
 0x4d7   :  { %6208 = vmatpush1.bf16.msra.mxu0 %v19312_v61  ;;  %6331 = vmatpush1.bf16.msra.mxu1 %v19313_v62  ;;  %v19343_v61 = vld [vmem:[#allocation343_spill] sm:$0xff]  ;;  %v19344_v62 = vld [vmem:[#allocation344_spill] sm:$0xff] }
 0x4d8   :  { %6218 = vmatprep.subr.bf16.mxu0 %v19314_v22  ;;  %6341 = vmatprep.subr.bf16.mxu1 %v19315_v6  ;;  %v19345_v22 = vld [vmem:[#allocation345_spill] sm:$0xff]  ;;  %v19346_v6 = vld [vmem:[#allocation346_spill] sm:$0xff] }
 0x4da   :  { %6210 = vmatmul.mubr.bf16.vlgmr.msra.gmra.mrb[20].mxu0 %v16106_v51  ;;  %6333 = vmatmul.mubr.bf16.vlgmr.msra.gmra.mrb[20].mxu1 %v16106_v51 }
 0x4db   :  { %6219 = vmatpush1.bf16.msra.mxu0 %v19316_v7  ;;  %6342 = vmatpush1.bf16.msra.mxu1 %v19317_v11  ;;  %v19347_v7 = vld [vmem:[#allocation347_spill] sm:$0xff]  ;;  %v19348_v11 = vld [vmem:[#allocation348_spill] sm:$0xff] }
 0x4dc   :  { %6220 = vmatprep.subr.bf16.mxu0 %v19318_v23  ;;  %6343 = vmatprep.subr.bf16.mxu1 %v19319_v24  ;;  %v19349_v23 = vld [vmem:[#allocation349_spill] sm:$0xff]  ;;  %v19350_v24 = vld [vmem:[#allocation350_spill] sm:$0xff] }
 0x4dd   :  { %6250 = vmatprep.mubr.bf16.mxu0 %v16119_v63  ;;  %6373 = vmatprep.mubr.bf16.mxu1 %v16119_v63 }
 0x4df   :  { %6221 = vmatpush1.bf16.msra.mxu0 %v19320_v4  ;;  %6344 = vmatpush1.bf16.msra.mxu1 %v19321_v2  ;;  %v19351_v4 = vld [vmem:[#allocation351_spill] sm:$0xff]  ;;  %v19352_v2 = vld [vmem:[#allocation352_spill] sm:$0xff] }
 0x4e0   :  { %6222 = vmatprep.subr.bf16.mxu0 %v19322_v38  ;;  %6345 = vmatprep.subr.bf16.mxu1 %v19323_v41  ;;  %v19353_v38 = vld [vmem:[#allocation353_spill] sm:$0xff]  ;;  %v19354_v41 = vld [vmem:[#allocation354_spill] sm:$0xff] }
 0x4e3   :  { %6223 = vmatpush1.bf16.msra.mxu0 %v19324_v0  ;;  %6346 = vmatpush1.bf16.msra.mxu1 %v19325_v59  ;;  %v19355_v0 = vld [vmem:[#allocation355_spill] sm:$0xff]  ;;  %v19356_v59 = vld [vmem:[#allocation356_spill] sm:$0xff] }
 0x4e4   :  { %6224 = vmatprep.subr.bf16.mxu0 %v19326_v10  ;;  %6347 = vmatprep.subr.bf16.mxu1 %v19327_v18  ;;  %v19357_v10 = vld [vmem:[#allocation357_spill] sm:$0xff]  ;;  %v19358_v18 = vld [vmem:[#allocation358_spill] sm:$0xff] }
 0x4e7   :  { %6225 = vmatpush1.bf16.msra.mxu0 %v19328_v26  ;;  %6348 = vmatpush1.bf16.msra.mxu1 %v19329_v27  ;;  %v19359_v26 = vld [vmem:[#allocation359_spill] sm:$0xff]  ;;  %v19360_v27 = vld [vmem:[#allocation360_spill] sm:$0xff] }
 0x4e8   :  { %6226 = vmatprep.subr.bf16.mxu0 %v19330_v28  ;;  %6349 = vmatprep.subr.bf16.mxu1 %v19331_v29  ;;  %v19361_v28 = vld [vmem:[#allocation361_spill] sm:$0xff]  ;;  %v19362_v29 = vld [vmem:[#allocation362_spill] sm:$0xff] }
 0x4eb   :  { %6227 = vmatpush1.bf16.msra.mxu0 %v19332_v34  ;;  %6350 = vmatpush1.bf16.msra.mxu1 %v19333_v35  ;;  %v19363_v34 = vld [vmem:[#allocation363_spill] sm:$0xff]  ;;  %v19364_v35 = vld [vmem:[#allocation364_spill] sm:$0xff] }
 0x4ec   :  { %6228 = vmatprep.subr.bf16.mxu0 %v19334_v36  ;;  %6351 = vmatprep.subr.bf16.mxu1 %v19335_v42  ;;  %v19365_v36 = vld [vmem:[#allocation365_spill] sm:$0xff]  ;;  %v19366_v42 = vld [vmem:[#allocation366_spill] sm:$0xff] }
 0x4ef   :  { %6229 = vmatpush1.bf16.msra.mxu0 %v19336_v43  ;;  %6352 = vmatpush1.bf16.msra.mxu1 %v19337_v44  ;;  %v19367_v43 = vld [vmem:[#allocation367_spill] sm:$0xff]  ;;  %v19368_v44 = vld [vmem:[#allocation368_spill] sm:$0xff] }
 0x4f0   :  { %6230 = vmatprep.subr.bf16.mxu0 %v19338_v45  ;;  %6353 = vmatprep.subr.bf16.mxu1 %v19339_v50  ;;  %v19369_v45 = vld [vmem:[#allocation369_spill] sm:$0xff]  ;;  %v19370_v50 = vld [vmem:[#allocation370_spill] sm:$0xff] }
 0x4f3   :  { %6231 = vmatpush1.bf16.msra.mxu0 %v19340_v54  ;;  %6354 = vmatpush1.bf16.msra.mxu1 %v19341_v60  ;;  %v19371_v54 = vld [vmem:[#allocation371_spill] sm:$0xff]  ;;  %v19372_v60 = vld [vmem:[#allocation372_spill] sm:$0xff] }
 0x4f4   :  { %6232 = vmatprep.subr.bf16.mxu0 %v19342_v52  ;;  %6355 = vmatprep.subr.bf16.mxu1 %v19343_v61  ;;  %v19373_v52 = vld [vmem:[#allocation373_spill] sm:$0xff]  ;;  %v19374_v61 = vld [vmem:[#allocation374_spill] sm:$0xff] }
 0x4f7   :  { %6233 = vmatpush1.bf16.msra.mxu0 %v19344_v62  ;;  %6356 = vmatpush1.bf16.msra.mxu1 %v19345_v22  ;;  %v19375_v62 = vld [vmem:[#allocation375_spill] sm:$0xff]  ;;  %v19376_v22 = vld [vmem:[#allocation376_spill] sm:$0xff] }
 0x4f8   :  { %6234 = vmatprep.subr.bf16.mxu0 %v19346_v6  ;;  %6357 = vmatprep.subr.bf16.mxu1 %v19347_v7  ;;  %v19377_v6 = vld [vmem:[#allocation377_spill] sm:$0xff]  ;;  %v19378_v7 = vld [vmem:[#allocation378_spill] sm:$0xff] }
 0x4fb   :  { %6235 = vmatpush1.bf16.msra.mxu0 %v19348_v11  ;;  %6358 = vmatpush1.bf16.msra.mxu1 %v19349_v23  ;;  %v19379_v11 = vld [vmem:[#allocation379_spill] sm:$0xff]  ;;  %v19380_v23 = vld [vmem:[#allocation380_spill] sm:$0xff] }
 0x4fc   :  { %6236 = vmatprep.subr.bf16.mxu0 %v19350_v24  ;;  %6359 = vmatprep.subr.bf16.mxu1 %v19351_v4  ;;  %v19381_v24 = vld [vmem:[#allocation381_spill] sm:$0xff]  ;;  %v19382_v4 = vld [vmem:[#allocation382_spill] sm:$0xff] }
 0x4ff   :  { %6237 = vmatpush1.bf16.msra.mxu0 %v19352_v2  ;;  %6360 = vmatpush1.bf16.msra.mxu1 %v19353_v38  ;;  %v19383_v2 = vld [vmem:[#allocation383_spill] sm:$0xff]  ;;  %v19384_v38 = vld [vmem:[#allocation384_spill] sm:$0xff] }
 0x500   :  { %6238 = vmatprep.subr.bf16.mxu0 %v19354_v41  ;;  %6361 = vmatprep.subr.bf16.mxu1 %v19355_v0  ;;  %v19385_v41 = vld [vmem:[#allocation385_spill] sm:$0xff]  ;;  %v19386_v0 = vld [vmem:[#allocation386_spill] sm:$0xff] }
 0x503   :  { %6239 = vmatpush1.bf16.msra.mxu0 %v19356_v59  ;;  %6362 = vmatpush1.bf16.msra.mxu1 %v19357_v10  ;;  %v19387_v59 = vld [vmem:[#allocation387_spill] sm:$0xff]  ;;  %v19388_v10 = vld [vmem:[#allocation388_spill] sm:$0xff] }
 0x504   :  { %6240 = vmatprep.subr.bf16.mxu0 %v19358_v18  ;;  %6363 = vmatprep.subr.bf16.mxu1 %v19359_v26  ;;  %v19389_v18 = vld [vmem:[#allocation389_spill] sm:$0xff]  ;;  %v19390_v26 = vld [vmem:[#allocation390_spill] sm:$0xff] }
 0x507   :  { %6241 = vmatpush1.bf16.msra.mxu0 %v19360_v27  ;;  %6364 = vmatpush1.bf16.msra.mxu1 %v19361_v28  ;;  %v19391_v27 = vld [vmem:[#allocation391_spill] sm:$0xff]  ;;  %v19392_v28 = vld [vmem:[#allocation392_spill] sm:$0xff] }
 0x508   :  { %6242 = vmatprep.subr.bf16.mxu0 %v19362_v29  ;;  %6365 = vmatprep.subr.bf16.mxu1 %v19363_v34  ;;  %v19393_v29 = vld [vmem:[#allocation393_spill] sm:$0xff]  ;;  %v19394_v34 = vld [vmem:[#allocation394_spill] sm:$0xff] }
 0x50b   :  { %6243 = vmatpush1.bf16.msra.mxu0 %v19364_v35  ;;  %6366 = vmatpush1.bf16.msra.mxu1 %v19365_v36  ;;  %v19395_v35 = vld [vmem:[#allocation395_spill] sm:$0xff]  ;;  %v19396_v36 = vld [vmem:[#allocation396_spill] sm:$0xff] }
 0x50c   :  { %6244 = vmatprep.subr.bf16.mxu0 %v19366_v42  ;;  %6367 = vmatprep.subr.bf16.mxu1 %v19367_v43  ;;  %v19397_v42 = vld [vmem:[#allocation397_spill] sm:$0xff]  ;;  %v19398_v43 = vld [vmem:[#allocation398_spill] sm:$0xff] }
 0x50f   :  { %6245 = vmatpush1.bf16.msra.mxu0 %v19368_v44  ;;  %6368 = vmatpush1.bf16.msra.mxu1 %v19369_v45  ;;  %v19399_v45 = vld [vmem:[#allocation399_spill] sm:$0xff] }
 0x510   :  { %6246 = vmatprep.subr.bf16.mxu0 %v19370_v50  ;;  %6369 = vmatprep.subr.bf16.mxu1 %v19371_v54  ;;  %v19400_v50 = vld [vmem:[#allocation402_spill] sm:$0xff] }
 0x513   :  { %6247 = vmatpush1.bf16.msra.mxu0 %v19372_v60  ;;  %6370 = vmatpush1.bf16.msra.mxu1 %v19373_v52 }
 0x514   :  { %6248 = vmatprep.subr.bf16.mxu0 %v19374_v61  ;;  %6371 = vmatprep.subr.bf16.mxu1 %v19375_v62  ;;  %v19401_v61 = vld [vmem:[#allocation404_spill] sm:$0xff] }
 0x517   :  { %6249 = vmatpush1.bf16.msra.mxu0 %v19376_v22  ;;  %6372 = vmatpush1.bf16.msra.mxu1 %v19377_v6  ;;  %v19402_v22 = vld [vmem:[#allocation405_spill] sm:$0xff] }
 0x518   :  { %6382 = vmatprep.subr.bf16.mxu0 %v19378_v7  ;;  %6505 = vmatprep.subr.bf16.mxu1 %v19379_v11 }
 0x51a   :  { %6251 = vmatmul.mubr.bf16.vlgmr.msra.gmra.mrb[20].mxu0 %v16187_v37  ;;  %6374 = vmatmul.mubr.bf16.vlgmr.msra.gmra.mrb[20].mxu1 %v16187_v37 }
 0x51b   :  { %6383 = vmatpush1.bf16.msra.mxu0 %v19380_v23  ;;  %6506 = vmatpush1.bf16.msra.mxu1 %v19381_v24  ;;  %v19403_v23 = vld [vmem:[#allocation400_spill] sm:$0xff]  ;;  %v19404_v24 = vld [vmem:[#allocation406_spill] sm:$0xff] }
 0x51c   :  { %6384 = vmatprep.subr.bf16.mxu0 %v19382_v4  ;;  %6507 = vmatprep.subr.bf16.mxu1 %v19383_v2 }
 0x51d   :  { %6414 = vmatprep.mubr.bf16.mxu0 %v15949_v40  ;;  %6537 = vmatprep.mubr.bf16.mxu1 %v15949_v40 }
 0x51f   :  { %6385 = vmatpush1.bf16.msra.mxu0 %v19384_v38  ;;  %6508 = vmatpush1.bf16.msra.mxu1 %v19385_v41  ;;  %v19405_v41 = vld [vmem:[#allocation401_spill] sm:$0xff] }
 0x520   :  { %6386 = vmatprep.subr.bf16.mxu0 %v19386_v0  ;;  %6509 = vmatprep.subr.bf16.mxu1 %v19387_v59  ;;  %v19406_v59 = vld [vmem:[#allocation403_spill] sm:$0xff] }
 0x523   :  { %6387 = vmatpush1.bf16.msra.mxu0 %v19388_v10  ;;  %6510 = vmatpush1.bf16.msra.mxu1 %v19389_v18  ;;  %v19407_v10 = vld [vmem:[#allocation407_spill] sm:$0xff]  ;;  %v19408_v18 = vld [vmem:[#allocation408_spill] sm:$0xff] }
 0x524   :  { %6388 = vmatprep.subr.bf16.mxu0 %v19390_v26  ;;  %6511 = vmatprep.subr.bf16.mxu1 %v19391_v27  ;;  %v19409_v26 = vld [vmem:[#allocation409_spill] sm:$0xff]  ;;  %v19410_v27 = vld [vmem:[#allocation410_spill] sm:$0xff] }
 0x527   :  { %6389 = vmatpush1.bf16.msra.mxu0 %v19392_v28  ;;  %6512 = vmatpush1.bf16.msra.mxu1 %v19393_v29  ;;  %v19411_v28 = vld [vmem:[#allocation411_spill] sm:$0xff]  ;;  %v19412_v29 = vld [vmem:[#allocation412_spill] sm:$0xff] }
 0x528   :  { %6390 = vmatprep.subr.bf16.mxu0 %v19394_v34  ;;  %6513 = vmatprep.subr.bf16.mxu1 %v19395_v35  ;;  %v19413_v34 = vld [vmem:[#allocation413_spill] sm:$0xff]  ;;  %v19415_v35 = vld [vmem:[#allocation415_spill] sm:$0xff] }
 0x52b   :  { %6391 = vmatpush1.bf16.msra.mxu0 %v19396_v36  ;;  %6514 = vmatpush1.bf16.msra.mxu1 %v19397_v42  ;;  %v19416_v36 = vld [vmem:[#allocation416_spill] sm:$0xff]  ;;  %v19417_v42 = vld [vmem:[#allocation417_spill] sm:$0xff] }
 0x52c   :  { %6392 = vmatprep.subr.bf16.mxu0 %v19398_v43  ;;  %6515 = vmatprep.subr.bf16.mxu1 %v19399_v45  ;;  %v19418_v43 = vld [vmem:[#allocation418_spill] sm:$0xff]  ;;  %v19419_v45 = vld [vmem:[#allocation419_spill] sm:$0xff] }
 0x52d   :  { %v16428_v44 = vpop.f32.mrb[16].mxu0  ;;  %v16433_v60 = vpop.f32.mrb[16].mxu1 }
 0x52e   :  { %v6941_v54 = vpack.c.bf16 %v16428_v44, %v19400_v50  ;;  %v16435_v52 = vpop.f32.mrb[17].mxu0  ;;  %v6943_v62 = vpack.c.bf16 %v16433_v60, %v19401_v61  ;;  %v16441_v7 = vpop.f32.mrb[17].mxu1  ;;  %v12854_v44 = vld [vmem:[#allocation7 + $0x1d0] sm:$0xff]  }
 0x52f   :  { %v6942_v6 = vpack.c.bf16 %v16435_v52, %v19402_v22  ;;  %v6010_v11 = vpop.f32.mrb[18].mxu0  ;;  %6393 = vmatpush1.bf16.msra.mxu0 %v19403_v23  ;;  %v6944_v4 = vpack.c.bf16 %v16441_v7, %v19404_v24  ;;  %v6133_v2 = vpop.f32.mrb[18].mxu1  ;;  %6516 = vmatpush1.bf16.msra.mxu1 %v14819_v30  ;;  %v19414_v30 = vld [vmem:[#allocation414_spill] sm:$0xff]  ;;  %v19421_v23 = vld [vmem:[#allocation421_spill] sm:$0xff]  ;;  %v12827_v52 = vld [vmem:[#allocation7 + $0x18] sm:$0xff]  }
 0x530   :  { %v6011_v38 = vpop.f32.mrb[19].mxu0  ;;  %6394 = vmatprep.subr.bf16.mxu0 %v19405_v41  ;;  %v6134_v0 = vpop.f32.mrb[19].mxu1  ;;  %6517 = vmatprep.subr.bf16.mxu1 %v19406_v59  ;;  %v19420_v11 = vld [vmem:[#allocation420_spill] sm:$0xff]  ;;  %v19422_v2 = vld [vmem:[#allocation422_spill] sm:$0xff]  ;;  %v12830_v7 = vld [vmem:[#allocation7 + $0xe0] sm:$0xff]  }
 0x531   :  { %v19423_v38 = vld [vmem:[#allocation423_spill] sm:$0xff]  ;;  %v19424_v41 = vld [vmem:[#allocation424_spill] sm:$0xff]  ;;  %v19425_v0 = vld [vmem:[#allocation425_spill] sm:$0xff] }
 0x532   :  { %v19426_v59 = vld [vmem:[#allocation426_spill] sm:$0xff]  ;;  %v12856_v60 = vld [vmem:[#allocation7 + $0x190] sm:$0xff]  }
 0x533   :  { %6395 = vmatpush1.bf16.msra.mxu0 %v19407_v10  ;;  %6518 = vmatpush1.bf16.msra.mxu1 %v19408_v18  ;;  %v19427_v10 = vld [vmem:[#allocation427_spill] sm:$0xff]  ;;  %v19428_v18 = vld [vmem:[#allocation428_spill] sm:$0xff] }
 0x534   :  { %6396 = vmatprep.subr.bf16.mxu0 %v19409_v26  ;;  %6519 = vmatprep.subr.bf16.mxu1 %v19410_v27  ;;  %v19429_v26 = vld [vmem:[#allocation429_spill] sm:$0xff]  ;;  %v19430_v27 = vld [vmem:[#allocation430_spill] sm:$0xff] }
 0x537   :  { %6397 = vmatpush1.bf16.msra.mxu0 %v19411_v28  ;;  %6520 = vmatpush1.bf16.msra.mxu1 %v19412_v29  ;;  %v19431_v28 = vld [vmem:[#allocation431_spill] sm:$0xff]  ;;  %v19432_v29 = vld [vmem:[#allocation432_spill] sm:$0xff] }
 0x538   :  { %6398 = vmatprep.subr.bf16.mxu0 %v19413_v34  ;;  %6521 = vmatprep.subr.bf16.mxu1 %v19414_v30  ;;  %v19433_v34 = vld [vmem:[#allocation433_spill] sm:$0xff]  ;;  %v19434_v30 = vld [vmem:[#allocation434_spill] sm:$0xff] }
 0x53b   :  { %6399 = vmatpush1.bf16.msra.mxu0 %v19415_v35  ;;  %6522 = vmatpush1.bf16.msra.mxu1 %v19416_v36  ;;  %v19435_v35 = vld [vmem:[#allocation435_spill] sm:$0xff]  ;;  %v19436_v36 = vld [vmem:[#allocation436_spill] sm:$0xff] }
 0x53c   :  { %6400 = vmatprep.subr.bf16.mxu0 %v19417_v42  ;;  %6523 = vmatprep.subr.bf16.mxu1 %v19418_v43  ;;  %v19437_v42 = vld [vmem:[#allocation437_spill] sm:$0xff]  ;;  %v19438_v43 = vld [vmem:[#allocation438_spill] sm:$0xff] }
 0x53f   :  { %6401 = vmatpush1.bf16.msra.mxu0 %v19419_v45  ;;  %6524 = vmatpush1.bf16.msra.mxu1 %v19420_v11  ;;  %v19439_v45 = vld [vmem:[#allocation439_spill] sm:$0xff]  ;;  %v19440_v11 = vld [vmem:[#allocation440_spill] sm:$0xff] }
 0x540   :  { %6402 = vmatprep.subr.bf16.mxu0 %v19421_v23  ;;  %6525 = vmatprep.subr.bf16.mxu1 %v19422_v2  ;;  %v19441_v23 = vld [vmem:[#allocation441_spill] sm:$0xff]  ;;  %v19442_v2 = vld [vmem:[#allocation442_spill] sm:$0xff] }
 0x543   :  { %6403 = vmatpush1.bf16.msra.mxu0 %v19423_v38  ;;  %6526 = vmatpush1.bf16.msra.mxu1 %v19424_v41  ;;  %v19443_v38 = vld [vmem:[#allocation443_spill] sm:$0xff]  ;;  %v19444_v41 = vld [vmem:[#allocation444_spill] sm:$0xff] }
 0x544   :  { %6404 = vmatprep.subr.bf16.mxu0 %v19425_v0  ;;  %6527 = vmatprep.subr.bf16.mxu1 %v19426_v59  ;;  %v19445_v0 = vld [vmem:[#allocation445_spill] sm:$0xff]  ;;  %v19446_v59 = vld [vmem:[#allocation446_spill] sm:$0xff] }
 0x547   :  { %6405 = vmatpush1.bf16.msra.mxu0 %v19427_v10  ;;  %6528 = vmatpush1.bf16.msra.mxu1 %v19428_v18  ;;  %v19447_v10 = vld [vmem:[#allocation447_spill] sm:$0xff]  ;;  %v19448_v18 = vld [vmem:[#allocation448_spill] sm:$0xff] }
 0x548   :  { %6406 = vmatprep.subr.bf16.mxu0 %v19429_v26  ;;  %6529 = vmatprep.subr.bf16.mxu1 %v19430_v27  ;;  %v19449_v26 = vld [vmem:[#allocation449_spill] sm:$0xff]  ;;  %v19450_v27 = vld [vmem:[#allocation450_spill] sm:$0xff] }
 0x54b   :  { %6407 = vmatpush1.bf16.msra.mxu0 %v19431_v28  ;;  %6530 = vmatpush1.bf16.msra.mxu1 %v19432_v29  ;;  %v19451_v28 = vld [vmem:[#allocation451_spill] sm:$0xff]  ;;  %v19452_v29 = vld [vmem:[#allocation452_spill] sm:$0xff] }
 0x54c   :  { %6408 = vmatprep.subr.bf16.mxu0 %v19433_v34  ;;  %6531 = vmatprep.subr.bf16.mxu1 %v19434_v30  ;;  %v19453_v34 = vld [vmem:[#allocation453_spill] sm:$0xff]  ;;  %v19454_v30 = vld [vmem:[#allocation454_spill] sm:$0xff] }
 0x54f   :  { %6409 = vmatpush1.bf16.msra.mxu0 %v19435_v35  ;;  %6532 = vmatpush1.bf16.msra.mxu1 %v19436_v36  ;;  %v19455_v35 = vld [vmem:[#allocation455_spill] sm:$0xff]  ;;  %v19456_v36 = vld [vmem:[#allocation456_spill] sm:$0xff] }
 0x550   :  { %6410 = vmatprep.subr.bf16.mxu0 %v19437_v42  ;;  %6533 = vmatprep.subr.bf16.mxu1 %v19438_v43  ;;  %v19457_v42 = vld [vmem:[#allocation457_spill] sm:$0xff]  ;;  %v19458_v43 = vld [vmem:[#allocation458_spill] sm:$0xff] }
 0x553   :  { %6411 = vmatpush1.bf16.msra.mxu0 %v19439_v45  ;;  %6534 = vmatpush1.bf16.msra.mxu1 %v19440_v11  ;;  %v19459_v45 = vld [vmem:[#allocation459_spill] sm:$0xff]  ;;  %v19460_v11 = vld [vmem:[#allocation460_spill] sm:$0xff] }
 0x554   :  { %6412 = vmatprep.subr.bf16.mxu0 %v19441_v23  ;;  %6535 = vmatprep.subr.bf16.mxu1 %v19442_v2  ;;  %v19461_v23 = vld [vmem:[#allocation461_spill] sm:$0xff]  ;;  %v19462_v2 = vld [vmem:[#allocation462_spill] sm:$0xff] }
 0x557   :  { %6413 = vmatpush1.bf16.msra.mxu0 %v19443_v38  ;;  %6536 = vmatpush1.bf16.msra.mxu1 %v19444_v41  ;;  %v19463_v38 = vld [vmem:[#allocation463_spill] sm:$0xff]  ;;  %v19464_v41 = vld [vmem:[#allocation464_spill] sm:$0xff] }
 0x558   :  { %6423 = vmatprep.subr.bf16.mxu0 %v19445_v0  ;;  %6546 = vmatprep.subr.bf16.mxu1 %v19446_v59  ;;  %v19465_v0 = vld [vmem:[#allocation465_spill] sm:$0xff]  ;;  %v19466_v59 = vld [vmem:[#allocation466_spill] sm:$0xff] }
 0x55a   :  { %6415 = vmatmul.mubr.bf16.vlgmr.msra.gmra.mrb[24].mxu0 %v16025_v12  ;;  %6538 = vmatmul.mubr.bf16.vlgmr.msra.gmra.mrb[24].mxu1 %v16025_v12 }
 0x55b   :  { %6424 = vmatpush1.bf16.msra.mxu0 %v19447_v10  ;;  %6547 = vmatpush1.bf16.msra.mxu1 %v19448_v18  ;;  %v19467_v10 = vld [vmem:[#allocation467_spill] sm:$0xff]  ;;  %v19468_v18 = vld [vmem:[#allocation468_spill] sm:$0xff] }
 0x55c   :  { %6425 = vmatprep.subr.bf16.mxu0 %v19449_v26  ;;  %6548 = vmatprep.subr.bf16.mxu1 %v19450_v27  ;;  %v19469_v26 = vld [vmem:[#allocation469_spill] sm:$0xff]  ;;  %v19470_v27 = vld [vmem:[#allocation470_spill] sm:$0xff] }
 0x55d   :  { %6455 = vmatprep.mubr.bf16.mxu0 %v16038_v31  ;;  %6578 = vmatprep.mubr.bf16.mxu1 %v16038_v31 }
 0x55f   :  { %6426 = vmatpush1.bf16.msra.mxu0 %v19451_v28  ;;  %6549 = vmatpush1.bf16.msra.mxu1 %v19452_v29  ;;  %v19471_v28 = vld [vmem:[#allocation471_spill] sm:$0xff]  ;;  %v19472_v29 = vld [vmem:[#allocation472_spill] sm:$0xff] }
 0x560   :  { %6427 = vmatprep.subr.bf16.mxu0 %v19453_v34  ;;  %6550 = vmatprep.subr.bf16.mxu1 %v19454_v30  ;;  %v19473_v34 = vld [vmem:[#allocation473_spill] sm:$0xff]  ;;  %v19474_v30 = vld [vmem:[#allocation474_spill] sm:$0xff] }
 0x563   :  { %6428 = vmatpush1.bf16.msra.mxu0 %v19455_v35  ;;  %6551 = vmatpush1.bf16.msra.mxu1 %v19456_v36  ;;  %v19475_v35 = vld [vmem:[#allocation475_spill] sm:$0xff]  ;;  %v19476_v36 = vld [vmem:[#allocation476_spill] sm:$0xff] }
 0x564   :  { %6429 = vmatprep.subr.bf16.mxu0 %v19457_v42  ;;  %6552 = vmatprep.subr.bf16.mxu1 %v19458_v43  ;;  %v19477_v42 = vld [vmem:[#allocation477_spill] sm:$0xff]  ;;  %v19478_v43 = vld [vmem:[#allocation478_spill] sm:$0xff] }
 0x567   :  { %6430 = vmatpush1.bf16.msra.mxu0 %v19459_v45  ;;  %6553 = vmatpush1.bf16.msra.mxu1 %v19460_v11  ;;  %v19479_v45 = vld [vmem:[#allocation479_spill] sm:$0xff]  ;;  %v19480_v11 = vld [vmem:[#allocation480_spill] sm:$0xff] }
 0x568   :  { %6431 = vmatprep.subr.bf16.mxu0 %v19461_v23  ;;  %6554 = vmatprep.subr.bf16.mxu1 %v19462_v2  ;;  %v19481_v23 = vld [vmem:[#allocation481_spill] sm:$0xff]  ;;  %v19482_v2 = vld [vmem:[#allocation482_spill] sm:$0xff] }
 0x56b   :  { %6432 = vmatpush1.bf16.msra.mxu0 %v19463_v38  ;;  %6555 = vmatpush1.bf16.msra.mxu1 %v19464_v41  ;;  %v19483_v38 = vld [vmem:[#allocation483_spill] sm:$0xff]  ;;  %v19484_v41 = vld [vmem:[#allocation484_spill] sm:$0xff] }
 0x56c   :  { %6433 = vmatprep.subr.bf16.mxu0 %v19465_v0  ;;  %6556 = vmatprep.subr.bf16.mxu1 %v19466_v59  ;;  %v19485_v0 = vld [vmem:[#allocation485_spill] sm:$0xff]  ;;  %v19486_v59 = vld [vmem:[#allocation486_spill] sm:$0xff] }
 0x56f   :  { %6434 = vmatpush1.bf16.msra.mxu0 %v19467_v10  ;;  %6557 = vmatpush1.bf16.msra.mxu1 %v19468_v18  ;;  %v19487_v10 = vld [vmem:[#allocation487_spill] sm:$0xff]  ;;  %v19488_v18 = vld [vmem:[#allocation488_spill] sm:$0xff] }
 0x570   :  { %6435 = vmatprep.subr.bf16.mxu0 %v19469_v26  ;;  %6558 = vmatprep.subr.bf16.mxu1 %v19470_v27  ;;  %v19489_v26 = vld [vmem:[#allocation489_spill] sm:$0xff]  ;;  %v19490_v27 = vld [vmem:[#allocation490_spill] sm:$0xff] }
 0x573   :  { %6436 = vmatpush1.bf16.msra.mxu0 %v19471_v28  ;;  %6559 = vmatpush1.bf16.msra.mxu1 %v19472_v29  ;;  %v19491_v28 = vld [vmem:[#allocation491_spill] sm:$0xff]  ;;  %v19492_v29 = vld [vmem:[#allocation492_spill] sm:$0xff] }
 0x574   :  { %6437 = vmatprep.subr.bf16.mxu0 %v19473_v34  ;;  %6560 = vmatprep.subr.bf16.mxu1 %v19474_v30  ;;  %v19493_v34 = vld [vmem:[#allocation493_spill] sm:$0xff]  ;;  %v19494_v30 = vld [vmem:[#allocation494_spill] sm:$0xff] }
 0x577   :  { %6438 = vmatpush1.bf16.msra.mxu0 %v19475_v35  ;;  %6561 = vmatpush1.bf16.msra.mxu1 %v19476_v36  ;;  %v19495_v35 = vld [vmem:[#allocation495_spill] sm:$0xff]  ;;  %v19496_v36 = vld [vmem:[#allocation496_spill] sm:$0xff] }
 0x578   :  { %6439 = vmatprep.subr.bf16.mxu0 %v19477_v42  ;;  %6562 = vmatprep.subr.bf16.mxu1 %v19478_v43  ;;  %v19497_v42 = vld [vmem:[#allocation497_spill] sm:$0xff]  ;;  %v19498_v43 = vld [vmem:[#allocation498_spill] sm:$0xff] }
 0x57b   :  { %6440 = vmatpush1.bf16.msra.mxu0 %v19479_v45  ;;  %6563 = vmatpush1.bf16.msra.mxu1 %v19480_v11  ;;  %v19499_v45 = vld [vmem:[#allocation499_spill] sm:$0xff]  ;;  %v19500_v11 = vld [vmem:[#allocation500_spill] sm:$0xff] }
 0x57c   :  { %6441 = vmatprep.subr.bf16.mxu0 %v19481_v23  ;;  %6564 = vmatprep.subr.bf16.mxu1 %v19482_v2  ;;  %v19501_v23 = vld [vmem:[#allocation501_spill] sm:$0xff]  ;;  %v19502_v2 = vld [vmem:[#allocation502_spill] sm:$0xff] }
 0x57f   :  { %6442 = vmatpush1.bf16.msra.mxu0 %v19483_v38  ;;  %6565 = vmatpush1.bf16.msra.mxu1 %v19484_v41  ;;  %v19503_v38 = vld [vmem:[#allocation503_spill] sm:$0xff]  ;;  %v19504_v41 = vld [vmem:[#allocation504_spill] sm:$0xff] }
 0x580   :  { %6443 = vmatprep.subr.bf16.mxu0 %v19485_v0  ;;  %6566 = vmatprep.subr.bf16.mxu1 %v19486_v59  ;;  %v19505_v0 = vld [vmem:[#allocation505_spill] sm:$0xff]  ;;  %v19506_v59 = vld [vmem:[#allocation506_spill] sm:$0xff] }
 0x583   :  { %6444 = vmatpush1.bf16.msra.mxu0 %v19487_v10  ;;  %6567 = vmatpush1.bf16.msra.mxu1 %v19488_v18  ;;  %v19507_v10 = vld [vmem:[#allocation507_spill] sm:$0xff]  ;;  %v19508_v18 = vld [vmem:[#allocation508_spill] sm:$0xff] }
 0x584   :  { %6445 = vmatprep.subr.bf16.mxu0 %v19489_v26  ;;  %6568 = vmatprep.subr.bf16.mxu1 %v19490_v27  ;;  %v19509_v26 = vld [vmem:[#allocation509_spill] sm:$0xff]  ;;  %v19510_v27 = vld [vmem:[#allocation510_spill] sm:$0xff] }
 0x587   :  { %6446 = vmatpush1.bf16.msra.mxu0 %v19491_v28  ;;  %6569 = vmatpush1.bf16.msra.mxu1 %v19492_v29  ;;  %v19511_v28 = vld [vmem:[#allocation511_spill] sm:$0xff]  ;;  %v19512_v29 = vld [vmem:[#allocation512_spill] sm:$0xff] }
 0x588   :  { %6447 = vmatprep.subr.bf16.mxu0 %v19493_v34  ;;  %6570 = vmatprep.subr.bf16.mxu1 %v19494_v30  ;;  %v19513_v34 = vld [vmem:[#allocation513_spill] sm:$0xff]  ;;  %v19514_v30 = vld [vmem:[#allocation514_spill] sm:$0xff] }
 0x58b   :  { %6448 = vmatpush1.bf16.msra.mxu0 %v19495_v35  ;;  %6571 = vmatpush1.bf16.msra.mxu1 %v19496_v36  ;;  %v19515_v35 = vld [vmem:[#allocation515_spill] sm:$0xff]  ;;  %v19516_v36 = vld [vmem:[#allocation516_spill] sm:$0xff] }
 0x58c   :  { %6449 = vmatprep.subr.bf16.mxu0 %v19497_v42  ;;  %6572 = vmatprep.subr.bf16.mxu1 %v19498_v43  ;;  %v19517_v42 = vld [vmem:[#allocation517_spill] sm:$0xff]  ;;  %v19518_v43 = vld [vmem:[#allocation518_spill] sm:$0xff] }
 0x58f   :  { %6450 = vmatpush1.bf16.msra.mxu0 %v19499_v45  ;;  %6573 = vmatpush1.bf16.msra.mxu1 %v19500_v11  ;;  %v19519_v45 = vld [vmem:[#allocation519_spill] sm:$0xff]  ;;  %v19520_v11 = vld [vmem:[#allocation520_spill] sm:$0xff] }
 0x590   :  { %6451 = vmatprep.subr.bf16.mxu0 %v19501_v23  ;;  %6574 = vmatprep.subr.bf16.mxu1 %v19502_v2  ;;  %v19521_v23 = vld [vmem:[#allocation521_spill] sm:$0xff]  ;;  %v19522_v2 = vld [vmem:[#allocation522_spill] sm:$0xff] }
 0x593   :  { %6452 = vmatpush1.bf16.msra.mxu0 %v19503_v38  ;;  %6575 = vmatpush1.bf16.msra.mxu1 %v19504_v41  ;;  %v19523_v38 = vld [vmem:[#allocation523_spill] sm:$0xff]  ;;  %v19524_v41 = vld [vmem:[#allocation524_spill] sm:$0xff] }
 0x594   :  { %6453 = vmatprep.subr.bf16.mxu0 %v19505_v0  ;;  %6576 = vmatprep.subr.bf16.mxu1 %v19506_v59  ;;  %v19525_v0 = vld [vmem:[#allocation525_spill] sm:$0xff]  ;;  %v19526_v59 = vld [vmem:[#allocation526_spill] sm:$0xff] }
 0x597   :  { %6454 = vmatpush1.bf16.msra.mxu0 %v19507_v10  ;;  %6577 = vmatpush1.bf16.msra.mxu1 %v19508_v18  ;;  %v19527_v10 = vld [vmem:[#allocation527_spill] sm:$0xff]  ;;  %v19528_v18 = vld [vmem:[#allocation528_spill] sm:$0xff] }
 0x598   :  { %6464 = vmatprep.subr.bf16.mxu0 %v19509_v26  ;;  %6587 = vmatprep.subr.bf16.mxu1 %v19510_v27  ;;  %v19529_v26 = vld [vmem:[#allocation529_spill] sm:$0xff]  ;;  %v19530_v27 = vld [vmem:[#allocation530_spill] sm:$0xff] }
 0x59a   :  { %6456 = vmatmul.mubr.bf16.vlgmr.msra.gmra.mrb[24].mxu0 %v16106_v51  ;;  %6579 = vmatmul.mubr.bf16.vlgmr.msra.gmra.mrb[24].mxu1 %v16106_v51 }
 0x59b   :  { %6465 = vmatpush1.bf16.msra.mxu0 %v19511_v28  ;;  %6588 = vmatpush1.bf16.msra.mxu1 %v19512_v29  ;;  %v19531_v28 = vld [vmem:[#allocation531_spill] sm:$0xff]  ;;  %v19532_v29 = vld [vmem:[#allocation532_spill] sm:$0xff] }
 0x59c   :  { %6466 = vmatprep.subr.bf16.mxu0 %v19513_v34  ;;  %6589 = vmatprep.subr.bf16.mxu1 %v19514_v30  ;;  %v19533_v34 = vld [vmem:[#allocation533_spill] sm:$0xff]  ;;  %v19534_v30 = vld [vmem:[#allocation534_spill] sm:$0xff] }
 0x59d   :  { %6496 = vmatprep.mubr.bf16.mxu0 %v16119_v63  ;;  %6619 = vmatprep.mubr.bf16.mxu1 %v16119_v63 }
 0x59f   :  { %6467 = vmatpush1.bf16.msra.mxu0 %v19515_v35  ;;  %6590 = vmatpush1.bf16.msra.mxu1 %v19516_v36  ;;  %v19535_v35 = vld [vmem:[#allocation535_spill] sm:$0xff]  ;;  %v19536_v36 = vld [vmem:[#allocation536_spill] sm:$0xff] }
 0x5a0   :  { %6468 = vmatprep.subr.bf16.mxu0 %v19517_v42  ;;  %6591 = vmatprep.subr.bf16.mxu1 %v19518_v43  ;;  %v19537_v42 = vld [vmem:[#allocation537_spill] sm:$0xff]  ;;  %v19538_v43 = vld [vmem:[#allocation538_spill] sm:$0xff] }
 0x5a3   :  { %6469 = vmatpush1.bf16.msra.mxu0 %v19519_v45  ;;  %6592 = vmatpush1.bf16.msra.mxu1 %v19520_v11  ;;  %v19539_v45 = vld [vmem:[#allocation539_spill] sm:$0xff]  ;;  %v19540_v11 = vld [vmem:[#allocation540_spill] sm:$0xff] }
 0x5a4   :  { %6470 = vmatprep.subr.bf16.mxu0 %v19521_v23  ;;  %6593 = vmatprep.subr.bf16.mxu1 %v19522_v2  ;;  %v19541_v23 = vld [vmem:[#allocation541_spill] sm:$0xff]  ;;  %v19542_v2 = vld [vmem:[#allocation542_spill] sm:$0xff] }
 0x5a7   :  { %6471 = vmatpush1.bf16.msra.mxu0 %v19523_v38  ;;  %6594 = vmatpush1.bf16.msra.mxu1 %v19524_v41  ;;  %v19543_v38 = vld [vmem:[#allocation543_spill] sm:$0xff]  ;;  %v19544_v41 = vld [vmem:[#allocation544_spill] sm:$0xff] }
 0x5a8   :  { %6472 = vmatprep.subr.bf16.mxu0 %v19525_v0  ;;  %6595 = vmatprep.subr.bf16.mxu1 %v19526_v59  ;;  %v19545_v0 = vld [vmem:[#allocation545_spill] sm:$0xff]  ;;  %v19546_v59 = vld [vmem:[#allocation546_spill] sm:$0xff] }
 0x5ab   :  { %6473 = vmatpush1.bf16.msra.mxu0 %v19527_v10  ;;  %6596 = vmatpush1.bf16.msra.mxu1 %v19528_v18  ;;  %v19547_v10 = vld [vmem:[#allocation547_spill] sm:$0xff]  ;;  %v19548_v18 = vld [vmem:[#allocation548_spill] sm:$0xff] }
 0x5ac   :  { %6474 = vmatprep.subr.bf16.mxu0 %v19529_v26  ;;  %6597 = vmatprep.subr.bf16.mxu1 %v19530_v27  ;;  %v19549_v26 = vld [vmem:[#allocation549_spill] sm:$0xff]  ;;  %v19550_v27 = vld [vmem:[#allocation550_spill] sm:$0xff] }
 0x5af   :  { %6475 = vmatpush1.bf16.msra.mxu0 %v19531_v28  ;;  %6598 = vmatpush1.bf16.msra.mxu1 %v19532_v29  ;;  %v19551_v28 = vld [vmem:[#allocation551_spill] sm:$0xff]  ;;  %v19552_v29 = vld [vmem:[#allocation552_spill] sm:$0xff] }
 0x5b0   :  { %6476 = vmatprep.subr.bf16.mxu0 %v19533_v34  ;;  %6599 = vmatprep.subr.bf16.mxu1 %v19534_v30  ;;  %v19553_v34 = vld [vmem:[#allocation553_spill] sm:$0xff]  ;;  %v19554_v30 = vld [vmem:[#allocation554_spill] sm:$0xff] }
 0x5b3   :  { %6477 = vmatpush1.bf16.msra.mxu0 %v19535_v35  ;;  %6600 = vmatpush1.bf16.msra.mxu1 %v19536_v36  ;;  %v19555_v35 = vld [vmem:[#allocation555_spill] sm:$0xff]  ;;  %v19556_v36 = vld [vmem:[#allocation556_spill] sm:$0xff] }
 0x5b4   :  { %6478 = vmatprep.subr.bf16.mxu0 %v19537_v42  ;;  %6601 = vmatprep.subr.bf16.mxu1 %v19538_v43  ;;  %v19557_v42 = vld [vmem:[#allocation557_spill] sm:$0xff]  ;;  %v19558_v43 = vld [vmem:[#allocation558_spill] sm:$0xff] }
 0x5b7   :  { %6479 = vmatpush1.bf16.msra.mxu0 %v19539_v45  ;;  %6602 = vmatpush1.bf16.msra.mxu1 %v19540_v11  ;;  %v19559_v45 = vld [vmem:[#allocation559_spill] sm:$0xff]  ;;  %v19560_v11 = vld [vmem:[#allocation560_spill] sm:$0xff] }
 0x5b8   :  { %6480 = vmatprep.subr.bf16.mxu0 %v19541_v23  ;;  %6603 = vmatprep.subr.bf16.mxu1 %v19542_v2  ;;  %v19561_v23 = vld [vmem:[#allocation561_spill] sm:$0xff]  ;;  %v19562_v2 = vld [vmem:[#allocation562_spill] sm:$0xff] }
 0x5bb   :  { %6481 = vmatpush1.bf16.msra.mxu0 %v19543_v38  ;;  %6604 = vmatpush1.bf16.msra.mxu1 %v19544_v41  ;;  %v19563_v38 = vld [vmem:[#allocation563_spill] sm:$0xff]  ;;  %v19564_v41 = vld [vmem:[#allocation564_spill] sm:$0xff] }
 0x5bc   :  { %6482 = vmatprep.subr.bf16.mxu0 %v19545_v0  ;;  %6605 = vmatprep.subr.bf16.mxu1 %v19546_v59  ;;  %v19565_v0 = vld [vmem:[#allocation565_spill] sm:$0xff]  ;;  %v19566_v59 = vld [vmem:[#allocation566_spill] sm:$0xff] }
 0x5bf   :  { %6483 = vmatpush1.bf16.msra.mxu0 %v19547_v10  ;;  %6606 = vmatpush1.bf16.msra.mxu1 %v19548_v18  ;;  %v19567_v10 = vld [vmem:[#allocation567_spill] sm:$0xff]  ;;  %v19568_v18 = vld [vmem:[#allocation568_spill] sm:$0xff] }
 0x5c0   :  { %6484 = vmatprep.subr.bf16.mxu0 %v19549_v26  ;;  %6607 = vmatprep.subr.bf16.mxu1 %v19550_v27  ;;  %v19569_v26 = vld [vmem:[#allocation569_spill] sm:$0xff]  ;;  %v19570_v27 = vld [vmem:[#allocation570_spill] sm:$0xff] }
 0x5c3   :  { %6485 = vmatpush1.bf16.msra.mxu0 %v19551_v28  ;;  %6608 = vmatpush1.bf16.msra.mxu1 %v19552_v29  ;;  %v19571_v28 = vld [vmem:[#allocation571_spill] sm:$0xff]  ;;  %v19572_v29 = vld [vmem:[#allocation572_spill] sm:$0xff] }
 0x5c4   :  { %6486 = vmatprep.subr.bf16.mxu0 %v19553_v34  ;;  %6609 = vmatprep.subr.bf16.mxu1 %v19554_v30  ;;  %v19573_v34 = vld [vmem:[#allocation573_spill] sm:$0xff]  ;;  %v19574_v30 = vld [vmem:[#allocation574_spill] sm:$0xff] }
 0x5c7   :  { %6487 = vmatpush1.bf16.msra.mxu0 %v19555_v35  ;;  %6610 = vmatpush1.bf16.msra.mxu1 %v19556_v36  ;;  %v19575_v35 = vld [vmem:[#allocation575_spill] sm:$0xff]  ;;  %v19576_v36 = vld [vmem:[#allocation576_spill] sm:$0xff] }
 0x5c8   :  { %6488 = vmatprep.subr.bf16.mxu0 %v19557_v42  ;;  %6611 = vmatprep.subr.bf16.mxu1 %v19558_v43  ;;  %v19577_v42 = vld [vmem:[#allocation577_spill] sm:$0xff]  ;;  %v19578_v43 = vld [vmem:[#allocation578_spill] sm:$0xff] }
 0x5cb   :  { %6489 = vmatpush1.bf16.msra.mxu0 %v19559_v45  ;;  %6612 = vmatpush1.bf16.msra.mxu1 %v19560_v11  ;;  %v19579_v45 = vld [vmem:[#allocation579_spill] sm:$0xff]  ;;  %v19580_v11 = vld [vmem:[#allocation580_spill] sm:$0xff] }
 0x5cc   :  { %6490 = vmatprep.subr.bf16.mxu0 %v19561_v23  ;;  %6613 = vmatprep.subr.bf16.mxu1 %v19562_v2  ;;  %v19581_v23 = vld [vmem:[#allocation581_spill] sm:$0xff]  ;;  %v19582_v2 = vld [vmem:[#allocation582_spill] sm:$0xff] }
 0x5cf   :  { %6491 = vmatpush1.bf16.msra.mxu0 %v19563_v38  ;;  %6614 = vmatpush1.bf16.msra.mxu1 %v19564_v41  ;;  %v19583_v38 = vld [vmem:[#allocation583_spill] sm:$0xff]  ;;  %v19584_v41 = vld [vmem:[#allocation584_spill] sm:$0xff] }
 0x5d0   :  { %6492 = vmatprep.subr.bf16.mxu0 %v19565_v0  ;;  %6615 = vmatprep.subr.bf16.mxu1 %v19566_v59  ;;  %v19585_v0 = vld [vmem:[#allocation585_spill] sm:$0xff]  ;;  %v19586_v59 = vld [vmem:[#allocation586_spill] sm:$0xff] }
 0x5d3   :  { %6493 = vmatpush1.bf16.msra.mxu0 %v19567_v10  ;;  %6616 = vmatpush1.bf16.msra.mxu1 %v19568_v18  ;;  %v19587_v10 = vld [vmem:[#allocation587_spill] sm:$0xff]  ;;  %v19588_v18 = vld [vmem:[#allocation588_spill] sm:$0xff] }
 0x5d4   :  { %6494 = vmatprep.subr.bf16.mxu0 %v19569_v26  ;;  %6617 = vmatprep.subr.bf16.mxu1 %v19570_v27  ;;  %v19590_v26 = vld [vmem:[#allocation590_spill] sm:$0xff]  ;;  %v19591_v27 = vld [vmem:[#allocation591_spill] sm:$0xff] }
 0x5d7   :  { %6495 = vmatpush1.bf16.msra.mxu0 %v19571_v28  ;;  %6618 = vmatpush1.bf16.msra.mxu1 %v19572_v29  ;;  %v19592_v28 = vld [vmem:[#allocation592_spill] sm:$0xff]  ;;  %v19593_v29 = vld [vmem:[#allocation593_spill] sm:$0xff] }
 0x5d8   :  { %6628 = vmatprep.subr.bf16.mxu0 %v19573_v34  ;;  %6751 = vmatprep.subr.bf16.mxu1 %v19574_v30  ;;  %v19594_v30 = vld [vmem:[#allocation594_spill] sm:$0xff] }
 0x5da   :  { %6497 = vmatmul.mubr.bf16.vlgmr.msra.gmra.mrb[24].mxu0 %v16187_v37  ;;  %6620 = vmatmul.mubr.bf16.vlgmr.msra.gmra.mrb[24].mxu1 %v16187_v37 }
 0x5db   :  { %6629 = vmatpush1.bf16.msra.mxu0 %v19575_v35  ;;  %6752 = vmatpush1.bf16.msra.mxu1 %v19576_v36  ;;  %v19595_v35 = vld [vmem:[#allocation597_spill] sm:$0xff]  ;;  %v19607_v36 = vld [vmem:[#allocation607_spill] sm:$0xff] }
 0x5dc   :  { %6630 = vmatprep.subr.bf16.mxu0 %v19577_v42  ;;  %6753 = vmatprep.subr.bf16.mxu1 %v19578_v43 }
 0x5dd   :  { %6660 = vmatprep.mubr.bf16.mxu0 %v15949_v40  ;;  %6783 = vmatprep.mubr.bf16.mxu1 %v15949_v40  ;;  %v19589_v40 = vld [vmem:[#allocation589_spill] sm:$0xff] }
 0x5df   :  { %6631 = vmatpush1.bf16.msra.mxu0 %v19579_v45  ;;  %6754 = vmatpush1.bf16.msra.mxu1 %v19580_v11  ;;  %v19596_v45 = vld [vmem:[#allocation599_spill] sm:$0xff]  ;;  %v19604_v11 = vld [vmem:[#allocation604_spill] sm:$0xff] }
 0x5e0   :  { %6632 = vmatprep.subr.bf16.mxu0 %v19581_v23  ;;  %6755 = vmatprep.subr.bf16.mxu1 %v19582_v2  ;;  %v19597_v23 = vld [vmem:[#allocation600_spill] sm:$0xff] }
 0x5e3   :  { %6633 = vmatpush1.bf16.msra.mxu0 %v19583_v38  ;;  %6756 = vmatpush1.bf16.msra.mxu1 %v19584_v41 }
 0x5e4   :  { %6634 = vmatprep.subr.bf16.mxu0 %v19585_v0  ;;  %6757 = vmatprep.subr.bf16.mxu1 %v19586_v59  ;;  %v19598_v0 = vld [vmem:[#allocation595_spill] sm:$0xff]  ;;  %v19599_v59 = vld [vmem:[#allocation601_spill] sm:$0xff] }
 0x5e7   :  { %6635 = vmatpush1.bf16.msra.mxu0 %v19587_v10  ;;  %6758 = vmatpush1.bf16.msra.mxu1 %v19588_v18 }
 0x5e8   :  { %6636 = vmatprep.subr.bf16.mxu0 %v19589_v40  ;;  %6759 = vmatprep.subr.bf16.mxu1 %v19590_v26  ;;  %v19600_v26 = vld [vmem:[#allocation596_spill] sm:$0xff] }
 0x5eb   :  { %6637 = vmatpush1.bf16.msra.mxu0 %v19591_v27  ;;  %6760 = vmatpush1.bf16.msra.mxu1 %v19592_v28  ;;  %v19601_v28 = vld [vmem:[#allocation598_spill] sm:$0xff] }
 0x5ec   :  { %6638 = vmatprep.subr.bf16.mxu0 %v19593_v29  ;;  %6761 = vmatprep.subr.bf16.mxu1 %v19594_v30  ;;  %v19602_v29 = vld [vmem:[#allocation602_spill] sm:$0xff]  ;;  %v19603_v30 = vld [vmem:[#allocation603_spill] sm:$0xff] }
 0x5ed   :  { %v16648_v34 = vpop.f32.mrb[20].mxu0  ;;  %v16653_v42 = vpop.f32.mrb[20].mxu1 }
 0x5ee   :  { %v16655_v43 = vpop.f32.mrb[21].mxu0  ;;  %v16661_v38 = vpop.f32.mrb[21].mxu1 }
 0x5ef   :  { %v6946_v2 = vpack.c.bf16 %v16655_v43, %v19597_v23  ;;  %v6256_v41 = vpop.f32.mrb[22].mxu0  ;;  %6639 = vmatpush1.bf16.msra.mxu0 %v19598_v0  ;;  %v6948_v10 = vpack.c.bf16 %v16661_v38, %v19599_v59  ;;  %v6379_v18 = vpop.f32.mrb[22].mxu1  ;;  %6762 = vmatpush1.bf16.msra.mxu1 %v15415_v55  ;;  %v19606_v0 = vld [vmem:[#allocation606_spill] sm:$0xff]  ;;  %v19609_v55 = vld [vmem:[#allocation609_spill] sm:$0xff]  ;;  %v12859_v43 = vld [vmem:[#allocation7 + $0x118] sm:$0xff]  }
 0x5f0   :  { %v6257_v40 = vpop.f32.mrb[23].mxu0  ;;  %6640 = vmatprep.subr.bf16.mxu0 %v19600_v26  ;;  %v6380_v27 = vpop.f32.mrb[23].mxu1  ;;  %6763 = vmatprep.subr.bf16.mxu1 %v19601_v28  ;;  %v19605_v41 = vld [vmem:[#allocation605_spill] sm:$0xff]  ;;  %v19608_v18 = vld [vmem:[#allocation608_spill] sm:$0xff]  ;;  %v19611_v26 = vld [vmem:[#allocation611_spill] sm:$0xff] }
 0x5f1   :  { %v19610_v40 = vld [vmem:[#allocation610_spill] sm:$0xff]  ;;  %v19612_v27 = vld [vmem:[#allocation612_spill] sm:$0xff]  ;;  %v19613_v28 = vld [vmem:[#allocation613_spill] sm:$0xff] }
 0x5f2   :  { %v12862_v38 = vld [vmem:[#allocation7 + $0x1e0] sm:$0xff]  }
 0x5f3   :  { %6641 = vmatpush1.bf16.msra.mxu0 %v19602_v29  ;;  %6764 = vmatpush1.bf16.msra.mxu1 %v19603_v30  ;;  %v19614_v29 = vld [vmem:[#allocation614_spill] sm:$0xff]  ;;  %v19616_v30 = vld [vmem:[#allocation616_spill] sm:$0xff] }
 0x5f4   :  { %6642 = vmatprep.subr.bf16.mxu0 %v19604_v11  ;;  %6765 = vmatprep.subr.bf16.mxu1 %v19605_v41  ;;  %v19615_v11 = vld [vmem:[#allocation615_spill] sm:$0xff]  ;;  %v19617_v41 = vld [vmem:[#allocation617_spill] sm:$0xff] }
 0x5f7   :  { %6643 = vmatpush1.bf16.msra.mxu0 %v19606_v0  ;;  %6766 = vmatpush1.bf16.msra.mxu1 %v19607_v36  ;;  %v19618_v36 = vld [vmem:[#allocation618_spill] sm:$0xff]  ;;  %v19619_v0 = vld [vmem:[#allocation619_spill] sm:$0xff] }
 0x5f8   :  { %6644 = vmatprep.subr.bf16.mxu0 %v19608_v18  ;;  %6767 = vmatprep.subr.bf16.mxu1 %v19609_v55  ;;  %v19620_v18 = vld [vmem:[#allocation620_spill] sm:$0xff]  ;;  %v19621_v55 = vld [vmem:[#allocation621_spill] sm:$0xff] }
 0x5fb   :  { %6645 = vmatpush1.bf16.msra.mxu0 %v19610_v40  ;;  %6768 = vmatpush1.bf16.msra.mxu1 %v19611_v26  ;;  %v19622_v40 = vld [vmem:[#allocation622_spill] sm:$0xff]  ;;  %v19623_v26 = vld [vmem:[#allocation623_spill] sm:$0xff] }
 0x5fc   :  { %6646 = vmatprep.subr.bf16.mxu0 %v19612_v27  ;;  %6769 = vmatprep.subr.bf16.mxu1 %v19613_v28  ;;  %v19624_v27 = vld [vmem:[#allocation624_spill] sm:$0xff]  ;;  %v19625_v28 = vld [vmem:[#allocation625_spill] sm:$0xff] }
 0x5ff   :  { %6647 = vmatpush1.bf16.msra.mxu0 %v19614_v29  ;;  %6770 = vmatpush1.bf16.msra.mxu1 %v19615_v11  ;;  %v19626_v29 = vld [vmem:[#allocation626_spill] sm:$0xff]  ;;  %v19627_v11 = vld [vmem:[#allocation627_spill] sm:$0xff] }
 0x600   :  { %6648 = vmatprep.subr.bf16.mxu0 %v19616_v30  ;;  %6771 = vmatprep.subr.bf16.mxu1 %v19617_v41  ;;  %v19628_v30 = vld [vmem:[#allocation628_spill] sm:$0xff]  ;;  %v19629_v41 = vld [vmem:[#allocation629_spill] sm:$0xff] }
 0x603   :  { %6649 = vmatpush1.bf16.msra.mxu0 %v19618_v36  ;;  %6772 = vmatpush1.bf16.msra.mxu1 %v19619_v0  ;;  %v19630_v36 = vld [vmem:[#allocation630_spill] sm:$0xff]  ;;  %v19631_v0 = vld [vmem:[#allocation631_spill] sm:$0xff] }
 0x604   :  { %6650 = vmatprep.subr.bf16.mxu0 %v19620_v18  ;;  %6773 = vmatprep.subr.bf16.mxu1 %v19621_v55  ;;  %v19632_v18 = vld [vmem:[#allocation632_spill] sm:$0xff]  ;;  %v19633_v55 = vld [vmem:[#allocation633_spill] sm:$0xff] }
 0x607   :  { %6651 = vmatpush1.bf16.msra.mxu0 %v19622_v40  ;;  %6774 = vmatpush1.bf16.msra.mxu1 %v19623_v26  ;;  %v19634_v40 = vld [vmem:[#allocation634_spill] sm:$0xff]  ;;  %v19635_v26 = vld [vmem:[#allocation635_spill] sm:$0xff] }
 0x608   :  { %6652 = vmatprep.subr.bf16.mxu0 %v19624_v27  ;;  %6775 = vmatprep.subr.bf16.mxu1 %v19625_v28  ;;  %v19636_v27 = vld [vmem:[#allocation636_spill] sm:$0xff]  ;;  %v19637_v28 = vld [vmem:[#allocation637_spill] sm:$0xff] }
 0x60b   :  { %6653 = vmatpush1.bf16.msra.mxu0 %v19626_v29  ;;  %6776 = vmatpush1.bf16.msra.mxu1 %v19627_v11  ;;  %v19638_v29 = vld [vmem:[#allocation638_spill] sm:$0xff]  ;;  %v19639_v11 = vld [vmem:[#allocation639_spill] sm:$0xff] }
 0x60c   :  { %6654 = vmatprep.subr.bf16.mxu0 %v19628_v30  ;;  %6777 = vmatprep.subr.bf16.mxu1 %v19629_v41  ;;  %v19640_v30 = vld [vmem:[#allocation640_spill] sm:$0xff]  ;;  %v19642_v41 = vld [vmem:[#allocation642_spill] sm:$0xff] }
 0x60f   :  { %6655 = vmatpush1.bf16.msra.mxu0 %v19630_v36  ;;  %6778 = vmatpush1.bf16.msra.mxu1 %v19631_v0  ;;  %v19643_v36 = vld [vmem:[#allocation643_spill] sm:$0xff]  ;;  %v19645_v0 = vld [vmem:[#allocation645_spill] sm:$0xff] }
 0x610   :  { %6656 = vmatprep.subr.bf16.mxu0 %v19632_v18  ;;  %6779 = vmatprep.subr.bf16.mxu1 %v19633_v55  ;;  %v19646_v18 = vld [vmem:[#allocation646_spill] sm:$0xff]  ;;  %v19647_v55 = vld [vmem:[#allocation647_spill] sm:$0xff] }
 0x613   :  { %6657 = vmatpush1.bf16.msra.mxu0 %v15527_v58  ;;  %6780 = vmatpush1.bf16.msra.mxu1 %v19634_v40  ;;  %v19641_v58 = vld [vmem:[#allocation641_spill] sm:$0xff]  ;;  %v19648_v40 = vld [vmem:[#allocation648_spill] sm:$0xff] }
 0x614   :  { %6658 = vmatprep.subr.bf16.mxu0 %v19635_v26  ;;  %6781 = vmatprep.subr.bf16.mxu1 %v19636_v27  ;;  %v19650_v26 = vld [vmem:[#allocation650_spill] sm:$0xff]  ;;  %v19651_v27 = vld [vmem:[#allocation651_spill] sm:$0xff] }
 0x617   :  { %6659 = vmatpush1.bf16.msra.mxu0 %v19637_v28  ;;  %6782 = vmatpush1.bf16.msra.mxu1 %v15543_v57  ;;  %v19644_v57 = vld [vmem:[#allocation644_spill] sm:$0xff] }
 0x618   :  { %6669 = vmatprep.subr.bf16.mxu0 %v19638_v29  ;;  %6792 = vmatprep.subr.bf16.mxu1 %v19639_v11  ;;  %v19652_v28 = vld [vmem:[#allocation652_spill] sm:$0xff]  ;;  %v19653_v29 = vld [vmem:[#allocation653_spill] sm:$0xff]  ;;  %v19655_v11 = vld [vmem:[#allocation655_spill] sm:$0xff] }
 0x61a   :  { %6661 = vmatmul.mubr.bf16.vlgmr.msra.gmra.mrb[28].mxu0 %v16025_v12  ;;  %6784 = vmatmul.mubr.bf16.vlgmr.msra.gmra.mrb[28].mxu1 %v16025_v12  ;;  %v19649_v12 = vld [vmem:[#allocation649_spill] sm:$0xff] }
 0x61b   :  { %6670 = vmatpush1.bf16.msra.mxu0 %v19640_v30  ;;  %6793 = vmatpush1.bf16.msra.mxu1 %v19641_v58  ;;  %v19656_v30 = vld [vmem:[#allocation656_spill] sm:$0xff]  ;;  %v19657_v58 = vld [vmem:[#allocation657_spill] sm:$0xff] }
 0x61c   :  { %6671 = vmatprep.subr.bf16.mxu0 %v19642_v41  ;;  %6794 = vmatprep.subr.bf16.mxu1 %v19643_v36  ;;  %v19658_v41 = vld [vmem:[#allocation658_spill] sm:$0xff]  ;;  %v19659_v36 = vld [vmem:[#allocation659_spill] sm:$0xff] }
 0x61d   :  { %6701 = vmatprep.mubr.bf16.mxu0 %v16038_v31  ;;  %6824 = vmatprep.mubr.bf16.mxu1 %v16038_v31  ;;  %v19654_v31 = vld [vmem:[#allocation654_spill] sm:$0xff] }
 0x61f   :  { %6672 = vmatpush1.bf16.msra.mxu0 %v19644_v57  ;;  %6795 = vmatpush1.bf16.msra.mxu1 %v19645_v0  ;;  %v19660_v57 = vld [vmem:[#allocation660_spill] sm:$0xff]  ;;  %v19661_v0 = vld [vmem:[#allocation661_spill] sm:$0xff] }
 0x620   :  { %6673 = vmatprep.subr.bf16.mxu0 %v19646_v18  ;;  %6796 = vmatprep.subr.bf16.mxu1 %v19647_v55  ;;  %v19662_v18 = vld [vmem:[#allocation662_spill] sm:$0xff]  ;;  %v19663_v55 = vld [vmem:[#allocation663_spill] sm:$0xff] }
 0x623   :  { %6674 = vmatpush1.bf16.msra.mxu0 %v19648_v40  ;;  %6797 = vmatpush1.bf16.msra.mxu1 %v19649_v12  ;;  %v19664_v40 = vld [vmem:[#allocation664_spill] sm:$0xff]  ;;  %v19665_v12 = vld [vmem:[#allocation665_spill] sm:$0xff] }
 0x624   :  { %6675 = vmatprep.subr.bf16.mxu0 %v19650_v26  ;;  %6798 = vmatprep.subr.bf16.mxu1 %v19651_v27  ;;  %v19666_v26 = vld [vmem:[#allocation666_spill] sm:$0xff]  ;;  %v19667_v27 = vld [vmem:[#allocation667_spill] sm:$0xff] }
 0x627   :  { %6676 = vmatpush1.bf16.msra.mxu0 %v19652_v28  ;;  %6799 = vmatpush1.bf16.msra.mxu1 %v19653_v29  ;;  %v19668_v28 = vld [vmem:[#allocation668_spill] sm:$0xff]  ;;  %v19669_v29 = vld [vmem:[#allocation669_spill] sm:$0xff] }
 0x628   :  { %6677 = vmatprep.subr.bf16.mxu0 %v19654_v31  ;;  %6800 = vmatprep.subr.bf16.mxu1 %v19655_v11  ;;  %v19670_v31 = vld [vmem:[#allocation670_spill] sm:$0xff]  ;;  %v19671_v11 = vld [vmem:[#allocation671_spill] sm:$0xff] }
 0x62b   :  { %6678 = vmatpush1.bf16.msra.mxu0 %v19656_v30  ;;  %6801 = vmatpush1.bf16.msra.mxu1 %v19657_v58  ;;  %v19672_v30 = vld [vmem:[#allocation672_spill] sm:$0xff]  ;;  %v19673_v58 = vld [vmem:[#allocation673_spill] sm:$0xff] }
 0x62c   :  { %6679 = vmatprep.subr.bf16.mxu0 %v19658_v41  ;;  %6802 = vmatprep.subr.bf16.mxu1 %v19659_v36  ;;  %v19674_v41 = vld [vmem:[#allocation674_spill] sm:$0xff]  ;;  %v19675_v36 = vld [vmem:[#allocation675_spill] sm:$0xff] }
 0x62f   :  { %6680 = vmatpush1.bf16.msra.mxu0 %v19660_v57  ;;  %6803 = vmatpush1.bf16.msra.mxu1 %v19661_v0  ;;  %v19676_v57 = vld [vmem:[#allocation676_spill] sm:$0xff]  ;;  %v19677_v0 = vld [vmem:[#allocation677_spill] sm:$0xff] }
 0x630   :  { %6681 = vmatprep.subr.bf16.mxu0 %v19662_v18  ;;  %6804 = vmatprep.subr.bf16.mxu1 %v19663_v55  ;;  %v19678_v18 = vld [vmem:[#allocation678_spill] sm:$0xff]  ;;  %v19679_v55 = vld [vmem:[#allocation679_spill] sm:$0xff] }
 0x633   :  { %6682 = vmatpush1.bf16.msra.mxu0 %v19664_v40  ;;  %6805 = vmatpush1.bf16.msra.mxu1 %v19665_v12  ;;  %v19680_v40 = vld [vmem:[#allocation680_spill] sm:$0xff]  ;;  %v19681_v12 = vld [vmem:[#allocation681_spill] sm:$0xff] }
 0x634   :  { %6683 = vmatprep.subr.bf16.mxu0 %v19666_v26  ;;  %6806 = vmatprep.subr.bf16.mxu1 %v19667_v27  ;;  %v19682_v26 = vld [vmem:[#allocation682_spill] sm:$0xff]  ;;  %v19683_v27 = vld [vmem:[#allocation683_spill] sm:$0xff] }
 0x637   :  { %6684 = vmatpush1.bf16.msra.mxu0 %v19668_v28  ;;  %6807 = vmatpush1.bf16.msra.mxu1 %v19669_v29  ;;  %v19684_v28 = vld [vmem:[#allocation684_spill] sm:$0xff]  ;;  %v19685_v29 = vld [vmem:[#allocation685_spill] sm:$0xff] }
 0x638   :  { %6685 = vmatprep.subr.bf16.mxu0 %v19670_v31  ;;  %6808 = vmatprep.subr.bf16.mxu1 %v19671_v11  ;;  %v19686_v31 = vld [vmem:[#allocation686_spill] sm:$0xff]  ;;  %v19687_v11 = vld [vmem:[#allocation687_spill] sm:$0xff] }
 0x63b   :  { %6686 = vmatpush1.bf16.msra.mxu0 %v19672_v30  ;;  %6809 = vmatpush1.bf16.msra.mxu1 %v19673_v58  ;;  %v19688_v30 = vld [vmem:[#allocation688_spill] sm:$0xff]  ;;  %v19689_v58 = vld [vmem:[#allocation689_spill] sm:$0xff] }
 0x63c   :  { %6687 = vmatprep.subr.bf16.mxu0 %v19674_v41  ;;  %6810 = vmatprep.subr.bf16.mxu1 %v19675_v36  ;;  %v19690_v41 = vld [vmem:[#allocation690_spill] sm:$0xff]  ;;  %v19691_v36 = vld [vmem:[#allocation691_spill] sm:$0xff] }
 0x63f   :  { %6688 = vmatpush1.bf16.msra.mxu0 %v19676_v57  ;;  %6811 = vmatpush1.bf16.msra.mxu1 %v19677_v0  ;;  %v19692_v57 = vld [vmem:[#allocation692_spill] sm:$0xff]  ;;  %v19693_v0 = vld [vmem:[#allocation693_spill] sm:$0xff] }
 0x640   :  { %6689 = vmatprep.subr.bf16.mxu0 %v19678_v18  ;;  %6812 = vmatprep.subr.bf16.mxu1 %v19679_v55  ;;  %v19694_v18 = vld [vmem:[#allocation694_spill] sm:$0xff]  ;;  %v19695_v55 = vld [vmem:[#allocation695_spill] sm:$0xff] }
 0x643   :  { %6690 = vmatpush1.bf16.msra.mxu0 %v19680_v40  ;;  %6813 = vmatpush1.bf16.msra.mxu1 %v19681_v12  ;;  %v19696_v40 = vld [vmem:[#allocation696_spill] sm:$0xff]  ;;  %v19697_v12 = vld [vmem:[#allocation697_spill] sm:$0xff] }
 0x644   :  { %6691 = vmatprep.subr.bf16.mxu0 %v19682_v26  ;;  %6814 = vmatprep.subr.bf16.mxu1 %v19683_v27  ;;  %v19698_v26 = vld [vmem:[#allocation698_spill] sm:$0xff]  ;;  %v19699_v27 = vld [vmem:[#allocation699_spill] sm:$0xff] }
 0x647   :  { %6692 = vmatpush1.bf16.msra.mxu0 %v19684_v28  ;;  %6815 = vmatpush1.bf16.msra.mxu1 %v19685_v29  ;;  %v19700_v28 = vld [vmem:[#allocation700_spill] sm:$0xff]  ;;  %v19701_v29 = vld [vmem:[#allocation701_spill] sm:$0xff] }
 0x648   :  { %6693 = vmatprep.subr.bf16.mxu0 %v19686_v31  ;;  %6816 = vmatprep.subr.bf16.mxu1 %v19687_v11  ;;  %v19702_v31 = vld [vmem:[#allocation702_spill] sm:$0xff]  ;;  %v19704_v11 = vld [vmem:[#allocation704_spill] sm:$0xff] }
 0x64b   :  { %6694 = vmatpush1.bf16.msra.mxu0 %v19688_v30  ;;  %6817 = vmatpush1.bf16.msra.mxu1 %v19689_v58  ;;  %v19705_v30 = vld [vmem:[#allocation705_spill] sm:$0xff]  ;;  %v19707_v58 = vld [vmem:[#allocation707_spill] sm:$0xff] }
 0x64c   :  { %6695 = vmatprep.subr.bf16.mxu0 %v19690_v41  ;;  %6818 = vmatprep.subr.bf16.mxu1 %v19691_v36  ;;  %v19708_v41 = vld [vmem:[#allocation708_spill] sm:$0xff]  ;;  %v19709_v36 = vld [vmem:[#allocation709_spill] sm:$0xff] }
 0x64f   :  { %6696 = vmatpush1.bf16.msra.mxu0 %v19692_v57  ;;  %6819 = vmatpush1.bf16.msra.mxu1 %v19693_v0  ;;  %v19710_v57 = vld [vmem:[#allocation710_spill] sm:$0xff]  ;;  %v19712_v0 = vld [vmem:[#allocation712_spill] sm:$0xff] }
 0x650   :  { %6697 = vmatprep.subr.bf16.mxu0 %v19694_v18  ;;  %6820 = vmatprep.subr.bf16.mxu1 %v19695_v55  ;;  %v19713_v18 = vld [vmem:[#allocation713_spill] sm:$0xff]  ;;  %v19714_v55 = vld [vmem:[#allocation714_spill] sm:$0xff] }
 0x653   :  { %6698 = vmatpush1.bf16.msra.mxu0 %v15723_v15  ;;  %6821 = vmatpush1.bf16.msra.mxu1 %v19696_v40  ;;  %v19703_v15 = vld [vmem:[#allocation703_spill] sm:$0xff] }
 0x654   :  { %6699 = vmatprep.subr.bf16.mxu0 %v19697_v12  ;;  %6822 = vmatprep.subr.bf16.mxu1 %v19698_v26  ;;  %v19715_v40 = vld [vmem:[#allocation715_spill] sm:$0xff]  ;;  %v19717_v12 = vld [vmem:[#allocation717_spill] sm:$0xff]  ;;  %v19718_v26 = vld [vmem:[#allocation718_spill] sm:$0xff] }
 0x657   :  { %6700 = vmatpush1.bf16.msra.mxu0 %v19699_v27  ;;  %6823 = vmatpush1.bf16.msra.mxu1 %v15739_v56  ;;  %v19706_v56 = vld [vmem:[#allocation706_spill] sm:$0xff]  ;;  %v19719_v27 = vld [vmem:[#allocation719_spill] sm:$0xff] }
 0x658   :  { %6710 = vmatprep.subr.bf16.mxu0 %v19700_v28  ;;  %6833 = vmatprep.subr.bf16.mxu1 %v19701_v29  ;;  %v19720_v28 = vld [vmem:[#allocation720_spill] sm:$0xff]  ;;  %v19721_v29 = vld [vmem:[#allocation721_spill] sm:$0xff] }
 0x65a   :  { %6702 = vmatmul.mubr.bf16.vlgmr.msra.gmra.mrb[28].mxu0 %v16106_v51  ;;  %6825 = vmatmul.mubr.bf16.vlgmr.msra.gmra.mrb[28].mxu1 %v16106_v51  ;;  %v19711_v51 = vld [vmem:[#allocation711_spill] sm:$0xff] }
 0x65b   :  { %6711 = vmatpush1.bf16.msra.mxu0 %v19702_v31  ;;  %6834 = vmatpush1.bf16.msra.mxu1 %v19703_v15  ;;  %v19722_v31 = vld [vmem:[#allocation722_spill] sm:$0xff]  ;;  %v19723_v15 = vld [vmem:[#allocation723_spill] sm:$0xff] }
 0x65c   :  { %6712 = vmatprep.subr.bf16.mxu0 %v19704_v11  ;;  %6835 = vmatprep.subr.bf16.mxu1 %v19705_v30  ;;  %v19724_v11 = vld [vmem:[#allocation724_spill] sm:$0xff]  ;;  %v19725_v30 = vld [vmem:[#allocation725_spill] sm:$0xff] }
 0x65d   :  { %6742 = vmatprep.mubr.bf16.mxu0 %v16119_v63  ;;  %6865 = vmatprep.mubr.bf16.mxu1 %v16119_v63  ;;  %v19716_v63 = vld [vmem:[#allocation716_spill] sm:$0xff] }
 0x65f   :  { %6713 = vmatpush1.bf16.msra.mxu0 %v19706_v56  ;;  %6836 = vmatpush1.bf16.msra.mxu1 %v19707_v58  ;;  %v19726_v56 = vld [vmem:[#allocation726_spill] sm:$0xff]  ;;  %v19727_v58 = vld [vmem:[#allocation727_spill] sm:$0xff] }
 0x660   :  { %6714 = vmatprep.subr.bf16.mxu0 %v19708_v41  ;;  %6837 = vmatprep.subr.bf16.mxu1 %v19709_v36  ;;  %v19728_v41 = vld [vmem:[#allocation728_spill] sm:$0xff]  ;;  %v19729_v36 = vld [vmem:[#allocation729_spill] sm:$0xff] }
 0x663   :  { %6715 = vmatpush1.bf16.msra.mxu0 %v19710_v57  ;;  %6838 = vmatpush1.bf16.msra.mxu1 %v19711_v51  ;;  %v19730_v57 = vld [vmem:[#allocation730_spill] sm:$0xff]  ;;  %v19731_v51 = vld [vmem:[#allocation731_spill] sm:$0xff] }
 0x664   :  { %6716 = vmatprep.subr.bf16.mxu0 %v19712_v0  ;;  %6839 = vmatprep.subr.bf16.mxu1 %v19713_v18  ;;  %v19732_v0 = vld [vmem:[#allocation732_spill] sm:$0xff]  ;;  %v19733_v18 = vld [vmem:[#allocation733_spill] sm:$0xff] }
 0x667   :  { %6717 = vmatpush1.bf16.msra.mxu0 %v19714_v55  ;;  %6840 = vmatpush1.bf16.msra.mxu1 %v19715_v40  ;;  %v19734_v55 = vld [vmem:[#allocation734_spill] sm:$0xff]  ;;  %v19735_v40 = vld [vmem:[#allocation735_spill] sm:$0xff] }
 0x668   :  { %6718 = vmatprep.subr.bf16.mxu0 %v19716_v63  ;;  %6841 = vmatprep.subr.bf16.mxu1 %v19717_v12  ;;  %v19736_v63 = vld [vmem:[#allocation736_spill] sm:$0xff]  ;;  %v19737_v12 = vld [vmem:[#allocation737_spill] sm:$0xff] }
 0x66b   :  { %6719 = vmatpush1.bf16.msra.mxu0 %v19718_v26  ;;  %6842 = vmatpush1.bf16.msra.mxu1 %v19719_v27  ;;  %v19738_v26 = vld [vmem:[#allocation738_spill] sm:$0xff]  ;;  %v19739_v27 = vld [vmem:[#allocation739_spill] sm:$0xff] }
 0x66c   :  { %6720 = vmatprep.subr.bf16.mxu0 %v19720_v28  ;;  %6843 = vmatprep.subr.bf16.mxu1 %v19721_v29  ;;  %v19740_v28 = vld [vmem:[#allocation740_spill] sm:$0xff]  ;;  %v19741_v29 = vld [vmem:[#allocation741_spill] sm:$0xff] }
 0x66f   :  { %6721 = vmatpush1.bf16.msra.mxu0 %v19722_v31  ;;  %6844 = vmatpush1.bf16.msra.mxu1 %v19723_v15  ;;  %v19742_v31 = vld [vmem:[#allocation742_spill] sm:$0xff]  ;;  %v19743_v15 = vld [vmem:[#allocation743_spill] sm:$0xff] }
 0x670   :  { %6722 = vmatprep.subr.bf16.mxu0 %v19724_v11  ;;  %6845 = vmatprep.subr.bf16.mxu1 %v19725_v30  ;;  %v19744_v11 = vld [vmem:[#allocation744_spill] sm:$0xff]  ;;  %v19745_v30 = vld [vmem:[#allocation745_spill] sm:$0xff] }
 0x673   :  { %6723 = vmatpush1.bf16.msra.mxu0 %v19726_v56  ;;  %6846 = vmatpush1.bf16.msra.mxu1 %v19727_v58  ;;  %v19746_v56 = vld [vmem:[#allocation746_spill] sm:$0xff]  ;;  %v19747_v58 = vld [vmem:[#allocation747_spill] sm:$0xff] }
 0x674   :  { %6724 = vmatprep.subr.bf16.mxu0 %v19728_v41  ;;  %6847 = vmatprep.subr.bf16.mxu1 %v19729_v36  ;;  %v19748_v41 = vld [vmem:[#allocation748_spill] sm:$0xff]  ;;  %v19749_v36 = vld [vmem:[#allocation749_spill] sm:$0xff] }
 0x677   :  { %6725 = vmatpush1.bf16.msra.mxu0 %v19730_v57  ;;  %6848 = vmatpush1.bf16.msra.mxu1 %v19731_v51  ;;  %v19750_v57 = vld [vmem:[#allocation750_spill] sm:$0xff]  ;;  %v12829_v51 = vld [vmem:[#allocation7 + $0x60] sm:$0xff]  }
 0x678   :  { %6726 = vmatprep.subr.bf16.mxu0 %v19732_v0  ;;  %6849 = vmatprep.subr.bf16.mxu1 %v19733_v18  ;;  %v12832_v0 = vld [vmem:[#allocation7 + $0xa0] sm:$0xff]   ;;  %v12833_v18 = vld [vmem:[#allocation7 + $0x68] sm:$0xff]  }
 0x67b   :  { %6727 = vmatpush1.bf16.msra.mxu0 %v19734_v55  ;;  %6850 = vmatpush1.bf16.msra.mxu1 %v19735_v40  ;;  %v12834_v55 = vld [vmem:[#allocation7 + $0xe8] sm:$0xff]  }
 0x67c   :  { %6728 = vmatprep.subr.bf16.mxu0 %v19736_v63  ;;  %6851 = vmatprep.subr.bf16.mxu1 %v19737_v12  ;;  %v12835_v40 = vld [vmem:[#allocation7 + $0x28] sm:$0xff]   ;;  %v12837_v12 = vld [vmem:[#allocation7 + $0x70] sm:$0xff]  }
 0x67d   :  { %v12836_v63 = vld [vmem:[#allocation7 + $0xa8] sm:$0xff]  }
 0x67f   :  { %6729 = vmatpush1.bf16.msra.mxu0 %v19738_v26  ;;  %6852 = vmatpush1.bf16.msra.mxu1 %v19739_v27  ;;  %v12838_v27 = vld [vmem:[#allocation7 + $0xf0] sm:$0xff]  }
 0x680   :  { %6730 = vmatprep.subr.bf16.mxu0 %v19740_v28  ;;  %6853 = vmatprep.subr.bf16.mxu1 %v19741_v29 }
 0x683   :  { %6731 = vmatpush1.bf16.msra.mxu0 %v19742_v31  ;;  %6854 = vmatpush1.bf16.msra.mxu1 %v19743_v15 }
 0x684   :  { %6732 = vmatprep.subr.bf16.mxu0 %v19744_v11  ;;  %6855 = vmatprep.subr.bf16.mxu1 %v19745_v30 }
 0x687   :  { %6733 = vmatpush1.bf16.msra.mxu0 %v19746_v56  ;;  %6856 = vmatpush1.bf16.msra.mxu1 %v19747_v58  ;;  %v12839_v58 = vld [vmem:[#allocation7 + $0x30] sm:$0xff]  }
 0x688   :  { %6734 = vmatprep.subr.bf16.mxu0 %v19748_v41  ;;  %6857 = vmatprep.subr.bf16.mxu1 %v19749_v36 }
 0x68b   :  { %6735 = vmatpush1.bf16.msra.mxu0 %v15895_v47  ;;  %6858 = vmatpush1.bf16.msra.mxu1 %v15899_v32  ;;  %v12813_v47 = vld [vmem:[#allocation7 + $0x40] sm:$0xff]  }
 0x68c   :  { %6736 = vmatprep.subr.bf16.mxu0 %v15901_v16  ;;  %6859 = vmatprep.subr.bf16.mxu1 %v19750_v57  ;;  %v12814_v32 = vld [vmem:[#allocation7 + $0xc0] sm:$0xff]  }
 0x68d   :  { %v12815_v16 = vld [vmem:[#allocation7] sm:$0xff]  }
 0x68f   :  { %6737 = vmatpush1.bf16.msra.mxu0 %v15907_v49  ;;  %6860 = vmatpush1.bf16.msra.mxu1 %v15911_v1  ;;  %v12816_v49 = vld [vmem:[#allocation7 + $0x80] sm:$0xff]   ;;  %v12817_v1 = vld [vmem:[#allocation7 + $0x48] sm:$0xff]  }
 0x690   :  { %6738 = vmatprep.subr.bf16.mxu0 %v15913_v46  ;;  %6861 = vmatprep.subr.bf16.mxu1 %v15916_v25  ;;  %v12818_v46 = vld [vmem:[#allocation7 + $0xc8] sm:$0xff]  }
 0x691   :  { %v12819_v25 = vld [vmem:[#allocation7 + $0x8] sm:$0xff]  }
 0x693   :  { %6739 = vmatpush1.bf16.msra.mxu0 %v15919_v48  ;;  %6862 = vmatpush1.bf16.msra.mxu1 %v15923_v33  ;;  %v12821_v48 = vld [vmem:[#allocation7 + $0x50] sm:$0xff]  }
 0x694   :  { %6740 = vmatprep.subr.bf16.mxu0 %v15925_v17  ;;  %6863 = vmatprep.subr.bf16.mxu1 %v15928_v13  ;;  %v12822_v33 = vld [vmem:[#allocation7 + $0xd0] sm:$0xff]  }
 0x695   :  { %v12823_v17 = vld [vmem:[#allocation7 + $0x10] sm:$0xff]  }
 0x696   :  { %v12824_v13 = vld [vmem:[#allocation7 + $0x90] sm:$0xff]  }
 0x697   :  { %6741 = vmatpush1.bf16.msra.mxu0 %v15931_v53  ;;  %6864 = vmatpush1.bf16.msra.mxu1 %v15935_v39  ;;  %v12820_v53 = vld [vmem:[#allocation7 + $0x88] sm:$0xff]   ;;  %v12825_v39 = vld [vmem:[#allocation7 + $0x58] sm:$0xff]  }
 0x698   :  { %11916 = vmatprep.subr.bf16.mxu0 %v12813_v47  ;;  %11938 = vmatprep.subr.bf16.mxu1 %v12814_v32  ;;  %v12840_v47 = vld [vmem:[#allocation7 + $0xb0] sm:$0xff]   ;;  %v12841_v32 = vld [vmem:[#allocation7 + $0x78] sm:$0xff]  }
 0x69a   :  { %6743 = vmatmul.mubr.bf16.vlgmr.msra.gmra.mrb[28].mxu0 %v16187_v37  ;;  %6866 = vmatmul.mubr.bf16.vlgmr.msra.gmra.mrb[28].mxu1 %v16187_v37  ;;  %v12826_v37 = vld [vmem:[#allocation7 + $0xd8] sm:$0xff]  }
 0x69b   :  { %11917 = vmatpush3.bf16.msra.mxu0 %v12815_v16  ;;  %8013 = vmatprep.mubr.bf16.mxu0 %v6942_v6  ;;  %v12828_v6 = vld [vmem:[#allocation7 + $0x98] sm:$0xff]  }
 0x69c   :  { %11939 = vmatpush3.bf16.msra.mxu1 %v12816_v49  ;;  %8054 = vmatprep.mubr.bf16.mxu1 %v6944_v4  ;;  %v12831_v4 = vld [vmem:[#allocation7 + $0x20] sm:$0xff]   ;;  %v12842_v49 = vld [vmem:[#allocation7 + $0xf8] sm:$0xff]  }
 0x69d   :  { %11918 = vmatprep.subr.bf16.mxu0 %v12817_v1  ;;  %11940 = vmatprep.subr.bf16.mxu1 %v12818_v46  ;;  %v12843_v1 = vld [vmem:[#allocation7 + $0x38] sm:$0xff]  }
 0x69e   :  { %v12844_v46 = vld [vmem:[#allocation7 + $0xb8] sm:$0xff]  }
 0x69f   :  { %11919 = vmatpush3.bf16.msra.mxu0 %v12819_v25  ;;  %v12845_v25 = vld [vmem:[#allocation7 + $0x140] sm:$0xff]  }
 0x6a0   :  { %11941 = vmatpush3.bf16.msra.mxu1 %v12820_v53  ;;  %11920 = vmatprep.subr.bf16.mxu0 %v12821_v48  ;;  %v12846_v53 = vld [vmem:[#allocation7 + $0x1c0] sm:$0xff]  }
 0x6a1   :  { %11942 = vmatprep.subr.bf16.mxu1 %v12822_v33  ;;  %v12847_v48 = vld [vmem:[#allocation7 + $0x100] sm:$0xff]  }
 0x6a2   :  { %v12848_v33 = vld [vmem:[#allocation7 + $0x180] sm:$0xff]  }
 0x6a3   :  { %11921 = vmatpush3.bf16.msra.mxu0 %v12823_v17  ;;  %v12849_v17 = vld [vmem:[#allocation7 + $0x148] sm:$0xff]  }
 0x6a4   :  { %11943 = vmatpush3.bf16.msra.mxu1 %v12824_v13  ;;  %11922 = vmatprep.subr.bf16.mxu0 %v12825_v39  ;;  %v12850_v13 = vld [vmem:[#allocation7 + $0x1c8] sm:$0xff]  }
 0x6a5   :  { %11944 = vmatprep.subr.bf16.mxu1 %v12826_v37  ;;  %v12851_v39 = vld [vmem:[#allocation7 + $0x108] sm:$0xff]  }
 0x6a6   :  { %v12852_v37 = vld [vmem:[#allocation7 + $0x188] sm:$0xff]  }
 0x6a7   :  { %11923 = vmatpush3.bf16.msra.mxu0 %v12827_v52  ;;  %v12853_v52 = vld [vmem:[#allocation7 + $0x150] sm:$0xff]  }
 0x6a8   :  { %11945 = vmatpush3.bf16.msra.mxu1 %v12828_v6  ;;  %11924 = vmatprep.subr.bf16.mxu0 %v12829_v51  ;;  %v12858_v6 = vld [vmem:[#allocation7 + $0x1d8] sm:$0xff]   ;;  %v12861_v51 = vld [vmem:[#allocation7 + $0x160] sm:$0xff]  }
 0x6a9   :  { %11946 = vmatprep.subr.bf16.mxu1 %v12830_v7  ;;  %v12864_v7 = vld [vmem:[#allocation7 + $0x1a0] sm:$0xff]  }
 0x6ab   :  { %11925 = vmatpush3.bf16.msra.mxu0 %v12831_v4  ;;  %v12865_v4 = vld [vmem:[#allocation7 + $0x168] sm:$0xff]  }
 0x6ac   :  { %11947 = vmatpush3.bf16.msra.mxu1 %v12832_v0  ;;  %11926 = vmatprep.subr.bf16.mxu0 %v12833_v18  ;;  %v12866_v0 = vld [vmem:[#allocation7 + $0x1e8] sm:$0xff]  }
 0x6ad   :  { %v16851_v26 = vpop.f32.mrb[24].mxu0  ;;  %11948 = vmatprep.subr.bf16.mxu1 %v12834_v55  ;;  %v16855_v29 = vpop.f32.mrb[24].mxu1  ;;  %v12867_v18 = vld [vmem:[#allocation7 + $0x128] sm:$0xff]  }
 0x6ae   :  { %v6949_v28 = vpack.c.bf16 %v16851_v26, %v15974_v3  ;;  %v16857_v31 = vpop.f32.mrb[25].mxu0  ;;  %v6951_v15 = vpack.c.bf16 %v16855_v29, %v15977_v5  ;;  %v16863_v30 = vpop.f32.mrb[25].mxu1  ;;  %v12868_v55 = vld [vmem:[#allocation7 + $0x1a8] sm:$0xff]   ;;  %v12922_v26 = vld [vmem:[#allocation7 + $0x3d8] sm:$0xff]  }
 0x6af   :  { %v6950_v11 = vpack.c.bf16 %v16857_v31, %v15979_v8  ;;  %v6502_v56 = vpop.f32.mrb[26].mxu0  ;;  %11927 = vmatpush3.bf16.msra.mxu0 %v12835_v40  ;;  %v6952_v41 = vpack.c.bf16 %v16863_v30, %v15981_v9  ;;  %v6625_v36 = vpop.f32.mrb[26].mxu1  ;;  %v12869_v40 = vld [vmem:[#allocation7 + $0x170] sm:$0xff]   ;;  %v12891_v31 = vld [vmem:[#allocation7 + $0x218] sm:$0xff]   ;;  %v12894_v30 = vld [vmem:[#allocation7 + $0x2e0] sm:$0xff]  }
 0x6b0   :  { %11949 = vmatpush3.bf16.msra.mxu1 %v12836_v63  ;;  %v6503_v57 = vpop.f32.mrb[27].mxu0  ;;  %11928 = vmatprep.subr.bf16.mxu0 %v12837_v12  ;;  %v6626_v16 = vpop.f32.mrb[27].mxu1  ;;  %v12870_v63 = vld [vmem:[#allocation7 + $0x1f0] sm:$0xff]   ;;  %v12873_v56 = vld [vmem:[#allocation7 + $0x178] sm:$0xff]  }
 0x6b1   :  { %11950 = vmatprep.subr.bf16.mxu1 %v12838_v27  ;;  %v12871_v12 = vld [vmem:[#allocation7 + $0x130] sm:$0xff]   ;;  %v12875_v36 = vld [vmem:[#allocation7 + $0x138] sm:$0xff]   ;;  %v12879_v16 = vld [vmem:[#allocation7 + $0x200] sm:$0xff]  }
 0x6b2   :  { %v12872_v27 = vld [vmem:[#allocation7 + $0x1b0] sm:$0xff]   ;;  %v12876_v57 = vld [vmem:[#allocation7 + $0x1b8] sm:$0xff]  }
 0x6b3   :  { %11929 = vmatpush3.bf16.msra.mxu0 %v12839_v58  ;;  %v12874_v58 = vld [vmem:[#allocation7 + $0x1f8] sm:$0xff]  }
 0x6b4   :  { %11951 = vmatpush3.bf16.msra.mxu1 %v12840_v47  ;;  %11930 = vmatprep.subr.bf16.mxu0 %v12841_v32  ;;  %v12877_v47 = vld [vmem:[#allocation7 + $0x240] sm:$0xff]   ;;  %v12924_v29 = vld [vmem:[#allocation7 + $0x398] sm:$0xff]  }
 0x6b5   :  { %11952 = vmatprep.subr.bf16.mxu1 %v12842_v49  ;;  %v12878_v32 = vld [vmem:[#allocation7 + $0x2c0] sm:$0xff]  }
 0x6b6   :  { %v12880_v49 = vld [vmem:[#allocation7 + $0x280] sm:$0xff]  }
 0x6b7   :  { %11931 = vmatpush3.bf16.msra.mxu0 %v12843_v1  ;;  %v12881_v1 = vld [vmem:[#allocation7 + $0x248] sm:$0xff]  }
 0x6b8   :  { %11953 = vmatpush3.bf16.msra.mxu1 %v12844_v46  ;;  %11960 = vmatprep.subr.bf16.mxu0 %v12845_v25  ;;  %v19751_v46 = vpack.c.bf16 %v16648_v34, %v19595_v35  ;;  %v12882_v25 = vld [vmem:[#allocation7 + $0x2c8] sm:$0xff]   ;;  %v12886_v34 = vld [vmem:[#allocation7 + $0x2d0] sm:$0xff]  }
 0x6b9   :  { %11982 = vmatprep.subr.bf16.mxu1 %v12846_v53  ;;  %v19752_v53 = vpack.c.bf16 %v16653_v42, %v19596_v45  ;;  %v12888_v42 = vld [vmem:[#allocation7 + $0x290] sm:$0xff]  }
 0x6ba   :  { %8014 = vmatmul.mubr.bf16.vlgmr.msra.gmra.mrb[32].mxu0 %v6941_v54  ;;  %v12855_v54 = vld [vmem:[#allocation7 + $0x110] sm:$0xff]  }
 0x6bb   :  { %8055 = vmatmul.mubr.bf16.vlgmr.msra.gmra.mrb[32].mxu1 %v6943_v62  ;;  %11961 = vmatpush3.bf16.msra.mxu0 %v12847_v48  ;;  %v12857_v62 = vld [vmem:[#allocation7 + $0x158] sm:$0xff]   ;;  %v12883_v48 = vld [vmem:[#allocation7 + $0x208] sm:$0xff]  }
 0x6bc   :  { %8095 = vmatprep.mubr.bf16.mxu0 %v6946_v2  ;;  %11983 = vmatpush3.bf16.msra.mxu1 %v12848_v33  ;;  %v12860_v2 = vld [vmem:[#allocation7 + $0x198] sm:$0xff]   ;;  %v12884_v33 = vld [vmem:[#allocation7 + $0x288] sm:$0xff]  }
 0x6bd   :  { %8136 = vmatprep.mubr.bf16.mxu1 %v6948_v10  ;;  %11962 = vmatprep.subr.bf16.mxu0 %v12849_v17  ;;  %v12863_v10 = vld [vmem:[#allocation7 + $0x120] sm:$0xff]   ;;  %v12885_v17 = vld [vmem:[#allocation7 + $0x250] sm:$0xff]  }
 0x6be   :  { %11984 = vmatprep.subr.bf16.mxu1 %v12850_v13  ;;  %v12887_v13 = vld [vmem:[#allocation7 + $0x210] sm:$0xff]  }
 0x6bf   :  { %11963 = vmatpush3.bf16.msra.mxu0 %v12851_v39  ;;  %v12889_v39 = vld [vmem:[#allocation7 + $0x258] sm:$0xff]  }
 0x6c0   :  { %11985 = vmatpush3.bf16.msra.mxu1 %v12852_v37  ;;  %11964 = vmatprep.subr.bf16.mxu0 %v12853_v52  ;;  %v12890_v37 = vld [vmem:[#allocation7 + $0x2d8] sm:$0xff]   ;;  %v12893_v52 = vld [vmem:[#allocation7 + $0x260] sm:$0xff]  }
 0x6c1   :  { %11986 = vmatprep.subr.bf16.mxu1 %v12854_v44  ;;  %v12896_v44 = vld [vmem:[#allocation7 + $0x2a0] sm:$0xff]  }
 0x6c3   :  { %11965 = vmatpush3.bf16.msra.mxu0 %v12855_v54  ;;  %v12897_v54 = vld [vmem:[#allocation7 + $0x268] sm:$0xff]  }
 0x6c4   :  { %11987 = vmatpush3.bf16.msra.mxu1 %v12856_v60  ;;  %11966 = vmatprep.subr.bf16.mxu0 %v12857_v62  ;;  %v12898_v60 = vld [vmem:[#allocation7 + $0x2e8] sm:$0xff]  }
 0x6c5   :  { %11988 = vmatprep.subr.bf16.mxu1 %v12858_v6  ;;  %v12899_v62 = vld [vmem:[#allocation7 + $0x228] sm:$0xff]  }
 0x6c6   :  { %v12900_v6 = vld [vmem:[#allocation7 + $0x2a8] sm:$0xff]  }
 0x6c7   :  { %11967 = vmatpush3.bf16.msra.mxu0 %v12859_v43  ;;  %v12901_v43 = vld [vmem:[#allocation7 + $0x270] sm:$0xff]  }
 0x6c8   :  { %11989 = vmatpush3.bf16.msra.mxu1 %v12860_v2  ;;  %11968 = vmatprep.subr.bf16.mxu0 %v12861_v51  ;;  %v12902_v2 = vld [vmem:[#allocation7 + $0x2f0] sm:$0xff]  }
 0x6c9   :  { %11990 = vmatprep.subr.bf16.mxu1 %v12862_v38  ;;  %v12903_v51 = vld [vmem:[#allocation7 + $0x230] sm:$0xff]  }
 0x6ca   :  { %v12904_v38 = vld [vmem:[#allocation7 + $0x2b0] sm:$0xff]  }
 0x6cb   :  { %11969 = vmatpush3.bf16.msra.mxu0 %v12863_v10  ;;  %v12905_v10 = vld [vmem:[#allocation7 + $0x278] sm:$0xff]  }
 0x6cc   :  { %11991 = vmatpush3.bf16.msra.mxu1 %v12864_v7  ;;  %11970 = vmatprep.subr.bf16.mxu0 %v12865_v4  ;;  %v12906_v7 = vld [vmem:[#allocation7 + $0x2f8] sm:$0xff]  }
 0x6cd   :  { %11992 = vmatprep.subr.bf16.mxu1 %v12866_v0  ;;  %v12907_v4 = vld [vmem:[#allocation7 + $0x238] sm:$0xff]  }
 0x6ce   :  { %v12908_v0 = vld [vmem:[#allocation7 + $0x2b8] sm:$0xff]  }
 0x6cf   :  { %11971 = vmatpush3.bf16.msra.mxu0 %v12867_v18  ;;  %v12909_v18 = vld [vmem:[#allocation7 + $0x340] sm:$0xff]  }
 0x6d0   :  { %11993 = vmatpush3.bf16.msra.mxu1 %v12868_v55  ;;  %11972 = vmatprep.subr.bf16.mxu0 %v12869_v40  ;;  %v12910_v55 = vld [vmem:[#allocation7 + $0x3c0] sm:$0xff]  }
 0x6d1   :  { %11994 = vmatprep.subr.bf16.mxu1 %v12870_v63  ;;  %v12911_v40 = vld [vmem:[#allocation7 + $0x300] sm:$0xff]  }
 0x6d2   :  { %v12912_v63 = vld [vmem:[#allocation7 + $0x380] sm:$0xff]  }
 0x6d3   :  { %11973 = vmatpush3.bf16.msra.mxu0 %v12871_v12  ;;  %v12913_v12 = vld [vmem:[#allocation7 + $0x348] sm:$0xff]  }
 0x6d4   :  { %11995 = vmatpush3.bf16.msra.mxu1 %v12872_v27  ;;  %11974 = vmatprep.subr.bf16.mxu0 %v12873_v56  ;;  %v12914_v27 = vld [vmem:[#allocation7 + $0x3c8] sm:$0xff]  }
 0x6d5   :  { %11996 = vmatprep.subr.bf16.mxu1 %v12874_v58  ;;  %v12915_v56 = vld [vmem:[#allocation7 + $0x308] sm:$0xff]  }
 0x6d6   :  { %v12916_v58 = vld [vmem:[#allocation7 + $0x388] sm:$0xff]  }
 0x6d7   :  { %11975 = vmatpush3.bf16.msra.mxu0 %v12875_v36  ;;  %v12917_v36 = vld [vmem:[#allocation7 + $0x350] sm:$0xff]  }
 0x6d8   :  { %11997 = vmatpush3.bf16.msra.mxu1 %v12876_v57  ;;  %12004 = vmatprep.subr.bf16.mxu0 %v12877_v47  ;;  %v12918_v57 = vld [vmem:[#allocation7 + $0x3d0] sm:$0xff]  }
 0x6d9   :  { %12026 = vmatprep.subr.bf16.mxu1 %v12878_v32  ;;  %v12919_v47 = vld [vmem:[#allocation7 + $0x310] sm:$0xff]  }
 0x6da   :  { %8096 = vmatmul.mubr.bf16.vlgmr.msra.gmra.mrb[36].mxu0 %v19751_v46  ;;  %v12920_v32 = vld [vmem:[#allocation7 + $0x390] sm:$0xff]   ;;  %v12928_v46 = vld [vmem:[#allocation7 + $0x3a0] sm:$0xff]  }
 0x6db   :  { %8137 = vmatmul.mubr.bf16.vlgmr.msra.gmra.mrb[36].mxu1 %v19752_v53  ;;  %12005 = vmatpush3.bf16.msra.mxu0 %v12879_v16  ;;  %v12921_v16 = vld [vmem:[#allocation7 + $0x358] sm:$0xff]   ;;  %v12930_v53 = vld [vmem:[#allocation7 + $0x3e8] sm:$0xff]  }
 0x6dc   :  { %8177 = vmatprep.mubr.bf16.mxu0 %v6950_v11  ;;  %12027 = vmatpush3.bf16.msra.mxu1 %v12880_v49  ;;  %v12892_v11 = vld [vmem:[#allocation7 + $0x298] sm:$0xff]   ;;  %v12926_v49 = vld [vmem:[#allocation7 + $0x3e0] sm:$0xff]  }
 0x6dd   :  { %8218 = vmatprep.mubr.bf16.mxu1 %v6952_v41  ;;  %12006 = vmatprep.subr.bf16.mxu0 %v12881_v1  ;;  %v12895_v41 = vld [vmem:[#allocation7 + $0x220] sm:$0xff]  }
 0x6de   :  { %12028 = vmatprep.subr.bf16.mxu1 %v12882_v25  ;;  %v12927_v1 = vld [vmem:[#allocation7 + $0x320] sm:$0xff]   ;;  %v12929_v25 = vld [vmem:[#allocation7 + $0x368] sm:$0xff]  }
 0x6df   :  { %12007 = vmatpush3.bf16.msra.mxu0 %v12883_v48  ;;  %v12931_v48 = vld [vmem:[#allocation7 + $0x328] sm:$0xff]  }
 0x6e0   :  { %12029 = vmatpush3.bf16.msra.mxu1 %v12884_v33  ;;  %12008 = vmatprep.subr.bf16.mxu0 %v12885_v17  ;;  %v12932_v33 = vld [vmem:[#allocation7 + $0x3a8] sm:$0xff]   ;;  %v12933_v17 = vld [vmem:[#allocation7 + $0x370] sm:$0xff]  }
 0x6e1   :  { %12030 = vmatprep.subr.bf16.mxu1 %v12886_v34  ;;  %v12934_v34 = vld [vmem:[#allocation7 + $0x3f0] sm:$0xff]  }
 0x6e3   :  { %12009 = vmatpush3.bf16.msra.mxu0 %v12887_v13  ;;  %v12935_v13 = vld [vmem:[#allocation7 + $0x330] sm:$0xff]  }
 0x6e4   :  { %12031 = vmatpush3.bf16.msra.mxu1 %v12888_v42  ;;  %12010 = vmatprep.subr.bf16.mxu0 %v12889_v39  ;;  %v12936_v42 = vld [vmem:[#allocation7 + $0x3b0] sm:$0xff]   ;;  %v12937_v39 = vld [vmem:[#allocation7 + $0x378] sm:$0xff]  }
 0x6e5   :  { %12032 = vmatprep.subr.bf16.mxu1 %v12890_v37  ;;  %v12938_v37 = vld [vmem:[#allocation7 + $0x3f8] sm:$0xff]  }
 0x6e7   :  { %12011 = vmatpush3.bf16.msra.mxu0 %v12891_v31  ;;  %v12939_v31 = vld [vmem:[#allocation7 + $0x338] sm:$0xff]  }
 0x6e8   :  { %12033 = vmatpush3.bf16.msra.mxu1 %v12892_v11  ;;  %12012 = vmatprep.subr.bf16.mxu0 %v12893_v52  ;;  %v12940_v11 = vld [vmem:[#allocation7 + $0x3b8] sm:$0xff]  }
 0x6e9   :  { %12034 = vmatprep.subr.bf16.mxu1 %v12894_v30 }
 0x6eb   :  { %12013 = vmatpush3.bf16.msra.mxu0 %v12895_v41 }
 0x6ec   :  { %12035 = vmatpush3.bf16.msra.mxu1 %v12896_v44  ;;  %12014 = vmatprep.subr.bf16.mxu0 %v12897_v54 }
 0x6ed   :  { %12036 = vmatprep.subr.bf16.mxu1 %v12898_v60 }
 0x6ef   :  { %12015 = vmatpush3.bf16.msra.mxu0 %v12899_v62 }
 0x6f0   :  { %12037 = vmatpush3.bf16.msra.mxu1 %v12900_v6  ;;  %12016 = vmatprep.subr.bf16.mxu0 %v12901_v43 }
 0x6f1   :  { %12038 = vmatprep.subr.bf16.mxu1 %v12902_v2 }
 0x6f3   :  { %12017 = vmatpush3.bf16.msra.mxu0 %v12903_v51 }
 0x6f4   :  { %12039 = vmatpush3.bf16.msra.mxu1 %v12904_v38  ;;  %12018 = vmatprep.subr.bf16.mxu0 %v12905_v10 }
 0x6f5   :  { %12040 = vmatprep.subr.bf16.mxu1 %v12906_v7 }
 0x6f7   :  { %12019 = vmatpush3.bf16.msra.mxu0 %v12907_v4 }
 0x6f8   :  { %12041 = vmatpush3.bf16.msra.mxu1 %v12908_v0  ;;  %12048 = vmatprep.subr.bf16.mxu0 %v12909_v18 }
 0x6f9   :  { %12070 = vmatprep.subr.bf16.mxu1 %v12910_v55 }
 0x6fa   :  { %8178 = vmatmul.mubr.bf16.vlgmr.msra.gmra.mrb[40].mxu0 %v6949_v28  ;;  %v12923_v28 = vld [vmem:[#allocation7 + $0x318] sm:$0xff]  }
 0x6fb   :  { %8219 = vmatmul.mubr.bf16.vlgmr.msra.gmra.mrb[40].mxu1 %v6951_v15  ;;  %12049 = vmatpush3.bf16.msra.mxu0 %v12911_v40  ;;  %v12925_v15 = vld [vmem:[#allocation7 + $0x360] sm:$0xff]  }
 0x6fc   :  { %12071 = vmatpush3.bf16.msra.mxu1 %v12912_v63  ;;  %12050 = vmatprep.subr.bf16.mxu0 %v12913_v12 }
 0x6fd   :  { %12072 = vmatprep.subr.bf16.mxu1 %v12914_v27 }
 0x6ff   :  { %12051 = vmatpush3.bf16.msra.mxu0 %v12915_v56 }
 0x700   :  { %12073 = vmatpush3.bf16.msra.mxu1 %v12916_v58  ;;  %12052 = vmatprep.subr.bf16.mxu0 %v12917_v36 }
 0x701   :  { %12074 = vmatprep.subr.bf16.mxu1 %v12918_v57 }
 0x703   :  { %12053 = vmatpush3.bf16.msra.mxu0 %v12919_v47 }
 0x704   :  { %12075 = vmatpush3.bf16.msra.mxu1 %v12920_v32  ;;  %12054 = vmatprep.subr.bf16.mxu0 %v12921_v16 }
 0x705   :  { %12076 = vmatprep.subr.bf16.mxu1 %v12922_v26 }
 0x707   :  { %12055 = vmatpush3.bf16.msra.mxu0 %v12923_v28 }
 0x708   :  { %12077 = vmatpush3.bf16.msra.mxu1 %v12924_v29  ;;  %12056 = vmatprep.subr.bf16.mxu0 %v12925_v15 }
 0x709   :  { %12078 = vmatprep.subr.bf16.mxu1 %v12926_v49 }
 0x70b   :  { %12057 = vmatpush3.bf16.msra.mxu0 %v12927_v1 }
 0x70c   :  { %12079 = vmatpush3.bf16.msra.mxu1 %v12928_v46  ;;  %12058 = vmatprep.subr.bf16.mxu0 %v12929_v25 }
 0x70d   :  { %12080 = vmatprep.subr.bf16.mxu1 %v12930_v53 }
 0x70f   :  { %12059 = vmatpush3.bf16.msra.mxu0 %v12931_v48 }
 0x710   :  { %12081 = vmatpush3.bf16.msra.mxu1 %v12932_v33  ;;  %12060 = vmatprep.subr.bf16.mxu0 %v12933_v17 }
 0x711   :  { %12082 = vmatprep.subr.bf16.mxu1 %v12934_v34 }
 0x713   :  { %12061 = vmatpush3.bf16.msra.mxu0 %v12935_v13 }
 0x714   :  { %12083 = vmatpush3.bf16.msra.mxu1 %v12936_v42  ;;  %12062 = vmatprep.subr.bf16.mxu0 %v12937_v39 }
 0x715   :  { %12084 = vmatprep.subr.bf16.mxu1 %v12938_v37 }
 0x717   :  { %12063 = vmatpush3.bf16.msra.mxu0 %v12939_v31 }
 0x718   :  { %12085 = vmatpush3.bf16.msra.mxu1 %v12940_v11 }
 0x76d   :  { %v6744_v52 = vpop.f32.mrb[28].mxu0  ;;  %v6867_v41 = vpop.f32.mrb[28].mxu1 }
 0x76e   :  { %v6953_v30 = vpack.c.bf16 %v6744_v52, %v16216_v14  ;;  %v6746_v44 = vpop.f32.mrb[29].mxu0  ;;  %v6955_v54 = vpack.c.bf16 %v6867_v41, %v16219_v19  ;;  %v6869_v62 = vpop.f32.mrb[29].mxu1 }
 0x76f   :  { %v6954_v60 = vpack.c.bf16 %v6746_v44, %v16221_v20  ;;  %v6748_v6 = vpop.f32.mrb[30].mxu0  ;;  %v6956_v43 = vpack.c.bf16 %v6869_v62, %v16223_v21  ;;  %v6871_v2 = vpop.f32.mrb[30].mxu1 }
 0x770   :  { %v6749_v51 = vpop.f32.mrb[31].mxu0  ;;  %v6872_v38 = vpop.f32.mrb[31].mxu1 }
 0x771   :  { %8259 = vmatprep.mubr.bf16.mxu0 %v6954_v60  ;;  %8300 = vmatprep.mubr.bf16.mxu1 %v6956_v43  ;;  %v8368_v51 = vld [vmem:[#allocation12] sm:$0xff]  ;;  %v8369_v38 = vld [vmem:[#allocation12 + $0x8] sm:$0xff] }
 0x772   :  { %8260 = vmatmul.mubr.bf16.vlgmr.msra.gmra.mrb[44].mxu0 %v6953_v30  ;;  %8301 = vmatmul.mubr.bf16.vlgmr.msra.gmra.mrb[44].mxu1 %v6955_v54 }
 0x78d   :  { %v11932_v10 = vpop.f32.mrb[32].mxu0 }
 0x78e   :  { %v11954_v7 = vpop.f32.mrb[32].mxu1  ;;  %v11933_v4 = vpop.f32.mrb[33].mxu0 }
 0x78f   :  { %v11934_v0 = vadd.f32 %v11933_v4, %v11932_v10  ;;  %v11955_v18 = vpop.f32.mrb[33].mxu1  ;;  %v11935_v55 = vpop.f32.mrb[34].mxu0  ;;  %v12548_v10 = vpack.c.bf16 %v8369_v38, %v8368_v51  ;;  %v8371_v4 = vld [vmem:[#allocation12 + $0x18] sm:$0xff] }
 0x790   :  { %v11956_v40 = vadd.f32 %v11955_v18, %v11954_v7  ;;  %v11957_v63 = vpop.f32.mrb[34].mxu1  ;;  %v11936_v12 = vpop.f32.mrb[35].mxu0  ;;  %v8370_v7 = vld [vmem:[#allocation12 + $0x10] sm:$0xff]  ;;  %v8372_v18 = vld [vmem:[#allocation12 + $0x20] sm:$0xff] }
 0x791   :  { %v11937_v27 = vadd.f32 %v11936_v12, %v11935_v55  ;;  %v11958_v56 = vpop.f32.mrb[35].mxu1  ;;  %12549 = vmatprep.subr.bf16.mxu0 %v12548_v10  ;;  %v8373_v55 = vld [vmem:[#allocation12 + $0x28] sm:$0xff]  ;;  %v8375_v12 = vld [vmem:[#allocation12 + $0x38] sm:$0xff] }
 0x792   :  { %v8057_v58 = vadd.f32 %v11956_v40, %v11934_v0  ;;  %v11959_v36 = vadd.f32 %v11958_v56, %v11957_v63  ;;  %12551 = vmatpush3.bf16.msra.mxu0 %v12548_v10  ;;  %v12552_v0 = vpack.c.bf16 %v8371_v4, %v8370_v7  ;;  %v12556_v40 = vpack.c.bf16 %v8373_v55, %v8372_v18  ;;  %v8374_v63 = vld [vmem:[#allocation12 + $0x30] sm:$0xff]  ;;  %v8376_v56 = vld [vmem:[#allocation12 + $0x40] sm:$0xff] }
 0x794   :  { %v8060_v57 = vadd.f32 %v11959_v36, %v11937_v27  ;;  %12553 = vmatprep.subr.bf16.mxu0 %v12552_v0  ;;  %v12560_v27 = vpack.c.bf16 %v8375_v12, %v8374_v63 }
 0x796   :  { %12555 = vmatpush3.bf16.msra.mxu0 %v12552_v0 }
 0x797   :  { %12557 = vmatprep.subr.bf16.mxu0 %v12556_v40 }
 0x79a   :  { %12559 = vmatpush3.bf16.msra.mxu0 %v12556_v40 }
 0x79b   :  { %12561 = vmatprep.subr.bf16.mxu0 %v12560_v27 }
 0x79e   :  { %12563 = vmatpush3.bf16.msra.mxu0 %v12560_v27 }
 0x7ad   :  { %v11976_v47 = vpop.f32.mrb[36].mxu0 }
 0x7ae   :  { %v11998_v32 = vpop.f32.mrb[36].mxu1  ;;  %v11977_v16 = vpop.f32.mrb[37].mxu0 }
 0x7af   :  { %v11978_v26 = vadd.f32 %v11977_v16, %v11976_v47  ;;  %v11999_v28 = vpop.f32.mrb[37].mxu1  ;;  %v11979_v29 = vpop.f32.mrb[38].mxu0  ;;  %v8379_v47 = vld [vmem:[#allocation12 + $0x58] sm:$0xff]  ;;  %v8380_v16 = vld [vmem:[#allocation12 + $0x60] sm:$0xff] }
 0x7b0   :  { %v12000_v15 = vadd.f32 %v11999_v28, %v11998_v32  ;;  %v12001_v49 = vpop.f32.mrb[38].mxu1  ;;  %v11980_v1 = vpop.f32.mrb[39].mxu0 }
 0x7b1   :  { %v8098_v46 = vadd.f32 %v11978_v26, %v8057_v58  ;;  %v11981_v25 = vadd.f32 %v11980_v1, %v11979_v29  ;;  %v12002_v53 = vpop.f32.mrb[39].mxu1  ;;  %v8377_v58 = vld [vmem:[#allocation12 + $0x48] sm:$0xff]  ;;  %v8382_v29 = vld [vmem:[#allocation12 + $0x70] sm:$0xff] }
 0x7b2   :  { %v12003_v48 = vadd.f32 %v12002_v53, %v12001_v49  ;;  %v12564_v36 = vpack.c.bf16 %v8377_v58, %v8376_v56  ;;  %v8381_v26 = vld [vmem:[#allocation12 + $0x68] sm:$0xff] }
 0x7b3   :  { %v8139_v33 = vadd.f32 %v12000_v15, %v8098_v46  ;;  %v8101_v17 = vadd.f32 %v11981_v25, %v8060_v57  ;;  %v8378_v57 = vld [vmem:[#allocation12 + $0x50] sm:$0xff]  ;;  %v12572_v28 = vpack.c.bf16 %v8381_v26, %v8380_v16  ;;  %v8383_v15 = vld [vmem:[#allocation12 + $0x78] sm:$0xff] }
 0x7b4   :  { %12565 = vmatprep.subr.bf16.mxu0 %v12564_v36  ;;  %v12568_v32 = vpack.c.bf16 %v8379_v47, %v8378_v57  ;;  %v12576_v49 = vpack.c.bf16 %v8383_v15, %v8382_v29 }
 0x7b5   :  { %v8142_v34 = vadd.f32 %v12003_v48, %v8101_v17  ;;  %12567 = vmatpush3.bf16.msra.mxu0 %v12564_v36 }
 0x7b6   :  { %12569 = vmatprep.subr.bf16.mxu0 %v12568_v32 }
 0x7b9   :  { %12571 = vmatpush3.bf16.msra.mxu0 %v12568_v32 }
 0x7ba   :  { %12573 = vmatprep.subr.bf16.mxu0 %v12572_v28 }
 0x7bd   :  { %12575 = vmatpush3.bf16.msra.mxu0 %v12572_v28 }
 0x7be   :  { %12577 = vmatprep.subr.bf16.mxu0 %v12576_v49 }
 0x7c1   :  { %12579 = vmatpush3.bf16.msra.mxu0 %v12576_v49 }
 0x7cd   :  { %v12020_v13 = vpop.f32.mrb[40].mxu0 }
 0x7ce   :  { %v12042_v42 = vpop.f32.mrb[40].mxu1  ;;  %v12021_v39 = vpop.f32.mrb[41].mxu0 }
 0x7cf   :  { %v12022_v37 = vadd.f32 %v12021_v39, %v12020_v13  ;;  %v12043_v31 = vpop.f32.mrb[41].mxu1  ;;  %v12023_v11 = vpop.f32.mrb[42].mxu0 }
 0x7d0   :  { %v12044_v52 = vadd.f32 %v12043_v31, %v12042_v42  ;;  %v12045_v30 = vpop.f32.mrb[42].mxu1  ;;  %v12024_v41 = vpop.f32.mrb[43].mxu0 }
 0x7d1   :  { %v8180_v44 = vadd.f32 %v12022_v37, %v8139_v33  ;;  %v12025_v54 = vadd.f32 %v12024_v41, %v12023_v11  ;;  %v12046_v60 = vpop.f32.mrb[43].mxu1 }
 0x7d2   :  { %v12047_v62 = vadd.f32 %v12046_v60, %v12045_v30 }
 0x7d3   :  { %v8221_v6 = vadd.f32 %v12044_v52, %v8180_v44  ;;  %v8183_v43 = vadd.f32 %v12025_v54, %v8142_v34 }
 0x7d5   :  { %v8224_v2 = vadd.f32 %v12047_v62, %v8183_v43 }
 0x845   :  { %v12064_v1 = vpop.f32.mrb[44].mxu0  ;;  %v12086_v46 = vpop.f32.mrb[44].mxu1 }
 0x846   :  { %v12065_v25 = vpop.f32.mrb[45].mxu0  ;;  %v12087_v48 = vpop.f32.mrb[45].mxu1 }
 0x847   :  { %v12066_v53 = vadd.f32 %v12065_v25, %v12064_v1  ;;  %v12067_v33 = vpop.f32.mrb[46].mxu0  ;;  %v12088_v17 = vadd.f32 %v12087_v48, %v12086_v46  ;;  %v12089_v34 = vpop.f32.mrb[46].mxu1 }
 0x848   :  { %v12068_v13 = vpop.f32.mrb[47].mxu0  ;;  %v12090_v37 = vpop.f32.mrb[47].mxu1 }
 0x849   :  { %v8262_v42 = vadd.f32 %v12066_v53, %v8221_v6  ;;  %v12069_v39 = vadd.f32 %v12068_v13, %v12067_v33  ;;  %v12091_v31 = vadd.f32 %v12090_v37, %v12089_v34  ;;  %v11752_v53 = vld [vmem:[#allocation9] ss:$0 sm:$0xff] }
 0x84b   :  { %v8303_v11 = vadd.f32 %v12088_v17, %v8262_v42  ;;  %v8265_v52 = vadd.f32 %v12069_v39, %v8224_v2  ;;  %v11753_v17 = vld [vmem:[#allocation10] ss:$0 sm:$0xff] }
 0x84d   :  { %v8311_v30 = vrot.slane %v8303_v11, 4  ;;  %v8306_v41 = vadd.f32 %v12091_v31, %v8265_v52  ;;  %v16901_v52 = vld [vmem:[#allocation13] sm:$0xff] }
 0x84f   :  { %v8312_v44 = vadd.f32 %v8311_v30, %v8303_v11  ;;  %v8317_v54 = vrot.slane %v8306_v41, 4  ;;  %v16903_v30 = vld [vmem:[#allocation13 + $0x8] sm:$0xff] }
 0x851   :  { %v8313_v60 = vrot.slane %v8312_v44, 2  ;;  %v8318_v62 = vadd.f32 %v8317_v54, %v8306_v41  ;;  %v16913_v54 = vld [vmem:[#allocation13 + $0x18] sm:$0xff] }
 0x853   :  { %v8314_v43 = vadd.f32 %v8313_v60, %v8312_v44  ;;  %v8319_v51 = vrot.slane %v8318_v62, 2  ;;  %v16911_v44 = vld [vmem:[#allocation13 + $0x10] sm:$0xff] }
 0x854   :  { %v16917_v60 = vpack.c.bf16 %v16913_v54, %v16911_v44 }
 0x855   :  { %v8315_v38 = vrot.slane %v8314_v43, 1  ;;  %v8320_v10 = vadd.f32 %v8319_v51, %v8318_v62  ;;  %v16921_v62 = vld [vmem:[#allocation13 + $0x20] sm:$0xff] }
 0x857   :  { %v8316_v7 = vadd.f32 %v8315_v38, %v8314_v43  ;;  %v8321_v4 = vrot.slane %v8320_v10, 1  ;;  %v16923_v43 = vld [vmem:[#allocation13 + $0x28] sm:$0xff]  ;;  %v16931_v38 = vld [vmem:[#allocation13 + $0x30] sm:$0xff] }
 0x858   :  { %v16927_v51 = vpack.c.bf16 %v16923_v43, %v16921_v62 }
 0x859   :  { %v8324_v0 = vmul.f32 0.125, %v8316_v7  ;;  %v8322_v18 = vadd.f32 %v8321_v4, %v8320_v10  ;;  %v16933_v10 = vld [vmem:[#allocation13 + $0x38] sm:$0xff]  ;;  %v16941_v4 = vld [vmem:[#allocation13 + $0x40] sm:$0xff] }
 0x85a   :  { %v16937_v7 = vpack.c.bf16 %v16933_v10, %v16931_v38 }
 0x85b   :  { %v8326_v6 = vsub.f32 %v8303_v11, %v8324_v0  ;;  %v8325_v55 = vmul.f32 0.125, %v8322_v18  ;;  %v16943_v0 = vld [vmem:[#allocation13 + $0x48] sm:$0xff] }
 0x85c   :  { %v16947_v18 = vpack.c.bf16 %v16943_v0, %v16941_v4 }
 0x85d   :  { %v8328_v40 = vmul.f32 %v8326_v6, %v8326_v6  ;;  %v8327_v63 = vsub.f32 %v8306_v41, %v8325_v55  ;;  %v16907_v41 = vpack.c.bf16 %v16903_v30, %v16901_v52  ;;  %v16953_v55 = vld [vmem:[#allocation13 + $0x58] sm:$0xff] }
 0x85f   :  { %v8330_v12 = vrot.slane %v8328_v40, 4  ;;  %v8329_v2 = vmul.f32 %v8327_v63, %v8327_v63  ;;  %12581 = vmatprep.subr.bf16.mxu1 %v16907_v41 }
 0x860   :  { %12583 = vmatpush3.bf16.msra.mxu1 %v16907_v41 }
 0x861   :  { %v8331_v27 = vadd.f32 %v8330_v12, %v8328_v40  ;;  %v8336_v56 = vrot.slane %v8329_v2, 4  ;;  %12585 = vmatprep.subr.bf16.mxu1 %v16917_v60  ;;  %v16963_v12 = vld [vmem:[#allocation13 + $0x68] sm:$0xff] }
 0x863   :  { %v8332_v58 = vrot.slane %v8331_v27, 2  ;;  %v8337_v36 = vadd.f32 %v8336_v56, %v8329_v2  ;;  %v16973_v56 = vld [vmem:[#allocation13 + $0x78] sm:$0xff] }
 0x864   :  { %12587 = vmatpush3.bf16.msra.mxu1 %v16917_v60 }
 0x865   :  { %v8333_v57 = vadd.f32 %v8332_v58, %v8331_v27  ;;  %v8338_v47 = vrot.slane %v8337_v36, 2  ;;  %12589 = vmatprep.subr.bf16.mxu1 %v16927_v51  ;;  %v16971_v27 = vld [vmem:[#allocation13 + $0x70] sm:$0xff] }
 0x866   :  { %v16977_v58 = vpack.c.bf16 %v16973_v56, %v16971_v27 }
 0x867   :  { %v8334_v32 = vrot.slane %v8333_v57, 1  ;;  %v8339_v16 = vadd.f32 %v8338_v47, %v8337_v36 }
 0x868   :  { %12591 = vmatpush3.bf16.msra.mxu1 %v16927_v51 }
 0x869   :  { %v8335_v26 = vadd.f32 %v8334_v32, %v8333_v57  ;;  %v8340_v28 = vrot.slane %v8339_v16, 1  ;;  %12593 = vmatprep.subr.bf16.mxu1 %v16937_v7 }
 0x86b   :  { %v8342_v29 = vmul.f32 0.125, %v8335_v26  ;;  %v8341_v15 = vadd.f32 %v8340_v28, %v8339_v16 }
 0x86c   :  { %12595 = vmatpush3.bf16.msra.mxu1 %v16937_v7 }
 0x86d   :  { %v8344_v49 = vadd.f32 1e-05, %v8342_v29  ;;  %v8343_v1 = vmul.f32 0.125, %v8341_v15  ;;  %12597 = vmatprep.subr.bf16.mxu1 %v16947_v18 }
 0x86f   :  { %13069 = vrsqrt.f32 %v8344_v49  ;;  %v8345_v46 = vadd.f32 1e-05, %v8343_v1 }
 0x870   :  { %12599 = vmatpush3.bf16.msra.mxu1 %v16947_v18 }
 0x871   :  { %13071 = vrsqrt.f32 %v8345_v46 }
 0x879   :  { %v13070_v25 = vpop.eup %13069 }
 0x87a   :  { %v8348_v48 = vmul.f32 %v13070_v25, %v8326_v6  ;;  %v16951_v6 = vld [vmem:[#allocation13 + $0x50] sm:$0xff] }
 0x87b   :  { %v13072_v33 = vpop.eup %13071  ;;  %v16957_v40 = vpack.c.bf16 %v16953_v55, %v16951_v6 }
 0x87c   :  { %v8349_v34 = vmul.f32 %v13072_v33, %v8327_v63  ;;  %v8356_v13 = vmul.f32 %v11752_v53, %v8348_v48  ;;  %v16961_v63 = vld [vmem:[#allocation13 + $0x60] sm:$0xff] }
 0x87d   :  { %12601 = vmatprep.subr.bf16.mxu1 %v16957_v40  ;;  %v16967_v2 = vpack.c.bf16 %v16963_v12, %v16961_v63 }
 0x87e   :  { %v8357_v42 = vmul.f32 %v11752_v53, %v8349_v34  ;;  %v8364_v39 = vadd.f32 %v11753_v17, %v8356_v13  ;;  %12603 = vmatpush3.bf16.msra.mxu1 %v16957_v40 }
 0x87f   :  { %12605 = vmatprep.subr.bf16.mxu1 %v16967_v2 }
 0x880   :  { %v8365_v37 = vadd.f32 %v11753_v17, %v8357_v42  ;;  %v8366_v31 = vmax.f32 %v8364_v39, 0.0 }
 0x882   :  { %v8367_v11 = vmax.f32 %v8365_v37, 0.0  ;;  %12402 = vmatprep.mubr.f32.mxu0 %v8366_v31  ;;  %12607 = vmatpush3.bf16.msra.mxu1 %v16967_v2 }
 0x883   :  { %12609 = vmatprep.subr.bf16.mxu1 %v16977_v58 }
 0x884   :  { %12403 = vmatmul.mubr.f32.vlgmr.msra.gmra.mrb[48].mxu0 %v8367_v11 }
 0x886   :  { %12611 = vmatpush3.bf16.msra.mxu1 %v16977_v58 }
 0x957   :  { %v12404_v36 = vpop.f32.mrb[48].mxu0 }
 0x958   :  { %v8465_v57 = vrot.slane %v12404_v36, 4  ;;  %v8450_v47 = vpop.f32.mrb[49].mxu0 }
 0x959   :  { %v8459_v32 = vrot.slane %v8450_v47, 4 }
 0x95a   :  { %v8466_v16 = vadd.f32 %v12404_v36, %v8465_v57 }
 0x95b   :  { %v8460_v26 = vadd.f32 %v8459_v32, %v8450_v47 }
 0x95c   :  { %v8467_v28 = vrot.slane %v8466_v16, 2 }
 0x95d   :  { %v8461_v29 = vrot.slane %v8460_v26, 2 }
 0x95e   :  { %v8468_v15 = vadd.f32 %v8467_v28, %v8466_v16 }
 0x95f   :  { %v8462_v49 = vadd.f32 %v8461_v29, %v8460_v26 }
 0x960   :  { %v8469_v1 = vrot.slane %v8468_v15, 1 }
 0x961   :  { %v8463_v46 = vrot.slane %v8462_v49, 1 }
 0x962   :  { %v8470_v25 = vadd.f32 %v8469_v1, %v8468_v15 }
 0x963   :  { %v8464_v53 = vadd.f32 %v8463_v46, %v8462_v49 }
 0x964   :  { %v8472_v48 = vmul.f32 0.125, %v8470_v25 }
 0x965   :  { %v8471_v33 = vmul.f32 0.125, %v8464_v53 }
 0x966   :  { %v8474_v17 = vsub.f32 %v12404_v36, %v8472_v48  ;;  %v11754_v48 = vld [vmem:[#allocation15] ss:$0 sm:$0xff] }
 0x967   :  { %v8473_v34 = vsub.f32 %v8450_v47, %v8471_v33 }
 0x968   :  { %v8476_v13 = vmul.f32 %v8474_v17, %v8474_v17 }
 0x969   :  { %v8475_v42 = vmul.f32 %v8473_v34, %v8473_v34 }
 0x96a   :  { %v8483_v39 = vrot.slane %v8476_v13, 4 }
 0x96b   :  { %v8477_v37 = vrot.slane %v8475_v42, 4 }
 0x96c   :  { %v8484_v31 = vadd.f32 %v8483_v39, %v8476_v13 }
 0x96d   :  { %v8478_v11 = vadd.f32 %v8477_v37, %v8475_v42 }
 0x96e   :  { %v8485_v57 = vrot.slane %v8484_v31, 2 }
 0x96f   :  { %v8479_v32 = vrot.slane %v8478_v11, 2 }
 0x970   :  { %v8486_v19 = vadd.f32 %v8485_v57, %v8484_v31 }
 0x971   :  { %v8480_v21 = vadd.f32 %v8479_v32, %v8478_v11 }
 0x972   :  { %v8487_v16 = vrot.slane %v8486_v19, 1 }
 0x973   :  { %v8481_v26 = vrot.slane %v8480_v21, 1 }
 0x974   :  { %v8488_v28 = vadd.f32 %v8487_v16, %v8486_v19 }
 0x975   :  { %v8482_v29 = vadd.f32 %v8481_v26, %v8480_v21  ;;  %v12955_v21 = vld [vmem:[%s17580_s9 + $0x40] sm:$0xff]  }
 0x976   :  { %v8490_v15 = vmul.f32 0.125, %v8488_v28 }
 0x977   :  { %v8489_v49 = vmul.f32 0.125, %v8482_v29 }
 0x978   :  { %v8492_v1 = vadd.f32 1e-05, %v8490_v15  ;;  %v12941_v15 = vld [vmem:[%s17580_s9 + $0x140] sm:$0xff]  }
 0x979   :  { %v8491_v46 = vadd.f32 1e-05, %v8489_v49 }
 0x97a   :  { %13073 = vrsqrt.f32 %v8492_v1  ;;  %v12943_v1 = vld [vmem:[%s17580_s9 + $0x148] sm:$0xff]  }
 0x97b   :  { %13075 = vrsqrt.f32 %v8491_v46  ;;  %v12957_v46 = vld [vmem:[%s17580_s9] sm:$0xff]  }
 0x984   :  { %v13074_v36 = vpop.eup %13073 }
 0x985   :  { %v13076_v47 = vpop.eup %13075  ;;  %v16981_v53 = vmul.f32 %v13074_v36, %v8474_v17 }
 0x986   :  { %v8495_v25 = vmul.f32 %v13076_v47, %v8473_v34  ;;  %v12945_v47 = vld [vmem:[%s17580_s9 + $0x150] sm:$0xff]  }
 0x988   :  { %12437 = vmatprep.mubr.f32.mxu1 %v8495_v25 }
 0x989   :  { %12438 = vmatmul.mubr.f32.vlgmr.msra.gmra.mrb[48].mxu1 %v16981_v53 }
 0xa5c   :  { %v12439_v33 = vpop.f32.mrb[48].mxu1 }
 0xa5d   :  { %v8592_v13 = vadd.f32 %v12439_v33, %v11754_v48  ;;  %v8586_v42 = vpop.f32.mrb[49].mxu1  ;;  %v12947_v33 = vld [vmem:[%s17580_s9 + $0x158] sm:$0xff]  }
 0xa5e   :  { %v16984_v19 = vadd.f32 %v11754_v48, %v8586_v42  ;;  %v12946_v48 = vld [vmem:[%s17580_s9 + $0x110] sm:$0xff]   ;;  %v12948_v42 = vld [vmem:[%s17580_s9 + $0x118] sm:$0xff]  }
 0xa5f   :  { %12466 = vmatprep.subr.mxu1 %v8592_v13  ;;  %v8609_v32 = vsub.f32 %v8592_v13, %v8495_v25  ;;  %v12961_v25 = vld [vmem:[%s17580_s9 + $0x8] sm:$0xff]  }
 0xa60   :  { %12467 = vmatpush3.msra.mxu1 %v8592_v13  ;;  %8626 = vxpose.xlu0.b32.start.end [1/1] (short) %v16984_v19, 128 }
 0xa61   :  { %12440 = vmatprep.subr.mxu0 %v16984_v19  ;;  %12194 = vmatprep.subr.bf16.mxu1 %v12955_v21  ;;  %v8610_v26 = vmul.f32 %v8609_v32, %v8609_v32  ;;  %v12949_v21 = vld [vmem:[%s17580_s9 + $0x160] sm:$0xff]   ;;  %v12981_v32 = vld [vmem:[%s17580_s9 + $0x30] sm:$0xff]  }
 0xa62   :  { %12441 = vmatpush3.msra.mxu0 %v16984_v19 }
 0xa63   :  { %12613 = vmatprep.subr.bf16.mxu0 %v16907_v41 }
 0xa9d   :  { %8852 = vxpose.xlu0.b32.start.end [1/1] (short) %v8592_v13, 128  ;;  %v12965_v13 = vld [vmem:[%s17580_s9 + $0x10] sm:$0xff]  }
 0xae0   :  { %v8642_v17 = vpop.trf.xlu0 }
 0xae1   :  { %12442 = vmatprep.mubr.msk.f32.mxu0 %vm8658_vm0, %v8642_v17  ;;  %v12969_v17 = vld [vmem:[%s17580_s9 + $0x18] sm:$0xff]  }
 0xae4   :  { %v8643_v34 = vpop.trf.xlu0 }
 0xae5   :  { %12443 = vmatmul.mubr.msk.f32.vlgmr.msra.gmra.mrb[50].mxu0 %vm8658_vm0, %v8643_v34  ;;  %v12950_v34 = vld [vmem:[%s17580_s9 + $0x120] sm:$0xff]  }
 0xae6   :  { %12615 = vmatpush3.bf16.xpose.msra.mxu0 %v16907_v41 }
 0xae7   :  { %12617 = vmatprep.subr.bf16.mxu0 %v16917_v60 }
 0xae8   :  { %v8644_v39 = vpop.trf.xlu0 }
 0xae9   :  { %12445 = vmatprep.mubr.msk.f32.mxu0 %vm8658_vm0, %v8644_v39  ;;  %v12951_v39 = vld [vmem:[%s17580_s9 + $0x168] sm:$0xff]  }
 0xaec   :  { %v8645_v37 = vpop.trf.xlu0 }
 0xaed   :  { %12446 = vmatmul.mubr.msk.f32.gmra.mrb[52].mxu0 %vm8658_vm0, %v8645_v37  ;;  %v12973_v37 = vld [vmem:[%s17580_s9 + $0x20] sm:$0xff]  }
 0xaee   :  { %12619 = vmatpush3.bf16.xpose.msra.mxu0 %v16917_v60 }
 0xaef   :  { %12621 = vmatprep.subr.bf16.mxu0 %v16927_v51 }
 0xaf0   :  { %v8646_v31 = vpop.trf.xlu0 }
 0xaf1   :  { %12448 = vmatprep.mubr.msk.f32.mxu0 %vm8658_vm0, %v8646_v31  ;;  %v12952_v31 = vld [vmem:[%s17580_s9 + $0x128] sm:$0xff]  }
 0xaf4   :  { %v8647_v11 = vpop.trf.xlu0 }
 0xaf5   :  { %12449 = vmatmul.mubr.msk.f32.gmra.mrb[54].mxu0 %vm8658_vm0, %v8647_v11  ;;  %v12953_v11 = vld [vmem:[%s17580_s9 + $0x170] sm:$0xff]  }
 0xaf6   :  { %12623 = vmatpush3.bf16.xpose.msra.mxu0 %v16927_v51 }
 0xaf7   :  { %12625 = vmatprep.subr.bf16.mxu0 %v16937_v7 }
 0xaf8   :  { %v8648_v41 = vpop.trf.xlu0 }
 0xaf9   :  { %12451 = vmatprep.mubr.msk.f32.mxu0 %vm8658_vm0, %v8648_v41  ;;  %v12977_v41 = vld [vmem:[%s17580_s9 + $0x28] sm:$0xff]  }
 0xafc   :  { %v8649_v57 = vpop.trf.xlu0 }
 0xafd   :  { %12452 = vmatmul.mubr.msk.f32.gmra.mrb[56].mxu0 %vm8658_vm0, %v8649_v57  ;;  %v12954_v57 = vld [vmem:[%s17580_s9 + $0x130] sm:$0xff]  }
 0xafe   :  { %12627 = vmatpush3.bf16.xpose.msra.mxu0 %v16937_v7 }
 0xaff   :  { %12629 = vmatprep.subr.bf16.mxu0 %v16947_v18 }
 0xb00   :  { %v8650_v60 = vpop.trf.xlu0 }
 0xb01   :  { %12454 = vmatprep.mubr.msk.f32.mxu0 %vm8658_vm0, %v8650_v60  ;;  %v12956_v60 = vld [vmem:[%s17580_s9 + $0x178] sm:$0xff]  }
 0xb04   :  { %v8651_v16 = vpop.trf.xlu0 }
 0xb05   :  { %12455 = vmatmul.mubr.msk.f32.gmra.mrb[58].mxu0 %vm8658_vm0, %v8651_v16  ;;  %v12958_v16 = vld [vmem:[%s17580_s9 + $0x138] sm:$0xff]  }
 0xb06   :  { %12631 = vmatpush3.bf16.xpose.msra.mxu0 %v16947_v18  ;;  %8611 = vadd.xlane.f32.xlu0 %v8610_v26  ;;  %v12960_v26 = vld [vmem:[%s17580_s9 + $0x240] sm:$0xff]  }
 0xb07   :  { %12633 = vmatprep.subr.bf16.mxu0 %v16957_v40 }
 0xb08   :  { %v8652_v51 = vpop.trf.xlu0 }
 0xb09   :  { %12457 = vmatprep.mubr.msk.f32.mxu0 %vm8658_vm0, %v8652_v51  ;;  %v12985_v51 = vld [vmem:[%s17580_s9 + $0x38] sm:$0xff]  }
 0xb0c   :  { %v8653_v28 = vpop.trf.xlu0 }
 0xb0d   :  { %12458 = vmatmul.mubr.msk.f32.gmra.mrb[60].mxu0 %vm8658_vm0, %v8653_v28 }
 0xb0e   :  { %12635 = vmatpush3.bf16.xpose.msra.mxu0 %v16957_v40 }
 0xb0f   :  { %12637 = vmatprep.subr.bf16.mxu0 %v16967_v2 }
 0xb10   :  { %v8654_v7 = vpop.trf.xlu0 }
 0xb11   :  { %12460 = vmatprep.mubr.msk.f32.mxu0 %vm8658_vm0, %v8654_v7  ;;  %v12962_v7 = vld [vmem:[%s17580_s9 + $0x200] sm:$0xff]  }
 0xb14   :  { %v8655_v29 = vpop.trf.xlu0 }
 0xb15   :  { %12461 = vmatmul.mubr.msk.f32.gmra.mrb[62].mxu0 %vm8658_vm0, %v8655_v29  ;;  %v9384_v29 = vpack.c.bf16 %v19595_v35, %v19595_v35  ;;  %v12966_v35 = vld [vmem:[%s17580_s9 + $0x208] sm:$0xff]  }
 0xb16   :  { %12639 = vmatpush3.bf16.xpose.msra.mxu0 %v16967_v2  ;;  %v12942_v2 = vld [vmem:[%s17580_s9 + $0x100] sm:$0xff]  }
 0xb17   :  { %12641 = vmatprep.subr.bf16.mxu0 %v16977_v58 }
 0xb18   :  { %v8656_v18 = vpop.trf.xlu0 }
 0xb19   :  { %12463 = vmatprep.mubr.msk.f32.mxu0 %vm8658_vm0, %v8656_v18 }
 0xb1c   :  { %v8657_v40 = vpop.trf.xlu0 }
 0xb1d   :  { %12464 = vmatmul.mubr.msk.f32.gmra.mrb[64].mxu0 %vm8658_vm0, %v8657_v40 }
 0xb1e   :  { %12643 = vmatpush3.bf16.xpose.msra.mxu0 %v16977_v58  ;;  %12524 = vmatprep.mubr.f32.mxu0 %v16901_v52  ;;  %v12959_v52 = vld [vmem:[%s17580_s9 + $0x48] sm:$0xff]  }
 0xb1f   :  { %12238 = vmatprep.subr.bf16.mxu0 %v12941_v15  ;;  %v12944_v58 = vld [vmem:[%s17580_s9 + $0x108] sm:$0xff]   ;;  %v12968_v15 = vld [vmem:[%s17580_s9 + $0x250] sm:$0xff]  }
 0xb20   :  { %v8868_v49 = vpop.trf.xlu0 }
 0xb21   :  { %12468 = vmatprep.mubr.msk.f32.mxu1 %vm8658_vm0, %v8868_v49  ;;  %v12972_v49 = vld [vmem:[%s17580_s9 + $0x258] sm:$0xff]  }
 0xb24   :  { %v8869_v36 = vpop.trf.xlu0 }
 0xb25   :  { %12525 = vmatmul.mubr.f32.vlgmr.msra.gmra.mrb[66].mxu0 %v16903_v30  ;;  %12469 = vmatmul.mubr.msk.f32.vlgmr.msra.gmra.mrb[50].mxu1 %vm8658_vm0, %v8869_v36 }
 0xb26   :  { %12239 = vmatpush3.bf16.msra.mxu0 %v12942_v2  ;;  %12527 = vmatprep.mubr.f32.mxu0 %v16911_v44  ;;  %v12963_v44 = vld [vmem:[%s17580_s9 + $0x50] sm:$0xff]  }
 0xb27   :  { %12240 = vmatprep.subr.bf16.mxu0 %v12943_v1  ;;  %12195 = vmatpush3.bf16.msra.mxu1 %v12957_v46  ;;  %v12974_v1 = vld [vmem:[%s17580_s9 + $0x218] sm:$0xff]   ;;  %v12976_v46 = vld [vmem:[%s17580_s9 + $0x260] sm:$0xff]  }
 0xb28   :  { %v8870_v30 = vpop.trf.xlu0  ;;  %12196 = vmatprep.subr.bf16.mxu1 %v12959_v52  ;;  %v12978_v52 = vld [vmem:[%s17580_s9 + $0x220] sm:$0xff]  }
 0xb29   :  { %12528 = vmatmul.mubr.f32.gmra.mrb[68].mxu0 %v16913_v54  ;;  %12471 = vmatprep.mubr.msk.f32.mxu1 %vm8658_vm0, %v8870_v30  ;;  %v12984_v30 = vld [vmem:[%s17580_s9 + $0x270] sm:$0xff]  }
 0xb2a   :  { %12241 = vmatpush3.bf16.msra.mxu0 %v12944_v58  ;;  %12530 = vmatprep.mubr.f32.mxu0 %v16921_v62  ;;  %v12967_v62 = vld [vmem:[%s17580_s9 + $0x58] sm:$0xff]   ;;  %v12980_v58 = vld [vmem:[%s17580_s9 + $0x268] sm:$0xff]  }
 0xb2b   :  { %12242 = vmatprep.subr.bf16.mxu0 %v12945_v47  ;;  %12197 = vmatpush3.bf16.msra.mxu1 %v12961_v25  ;;  %v12982_v25 = vld [vmem:[%s17580_s9 + $0x228] sm:$0xff]  }
 0xb2c   :  { %v8871_v54 = vpop.trf.xlu0  ;;  %12198 = vmatprep.subr.bf16.mxu1 %v12963_v44 }
 0xb2d   :  { %12531 = vmatmul.mubr.f32.gmra.mrb[70].mxu0 %v16923_v43  ;;  %12472 = vmatmul.mubr.msk.f32.gmra.mrb[52].mxu1 %vm8658_vm0, %v8871_v54 }
 0xb2e   :  { %12243 = vmatpush3.bf16.msra.mxu0 %v12946_v48  ;;  %12533 = vmatprep.mubr.f32.mxu0 %v16931_v38  ;;  %v12971_v38 = vld [vmem:[%s17580_s9 + $0x60] sm:$0xff]   ;;  %v12986_v48 = vld [vmem:[%s17580_s9 + $0x230] sm:$0xff]  }
 0xb2f   :  { %12244 = vmatprep.subr.bf16.mxu0 %v12947_v33  ;;  %12199 = vmatpush3.bf16.msra.mxu1 %v12965_v13  ;;  %v12988_v33 = vld [vmem:[%s17580_s9 + $0x278] sm:$0xff]   ;;  %v9381_v13 = vpack.c.bf16 %v19402_v22, %v19402_v22  ;;  %v12991_v22 = vld [vmem:[%s17580_s9 + $0xc8] sm:$0xff]  }
 0xb30   :  { %v8872_v43 = vpop.trf.xlu0  ;;  %12200 = vmatprep.subr.bf16.mxu1 %v12967_v62  ;;  %v12989_v62 = vld [vmem:[%s17580_s9 + $0x80] sm:$0xff]  }
 0xb31   :  { %12534 = vmatmul.mubr.f32.gmra.mrb[72].mxu0 %v16933_v10  ;;  %12474 = vmatprep.mubr.msk.f32.mxu1 %vm8658_vm0, %v8872_v43  ;;  %v9383_v43 = vpack.c.bf16 %v19404_v24, %v19404_v24  ;;  %v12995_v24 = vld [vmem:[%s17580_s9 + $0xd0] sm:$0xff]  }
 0xb32   :  { %12245 = vmatpush3.bf16.msra.mxu0 %v12948_v42  ;;  %12536 = vmatprep.mubr.f32.mxu0 %v16941_v4  ;;  %v12975_v4 = vld [vmem:[%s17580_s9 + $0x68] sm:$0xff]   ;;  %v12990_v42 = vld [vmem:[%s17580_s9 + $0x238] sm:$0xff]  }
 0xb33   :  { %12246 = vmatprep.subr.bf16.mxu0 %v12949_v21  ;;  %12201 = vmatpush3.bf16.msra.mxu1 %v12969_v17  ;;  %v9380_v21 = vpack.c.bf16 %v19400_v50, %v19400_v50  ;;  %v12992_v17 = vld [vmem:[%s17580_s9 + $0x340] sm:$0xff]  }
 0xb34   :  { %v8873_v10 = vpop.trf.xlu0  ;;  %12202 = vmatprep.subr.bf16.mxu1 %v12971_v38  ;;  %v12993_v38 = vld [vmem:[%s17580_s9 + $0x88] sm:$0xff]   ;;  %v12994_v50 = vld [vmem:[%s17580_s9 + $0x300] sm:$0xff]  }
 0xb35   :  { %12537 = vmatmul.mubr.f32.gmra.mrb[74].mxu0 %v16943_v0  ;;  %12475 = vmatmul.mubr.msk.f32.gmra.mrb[54].mxu1 %vm8658_vm0, %v8873_v10  ;;  %v12998_v10 = vld [vmem:[%s17580_s9 + $0x308] sm:$0xff]  }
 0xb36   :  { %12247 = vmatpush3.bf16.msra.mxu0 %v12950_v34  ;;  %12539 = vmatprep.mubr.f32.mxu0 %v16951_v6  ;;  %v12979_v6 = vld [vmem:[%s17580_s9 + $0x70] sm:$0xff]   ;;  %v9388_v34 = vpack.c.bf16 %v15974_v3, %v15974_v3 }
 0xb37   :  { %12248 = vmatprep.subr.bf16.mxu0 %v12951_v39  ;;  %12203 = vmatpush3.bf16.msra.mxu1 %v12973_v37  ;;  %v12996_v39 = vld [vmem:[%s17580_s9 + $0x348] sm:$0xff]   ;;  %v9393_v37 = vpack.c.bf16 %v16221_v20, %v16221_v20  ;;  %v12997_v3 = vld [vmem:[%s17580_s9 + $0x90] sm:$0xff]  }
 0xb38   :  { %v8874_v0 = vpop.trf.xlu0  ;;  %12204 = vmatprep.subr.bf16.mxu1 %v12975_v4  ;;  %v12999_v4 = vld [vmem:[%s17580_s9 + $0xd8] sm:$0xff]   ;;  %v13000_v20 = vld [vmem:[%s17580_s9 + $0x350] sm:$0xff]  }
 0xb39   :  { %12540 = vmatmul.mubr.f32.gmra.mrb[76].mxu0 %v16953_v55  ;;  %12477 = vmatprep.mubr.msk.f32.mxu1 %vm8658_vm0, %v8874_v0  ;;  %v13004_v0 = vld [vmem:[%s17580_s9 + $0x358] sm:$0xff]  }
 0xb3a   :  { %12249 = vmatpush3.bf16.msra.mxu0 %v12952_v31  ;;  %12542 = vmatprep.mubr.f32.mxu0 %v16961_v63  ;;  %v12983_v63 = vld [vmem:[%s17580_s9 + $0x78] sm:$0xff]  }
 0xb3b   :  { %12250 = vmatprep.subr.bf16.mxu0 %v12953_v11  ;;  %12205 = vmatpush3.bf16.msra.mxu1 %v12977_v41  ;;  %v13001_v31 = vld [vmem:[%s17580_s9 + $0x98] sm:$0xff]   ;;  %v13002_v11 = vld [vmem:[%s17580_s9 + $0x310] sm:$0xff]   ;;  %v13003_v41 = vld [vmem:[%s17580_s9 + $0xe0] sm:$0xff]  }
 0xb3c   :  { %v8875_v55 = vpop.trf.xlu0  ;;  %12206 = vmatprep.subr.bf16.mxu1 %v12979_v6  ;;  %v13005_v6 = vld [vmem:[%s17580_s9 + $0xa0] sm:$0xff]  }
 0xb3d   :  { %12543 = vmatmul.mubr.f32.gmra.mrb[78].mxu0 %v16963_v12  ;;  %12478 = vmatmul.mubr.msk.f32.gmra.mrb[56].mxu1 %vm8658_vm0, %v8875_v55  ;;  %v9385_v12 = vpack.c.bf16 %v19597_v23, %v19597_v23  ;;  %v12964_v23 = vld [vmem:[%s17580_s9 + $0x248] sm:$0xff]  }
 0xb3e   :  { %12251 = vmatpush3.bf16.msra.mxu0 %v12954_v57  ;;  %12545 = vmatprep.mubr.f32.mxu0 %v16971_v27  ;;  %v12987_v27 = vld [vmem:[%s17580_s9 + $0xc0] sm:$0xff]   ;;  %v13006_v57 = vld [vmem:[%s17580_s9 + $0x318] sm:$0xff]   ;;  %v13009_v55 = vld [vmem:[%s17580_s9 + $0xa8] sm:$0xff]  }
 0xb3f   :  { %12252 = vmatprep.subr.bf16.mxu0 %v12956_v60  ;;  %12207 = vmatpush3.bf16.msra.mxu1 %v12981_v32  ;;  %v13007_v60 = vld [vmem:[%s17580_s9 + $0xe8] sm:$0xff]   ;;  %v13008_v32 = vld [vmem:[%s17580_s9 + $0x360] sm:$0xff]  }
 0xb40   :  { %v8876_v28 = vpop.trf.xlu0  ;;  %12208 = vmatprep.subr.bf16.mxu1 %v12983_v63  ;;  %v13010_v63 = vld [vmem:[%s17580_s9 + $0x320] sm:$0xff]  }
 0xb41   :  { %12546 = vmatmul.mubr.f32.gmra.mrb[80].mxu0 %v16973_v56  ;;  %12480 = vmatprep.mubr.msk.f32.mxu1 %vm8658_vm0, %v8876_v28  ;;  %v9389_v56 = vpack.c.bf16 %v15979_v8, %v15979_v8  ;;  %v12970_v8 = vld [vmem:[%s17580_s9 + $0x210] sm:$0xff]   ;;  %v13015_v28 = vld [vmem:[%s17580_s9 + $0xf8] sm:$0xff]  }
 0xb42   :  { %12253 = vmatpush3.bf16.msra.mxu0 %v12958_v16  ;;  %10539 = vmatprep.mubr.bf16.mxu0 %v9385_v12  ;;  %v13011_v16 = vld [vmem:[%s17580_s9 + $0xf0] sm:$0xff]   ;;  %v13014_v12 = vld [vmem:[%s17580_s9 + $0x328] sm:$0xff]  }
 0xb43   :  { %12282 = vmatprep.subr.bf16.mxu0 %v12960_v26  ;;  %12209 = vmatpush3.bf16.msra.mxu1 %v12985_v51  ;;  %v13012_v26 = vld [vmem:[%s17580_s9 + $0x368] sm:$0xff]   ;;  %v13013_v51 = vld [vmem:[%s17580_s9 + $0xb0] sm:$0xff]  }
 0xb44   :  { %v8877_v18 = vpop.trf.xlu0  ;;  %12216 = vmatprep.subr.bf16.mxu1 %v12987_v27  ;;  %v13016_v27 = vld [vmem:[%s17580_s9 + $0x370] sm:$0xff]  }
 0xb45   :  { %10540 = vmatmul.mubr.bf16.vlgmr.msra.gmra.mrb[84].mxu0 %v9384_v29  ;;  %12481 = vmatmul.mubr.msk.f32.gmra.mrb[58].mxu1 %vm8658_vm0, %v8877_v18  ;;  %v13018_v29 = vld [vmem:[%s17580_s9 + $0x330] sm:$0xff]   ;;  %v13021_v18 = vld [vmem:[%s17580_s9 + $0x180] sm:$0xff]  }
 0xb46   :  { %12283 = vmatpush3.bf16.msra.mxu0 %v12962_v7  ;;  %10619 = vmatprep.mubr.bf16.mxu0 %v9389_v56  ;;  %v13017_v7 = vld [vmem:[%s17580_s9 + $0xb8] sm:$0xff]  }
 0xb47   :  { %12284 = vmatprep.subr.bf16.mxu0 %v12964_v23  ;;  %v13019_v23 = vld [vmem:[%s17580_s9 + $0x1c0] sm:$0xff]   ;;  %v13020_v56 = vld [vmem:[%s17580_s9 + $0x378] sm:$0xff]  }
 0xb48   :  { %v8878_v40 = vpop.trf.xlu0 }
 0xb49   :  { %12483 = vmatprep.mubr.msk.f32.mxu1 %vm8658_vm0, %v8878_v40  ;;  %v13023_v40 = vld [vmem:[%s17580_s9 + $0x1c8] sm:$0xff]  }
 0xb4a   :  { %12285 = vmatpush3.bf16.msra.mxu0 %v12966_v35  ;;  %v9382_v35 = vpack.c.bf16 %v19401_v61, %v19401_v61  ;;  %v13024_v61 = vld [vmem:[%s17580_s9 + $0x188] sm:$0xff]  }
 0xb4b   :  { %12286 = vmatprep.subr.bf16.mxu0 %v12968_v15  ;;  %v13022_v15 = vld [vmem:[%s17580_s9 + $0x338] sm:$0xff]  }
 0xb4c   :  { %v8879_v2 = vpop.trf.xlu0 }
 0xb4d   :  { %12484 = vmatmul.mubr.msk.f32.gmra.mrb[60].mxu1 %vm8658_vm0, %v8879_v2  ;;  %v9392_v2 = vpack.c.bf16 %v16216_v14, %v16216_v14  ;;  %v13029_v14 = vld [vmem:[%s17580_s9 + $0x1e0] sm:$0xff]  }
 0xb4e   :  { %12287 = vmatpush3.bf16.msra.mxu0 %v12970_v8  ;;  %v9387_v8 = vpack.c.bf16 %v19599_v59, %v19599_v59  ;;  %v13026_v59 = vld [vmem:[%s17580_s9 + $0x190] sm:$0xff]  }
 0xb4f   :  { %12288 = vmatprep.subr.bf16.mxu0 %v12972_v49  ;;  %v13025_v49 = vld [vmem:[%s17580_s9 + $0x1d0] sm:$0xff]  }
 0xb50   :  { %v8880_v36 = vpop.trf.xlu0 }
 0xb51   :  { %12486 = vmatprep.mubr.msk.f32.mxu1 %vm8658_vm0, %v8880_v36  ;;  %v13030_v36 = vld [vmem:[%s17580_s9 + $0x1a0] sm:$0xff]  }
 0xb52   :  { %12289 = vmatpush3.bf16.msra.mxu0 %v12974_v1  ;;  %v13027_v1 = vld [vmem:[%s17580_s9 + $0x1d8] sm:$0xff]  }
 0xb53   :  { %12290 = vmatprep.subr.bf16.mxu0 %v12976_v46  ;;  %v13028_v46 = vld [vmem:[%s17580_s9 + $0x198] sm:$0xff]  }
 0xb54   :  { %v8881_v47 = vpop.trf.xlu0 }
 0xb55   :  { %12487 = vmatmul.mubr.msk.f32.gmra.mrb[62].mxu1 %vm8658_vm0, %v8881_v47  ;;  %v13033_v47 = vld [vmem:[%s17580_s9 + $0x1f0] sm:$0xff]  }
 0xb56   :  { %12291 = vmatpush3.bf16.msra.mxu0 %v12978_v52  ;;  %v13031_v52 = vld [vmem:[%s17580_s9 + $0x1e8] sm:$0xff]  }
 0xb57   :  { %12292 = vmatprep.subr.bf16.mxu0 %v12980_v58  ;;  %v13032_v58 = vld [vmem:[%s17580_s9 + $0x1a8] sm:$0xff]  }
 0xb58   :  { %v8882_v44 = vpop.trf.xlu0 }
 0xb59   :  { %12489 = vmatprep.mubr.msk.f32.mxu1 %vm8658_vm0, %v8882_v44  ;;  %v13036_v44 = vld [vmem:[%s17580_s9 + $0x1b8] sm:$0xff]  }
 0xb5a   :  { %12293 = vmatpush3.bf16.msra.mxu0 %v12982_v25  ;;  %v13034_v25 = vld [vmem:[%s17580_s9 + $0x1b0] sm:$0xff]  }
 0xb5b   :  { %12294 = vmatprep.subr.bf16.mxu0 %v12984_v30  ;;  %v13035_v30 = vld [vmem:[%s17580_s9 + $0x1f8] sm:$0xff]  }
 0xb5c   :  { %v8883_v54 = vpop.trf.xlu0 }
 0xb5d   :  { %12490 = vmatmul.mubr.msk.f32.gmra.mrb[64].mxu1 %vm8658_vm0, %v8883_v54  ;;  %v13039_v54 = vld [vmem:[%s17580_s9 + $0x2c8] sm:$0xff]  }
 0xb5e   :  { %12295 = vmatpush3.bf16.msra.mxu0 %v12986_v48  ;;  %10459 = vmatprep.mubr.bf16.mxu1 %v9381_v13  ;;  %v13037_v48 = vld [vmem:[%s17580_s9 + $0x2c0] sm:$0xff]   ;;  %v9386_v13 = vpack.c.bf16 %v19596_v45, %v19596_v45  ;;  %v13041_v45 = vld [vmem:[%s17580_s9 + $0x2d0] sm:$0xff]  }
 0xb5f   :  { %12296 = vmatprep.subr.bf16.mxu0 %v12988_v33  ;;  %v13038_v33 = vld [vmem:[%s17580_s9 + $0x280] sm:$0xff]  }
 0xb61   :  { %10460 = vmatmul.mubr.bf16.vlgmr.msra.gmra.mrb[68].mxu1 %v9380_v21  ;;  %v13042_v21 = vld [vmem:[%s17580_s9 + $0x290] sm:$0xff]  }
 0xb62   :  { %12217 = vmatpush3.bf16.msra.mxu1 %v12989_v62  ;;  %12297 = vmatpush3.bf16.msra.mxu0 %v12990_v42  ;;  %v9391_v62 = vpack.c.bf16 %v15981_v9, %v15981_v9  ;;  %v13040_v42 = vld [vmem:[%s17580_s9 + $0x288] sm:$0xff]   ;;  %v13043_v9 = vld [vmem:[%s17580_s9 + $0x2d8] sm:$0xff]  }
 0xb63   :  { %10499 = vmatprep.mubr.bf16.mxu1 %v9383_v43  ;;  %12218 = vmatprep.subr.bf16.mxu1 %v12991_v22  ;;  %v13044_v22 = vld [vmem:[%s17580_s9 + $0x298] sm:$0xff]   ;;  %v13046_v43 = vld [vmem:[%s17580_s9 + $0x2a0] sm:$0xff]  }
 0xb64   :  { %12326 = vmatprep.subr.bf16.mxu0 %v12992_v17  ;;  %v13045_v17 = vld [vmem:[%s17580_s9 + $0x2e0] sm:$0xff]  }
 0xb65   :  { %10620 = vmatmul.mubr.bf16.vlgmr.msra.gmra.mrb[88].mxu0 %v9388_v34  ;;  %v13049_v34 = vld [vmem:[%s17580_s9 + $0x2f0] sm:$0xff]  }
 0xb66   :  { %12219 = vmatpush3.bf16.msra.mxu1 %v12993_v38  ;;  %12327 = vmatpush3.bf16.msra.mxu0 %v12994_v50  ;;  %v13047_v38 = vld [vmem:[%s17580_s9 + $0x2e8] sm:$0xff]  }
 0xb67   :  { %10699 = vmatprep.mubr.bf16.mxu0 %v9393_v37  ;;  %12220 = vmatprep.subr.bf16.mxu1 %v12995_v24  ;;  %v13048_v50 = vld [vmem:[%s17580_s9 + $0x2a8] sm:$0xff]   ;;  %v13050_v24 = vld [vmem:[%s17580_s9 + $0x2b0] sm:$0xff]  }
 0xb68   :  { %12328 = vmatprep.subr.bf16.mxu0 %v12996_v39  ;;  %v13051_v39 = vld [vmem:[%s17580_s9 + $0x2f8] sm:$0xff]  }
 0xb6a   :  { %12221 = vmatpush3.bf16.msra.mxu1 %v12997_v3  ;;  %12329 = vmatpush3.bf16.msra.mxu0 %v12998_v10  ;;  %v13052_v10 = vld [vmem:[%s17580_s9 + $0x2b8] sm:$0xff]  }
 0xb6b   :  { %12222 = vmatprep.subr.bf16.mxu1 %v12999_v4  ;;  %12330 = vmatprep.subr.bf16.mxu0 %v13000_v20  ;;  %v13053_v4 = vld [vmem:[%s17580_s9 + $0x3c0] sm:$0xff]  }
 0xb6c   :  { %v13054_v20 = vld [vmem:[%s17580_s9 + $0x380] sm:$0xff]  }
 0xb6e   :  { %12223 = vmatpush3.bf16.msra.mxu1 %v13001_v31  ;;  %12331 = vmatpush3.bf16.msra.mxu0 %v13002_v11  ;;  %v9390_v31 = vpack.c.bf16 %v15977_v5, %v15977_v5  ;;  %v13055_v11 = vld [vmem:[%s17580_s9 + $0x3c8] sm:$0xff]   ;;  %v13057_v5 = vld [vmem:[%s17580_s9 + $0x3d0] sm:$0xff]  }
 0xb6f   :  { %12224 = vmatprep.subr.bf16.mxu1 %v13003_v41  ;;  %12332 = vmatprep.subr.bf16.mxu0 %v13004_v0  ;;  %v19753_v41 = vld [vmem:[#allocation32_spill] sm:$0xff] }
 0xb70   :  { %v9395_v0 = vpack.c.bf16 %v19753_v41, %v19753_v41 }
 0xb72   :  { %12225 = vmatpush3.bf16.msra.mxu1 %v13005_v6  ;;  %12333 = vmatpush3.bf16.msra.mxu0 %v13006_v57 }
 0xb73   :  { %12226 = vmatprep.subr.bf16.mxu1 %v13007_v60  ;;  %12334 = vmatprep.subr.bf16.mxu0 %v13008_v32  ;;  %v13056_v60 = vld [vmem:[%s17580_s9 + $0x388] sm:$0xff]   ;;  %v13058_v32 = vld [vmem:[%s17580_s9 + $0x390] sm:$0xff]  }
 0xb76   :  { %12227 = vmatpush3.bf16.msra.mxu1 %v13009_v55  ;;  %12335 = vmatpush3.bf16.msra.mxu0 %v13010_v63  ;;  %v13059_v55 = vld [vmem:[%s17580_s9 + $0x3d8] sm:$0xff]  }
 0xb77   :  { %12228 = vmatprep.subr.bf16.mxu1 %v13011_v16  ;;  %12336 = vmatprep.subr.bf16.mxu0 %v13012_v26  ;;  %v13060_v26 = vld [vmem:[%s17580_s9 + $0x398] sm:$0xff]  }
 0xb7a   :  { %12229 = vmatpush3.bf16.msra.mxu1 %v13013_v51  ;;  %12337 = vmatpush3.bf16.msra.mxu0 %v13014_v12  ;;  %v13061_v51 = vld [vmem:[%s17580_s9 + $0x3e0] sm:$0xff]  }
 0xb7b   :  { %12230 = vmatprep.subr.bf16.mxu1 %v13015_v28  ;;  %12338 = vmatprep.subr.bf16.mxu0 %v13016_v27  ;;  %v13062_v12 = vld [vmem:[%s17580_s9 + $0x3a0] sm:$0xff]   ;;  %v13063_v28 = vld [vmem:[%s17580_s9 + $0x3e8] sm:$0xff]  }
 0xb7e   :  { %12231 = vmatpush3.bf16.msra.mxu1 %v13017_v7  ;;  %12339 = vmatpush3.bf16.msra.mxu0 %v13018_v29  ;;  %v13064_v29 = vld [vmem:[%s17580_s9 + $0x3a8] sm:$0xff]  }
 0xb7f   :  { %12260 = vmatprep.subr.bf16.mxu1 %v13019_v23  ;;  %12340 = vmatprep.subr.bf16.mxu0 %v13020_v56  ;;  %v13065_v23 = vld [vmem:[%s17580_s9 + $0x3f0] sm:$0xff]  }
 0xb80   :  { %v13066_v56 = vld [vmem:[%s17580_s9 + $0x3b0] sm:$0xff]  }
 0xb81   :  { %10500 = vmatmul.mubr.bf16.vlgmr.msra.gmra.mrb[72].mxu1 %v9382_v35 }
 0xb82   :  { %12261 = vmatpush3.bf16.msra.mxu1 %v13021_v18  ;;  %10579 = vmatprep.mubr.bf16.mxu1 %v9387_v8  ;;  %v13067_v18 = vld [vmem:[%s17580_s9 + $0x3f8] sm:$0xff]   ;;  %v19754_v8 = vld [vmem:[#allocation31_spill] sm:$0xff] }
 0xb83   :  { %12341 = vmatpush3.bf16.msra.mxu0 %v13022_v15  ;;  %12262 = vmatprep.subr.bf16.mxu1 %v13023_v40  ;;  %v13068_v40 = vld [vmem:[%s17580_s9 + $0x3b8] sm:$0xff]  }
 0xb86   :  { %10700 = vmatmul.mubr.bf16.vlgmr.msra.gmra.mrb[92].mxu0 %v9392_v2  ;;  %12263 = vmatpush3.bf16.msra.mxu1 %v13024_v61  ;;  %v9394_v61 = vpack.c.bf16 %v19754_v8, %v19754_v8 }
 0xb87   :  { %12264 = vmatprep.subr.bf16.mxu1 %v13025_v49 }
 0xb8a   :  { %12265 = vmatpush3.bf16.msra.mxu1 %v13026_v59 }
 0xb8b   :  { %12266 = vmatprep.subr.bf16.mxu1 %v13027_v1 }
 0xb8e   :  { %12267 = vmatpush3.bf16.msra.mxu1 %v13028_v46 }
 0xb8f   :  { %12268 = vmatprep.subr.bf16.mxu1 %v13029_v14 }
 0xb92   :  { %12269 = vmatpush3.bf16.msra.mxu1 %v13030_v36 }
 0xb93   :  { %12270 = vmatprep.subr.bf16.mxu1 %v13031_v52 }
 0xb96   :  { %12271 = vmatpush3.bf16.msra.mxu1 %v13032_v58 }
 0xb97   :  { %12272 = vmatprep.subr.bf16.mxu1 %v13033_v47 }
 0xb9a   :  { %12273 = vmatpush3.bf16.msra.mxu1 %v13034_v25 }
 0xb9b   :  { %12274 = vmatprep.subr.bf16.mxu1 %v13035_v30 }
 0xb9e   :  { %12275 = vmatpush3.bf16.msra.mxu1 %v13036_v44 }
 0xb9f   :  { %12304 = vmatprep.subr.bf16.mxu1 %v13037_v48 }
 0xba1   :  { %10580 = vmatmul.mubr.bf16.vlgmr.msra.gmra.mrb[76].mxu1 %v9386_v13 }
 0xba2   :  { %12305 = vmatpush3.bf16.msra.mxu1 %v13038_v33  ;;  %10659 = vmatprep.mubr.bf16.mxu1 %v9391_v62 }
 0xba3   :  { %12306 = vmatprep.subr.bf16.mxu1 %v13039_v54 }
 0xba6   :  { %12307 = vmatpush3.bf16.msra.mxu1 %v13040_v42 }
 0xba7   :  { %12308 = vmatprep.subr.bf16.mxu1 %v13041_v45 }
 0xbaa   :  { %12309 = vmatpush3.bf16.msra.mxu1 %v13042_v21 }
 0xbab   :  { %12310 = vmatprep.subr.bf16.mxu1 %v13043_v9 }
 0xbae   :  { %12311 = vmatpush3.bf16.msra.mxu1 %v13044_v22 }
 0xbaf   :  { %12312 = vmatprep.subr.bf16.mxu1 %v13045_v17 }
 0xbb2   :  { %12313 = vmatpush3.bf16.msra.mxu1 %v13046_v43 }
 0xbb3   :  { %12314 = vmatprep.subr.bf16.mxu1 %v13047_v38 }
 0xbb6   :  { %12315 = vmatpush3.bf16.msra.mxu1 %v13048_v50 }
 0xbb7   :  { %12316 = vmatprep.subr.bf16.mxu1 %v13049_v34 }
 0xbb8   :  { %v12444_v37 = vpop.f32.mrb[50].mxu0 }
 0xbb9   :  { %v8773_v3 = vpop.f32.mrb[51].mxu0  ;;  %v9078_v36 = vmul.f32 0.125, %v12444_v37 }
 0xbba   :  { %12317 = vmatpush3.bf16.msra.mxu1 %v13050_v24  ;;  %v9077_v52 = vmul.f32 0.125, %v8773_v3 }
 0xbbb   :  { %12318 = vmatprep.subr.bf16.mxu1 %v13051_v39 }
 0xbbe   :  { %12319 = vmatpush3.bf16.msra.mxu1 %v13052_v10 }
 0xbbf   :  { %12348 = vmatprep.subr.bf16.mxu1 %v13053_v4 }
 0xbc0   :  { %v12447_v6 = vpop.f32.mrb[52].mxu0 }
 0xbc1   :  { %10660 = vmatmul.mubr.bf16.vlgmr.msra.gmra.mrb[80].mxu1 %v9390_v31  ;;  %v8783_v57 = vpop.f32.mrb[53].mxu0  ;;  %v9080_v54 = vmul.f32 0.125, %v12447_v6 }
 0xbc2   :  { %12349 = vmatpush3.bf16.msra.mxu1 %v13054_v20  ;;  %10739 = vmatprep.mubr.bf16.mxu1 %v9395_v0  ;;  %v9079_v45 = vmul.f32 0.125, %v8783_v57 }
 0xbc3   :  { %12350 = vmatprep.subr.bf16.mxu1 %v13055_v11 }
 0xbc6   :  { %12351 = vmatpush3.bf16.msra.mxu1 %v13056_v60 }
 0xbc7   :  { %12352 = vmatprep.subr.bf16.mxu1 %v13057_v5 }
 0xbc8   :  { %v12450_v63 = vpop.f32.mrb[54].mxu0 }
 0xbc9   :  { %v8793_v16 = vpop.f32.mrb[55].mxu0  ;;  %v9082_v34 = vmul.f32 0.125, %v12450_v63 }
 0xbca   :  { %12353 = vmatpush3.bf16.msra.mxu1 %v13058_v32  ;;  %v9081_v24 = vmul.f32 0.125, %v8793_v16 }
 0xbcb   :  { %12354 = vmatprep.subr.bf16.mxu1 %v13059_v55 }
 0xbce   :  { %12355 = vmatpush3.bf16.msra.mxu1 %v13060_v26 }
 0xbcf   :  { %12356 = vmatprep.subr.bf16.mxu1 %v13061_v51 }
 0xbd0   :  { %v12453_v27 = vpop.f32.mrb[56].mxu0 }
 0xbd1   :  { %v8803_v7 = vpop.f32.mrb[57].mxu0  ;;  %v9084_v57 = vmul.f32 0.125, %v12453_v27 }
 0xbd2   :  { %12357 = vmatpush3.bf16.msra.mxu1 %v13062_v12  ;;  %v9083_v5 = vmul.f32 0.125, %v8803_v7 }
 0xbd3   :  { %12358 = vmatprep.subr.bf16.mxu1 %v13063_v28 }
 0xbd6   :  { %12359 = vmatpush3.bf16.msra.mxu1 %v13064_v29 }
 0xbd7   :  { %12360 = vmatprep.subr.bf16.mxu1 %v13065_v23 }
 0xbd8   :  { %v12456_v35 = vpop.f32.mrb[58].mxu0 }
 0xbd9   :  { %v8813_v15 = vpop.f32.mrb[59].mxu0  ;;  %v9086_v23 = vmul.f32 0.125, %v12456_v35 }
 0xbda   :  { %12361 = vmatpush3.bf16.msra.mxu1 %v13066_v56  ;;  %v9085_v56 = vmul.f32 0.125, %v8813_v15 }
 0xbdb   :  { %12362 = vmatprep.subr.bf16.mxu1 %v13067_v18 }
 0xbde   :  { %12363 = vmatpush3.bf16.msra.mxu1 %v13068_v40 }
 0xbe0   :  { %v17469_v49 = vpop.f32.mrb[60].mxu0 }
 0xbe1   :  { %10740 = vmatmul.mubr.bf16.vlgmr.msra.gmra.mrb[84].mxu1 %v9394_v61  ;;  %v17471_v2 = vpop.f32.mrb[61].mxu0 }
 0xbe8   :  { %v17473_v59 = vpop.f32.mrb[62].mxu0 }
 0xbe9   :  { %v17475_v1 = vpop.f32.mrb[63].mxu0 }
 0xbf0   :  { %v17477_v46 = vpop.f32.mrb[64].mxu0 }
 0xbf1   :  { %v17479_v14 = vpop.f32.mrb[65].mxu0 }
 0xbf8   :  { %v12526_v58 = vpop.f32.mrb[66].mxu0  ;;  %v12470_v47 = vpop.f32.mrb[50].mxu1 }
 0xbf9   :  { %v9271_v25 = vsub.f32 %v9078_v36, %v12526_v58  ;;  %v9094_v30 = vmul.f32 0.125, %v12470_v47  ;;  %v9191_v44 = vpop.f32.mrb[67].mxu0  ;;  %v8998_v48 = vpop.f32.mrb[51].mxu1 }
 0xbfa   :  { %v9270_v33 = vsub.f32 %v9077_v52, %v9191_v44  ;;  %v9093_v13 = vmul.f32 0.125, %v8998_v48 }
 0xbfb   :  { %v9303_v62 = vmul.f32 %v9271_v25, %v9271_v25  ;;  %v17481_v42 = vsub.f32 %v9094_v30, %v12526_v58 }
 0xbfc   :  { %v9302_v21 = vmul.f32 %v9270_v33, %v9270_v33  ;;  %v17483_v9 = vsub.f32 %v9093_v13, %v9191_v44  ;;  %v12529_v22 = vpop.f32.mrb[68].mxu0  ;;  %v9088_v44 = vmul.f32 0.125, %v17469_v49  ;;  %v9087_v33 = vmul.f32 0.125, %v17471_v2 }
 0xbfd   :  { %v9273_v17 = vsub.f32 %v9080_v54, %v12529_v22  ;;  %v9201_v43 = vpop.f32.mrb[69].mxu0 }
 0xbfe   :  { %v9334_v38 = vadd.f32 %v9303_v62, %v9302_v21  ;;  %v9272_v50 = vsub.f32 %v9079_v45, %v9201_v43 }
 0xbff   :  { %v9305_v11 = vmul.f32 %v9273_v17, %v9273_v17 }
 0xc00   :  { %v9304_v39 = vmul.f32 %v9272_v50, %v9272_v50  ;;  %v12532_v37 = vpop.f32.mrb[70].mxu0  ;;  %v12473_v3 = vpop.f32.mrb[52].mxu1 }
 0xc01   :  { %v9275_v10 = vsub.f32 %v9082_v34, %v12532_v37  ;;  %v9096_v4 = vmul.f32 0.125, %v12473_v3  ;;  %v9211_v20 = vpop.f32.mrb[71].mxu0  ;;  %v9008_v31 = vpop.f32.mrb[53].mxu1 }
 0xc02   :  { %v9335_v41 = vadd.f32 %v9334_v38, %v9304_v39  ;;  %v9274_v0 = vsub.f32 %v9081_v24, %v9211_v20  ;;  %v9095_v6 = vmul.f32 0.125, %v9008_v31  ;;  %v9089_v38 = vmul.f32 0.125, %v17475_v1 }
 0xc03   :  { %v17485_v60 = vsub.f32 %v9096_v4, %v12529_v22  ;;  %v9307_v12 = vmul.f32 %v9275_v10, %v9275_v10 }
 0xc04   :  { %v9306_v32 = vmul.f32 %v9274_v0, %v9274_v0  ;;  %v9336_v55 = vadd.f32 %v9335_v41, %v9305_v11  ;;  %v17487_v26 = vsub.f32 %v9095_v6, %v9201_v43  ;;  %v12535_v63 = vpop.f32.mrb[72].mxu0  ;;  %v9090_v43 = vmul.f32 0.125, %v17473_v59 }
 0xc05   :  { %v9277_v16 = vsub.f32 %v9084_v57, %v12535_v63  ;;  %v9221_v51 = vpop.f32.mrb[73].mxu0  ;;  %v9092_v11 = vmul.f32 0.125, %v17477_v46  ;;  %v9091_v59 = vmul.f32 0.125, %v17479_v14 }
 0xc06   :  { %v9337_v28 = vadd.f32 %v9336_v55, %v9306_v32  ;;  %v9276_v29 = vsub.f32 %v9083_v5, %v9221_v51 }
 0xc07   :  { %v9309_v58 = vmul.f32 %v9277_v16, %v9277_v16 }
 0xc08   :  { %v9308_v18 = vmul.f32 %v9276_v29, %v9276_v29  ;;  %v9338_v40 = vadd.f32 %v9337_v28, %v9307_v12  ;;  %v12538_v8 = vpop.f32.mrb[74].mxu0  ;;  %v12476_v61 = vpop.f32.mrb[54].mxu1 }
 0xc09   :  { %v9279_v27 = vsub.f32 %v9086_v23, %v12538_v8  ;;  %v9098_v36 = vmul.f32 0.125, %v12476_v61  ;;  %v9231_v52 = vpop.f32.mrb[75].mxu0  ;;  %v9018_v7 = vpop.f32.mrb[55].mxu1 }
 0xc0a   :  { %v9339_v47 = vadd.f32 %v9338_v40, %v9308_v18  ;;  %v9278_v25 = vsub.f32 %v9085_v56, %v9231_v52  ;;  %v9097_v30 = vmul.f32 0.125, %v9018_v7 }
 0xc0b   :  { %v17490_v48 = vsub.f32 %v9098_v36, %v12532_v37  ;;  %v9311_v21 = vmul.f32 %v9279_v27, %v9279_v27 }
 0xc0c   :  { %v9310_v35 = vmul.f32 %v9278_v25, %v9278_v25  ;;  %v9340_v15 = vadd.f32 %v9339_v47, %v9309_v58  ;;  %v9290_v13 = vsub.f32 %v9097_v30, %v9211_v20  ;;  %v12541_v54 = vpop.f32.mrb[76].mxu0  ;;  %v9318_v58 = vmul.f32 %v17483_v9, %v17483_v9 }
 0xc0d   :  { %v9281_v62 = vsub.f32 %v9088_v44, %v12541_v54  ;;  %v9241_v45 = vpop.f32.mrb[77].mxu0  ;;  %v9319_v30 = vmul.f32 %v17481_v42, %v17481_v42  ;;  %v9323_v42 = vmul.f32 %v17490_v48, %v17490_v48 }
 0xc0e   :  { %v9341_v22 = vadd.f32 %v9340_v15, %v9310_v35  ;;  %v9280_v17 = vsub.f32 %v9087_v33, %v9241_v45  ;;  %v9320_v33 = vmul.f32 %v17487_v26, %v17487_v26  ;;  %v9322_v9 = vmul.f32 %v9290_v13, %v9290_v13 }
 0xc0f   :  { %v9313_v10 = vmul.f32 %v9281_v62, %v9281_v62 }
 0xc10   :  { %v9312_v50 = vmul.f32 %v9280_v17, %v9280_v17  ;;  %v9342_v34 = vadd.f32 %v9341_v22, %v9311_v21  ;;  %v17495_v49 = vpop.f32.mrb[78].mxu0  ;;  %v12479_v24 = vpop.f32.mrb[56].mxu1 }
 0xc11   :  { %v9283_v2 = vsub.f32 %v9090_v43, %v17495_v49  ;;  %v9100_v39 = vmul.f32 0.125, %v12479_v24  ;;  %v9251_v37 = vpop.f32.mrb[79].mxu0  ;;  %v9028_v3 = vpop.f32.mrb[57].mxu1 }
 0xc12   :  { %v9343_v4 = vadd.f32 %v9342_v34, %v9312_v50  ;;  %v9282_v20 = vsub.f32 %v9089_v38, %v9251_v37  ;;  %v9099_v31 = vmul.f32 0.125, %v9028_v3 }
 0xc13   :  { %v9293_v41 = vsub.f32 %v9100_v39, %v12535_v63  ;;  %v9315_v55 = vmul.f32 %v9283_v2, %v9283_v2 }
 0xc14   :  { %v9314_v1 = vmul.f32 %v9282_v20, %v9282_v20  ;;  %v9344_v0 = vadd.f32 %v9343_v4, %v9313_v10  ;;  %v9292_v6 = vsub.f32 %v9099_v31, %v9221_v51  ;;  %v12547_v57 = vpop.f32.mrb[80].mxu0 }
 0xc15   :  { %v9285_v5 = vsub.f32 %v9092_v11, %v12547_v57  ;;  %v9261_v32 = vpop.f32.mrb[81].mxu0  ;;  %v9325_v3 = vmul.f32 %v9293_v41, %v9293_v41 }
 0xc16   :  { %v9345_v16 = vadd.f32 %v9344_v0, %v9314_v1  ;;  %v9284_v12 = vsub.f32 %v9091_v59, %v9261_v32  ;;  %v9324_v34 = vmul.f32 %v9292_v6, %v9292_v6 }
 0xc17   :  { %v9317_v46 = vmul.f32 %v9285_v5, %v9285_v5 }
 0xc18   :  { %v9316_v28 = vmul.f32 %v9284_v12, %v9284_v12  ;;  %v9346_v29 = vadd.f32 %v9345_v16, %v9315_v55  ;;  %v12254_v23 = vpop.f32.mrb[84].mxu0  ;;  %v12482_v56 = vpop.f32.mrb[58].mxu1 }
 0xc19   :  { %v9102_v18 = vmul.f32 0.125, %v12482_v56  ;;  %v12255_v40 = vpop.f32.mrb[85].mxu0  ;;  %v9038_v61 = vpop.f32.mrb[59].mxu1 }
 0xc1a   :  { %v9347_v63 = vadd.f32 %v9346_v29, %v9316_v28  ;;  %v17500_v27 = vadd.f32 %v12255_v40, %v12254_v23  ;;  %v9101_v14 = vmul.f32 0.125, %v9038_v61  ;;  %v12257_v36 = vpop.f32.mrb[86].mxu0 }
 0xc1b   :  { %v9295_v51 = vsub.f32 %v9102_v18, %v12538_v8  ;;  %v12258_v7 = vpop.f32.mrb[87].mxu0  ;;  %v9321_v8 = vmul.f32 %v17485_v60, %v17485_v60 }
 0xc1c   :  { %v9348_v47 = vadd.f32 %v9347_v63, %v9317_v46  ;;  %v9294_v25 = vsub.f32 %v9101_v14, %v9231_v52 }
 0xc1d   :  { %v9327_v13 = vmul.f32 %v9295_v51, %v9295_v51 }
 0xc1e   :  { %v9349_v44 = vadd.f32 %v9348_v47, %v9318_v58  ;;  %v9326_v20 = vmul.f32 %v9294_v25, %v9294_v25 }
 0xc20   :  { %v9350_v35 = vadd.f32 %v9349_v44, %v9319_v30  ;;  %v12485_v15 = vpop.f32.mrb[60].mxu1 }
 0xc21   :  { %v9104_v62 = vmul.f32 0.125, %v12485_v15  ;;  %v9048_v21 = vpop.f32.mrb[61].mxu1 }
 0xc22   :  { %v9351_v22 = vadd.f32 %v9350_v35, %v9320_v33  ;;  %v9103_v17 = vmul.f32 0.125, %v9048_v21 }
 0xc23   :  { %v9297_v43 = vsub.f32 %v9104_v62, %v12541_v54 }
 0xc24   :  { %v9352_v38 = vadd.f32 %v9351_v22, %v9321_v8  ;;  %v9296_v52 = vsub.f32 %v9103_v17, %v9241_v45 }
 0xc25   :  { %v9329_v6 = vmul.f32 %v9297_v43, %v9297_v43 }
 0xc26   :  { %v9353_v50 = vadd.f32 %v9352_v38, %v9322_v9  ;;  %v9328_v45 = vmul.f32 %v9296_v52, %v9296_v52 }
 0xc28   :  { %v9354_v24 = vadd.f32 %v9353_v50, %v9323_v42  ;;  %v12488_v26 = vpop.f32.mrb[62].mxu1 }
 0xc29   :  { %v9106_v2 = vmul.f32 0.125, %v12488_v26  ;;  %v9058_v39 = vpop.f32.mrb[63].mxu1 }
 0xc2a   :  { %v9355_v10 = vadd.f32 %v9354_v24, %v9324_v34  ;;  %v9105_v4 = vmul.f32 0.125, %v9058_v39 }
 0xc2b   :  { %v9299_v60 = vsub.f32 %v9106_v2, %v17495_v49 }
 0xc2c   :  { %v9356_v31 = vadd.f32 %v9355_v10, %v9325_v3  ;;  %v9298_v54 = vsub.f32 %v9105_v4, %v9251_v37 }
 0xc2d   :  { %v9331_v49 = vmul.f32 %v9299_v60, %v9299_v60 }
 0xc2e   :  { %v9357_v11 = vadd.f32 %v9356_v31, %v9326_v20  ;;  %v9330_v12 = vmul.f32 %v9298_v54, %v9298_v54 }
 0xc30   :  { %v9358_v59 = vadd.f32 %v9357_v11, %v9327_v13  ;;  %v12491_v1 = vpop.f32.mrb[64].mxu1 }
 0xc31   :  { %v9108_v48 = vmul.f32 0.125, %v12491_v1  ;;  %v9068_v0 = vpop.f32.mrb[65].mxu1 }
 0xc32   :  { %v9359_v5 = vadd.f32 %v9358_v59, %v9328_v45  ;;  %v9107_v55 = vmul.f32 0.125, %v9068_v0 }
 0xc33   :  { %v9301_v16 = vsub.f32 %v9108_v48, %v12547_v57  ;;  %v13338_v57 = vmov 0   ;;  %v10763_v48 = vld [vmem:[%s17582_s11] sm:$0xff] }
 0xc34   :  { %v9360_v41 = vadd.f32 %v9359_v5, %v9329_v6  ;;  %v9300_v28 = vsub.f32 %v9107_v55, %v9261_v32  ;;  %v12210_v29 = vpop.f32.mrb[68].mxu1  ;;  %12799 = vset.pattern.permute.xlu1 %v13338_v57  ;;  %12800 = vset.pattern.permute.xlu0 %v13338_v57  ;;  %v11787_v32 = vld [vmem:[#allocation16] ss:$0 sm:$0xff]  ;;  %v10761_v55 = vlaneseq }
 0xc35   :  { %v12211_v23 = vpop.f32.mrb[69].mxu1  ;;  %v9333_v36 = vmul.f32 %v9301_v16, %v9301_v16 }
 0xc36   :  { %v9361_v56 = vadd.f32 %v9360_v41, %v9330_v12  ;;  %v9332_v18 = vmul.f32 %v9300_v28, %v9300_v28  ;;  %v12212_v37 = vadd.f32 %v12211_v23, %v12210_v29  ;;  %v12213_v40 = vpop.f32.mrb[70].mxu1  ;;  %v10762_v16 = vand.u32 127, %v10761_v55 }
 0xc37   :  { %v12214_v61 = vpop.f32.mrb[71].mxu1  ;;  %v8595_v23 = vsub.f32 %v16984_v19, %v16981_v53 }
 0xc38   :  { %v12298_v46 = vpop.f32.mrb[88].mxu0  ;;  %v9362_v63 = vadd.f32 %v9361_v56, %v9331_v49  ;;  %v10462_v33 = vadd.f32 %v12212_v37, %v11787_v32 }
 0xc39   :  { %v12299_v14 = vpop.f32.mrb[89].mxu0  ;;  %v8596_v56 = vmul.f32 %v8595_v23, %v8595_v23 }
 0xc3a   :  { %v12300_v51 = vadd.f32 %v12299_v14, %v12298_v46  ;;  %v12301_v7 = vpop.f32.mrb[90].mxu0  ;;  %v9363_v58 = vadd.f32 %v9362_v63, %v9332_v18  ;;  %v8612_v18 = vpop.xlane.xlu0 %8611 }
 0xc3b   :  { %v12302_v47 = vpop.f32.mrb[91].mxu0  ;;  %v8613_v37 = vrot.slane %v8612_v18, 4 }
 0xc3c   :  { %v9364_v25 = vadd.f32 %v9363_v58, %v9333_v36 }
 0xc3d   :  { %v8614_v61 = vadd.f32 %v8613_v37, %v8612_v18 }
 0xc3f   :  { %v8615_v63 = vrot.slane %v8614_v61, 2 }
 0xc41   :  { %v8616_v58 = vadd.f32 %v8615_v63, %v8614_v61 }
 0xc54   :  { %v12232_v30 = vpop.f32.mrb[72].mxu1 }
 0xc55   :  { %v12233_v44 = vpop.f32.mrb[73].mxu1 }
 0xc56   :  { %v12234_v35 = vadd.f32 %v12233_v44, %v12232_v30  ;;  %v12235_v15 = vpop.f32.mrb[74].mxu1 }
 0xc57   :  { %v12236_v62 = vpop.f32.mrb[75].mxu1 }
 0xc58   :  { %v10502_v21 = vadd.f32 %v12234_v35, %v10462_v33  ;;  %v8617_v33 = vrot.slane %v8616_v58, 1 }
 0xc59   :  { %v12342_v8 = vpop.f32.mrb[92].mxu0 }
 0xc5a   :  { %v12343_v22 = vpop.f32.mrb[93].mxu0  ;;  %v10542_v17 = vadd.f32 %v17500_v27, %v10502_v21 }
 0xc5b   :  { %v12344_v43 = vadd.f32 %v12343_v22, %v12342_v8  ;;  %v12345_v9 = vpop.f32.mrb[94].mxu0  ;;  %v8618_v22 = vadd.f32 %v8617_v33, %v8616_v58 }
 0xc5c   :  { %v12346_v38 = vpop.f32.mrb[95].mxu0 }
 0xc74   :  { %v12276_v52 = vpop.f32.mrb[76].mxu1 }
 0xc75   :  { %v12277_v42 = vpop.f32.mrb[77].mxu1 }
 0xc76   :  { %v12278_v50 = vadd.f32 %v12277_v42, %v12276_v52  ;;  %v12279_v34 = vpop.f32.mrb[78].mxu1 }
 0xc77   :  { %v12280_v24 = vpop.f32.mrb[79].mxu1 }
 0xc78   :  { %v10582_v26 = vadd.f32 %v12278_v50, %v10542_v17 }
 0xc7a   :  { %v10622_v2 = vadd.f32 %v12300_v51, %v10582_v26 }
 0xc94   :  { %v12320_v39 = vpop.f32.mrb[80].mxu1 }
 0xc95   :  { %v12321_v3 = vpop.f32.mrb[81].mxu1 }
 0xc96   :  { %v12322_v10 = vadd.f32 %v12321_v3, %v12320_v39  ;;  %v12323_v4 = vpop.f32.mrb[82].mxu1 }
 0xc97   :  { %v12324_v60 = vpop.f32.mrb[83].mxu1 }
 0xc98   :  { %v10662_v20 = vadd.f32 %v12322_v10, %v10622_v2 }
 0xc9a   :  { %v10702_v31 = vadd.f32 %v12344_v43, %v10662_v20 }
 0xcb4   :  { %v12364_v54 = vpop.f32.mrb[84].mxu1 }
 0xcb5   :  { %v12365_v13 = vpop.f32.mrb[85].mxu1 }
 0xcb6   :  { %v12366_v27 = vadd.f32 %v12365_v13, %v12364_v54  ;;  %v12367_v11 = vpop.f32.mrb[86].mxu1 }
 0xcb7   :  { %v12368_v45 = vpop.f32.mrb[87].mxu1 }
 0xcb8   :  { %v10742_v59 = vadd.f32 %v12366_v27, %v10702_v31 }
 0xcba   :  { %v10749_v1 = vsel %vm10747_vm1, %v10742_v59, -inf  ;;  %10748 = vst.msk [vmem:[#allocation22] sm:$0xff] %vm10747_vm1, %v10742_v59 }
 0xcbb   :  { %10750 = vmax.xlane.f32.xlu1 %v10749_v1 }
 0xccc   :  { %10765 = vperm.xlu1 %12799, %v10763_v48  }
 0xd48   :  { %v10751_v0 = vpop.xlane.xlu1 %10750 }
 0xd49   :  { %v10752_v6 = vsub.f32 %v10742_v59, %v10751_v0 }
 0xd4b   :  { %v10753_v5 = vmul.f32 1.442695, %v10752_v6 }
 0xd4c   :  { %v10766_v12 = vpop.permute.xlu1 %10765 }
 0xd4d   :  { %13077 = vpow2.f32 %v10753_v5  ;;  %vm10767_vm2 = vcmp.eq.s32.totalorder %v10766_v12, %v10762_v16 }
 0xd4e   :  { %v10768_v29 = vsel %vm10767_vm2, %v10742_v59, 0.0 }
 0xd4f   :  { %v10769_v49 = vsel %vm10747_vm1, %v10768_v29, 0.0 }
 0xd57   :  { %v13078_v41 = vpop.eup %13077 }
 0xd58   :  { %v10755_v28 = vsel %vm10747_vm1, %v13078_v41, 0.0 }
 0xd59   :  { %10756 = vadd.xlane.f32.xlu1 %v10755_v28 }
 0xd5d   :  { %10770 = vadd.xlane.f32.xlu1 %v10769_v49 }
 0xd61   :  { %8597 = vadd.xlane.f32.xlu1 %v8596_v56 }
 0xd65   :  { %9365 = vadd.xlane.f32.xlu1 %v9364_v25 }
 0xde6   :  { %v10757_v40 = vpop.xlane.xlu1 %10756 }
 0xde7   :  { %13079 = vlog2.f32 %v10757_v40 }
 0xdea   :  { %v10771_v46 = vpop.xlane.xlu1 %10770 }
 0xdee   :  { %v8598_v14 = vpop.xlane.xlu1 %8597 }
 0xdef   :  { %v8599_v36 = vrot.slane %v8598_v14, 4 }
 0xdf1   :  { %v13080_v51 = vpop.eup %13079  ;;  %v8600_v7 = vadd.f32 %v8599_v36, %v8598_v14 }
 0xdf2   :  { %v10759_v47 = vmul.f32 0.6931472, %v13080_v51  ;;  %v9366_v53 = vpop.xlane.xlu1 %9365 }
 0xdf3   :  { %v8601_v19 = vrot.slane %v8600_v7, 2  ;;  %v9367_v57 = vrot.slane %v9366_v53, 4 }
 0xdf4   :  { %v10760_v32 = vadd.f32 %v10759_v47, %v10751_v0 }
 0xdf5   :  { %v9368_v30 = vadd.f32 %v9367_v57, %v9366_v53  ;;  %v8602_v25 = vadd.f32 %v8601_v19, %v8600_v7 }
 0xdf6   :  { %v10772_v44 = vsub.f32 %v10760_v32, %v10771_v46 }
 0xdf7   :  { %v9369_v35 = vrot.slane %v9368_v30, 2  ;;  %v8603_v15 = vrot.slane %v8602_v25, 1 }
 0xdf8   :  { %v10774_v62 = vsel %vm10773_vm3, %v10772_v44, 0.0 }
 0xdf9   :  { %10775 = vadd.xlane.f32.xlu1 %v10774_v62  ;;  %v8604_v21 = vadd.f32 %v8603_v15, %v8602_v25  ;;  %v9370_v8 = vadd.f32 %v9369_v35, %v9368_v30 }
 0xdfb   :  { %12772 = vpush %v8604_v21  ;;  %v9371_v17 = vrot.slane %v9370_v8, 1 }
 0xdfc   :  { %12774 = vpush %v8618_v22 }
 0xdfd   :  { %v9372_v43 = vadd.f32 %v9371_v17, %v9370_v8 }
 0xdff   :  { %12776 = vpush %v9372_v43 }
 0xe2c   :  { %s12773_s11 = spop %12772 }
 0xe2d   :  { %s8608_s19 = smul.f32 0.0009765625, %s12773_s11  ;;  %s12775_s24 = spop %12774 }
 0xe2e   :  { %s8622_s26 = smul.f32 0.0009765625, %s12775_s24 }
 0xe30   :  { %s8623_s28 = sadd.f32 %s8622_s26, %s8608_s19  ;;  %s12777_s8 = spop %12776 }
 0xe31   :  { %s9376_s25 = smul.f32 3.0517578e-05, %s12777_s8 }
 0xe32   :  { %8625 = sst [smem:[#allocation18]] %s8623_s28 }
 0xe33   :  { %s9377_s10 = smul.f32 256.0, %s9376_s25 }
 0xe35   :  { %9379 = sst [smem:[#allocation19]] %s9377_s10 }
 0xe36   :  { %13266 = shalt.err (!%p13263_p10)
}
 0xe37   :  { %s13339_s29 = smov [#allocation19]   ;;  %s13267_s30 = scalar_lea.hbm %s17583_s12, 16 }
 0xe38   :  { %10804 = dma.smem_to_hbm %s13339_s29, 16, %s17584_s13, [#allocation20]  }
 0xe39   :  { %p13268_p11 = scmp.ne.s32.totalorder %s17583_s12, %s13267_s30  ;;  %p13271_p12 = scmp.lt.u32.totalorder %s13267_s30, %s17583_s12 }
 0xe3b   :  { %p13273_p13 = pnand %p13271_p12, %p13268_p11 }
 0xe3d   :  { %13276 = shalt.err (!%p13273_p13)
}
 0xe3e   :  { %s13340_s9 = smov [#allocation18]   ;;  %s13341_s13 = smov [#allocation22]  }
 0xe3f   :  { %10796 = dma.smem_to_hbm %s13340_s9, 16, %s17583_s12, [#allocation6]  }
 0xe40   :  { %s10819_s19 = sshll.u32 %s13341_s13, 4  ;;  %s10820_s19 = int_to_ptr.vmem [resolvable:$true] %s10819_s19 }
 0xe41   :  { %s13277_s24 = scalar_lea.vmem %s10820_s19, 128  ;;  %p13282_p1 = scmp.lt.s32.totalorder %s10820_s19, %s10820_s19 }
 0xe42   :  { %p13278_p0 = scmp.ne.s32.totalorder %s10820_s19, %s13277_s24  ;;  %p13283_p2 = scmp.lt.s32.totalorder %s13277_s24, %s13277_s24 }
 0xe44   :  { %p13284_p3 = por %p13283_p2, %p13282_p1 }
 0xe46   :  { %p13285_p4 = pnand %p13284_p3, %p13278_p0 }
 0xe48   :  { %13288 = shalt.err (!%p13285_p4)
}
 0xe49   :  { %s13289_s8 = scalar_lea.hbm %s17586_s15, 128 }
 0xe4a   :  { %p13290_p5 = scmp.ne.s32.totalorder %s17586_s15, %s13289_s8  ;;  %p13293_p6 = scmp.lt.u32.totalorder %s13289_s8, %s17586_s15 }
 0xe4c   :  { %p13295_p7 = pnand %p13293_p6, %p13290_p5 }
 0xe4e   :  { %13298 = shalt.err (!%p13295_p7)
}
 0xe4f   :  { %10822 = dma.vmem_to_hbm [thread:$0]  %s10820_s19, 128, %s17586_s15, [#allocation5]  }
 0xe50   :  { %s13299_s29 = scalar_lea.hbm %s17585_s14, 16 }
 0xe51   :  { %p13300_p8 = scmp.ne.s32.totalorder %s17585_s14, %s13299_s29  ;;  %p13303_p9 = scmp.lt.u32.totalorder %s13299_s29, %s17585_s14 }
 0xe53   :  { %p13305_p10 = pnand %p13303_p9, %p13300_p8 }
 0xe86   :  { %v10776_v9 = vpop.xlane.xlu1 %10775 }
 0xe87   :  { %v10777_v38 = vrot.slane %v10776_v9, 4 }
 0xe89   :  { %v10778_v52 = vadd.f32 %v10777_v38, %v10776_v9 }
 0xe8b   :  { %v10779_v42 = vrot.slane %v10778_v52, 2 }
 0xe8d   :  { %v10780_v50 = vadd.f32 %v10779_v42, %v10778_v52 }
 0xe8f   :  { %v10781_v34 = vrot.slane %v10780_v50, 1 }
 0xe91   :  { %v10782_v24 = vadd.f32 %v10781_v34, %v10780_v50 }
 0xe93   :  { %12778 = vpush %v10782_v24 }
 0xec4   :  { %s12779_s16 = spop %12778 }
 0xec5   :  { %s10786_s27 = smul.f32 0.125, %s12779_s16 }
 0xec7   :  { %10788 = sst [smem:[#allocation21]] %s10786_s27 }
 0xec8   :  { %13308 = shalt.err (!%p13305_p10)
}
 0xec9   :  { %s13342_s1 = smov [#allocation21]  }
 0xeca   :  { %10812 = dma.smem_to_hbm %s13342_s1, 16, %s17585_s14, [#allocation20]  }
 0xecb   :  { %13319 = dma.done.wait [#allocation6], 16  }
 0xecc   :  { %13320 = vsyncadd [#allocation6], 4294967280 }
 0xecd   :  { %13321 = dma.done.wait [#allocation20], 32  }
 0xece   :  { %13322 = vsyncadd [#allocation20], 4294967264 }
 0xecf   :  { %13323 = dma.done.wait [#allocation5], 128  }
 0xed0   :  { %13324 = vsyncadd [#allocation5], 4294967168 }
 0xed1   :  { %10835 = sfence }
 0xed2   :  { %10836 = vsyncpa [#allocation4], 1 }
 0xed3   :  { %10837 = vsyncpa [#allocation8], 1 }
 0xed4   :  { %10838 = vsyncpa [#allocation11], 1 }
 0xed5   :  { %10839 = vsyncpa [#allocation14], 1 }
 0xed6   :  { %10840 = vsyncpa [#allocation17], 1 }
 0xed7   :  { %10841 = vsyncpa [#allocation5], 1 }
 0xed8   :  { %10842 = vsyncpa [#allocation6], 1 }
 0xed9   :  { %10843 = vsyncpa [#allocation20], 1 }

</bundles_post_ra>
